<compile_context>
chip_gen: v6e
topology: v6e:2x2x1
jax: 0.10.0
libtpu: 0.0.40
codegen_flags: <defaults>
</compile_context>

<pallas_src>
import functools

import numpy as np
import jax
import jax.numpy as jnp
from jax.experimental import pallas as pl
from jax.experimental.pallas import tpu as pltpu


# ----------------------------- helpers -------------------------------------

def _round_up(x, m):
    return ((x + m - 1) // m) * m


def _largest_divisor_leq(n, target):
    d = max(1, min(target, n))
    while n % d:
        d -= 1
    return d


# ----------------------------- Pallas kernels ------------------------------

def _layernorm_kernel(x_ref, g_ref, b_ref, o_ref, *, eps=1e-5):
    x = x_ref[...]
    mu = jnp.mean(x, axis=-1, keepdims=True)
    var = jnp.mean(jnp.square(x - mu), axis=-1, keepdims=True)
    o_ref[...] = ((x - mu) * jax.lax.rsqrt(var + eps)) * g_ref[...] + b_ref[...]


def layernorm(x2d, gamma, beta, rows_per_block=1024):
    M, C = x2d.shape
    rows = rows_per_block if M > rows_per_block else _round_up(M, 8)
    Mp = _round_up(M, rows)
    xpad = jnp.pad(x2d, ((0, Mp - M), (0, 0))) if Mp != M else x2d
    out = pl.pallas_call(
        _layernorm_kernel,
        out_shape=jax.ShapeDtypeStruct((Mp, C), x2d.dtype),
        grid=(Mp // rows,),
        in_specs=[
            pl.BlockSpec((rows, C), lambda i: (i, 0)),
            pl.BlockSpec((1, C), lambda i: (0, 0)),
            pl.BlockSpec((1, C), lambda i: (0, 0)),
        ],
        out_specs=pl.BlockSpec((rows, C), lambda i: (i, 0)),
        compiler_params=pltpu.CompilerParams(dimension_semantics=("parallel",)),
        cost_estimate=pl.CostEstimate(
            flops=10 * Mp * C, transcendentals=Mp,
            bytes_accessed=4 * (2 * Mp * C + 2 * C)),
    )(xpad, gamma.reshape(1, C), beta.reshape(1, C))
    return out[:M] if Mp != M else out


def _window_attn_kernel(x_ref, wqkv_ref, bqkv_ref, wproj_ref, bproj_ref,
                        rpb_ref, g_ref, b_ref, *rest,
                        num_heads, head_dim, scale, fuse_norm, has_mask, eps=1e-5):
    # x_ref block: (Wb, N, C); optional mask_ref block: (Wb, N, N); rpb_ref: (H, N, N)
    if has_mask:
        mask_ref, o_ref = rest
    else:
        (o_ref,) = rest
    Wb, N, C = x_ref.shape
    x2d = x_ref[...].reshape(Wb * N, C)

    if fuse_norm:
        # norm1 fused: LayerNorm is per-token, so it commutes with the (shifted)
        # window partition -> safe whenever no zero-padding was inserted.
        mu = jnp.mean(x2d, axis=-1, keepdims=True)
        var = jnp.mean(jnp.square(x2d - mu), axis=-1, keepdims=True)
        x2d = ((x2d - mu) * jax.lax.rsqrt(var + eps)) * g_ref[...] + b_ref[...]

    # batched QKV projection over all windows in the block: (Wb*N, C) @ (C, 3C)
    qkv = jnp.dot(x2d, wqkv_ref[...],
                  preferred_element_type=jnp.float32) + bqkv_ref[...]
    qkv3 = qkv.reshape(Wb, N, 3 * C)
    mask = mask_ref[...] if has_mask else None           # (Wb, N, N) or None

    out_acc = jnp.zeros((Wb * N, C), jnp.float32)
    for h in range(num_heads):                            # short unrolled loop over heads;
        lo = h * head_dim                                 # each iteration batched over Wb windows
        q = qkv3[:, :, lo:lo + head_dim] * scale          # (Wb, N, hd)
        k = qkv3[:, :, C + lo:C + lo + head_dim]
        v = qkv3[:, :, 2 * C + lo:2 * C + lo + head_dim]

        attn = jnp.einsum('wqd,wkd->wqk', q, k,
                          preferred_element_type=jnp.float32)       # (Wb, N, N)
        attn = attn + rpb_ref[h][None]
        if has_mask:
            attn = attn + mask

        # numerically-stable softmax; denominator via EUP reciprocal (free slot)
        m = jnp.max(attn, axis=-1, keepdims=True)
        e = jnp.exp(attn - m)
        p = e * pl.reciprocal(jnp.sum(e, axis=-1, keepdims=True), approx=True)

        ctx = jnp.einsum('wqk,wkd->wqd', p, v,
                         preferred_element_type=jnp.float32)         # (Wb, N, hd)
        # accumulate this head's slice of the output projection directly
        # (avoids a lane-wise concatenate of narrow per-head tiles)
        out_acc = out_acc + jnp.dot(ctx.reshape(Wb * N, head_dim),
                                    wproj_ref[lo:lo + head_dim, :],
                                    preferred_element_type=jnp.float32)

    out = out_acc + bproj_ref[...]
    o_ref[...] = out.reshape(Wb, N, C).astype(o_ref.dtype)


def window_attention(x_windows, params, rel_pos_bias, mask_full, num_heads,
                     fuse_norm, windows_per_block=32):
    Bw, N, C = x_windows.shape
    head_dim = C // num_heads
    scale = head_dim ** (-0.5)
    Wb = _largest_divisor_leq(Bw, windows_per_block)
    has_mask = mask_full is not None

    kernel = functools.partial(_window_attn_kernel, num_heads=num_heads,
                               head_dim=head_dim, scale=scale,
                               fuse_norm=fuse_norm, has_mask=has_mask)
    flops = Bw * (2 * N * C * 3 * C                       # qkv proj
                  + 4 * num_heads * N * N * head_dim      # qk^T and p@v
                  + 2 * N * C * C)                        # output proj
    bytes_accessed = 4 * (2 * Bw * N * C + C * 3 * C + 3 * C
                          + C * C + C + num_heads * N * N
                          + (Bw * N * N if has_mask else 0))

    in_specs = [
        pl.BlockSpec((Wb, N, C), lambda i: (i, 0, 0)),
        pl.BlockSpec((C, 3 * C), lambda i: (0, 0)),
        pl.BlockSpec((1, 3 * C), lambda i: (0, 0)),
        pl.BlockSpec((C, C), lambda i: (0, 0)),
        pl.BlockSpec((1, C), lambda i: (0, 0)),
        pl.BlockSpec((num_heads, N, N), lambda i: (0, 0, 0)),
        pl.BlockSpec((1, C), lambda i: (0, 0)),           # gamma (norm1)
        pl.BlockSpec((1, C), lambda i: (0, 0)),           # beta  (norm1)
    ]
    args = [x_windows, params['wqkv'], params['bqkv'], params['wproj'],
            params['bproj'], rel_pos_bias,
            params['g1'].reshape(1, C), params['b1'].reshape(1, C)]
    if has_mask:
        in_specs.append(pl.BlockSpec((Wb, N, N), lambda i: (i, 0, 0)))
        args.append(mask_full)

    return pl.pallas_call(
        kernel,
        out_shape=jax.ShapeDtypeStruct((Bw, N, C), x_windows.dtype),
        grid=(Bw // Wb,),
        in_specs=in_specs,
        out_specs=pl.BlockSpec((Wb, N, C), lambda i: (i, 0, 0)),
        # windows are independent -> parallel (sharded across TensorCores)
        compiler_params=pltpu.CompilerParams(dimension_semantics=("parallel",)),
        cost_estimate=pl.CostEstimate(flops=flops,
                                      transcendentals=Bw * num_heads * N * N,
                                      bytes_accessed=bytes_accessed),
    )(*args)


def _mlp_kernel(short_ref, xr_ref, g_ref, b_ref, w1_ref, b1_ref, w2_ref, b2_ref,
                o_ref, *, eps=1e-5):
    # fused: x1 = shortcut + attn_out ; out = x1 + fc2(gelu(fc1(LN(x1))))
    x = short_ref[...] + xr_ref[...]
    mu = jnp.mean(x, axis=-1, keepdims=True)
    var = jnp.mean(jnp.square(x - mu), axis=-1, keepdims=True)
    xn = ((x - mu) * jax.lax.rsqrt(var + eps)) * g_ref[...] + b_ref[...]
    h = jnp.dot(xn, w1_ref[...], preferred_element_type=jnp.float32) + b1_ref[...]
    # exact (erf-based) GELU, matching torch.nn.GELU default
    h = 0.5 * h * (1.0 + jax.lax.erf(h * 0.7071067811865476))
    y = jnp.dot(h, w2_ref[...], preferred_element_type=jnp.float32) + b2_ref[...]
    o_ref[...] = (x + y).astype(o_ref.dtype)


def mlp_block(shortcut2d, xr2d, params, rows_per_block=512):
    M, C = shortcut2d.shape
    Hd = params['w1'].shape[1]
    rows = rows_per_block if M > rows_per_block else _round_up(M, 8)
    Mp = _round_up(M, rows)
    if Mp != M:
        shortcut2d = jnp.pad(shortcut2d, ((0, Mp - M), (0, 0)))
        xr2d = jnp.pad(xr2d, ((0, Mp - M), (0, 0)))
    out = pl.pallas_call(
        _mlp_kernel,
        out_shape=jax.ShapeDtypeStruct((Mp, C), shortcut2d.dtype),
        grid=(Mp // rows,),
        in_specs=[
            pl.BlockSpec((rows, C), lambda i: (i, 0)),
            pl.BlockSpec((rows, C), lambda i: (i, 0)),
            pl.BlockSpec((1, C), lambda i: (0, 0)),
            pl.BlockSpec((1, C), lambda i: (0, 0)),
            pl.BlockSpec((C, Hd), lambda i: (0, 0)),
            pl.BlockSpec((1, Hd), lambda i: (0, 0)),
            pl.BlockSpec((Hd, C), lambda i: (0, 0)),
            pl.BlockSpec((1, C), lambda i: (0, 0)),
        ],
        out_specs=pl.BlockSpec((rows, C), lambda i: (i, 0)),
        compiler_params=pltpu.CompilerParams(dimension_semantics=("parallel",)),
        cost_estimate=pl.CostEstimate(
            flops=4 * Mp * C * Hd, transcendentals=Mp * Hd,
            bytes_accessed=4 * (3 * Mp * C + 2 * C * Hd + Hd + 3 * C)),
    )(shortcut2d, xr2d, params['g2'].reshape(1, C), params['b2'].reshape(1, C),
      params['w1'], params['b1m'], params['w2'], params['b2m'])
    return out[:M] if Mp != M else out


# ----------------------------- JAX glue -------------------------------------

def window_partition(x, ws):
    B, D, H, W, C = x.shape
    x = x.reshape(B, D // ws[0], ws[0], H // ws[1], ws[1], W // ws[2], ws[2], C)
    return x.transpose(0, 1, 3, 5, 2, 4, 6, 7).reshape(-1, ws[0] * ws[1] * ws[2], C)


def window_reverse(win, ws, B, D, H, W):
    x = win.reshape(B, D // ws[0], H // ws[1], W // ws[2], ws[0], ws[1], ws[2], -1)
    return x.transpose(0, 1, 4, 2, 5, 3, 6, 7).reshape(B, D, H, W, -1)


def swin_block_forward(x, params, window_size, shift_size, num_heads, attn_mask=None):
    b, t, h, w, c = x.shape
    ws = window_size
    shortcut2d = x.reshape(-1, c)

    pad_d1 = (ws[0] - t % ws[0]) % ws[0]
    pad_b = (ws[1] - h % ws[1]) % ws[1]
    pad_r = (ws[2] - w % ws[2]) % ws[2]
    needs_pad = (pad_d1 > 0) or (pad_b > 0) or (pad_r > 0)

    if needs_pad:
        # padded path: norm1 must run before padding with zeros (matches PyTorch)
        xn = layernorm(shortcut2d, params['g1'], params['b1']).reshape(b, t, h, w, c)
        xp = jnp.pad(xn, ((0, 0), (0, pad_d1), (0, pad_b), (0, pad_r), (0, 0)))
        fuse_norm = False
    else:
        # common path: fuse norm1 directly into the attention kernel
        xp = x
        fuse_norm = True
    _, Dp, Hp, Wp, _ = xp.shape

    # (shifted) window partition
    if any(i > 0 for i in shift_size):
        xs = jnp.roll(xp, shift=(-shift_size[0], -shift_size[1], -shift_size[2]),
                      axis=(1, 2, 3))
    else:
        xs = xp
    x_windows = window_partition(xs, ws)                 # (Bw, N, C)
    Bw, N, _ = x_windows.shape
    nW = Bw // b
    if attn_mask is None:
        mask_full = None                                  # no mask -> no HBM traffic
    else:
        mask_full = jnp.tile(attn_mask.astype(x.dtype), (Bw // nW, 1, 1))

    # window attention (Pallas, Wb windows per grid step, norm1 fused when possible)
    attn_windows = window_attention(x_windows, params, params['rpb'], mask_full,
                                    num_heads, fuse_norm)

    # reverse windows, un-shift, crop
    shifted = window_reverse(attn_windows, ws, b, Dp, Hp, Wp)
    if any(i > 0 for i in shift_size):
        xr = jnp.roll(shifted, shift=shift_size, axis=(1, 2, 3))
    else:
        xr = shifted
    xr = xr[:, :t, :h, :w, :]

    # residual1 + norm2 + MLP + residual2 (fused Pallas kernel; drop_path rate 0)
    out = mlp_block(shortcut2d, xr.reshape(-1, c), params).reshape(b, t, h, w, c)
    return out


# ----------------------------- parameters -----------------------------------

def init_params(key, dim, num_heads, window_size, mlp_ratio=4.0):
    ws = window_size
    N = ws[0] * ws[1] * ws[2]
    hidden = int(dim * mlp_ratio)
    ks = jax.random.split(key, 8)

    table_size = (2 * ws[0] - 1) * (2 * ws[1] - 1) * (2 * ws[2] - 1)
    table = 0.02 * jax.random.truncated_normal(
        ks[0], -2.0, 2.0, (table_size, num_heads), jnp.float32)

    # relative_position_index, exactly as in the PyTorch __init__
    coords = np.stack(np.meshgrid(np.arange(ws[0]), np.arange(ws[1]),
                                  np.arange(ws[2]), indexing='ij'))
    cf = coords.reshape(3, -1)
    rel = cf[:, :, None] - cf[:, None, :]
    rel = rel.transpose(1, 2, 0).astype(np.int64)
    rel[:, :, 0] += ws[0] - 1
    rel[:, :, 1] += ws[1] - 1
    rel[:, :, 2] += ws[2] - 1
    rel[:, :, 0] *= (2 * ws[1] - 1) * (2 * ws[2] - 1)
    rel[:, :, 1] *= (2 * ws[2] - 1)
    idx = rel.sum(-1)
    rpb = jnp.transpose(table[idx.reshape(-1)].reshape(N, N, num_heads), (2, 0, 1))

    params = dict(
        g1=jnp.ones((dim,), jnp.float32), b1=jnp.zeros((dim,), jnp.float32),
        g2=jnp.ones((dim,), jnp.float32), b2=jnp.zeros((dim,), jnp.float32),
        wqkv=0.02 * jax.random.normal(ks[1], (dim, 3 * dim), jnp.float32),
        bqkv=0.02 * jax.random.normal(ks[2], (1, 3 * dim), jnp.float32),
        wproj=0.02 * jax.random.normal(ks[3], (dim, dim), jnp.float32),
        bproj=0.02 * jax.random.normal(ks[4], (1, dim), jnp.float32),
        w1=0.02 * jax.random.normal(ks[5], (dim, hidden), jnp.float32),
        b1m=0.02 * jax.random.normal(ks[6], (1, hidden), jnp.float32),
        w2=0.02 * jax.random.normal(ks[7], (hidden, dim), jnp.float32),
        b2m=jnp.zeros((1, dim), jnp.float32),
        rpb=rpb,
    )
    return params


# ----------------------------- pure-JAX reference ----------------------------

def ref_forward(x, params, window_size, shift_size, num_heads, attn_mask=None):
    b, t, h, w, c = x.shape
    ws = window_size

    def ln(z, g, be):
        mu = z.mean(-1, keepdims=True)
        var = ((z - mu) ** 2).mean(-1, keepdims=True)
        return (z - mu) / jnp.sqrt(var + 1e-5) * g + be

    shortcut = x
    xn = ln(x, params['g1'], params['b1'])
    pad_d1 = (ws[0] - t % ws[0]) % ws[0]
    pad_b = (ws[1] - h % ws[1]) % ws[1]
    pad_r = (ws[2] - w % ws[2]) % ws[2]
    xp = jnp.pad(xn, ((0, 0), (0, pad_d1), (0, pad_b), (0, pad_r), (0, 0)))
    _, Dp, Hp, Wp, _ = xp.shape
    if any(i > 0 for i in shift_size):
        xs = jnp.roll(xp, shift=(-shift_size[0], -shift_size[1], -shift_size[2]),
                      axis=(1, 2, 3))
    else:
        xs = xp
    xw = window_partition(xs, ws)
    Bw, N, C = xw.shape
    nW = Bw // b
    mask = jnp.zeros((nW, N, N), x.dtype) if attn_mask is None else attn_mask

    hd = C // num_heads
    scale = hd ** (-0.5)
    qkv = xw @ params['wqkv'] + params['bqkv'][0]
    qkv = qkv.reshape(Bw, N, 3, num_heads, hd).transpose(2, 0, 3, 1, 4)
    q, k, v = qkv[0] * scale, qkv[1], qkv[2]
    attn = q @ jnp.swapaxes(k, -2, -1) + params['rpb'][None]
    attn = attn.reshape(Bw // nW, nW, num_heads, N, N) + mask[None, :, None]
    attn = jax.nn.softmax(attn.reshape(Bw, num_heads, N, N), axis=-1)
    out = (attn @ v).transpose(0, 2, 1, 3).reshape(Bw, N, C)
    out = out @ params['wproj'] + params['bproj'][0]

    shifted = window_reverse(out, ws, b, Dp, Hp, Wp)
    if any(i > 0 for i in shift_size):
        xr = jnp.roll(shifted, shift=shift_size, axis=(1, 2, 3))
    else:
        xr = shifted
    xr = xr[:, :t, :h, :w, :]
    x1 = shortcut + xr

    xn2 = ln(x1, params['g2'], params['b2'])
    hdn = jax.nn.gelu(xn2 @ params['w1'] + params['b1m'][0], approximate=False)
    return x1 + (hdn @ params['w2'] + params['b2m'][0])


# ----------------------------- main ------------------------------------------

if __name__ == "__main__":
    key = jax.random.PRNGKey(0)
    dim, num_heads = 32, 4
    window_size = (2, 4, 4)
    shift_size = (0, 0, 0)
    b, t, h, w = 2, 2, 8, 8

    kx, kp = jax.random.split(key)
    x = jax.random.normal(kx, (b, t, h, w, dim), jnp.float32)
    params = init_params(kp, dim, num_heads, window_size)

    out = swin_block_forward(x, params, window_size, shift_size, num_heads, None)
    out = jax.block_until_ready(out)

    ref = jax.block_until_ready(
        ref_forward(x, params, window_size, shift_size, num_heads, None))
    assert out.shape == x.shape
    err = float(jnp.max(jnp.abs(out - ref)))
    if not np.isfinite(err) or err > 5e-2:
        raise AssertionError(f"kernel/reference mismatch, max abs err = {err}")

    print("KERNEL_OK")
</pallas_src>

<mosaic_0001>
module attributes {stable_mosaic.version = 11 : i64} {
  func.func @_window_attn_kernel(%arg0: i32, %arg1: memref<8x32x32xf32, #tpu.memory_space<vmem>>, %arg2: memref<32x96xf32, #tpu.memory_space<vmem>>, %arg3: memref<1x96xf32, #tpu.memory_space<vmem>>, %arg4: memref<32x32xf32, #tpu.memory_space<vmem>>, %arg5: memref<1x32xf32, #tpu.memory_space<vmem>>, %arg6: memref<4x32x32xf32, #tpu.memory_space<vmem>>, %arg7: memref<1x32xf32, #tpu.memory_space<vmem>>, %arg8: memref<1x32xf32, #tpu.memory_space<vmem>>, %arg9: memref<8x32x32xf32, #tpu.memory_space<vmem>>) attributes {dimension_semantics = [#tpu.dimension_semantics<parallel>], iteration_bounds = array<i64: 1>, scalar_prefetch = 0 : i64, scratch_operands = 0 : i64, tpu.core_type = #tpu.core_type<tc>, window_params = [{transform_indices = @transform_0, window_bounds = array<i64: 8, 32, 32>}, {pipeline_mode = #tpu.pipeline_mode<synchronous>, transform_indices = @transform_1, window_bounds = array<i64: 32, 96>}, {pipeline_mode = #tpu.pipeline_mode<synchronous>, transform_indices = @transform_2, window_bounds = array<i64: 1, 96>}, {pipeline_mode = #tpu.pipeline_mode<synchronous>, transform_indices = @transform_3, window_bounds = array<i64: 32, 32>}, {pipeline_mode = #tpu.pipeline_mode<synchronous>, transform_indices = @transform_4, window_bounds = array<i64: 1, 32>}, {pipeline_mode = #tpu.pipeline_mode<synchronous>, transform_indices = @transform_5, window_bounds = array<i64: 4, 32, 32>}, {pipeline_mode = #tpu.pipeline_mode<synchronous>, transform_indices = @transform_6, window_bounds = array<i64: 1, 32>}, {pipeline_mode = #tpu.pipeline_mode<synchronous>, transform_indices = @transform_7, window_bounds = array<i64: 1, 32>}, {transform_indices = @transform_8, window_bounds = array<i64: 8, 32, 32>}]} {
    %c0 = arith.constant 0 : index
    %c0_0 = arith.constant 0 : index
    %c0_1 = arith.constant 0 : index
    %0 = vector.load %arg1[%c0, %c0_0, %c0_1] : memref<8x32x32xf32, #tpu.memory_space<vmem>>, vector<8x32x32xf32>
    %1 = vector.shape_cast %0 : vector<8x32x32xf32> to vector<256x32xf32>
    %cst = arith.constant dense<0.000000e+00> : vector<256xf32>
    %2 = vector.multi_reduction <add>, %1, %cst [1] : vector<256x32xf32> to vector<256xf32>
    %3 = vector.shape_cast %2 : vector<256xf32> to vector<256x1xf32>
    %cst_2 = arith.constant 3.200000e+01 : f32
    %4 = vector.broadcast %cst_2 : f32 to vector<256x1xf32>
    %5 = arith.divf %3, %4 : vector<256x1xf32>
    %6 = vector.broadcast %5 : vector<256x1xf32> to vector<256x32xf32>
    %7 = arith.subf %1, %6 : vector<256x32xf32>
    %8 = arith.mulf %7, %7 : vector<256x32xf32>
    %cst_3 = arith.constant dense<0.000000e+00> : vector<256xf32>
    %9 = vector.multi_reduction <add>, %8, %cst_3 [1] : vector<256x32xf32> to vector<256xf32>
    %10 = vector.shape_cast %9 : vector<256xf32> to vector<256x1xf32>
    %cst_4 = arith.constant 3.200000e+01 : f32
    %11 = vector.broadcast %cst_4 : f32 to vector<256x1xf32>
    %12 = arith.divf %10, %11 : vector<256x1xf32>
    %13 = vector.broadcast %5 : vector<256x1xf32> to vector<256x32xf32>
    %14 = arith.subf %1, %13 : vector<256x32xf32>
    %cst_5 = arith.constant 9.99999974E-6 : f32
    %15 = vector.broadcast %cst_5 : f32 to vector<256x1xf32>
    %16 = arith.addf %12, %15 : vector<256x1xf32>
    %17 = math.rsqrt %16 : vector<256x1xf32>
    %18 = vector.broadcast %17 : vector<256x1xf32> to vector<256x32xf32>
    %19 = arith.mulf %14, %18 : vector<256x32xf32>
    %c0_6 = arith.constant 0 : index
    %c0_7 = arith.constant 0 : index
    %20 = vector.load %arg7[%c0_6, %c0_7] : memref<1x32xf32, #tpu.memory_space<vmem>>, vector<1x32xf32>
    %21 = vector.broadcast %20 : vector<1x32xf32> to vector<256x32xf32>
    %22 = arith.mulf %19, %21 : vector<256x32xf32>
    %c0_8 = arith.constant 0 : index
    %c0_9 = arith.constant 0 : index
    %23 = vector.load %arg8[%c0_8, %c0_9] : memref<1x32xf32, #tpu.memory_space<vmem>>, vector<1x32xf32>
    %24 = vector.broadcast %23 : vector<1x32xf32> to vector<256x32xf32>
    %25 = arith.addf %22, %24 : vector<256x32xf32>
    %c0_10 = arith.constant 0 : index
    %c0_11 = arith.constant 0 : index
    %26 = vector.load %arg2[%c0_10, %c0_11] : memref<32x96xf32, #tpu.memory_space<vmem>>, vector<32x96xf32>
    %cst_12 = arith.constant dense<0.000000e+00> : vector<256x96xf32>
    %27 = tpu.matmul %25, %26, %cst_12 {dimension_numbers = #tpu.dot_dimension_numbers<[1], [0], [0], [1], [0, 0, 1, 1], [], []>} : vector<256x32xf32>, vector<32x96xf32>, vector<256x96xf32> -> vector<256x96xf32>
    %c0_13 = arith.constant 0 : index
    %c0_14 = arith.constant 0 : index
    %28 = vector.load %arg3[%c0_13, %c0_14] : memref<1x96xf32, #tpu.memory_space<vmem>>, vector<1x96xf32>
    %29 = vector.broadcast %28 : vector<1x96xf32> to vector<256x96xf32>
    %30 = arith.addf %27, %29 : vector<256x96xf32>
    %31 = vector.shape_cast %30 : vector<256x96xf32> to vector<8x32x96xf32>
    %cst_15 = arith.constant 0.000000e+00 : f32
    %32 = vector.broadcast %cst_15 : f32 to vector<256x32xf32>
    %33 = vector.extract_strided_slice %31 {offsets = [0, 0, 0], sizes = [8, 32, 8], strides = [1, 1, 1]} : vector<8x32x96xf32> to vector<8x32x8xf32>
    %cst_16 = arith.constant 0.353553385 : f32
    %34 = vector.broadcast %cst_16 : f32 to vector<8x32x8xf32>
    %35 = arith.mulf %33, %34 : vector<8x32x8xf32>
    %36 = vector.extract_strided_slice %31 {offsets = [0, 0, 32], sizes = [8, 32, 8], strides = [1, 1, 1]} : vector<8x32x96xf32> to vector<8x32x8xf32>
    %37 = vector.extract_strided_slice %31 {offsets = [0, 0, 64], sizes = [8, 32, 8], strides = [1, 1, 1]} : vector<8x32x96xf32> to vector<8x32x8xf32>
    "tpu.trace_start"() <{level = 10 : i32, message = "wqd,wkd->wqk"}> : () -> ()
    %cst_17 = arith.constant dense<0.000000e+00> : vector<8x32x32xf32>
    %38 = tpu.matmul %35, %36, %cst_17 {dimension_numbers = #tpu.dot_dimension_numbers<[2], [2], [1], [1], [0, 0, 0, 1, 1, 1], [0], [0]>} : vector<8x32x8xf32>, vector<8x32x8xf32>, vector<8x32x32xf32> -> vector<8x32x32xf32>
    "tpu.trace_stop"() : () -> ()
    %c0_18 = arith.constant 0 : index
    %c0_19 = arith.constant 0 : index
    %c0_20 = arith.constant 0 : index
    %39 = vector.load %arg6[%c0_18, %c0_19, %c0_20] : memref<4x32x32xf32, #tpu.memory_space<vmem>>, vector<1x32x32xf32>
    %40 = vector.shape_cast %39 : vector<1x32x32xf32> to vector<32x32xf32>
    %41 = vector.shape_cast %40 : vector<32x32xf32> to vector<1x32x32xf32>
    %42 = vector.broadcast %41 : vector<1x32x32xf32> to vector<8x32x32xf32>
    %43 = arith.addf %38, %42 : vector<8x32x32xf32>
    %cst_21 = arith.constant dense<0xFF800000> : vector<8x32xf32>
    %44 = vector.multi_reduction <maximumf>, %43, %cst_21 [2] : vector<8x32x32xf32> to vector<8x32xf32>
    %45 = vector.shape_cast %44 : vector<8x32xf32> to vector<8x32x1xf32>
    %46 = vector.broadcast %45 : vector<8x32x1xf32> to vector<8x32x32xf32>
    %47 = arith.subf %43, %46 : vector<8x32x32xf32>
    %48 = math.exp %47 : vector<8x32x32xf32>
    %cst_22 = arith.constant dense<0.000000e+00> : vector<8x32xf32>
    %49 = vector.multi_reduction <add>, %48, %cst_22 [2] : vector<8x32x32xf32> to vector<8x32xf32>
    %50 = vector.shape_cast %49 : vector<8x32xf32> to vector<8x32x1xf32>
    %51 = tpu.reciprocal %50 {approx = true} : vector<8x32x1xf32> -> vector<8x32x1xf32>
    %52 = vector.broadcast %51 : vector<8x32x1xf32> to vector<8x32x32xf32>
    %53 = arith.mulf %48, %52 : vector<8x32x32xf32>
    "tpu.trace_start"() <{level = 10 : i32, message = "wqk,wkd->wqd"}> : () -> ()
    %cst_23 = arith.constant dense<0.000000e+00> : vector<8x32x8xf32>
    %54 = tpu.matmul %53, %37, %cst_23 {dimension_numbers = #tpu.dot_dimension_numbers<[2], [1], [1], [2], [0, 0, 0, 1, 1, 2], [0], [0]>} : vector<8x32x32xf32>, vector<8x32x8xf32>, vector<8x32x8xf32> -> vector<8x32x8xf32>
    "tpu.trace_stop"() : () -> ()
    %55 = vector.shape_cast %54 : vector<8x32x8xf32> to vector<256x8xf32>
    %c0_24 = arith.constant 0 : index
    %c0_25 = arith.constant 0 : index
    %56 = vector.load %arg4[%c0_24, %c0_25] : memref<32x32xf32, #tpu.memory_space<vmem>>, vector<8x32xf32>
    %cst_26 = arith.constant dense<0.000000e+00> : vector<256x32xf32>
    %57 = tpu.matmul %55, %56, %cst_26 {dimension_numbers = #tpu.dot_dimension_numbers<[1], [0], [0], [1], [0, 0, 1, 1], [], []>} : vector<256x8xf32>, vector<8x32xf32>, vector<256x32xf32> -> vector<256x32xf32>
    %58 = arith.addf %32, %57 : vector<256x32xf32>
    %59 = vector.extract_strided_slice %31 {offsets = [0, 0, 8], sizes = [8, 32, 8], strides = [1, 1, 1]} : vector<8x32x96xf32> to vector<8x32x8xf32>
    %cst_27 = arith.constant 0.353553385 : f32
    %60 = vector.broadcast %cst_27 : f32 to vector<8x32x8xf32>
    %61 = arith.mulf %59, %60 : vector<8x32x8xf32>
    %62 = vector.extract_strided_slice %31 {offsets = [0, 0, 40], sizes = [8, 32, 8], strides = [1, 1, 1]} : vector<8x32x96xf32> to vector<8x32x8xf32>
    %63 = vector.extract_strided_slice %31 {offsets = [0, 0, 72], sizes = [8, 32, 8], strides = [1, 1, 1]} : vector<8x32x96xf32> to vector<8x32x8xf32>
    "tpu.trace_start"() <{level = 10 : i32, message = "wqd,wkd->wqk"}> : () -> ()
    %cst_28 = arith.constant dense<0.000000e+00> : vector<8x32x32xf32>
    %64 = tpu.matmul %61, %62, %cst_28 {dimension_numbers = #tpu.dot_dimension_numbers<[2], [2], [1], [1], [0, 0, 0, 1, 1, 1], [0], [0]>} : vector<8x32x8xf32>, vector<8x32x8xf32>, vector<8x32x32xf32> -> vector<8x32x32xf32>
    "tpu.trace_stop"() : () -> ()
    %c1 = arith.constant 1 : index
    %c0_29 = arith.constant 0 : index
    %c0_30 = arith.constant 0 : index
    %65 = vector.load %arg6[%c1, %c0_29, %c0_30] : memref<4x32x32xf32, #tpu.memory_space<vmem>>, vector<1x32x32xf32>
    %66 = vector.shape_cast %65 : vector<1x32x32xf32> to vector<32x32xf32>
    %67 = vector.shape_cast %66 : vector<32x32xf32> to vector<1x32x32xf32>
    %68 = vector.broadcast %67 : vector<1x32x32xf32> to vector<8x32x32xf32>
    %69 = arith.addf %64, %68 : vector<8x32x32xf32>
    %cst_31 = arith.constant dense<0xFF800000> : vector<8x32xf32>
    %70 = vector.multi_reduction <maximumf>, %69, %cst_31 [2] : vector<8x32x32xf32> to vector<8x32xf32>
    %71 = vector.shape_cast %70 : vector<8x32xf32> to vector<8x32x1xf32>
    %72 = vector.broadcast %71 : vector<8x32x1xf32> to vector<8x32x32xf32>
    %73 = arith.subf %69, %72 : vector<8x32x32xf32>
    %74 = math.exp %73 : vector<8x32x32xf32>
    %cst_32 = arith.constant dense<0.000000e+00> : vector<8x32xf32>
    %75 = vector.multi_reduction <add>, %74, %cst_32 [2] : vector<8x32x32xf32> to vector<8x32xf32>
    %76 = vector.shape_cast %75 : vector<8x32xf32> to vector<8x32x1xf32>
    %77 = tpu.reciprocal %76 {approx = true} : vector<8x32x1xf32> -> vector<8x32x1xf32>
    %78 = vector.broadcast %77 : vector<8x32x1xf32> to vector<8x32x32xf32>
    %79 = arith.mulf %74, %78 : vector<8x32x32xf32>
    "tpu.trace_start"() <{level = 10 : i32, message = "wqk,wkd->wqd"}> : () -> ()
    %cst_33 = arith.constant dense<0.000000e+00> : vector<8x32x8xf32>
    %80 = tpu.matmul %79, %63, %cst_33 {dimension_numbers = #tpu.dot_dimension_numbers<[2], [1], [1], [2], [0, 0, 0, 1, 1, 2], [0], [0]>} : vector<8x32x32xf32>, vector<8x32x8xf32>, vector<8x32x8xf32> -> vector<8x32x8xf32>
    "tpu.trace_stop"() : () -> ()
    %81 = vector.shape_cast %80 : vector<8x32x8xf32> to vector<256x8xf32>
    %c8 = arith.constant 8 : index
    %c0_34 = arith.constant 0 : index
    %82 = vector.load %arg4[%c8, %c0_34] : memref<32x32xf32, #tpu.memory_space<vmem>>, vector<8x32xf32>
    %cst_35 = arith.constant dense<0.000000e+00> : vector<256x32xf32>
    %83 = tpu.matmul %81, %82, %cst_35 {dimension_numbers = #tpu.dot_dimension_numbers<[1], [0], [0], [1], [0, 0, 1, 1], [], []>} : vector<256x8xf32>, vector<8x32xf32>, vector<256x32xf32> -> vector<256x32xf32>
    %84 = arith.addf %58, %83 : vector<256x32xf32>
    %85 = vector.extract_strided_slice %31 {offsets = [0, 0, 16], sizes = [8, 32, 8], strides = [1, 1, 1]} : vector<8x32x96xf32> to vector<8x32x8xf32>
    %cst_36 = arith.constant 0.353553385 : f32
    %86 = vector.broadcast %cst_36 : f32 to vector<8x32x8xf32>
    %87 = arith.mulf %85, %86 : vector<8x32x8xf32>
    %88 = vector.extract_strided_slice %31 {offsets = [0, 0, 48], sizes = [8, 32, 8], strides = [1, 1, 1]} : vector<8x32x96xf32> to vector<8x32x8xf32>
    %89 = vector.extract_strided_slice %31 {offsets = [0, 0, 80], sizes = [8, 32, 8], strides = [1, 1, 1]} : vector<8x32x96xf32> to vector<8x32x8xf32>
    "tpu.trace_start"() <{level = 10 : i32, message = "wqd,wkd->wqk"}> : () -> ()
    %cst_37 = arith.constant dense<0.000000e+00> : vector<8x32x32xf32>
    %90 = tpu.matmul %87, %88, %cst_37 {dimension_numbers = #tpu.dot_dimension_numbers<[2], [2], [1], [1], [0, 0, 0, 1, 1, 1], [0], [0]>} : vector<8x32x8xf32>, vector<8x32x8xf32>, vector<8x32x32xf32> -> vector<8x32x32xf32>
    "tpu.trace_stop"() : () -> ()
    %c2 = arith.constant 2 : index
    %c0_38 = arith.constant 0 : index
    %c0_39 = arith.constant 0 : index
    %91 = vector.load %arg6[%c2, %c0_38, %c0_39] : memref<4x32x32xf32, #tpu.memory_space<vmem>>, vector<1x32x32xf32>
    %92 = vector.shape_cast %91 : vector<1x32x32xf32> to vector<32x32xf32>
    %93 = vector.shape_cast %92 : vector<32x32xf32> to vector<1x32x32xf32>
    %94 = vector.broadcast %93 : vector<1x32x32xf32> to vector<8x32x32xf32>
    %95 = arith.addf %90, %94 : vector<8x32x32xf32>
    %cst_40 = arith.constant dense<0xFF800000> : vector<8x32xf32>
    %96 = vector.multi_reduction <maximumf>, %95, %cst_40 [2] : vector<8x32x32xf32> to vector<8x32xf32>
    %97 = vector.shape_cast %96 : vector<8x32xf32> to vector<8x32x1xf32>
    %98 = vector.broadcast %97 : vector<8x32x1xf32> to vector<8x32x32xf32>
    %99 = arith.subf %95, %98 : vector<8x32x32xf32>
    %100 = math.exp %99 : vector<8x32x32xf32>
    %cst_41 = arith.constant dense<0.000000e+00> : vector<8x32xf32>
    %101 = vector.multi_reduction <add>, %100, %cst_41 [2] : vector<8x32x32xf32> to vector<8x32xf32>
    %102 = vector.shape_cast %101 : vector<8x32xf32> to vector<8x32x1xf32>
    %103 = tpu.reciprocal %102 {approx = true} : vector<8x32x1xf32> -> vector<8x32x1xf32>
    %104 = vector.broadcast %103 : vector<8x32x1xf32> to vector<8x32x32xf32>
    %105 = arith.mulf %100, %104 : vector<8x32x32xf32>
    "tpu.trace_start"() <{level = 10 : i32, message = "wqk,wkd->wqd"}> : () -> ()
    %cst_42 = arith.constant dense<0.000000e+00> : vector<8x32x8xf32>
    %106 = tpu.matmul %105, %89, %cst_42 {dimension_numbers = #tpu.dot_dimension_numbers<[2], [1], [1], [2], [0, 0, 0, 1, 1, 2], [0], [0]>} : vector<8x32x32xf32>, vector<8x32x8xf32>, vector<8x32x8xf32> -> vector<8x32x8xf32>
    "tpu.trace_stop"() : () -> ()
    %107 = vector.shape_cast %106 : vector<8x32x8xf32> to vector<256x8xf32>
    %c16 = arith.constant 16 : index
    %c0_43 = arith.constant 0 : index
    %108 = vector.load %arg4[%c16, %c0_43] : memref<32x32xf32, #tpu.memory_space<vmem>>, vector<8x32xf32>
    %cst_44 = arith.constant dense<0.000000e+00> : vector<256x32xf32>
    %109 = tpu.matmul %107, %108, %cst_44 {dimension_numbers = #tpu.dot_dimension_numbers<[1], [0], [0], [1], [0, 0, 1, 1], [], []>} : vector<256x8xf32>, vector<8x32xf32>, vector<256x32xf32> -> vector<256x32xf32>
    %110 = arith.addf %84, %109 : vector<256x32xf32>
    %111 = vector.extract_strided_slice %31 {offsets = [0, 0, 24], sizes = [8, 32, 8], strides = [1, 1, 1]} : vector<8x32x96xf32> to vector<8x32x8xf32>
    %cst_45 = arith.constant 0.353553385 : f32
    %112 = vector.broadcast %cst_45 : f32 to vector<8x32x8xf32>
    %113 = arith.mulf %111, %112 : vector<8x32x8xf32>
    %114 = vector.extract_strided_slice %31 {offsets = [0, 0, 56], sizes = [8, 32, 8], strides = [1, 1, 1]} : vector<8x32x96xf32> to vector<8x32x8xf32>
    %115 = vector.extract_strided_slice %31 {offsets = [0, 0, 88], sizes = [8, 32, 8], strides = [1, 1, 1]} : vector<8x32x96xf32> to vector<8x32x8xf32>
    "tpu.trace_start"() <{level = 10 : i32, message = "wqd,wkd->wqk"}> : () -> ()
    %cst_46 = arith.constant dense<0.000000e+00> : vector<8x32x32xf32>
    %116 = tpu.matmul %113, %114, %cst_46 {dimension_numbers = #tpu.dot_dimension_numbers<[2], [2], [1], [1], [0, 0, 0, 1, 1, 1], [0], [0]>} : vector<8x32x8xf32>, vector<8x32x8xf32>, vector<8x32x32xf32> -> vector<8x32x32xf32>
    "tpu.trace_stop"() : () -> ()
    %c3 = arith.constant 3 : index
    %c0_47 = arith.constant 0 : index
    %c0_48 = arith.constant 0 : index
    %117 = vector.load %arg6[%c3, %c0_47, %c0_48] : memref<4x32x32xf32, #tpu.memory_space<vmem>>, vector<1x32x32xf32>
    %118 = vector.shape_cast %117 : vector<1x32x32xf32> to vector<32x32xf32>
    %119 = vector.shape_cast %118 : vector<32x32xf32> to vector<1x32x32xf32>
    %120 = vector.broadcast %119 : vector<1x32x32xf32> to vector<8x32x32xf32>
    %121 = arith.addf %116, %120 : vector<8x32x32xf32>
    %cst_49 = arith.constant dense<0xFF800000> : vector<8x32xf32>
    %122 = vector.multi_reduction <maximumf>, %121, %cst_49 [2] : vector<8x32x32xf32> to vector<8x32xf32>
    %123 = vector.shape_cast %122 : vector<8x32xf32> to vector<8x32x1xf32>
    %124 = vector.broadcast %123 : vector<8x32x1xf32> to vector<8x32x32xf32>
    %125 = arith.subf %121, %124 : vector<8x32x32xf32>
    %126 = math.exp %125 : vector<8x32x32xf32>
    %cst_50 = arith.constant dense<0.000000e+00> : vector<8x32xf32>
    %127 = vector.multi_reduction <add>, %126, %cst_50 [2] : vector<8x32x32xf32> to vector<8x32xf32>
    %128 = vector.shape_cast %127 : vector<8x32xf32> to vector<8x32x1xf32>
    %129 = tpu.reciprocal %128 {approx = true} : vector<8x32x1xf32> -> vector<8x32x1xf32>
    %130 = vector.broadcast %129 : vector<8x32x1xf32> to vector<8x32x32xf32>
    %131 = arith.mulf %126, %130 : vector<8x32x32xf32>
    "tpu.trace_start"() <{level = 10 : i32, message = "wqk,wkd->wqd"}> : () -> ()
    %cst_51 = arith.constant dense<0.000000e+00> : vector<8x32x8xf32>
    %132 = tpu.matmul %131, %115, %cst_51 {dimension_numbers = #tpu.dot_dimension_numbers<[2], [1], [1], [2], [0, 0, 0, 1, 1, 2], [0], [0]>} : vector<8x32x32xf32>, vector<8x32x8xf32>, vector<8x32x8xf32> -> vector<8x32x8xf32>
    "tpu.trace_stop"() : () -> ()
    %133 = vector.shape_cast %132 : vector<8x32x8xf32> to vector<256x8xf32>
    %c24 = arith.constant 24 : index
    %c0_52 = arith.constant 0 : index
    %134 = vector.load %arg4[%c24, %c0_52] : memref<32x32xf32, #tpu.memory_space<vmem>>, vector<8x32xf32>
    %cst_53 = arith.constant dense<0.000000e+00> : vector<256x32xf32>
    %135 = tpu.matmul %133, %134, %cst_53 {dimension_numbers = #tpu.dot_dimension_numbers<[1], [0], [0], [1], [0, 0, 1, 1], [], []>} : vector<256x8xf32>, vector<8x32xf32>, vector<256x32xf32> -> vector<256x32xf32>
    %136 = arith.addf %110, %135 : vector<256x32xf32>
    %c0_54 = arith.constant 0 : index
    %c0_55 = arith.constant 0 : index
    %137 = vector.load %arg5[%c0_54, %c0_55] : memref<1x32xf32, #tpu.memory_space<vmem>>, vector<1x32xf32>
    %138 = vector.broadcast %137 : vector<1x32xf32> to vector<256x32xf32>
    %139 = arith.addf %136, %138 : vector<256x32xf32>
    %140 = vector.shape_cast %139 : vector<256x32xf32> to vector<8x32x32xf32>
    %c0_56 = arith.constant 0 : index
    %c0_57 = arith.constant 0 : index
    %c0_58 = arith.constant 0 : index
    %141 = vector.load %arg9[%c0_56, %c0_57, %c0_58] : memref<8x32x32xf32, #tpu.memory_space<vmem>>, vector<8x32x32xf32>
    tpu.vector_store %arg9[%c0_56, %c0_57, %c0_58], %140 {strides = array<i32>} : memref<8x32x32xf32, #tpu.memory_space<vmem>>, vector<8x32x32xf32>,
    return
  }
  func.func @transform_0(%arg0: i32) -> (i32, i32, i32) {
    %c0_i32 = arith.constant 0 : i32
    %c0_i32_0 = arith.constant 0 : i32
    %c0_i32_1 = arith.constant 0 : i32
    return %arg0, %c0_i32, %c0_i32_0 : i32, i32, i32
  }
  func.func @transform_1(%arg0: i32) -> (i32, i32) {
    %c0_i32 = arith.constant 0 : i32
    %c0_i32_0 = arith.constant 0 : i32
    %c0_i32_1 = arith.constant 0 : i32
    return %c0_i32, %c0_i32_0 : i32, i32
  }
  func.func @transform_2(%arg0: i32) -> (i32, i32) {
    %c0_i32 = arith.constant 0 : i32
    %c0_i32_0 = arith.constant 0 : i32
    %c0_i32_1 = arith.constant 0 : i32
    return %c0_i32, %c0_i32_0 : i32, i32
  }
  func.func @transform_3(%arg0: i32) -> (i32, i32) {
    %c0_i32 = arith.constant 0 : i32
    %c0_i32_0 = arith.constant 0 : i32
    %c0_i32_1 = arith.constant 0 : i32
    return %c0_i32, %c0_i32_0 : i32, i32
  }
  func.func @transform_4(%arg0: i32) -> (i32, i32) {
    %c0_i32 = arith.constant 0 : i32
    %c0_i32_0 = arith.constant 0 : i32
    %c0_i32_1 = arith.constant 0 : i32
    return %c0_i32, %c0_i32_0 : i32, i32
  }
  func.func @transform_5(%arg0: i32) -> (i32, i32, i32) {
    %c0_i32 = arith.constant 0 : i32
    %c0_i32_0 = arith.constant 0 : i32
    %c0_i32_1 = arith.constant 0 : i32
    %c0_i32_2 = arith.constant 0 : i32
    return %c0_i32, %c0_i32_0, %c0_i32_1 : i32, i32, i32
  }
  func.func @transform_6(%arg0: i32) -> (i32, i32) {
    %c0_i32 = arith.constant 0 : i32
    %c0_i32_0 = arith.constant 0 : i32
    %c0_i32_1 = arith.constant 0 : i32
    return %c0_i32, %c0_i32_0 : i32, i32
  }
  func.func @transform_7(%arg0: i32) -> (i32, i32) {
    %c0_i32 = arith.constant 0 : i32
    %c0_i32_0 = arith.constant 0 : i32
    %c0_i32_1 = arith.constant 0 : i32
    return %c0_i32, %c0_i32_0 : i32, i32
  }
  func.func @transform_8(%arg0: i32) -> (i32, i32, i32) {
    %c0_i32 = arith.constant 0 : i32
    %c0_i32_0 = arith.constant 0 : i32
    %c0_i32_1 = arith.constant 0 : i32
    return %arg0, %c0_i32, %c0_i32_0 : i32, i32, i32
  }
}

</mosaic_0001>

<bundles_post_ra>
// kernel: tpu_custom_call.1
= control target key start
LH: loop header
LB: loop body
LE: loop exit
PB: predicated region body
PF: predicated region fallthrough
CT: control target
= control target key end

     0   :  { %13 = vsyncpa [#allocation3], 0  ;;  %s18918_s0 = inlined_call_operand.hbm [shape: f32[8,32,32], index: 0, kind: input, shape index: {}]   ;;  %s18919_s1 = inlined_call_operand.hbm [shape: f32[32,96], index: 1, kind: input, shape index: {}]   ;;  %s18920_s2 = inlined_call_operand.vmem [shape: f32[1,96], index: 2, kind: input, shape index: {}]   ;;  %s18921_s3 = inlined_call_operand.hbm [shape: f32[32,32], index: 3, kind: input, shape index: {}]   ;;  %s18922_s4 = inlined_call_operand.vmem [shape: f32[1,32], index: 4, kind: input, shape index: {}]   ;;  %s18923_s5 = inlined_call_operand.hbm [shape: f32[4,32,32], index: 5, kind: input, shape index: {}]   ;;  %s18924_s6 = inlined_call_operand.vmem [shape: f32[1,32], index: 6, kind: input, shape index: {}]   ;;  %s18925_s7 = inlined_call_operand.vmem [shape: f32[1,32], index: 7, kind: input, shape index: {}]   ;;  %s18926_s8 = inlined_call_operand.hbm [shape: f32[8,32,32], index: 8, kind: output, shape index: {}]  }
   0x1   :  { %14 = vsyncpa [#allocation6], 0 }
   0x2   :  { %15 = vsyncpa [#allocation9], 0 }
   0x3   :  { %16 = vsyncpa [#allocation4], 0  ;;  %s14170_s27 = smov [#allocation5]   ;;  %s14171_s29 = smov [#allocation2]  }
   0x4   :  { %s34_s28 = sshll.u32 %s14170_s27, 4  ;;  %s22_s30 = sshll.u32 %s14171_s29, 4  ;;  %s35_s28 = int_to_ptr.vmem [resolvable:$true] %s34_s28  ;;  %s23_s30 = int_to_ptr.vmem [resolvable:$true] %s22_s30 }
   0x5   :  { %s14070_s9 = scalar_lea.vmem %s35_s28, 512  ;;  %p14075_p1 = scmp.lt.s32.totalorder %s35_s28, %s35_s28 }
   0x6   :  { %p14071_p0 = scmp.ne.s32.totalorder %s35_s28, %s14070_s9  ;;  %p14076_p2 = scmp.lt.s32.totalorder %s14070_s9, %s14070_s9 }
   0x8   :  { %p14077_p3 = por %p14076_p2, %p14075_p1 }
   0xa   :  { %p14078_p4 = pnand %p14077_p3, %p14071_p0 }
   0xc   :  { %14081 = shalt.err (!%p14078_p4)
}
   0xd   :  { %s14172_s10 = smov 128   ;;  %s14173_s11 = smov 8  }
   0xe   :  { %40 = dma.hbm_to_vmem [thread:$0]  %s18919_s1, 512, %s35_s28, [#allocation6], %s14172_s10, %s14172_s10, %s14173_s11  }
   0xf   :  { %s14090_s14 = scalar_lea.vmem %s23_s30, 4096  ;;  %p14095_p6 = scmp.lt.s32.totalorder %s23_s30, %s23_s30 }
  0x10   :  { %p14091_p5 = scmp.ne.s32.totalorder %s23_s30, %s14090_s14  ;;  %p14096_p7 = scmp.lt.s32.totalorder %s14090_s14, %s14090_s14 }
  0x12   :  { %p14097_p8 = por %p14096_p7, %p14095_p6 }
  0x14   :  { %p14098_p9 = pnand %p14097_p8, %p14091_p5 }
  0x16   :  { %14101 = shalt.err (!%p14098_p9)
}
  0x17   :  { %28 = dma.hbm_to_vmem [thread:$0]  %s18918_s0, 4096, %s23_s30, [#allocation3], %s14172_s10, %s14172_s10, %s14173_s11  }
  0x18   :  { %s14174_s17 = smov [#allocation7]   ;;  %s14175_s19 = smov [#allocation8]  }
  0x19   :  { %s48_s18 = sshll.u32 %s14174_s17, 4  ;;  %s62_s20 = sshll.u32 %s14175_s19, 4  ;;  %s49_s18 = int_to_ptr.vmem [resolvable:$true] %s48_s18  ;;  %s63_s20 = int_to_ptr.vmem [resolvable:$true] %s62_s20 }
  0x1a   :  { %s14110_s1 = scalar_lea.vmem %s49_s18, 512  ;;  %p14115_p11 = scmp.lt.s32.totalorder %s49_s18, %s49_s18 }
  0x1b   :  { %p14111_p10 = scmp.ne.s32.totalorder %s49_s18, %s14110_s1  ;;  %p14116_p12 = scmp.lt.s32.totalorder %s14110_s1, %s14110_s1 }
  0x1d   :  { %p14117_p13 = por %p14116_p12, %p14115_p11 }
  0x1f   :  { %p14118_p0 = pnand %p14117_p13, %p14111_p10 }
  0x21   :  { %14121 = shalt.err (!%p14118_p0)
}
  0x22   :  { %54 = dma.hbm_to_vmem [thread:$0]  %s18921_s3, 512, %s49_s18, [#allocation6], %s14172_s10, %s14172_s10, %s14173_s11  }
  0x23   :  { %s14130_s0 = scalar_lea.vmem %s63_s20, 2048  ;;  %p14135_p2 = scmp.lt.s32.totalorder %s63_s20, %s63_s20 }
  0x24   :  { %p14131_p1 = scmp.ne.s32.totalorder %s63_s20, %s14130_s0  ;;  %p14136_p3 = scmp.lt.s32.totalorder %s14130_s0, %s14130_s0 }
  0x26   :  { %p14137_p4 = por %p14136_p3, %p14135_p2 }
  0x28   :  { %p14138_p5 = pnand %p14137_p4, %p14131_p1 }
  0x2a   :  { %14141 = shalt.err (!%p14138_p5)
}
  0x2b   :  { %68 = dma.hbm_to_vmem [thread:$0]  %s18923_s5, 2048, %s63_s20, [#allocation9], %s14172_s10, %s14172_s10, %s14173_s11  }
  0x2c   :  { %14162 = dma.done.wait [#allocation3], 4096  }
  0x2d   :  { %14163 = vsyncadd [#allocation3], 4294963200 }
  0x2e   :  { %14164 = dma.done.wait [#allocation6], 1024  }
  0x2f   :  { %14165 = vsyncadd [#allocation6], 4294966272 }
  0x30   :  { %14166 = dma.done.wait [#allocation9], 2048  }
  0x31   :  { %14167 = vsyncadd [#allocation9], 4294965248  ;;  %vm117_vm0 = vcmask 261120   ;;  %v14257_v0 = vld [vmem:[#allocation2] sm:$0xff]  ;;  %v14259_v1 = vld [vmem:[#allocation2 + $0x10] sm:$0xff]  ;;  %vm993_vm1 = vcmask 64512  }
  0x32   :  { %v14261_v2 = vld [vmem:[#allocation2 + $0x8] sm:$0xff]  ;;  %v118_v3 = vsel %vm117_vm0, %v14257_v0, 0.0  ;;  %v124_v4 = vsel %vm117_vm0, %v14259_v1, 0.0  ;;  %v14267_v5 = vld [vmem:[#allocation2 + $0x18] sm:$0xff]  ;;  %v14273_v8 = vld [vmem:[#allocation2 + $0x20] sm:$0xff]  ;;  %s14176_s27 = smov 96  }
  0x33   :  { %119 = vadd.xlane.f32.xlu0 %v118_v3  ;;  %125 = vadd.xlane.f32.xlu1 %v124_v4  ;;  %v121_v6 = vsel %vm117_vm0, %v14261_v2, 0.0  ;;  %v127_v7 = vsel %vm117_vm0, %v14267_v5, 0.0  ;;  %v14275_v9 = vld [vmem:[#allocation2 + $0x28] sm:$0xff]  ;;  %v130_v10 = vsel %vm117_vm0, %v14273_v8, 0.0  ;;  %v14281_v12 = vld [vmem:[#allocation2 + $0x30] sm:$0xff]  ;;  %v14283_v13 = vld [vmem:[#allocation2 + $0x38] sm:$0xff] }
  0x34   :  { %v133_v11 = vsel %vm117_vm0, %v14275_v9, 0.0  ;;  %v136_v14 = vsel %vm117_vm0, %v14281_v12, 0.0  ;;  %v139_v15 = vsel %vm117_vm0, %v14283_v13, 0.0  ;;  %v14289_v16 = vld [vmem:[#allocation2 + $0x40] sm:$0xff]  ;;  %v14291_v17 = vld [vmem:[#allocation2 + $0x48] sm:$0xff]  ;;  %v14297_v20 = vld [vmem:[#allocation2 + $0x50] sm:$0xff] }
  0x35   :  { %v142_v18 = vsel %vm117_vm0, %v14289_v16, 0.0  ;;  %v145_v19 = vsel %vm117_vm0, %v14291_v17, 0.0  ;;  %v14299_v21 = vld [vmem:[#allocation2 + $0x58] sm:$0xff]  ;;  %v148_v22 = vsel %vm117_vm0, %v14297_v20, 0.0  ;;  %v14305_v24 = vld [vmem:[#allocation2 + $0x70] sm:$0xff]  ;;  %v14313_v28 = vld [vmem:[#allocation2 + $0x80] sm:$0xff] }
  0x36   :  { %v151_v23 = vsel %vm117_vm0, %v14299_v21, 0.0  ;;  %v14307_v25 = vld [vmem:[#allocation2 + $0x78] sm:$0xff]  ;;  %v160_v26 = vsel %vm117_vm0, %v14305_v24, 0.0  ;;  %v14315_v29 = vld [vmem:[#allocation2 + $0x88] sm:$0xff]  ;;  %v166_v30 = vsel %vm117_vm0, %v14313_v28, 0.0  ;;  %v14321_v32 = vld [vmem:[#allocation2 + $0x60] sm:$0xff] }
  0x37   :  { %122 = vadd.xlane.f32.xlu0 %v121_v6  ;;  %128 = vadd.xlane.f32.xlu1 %v127_v7  ;;  %v163_v27 = vsel %vm117_vm0, %v14307_v25, 0.0  ;;  %v169_v31 = vsel %vm117_vm0, %v14315_v29, 0.0  ;;  %v14323_v33 = vld [vmem:[#allocation2 + $0x90] sm:$0xff]  ;;  %v154_v34 = vsel %vm117_vm0, %v14321_v32, 0.0  ;;  %v14329_v36 = vld [vmem:[#allocation2 + $0x68] sm:$0xff]  ;;  %v14331_v37 = vld [vmem:[#allocation2 + $0x98] sm:$0xff] }
  0x38   :  { %v172_v35 = vsel %vm117_vm0, %v14323_v33, 0.0  ;;  %v157_v38 = vsel %vm117_vm0, %v14329_v36, 0.0  ;;  %v175_v39 = vsel %vm117_vm0, %v14331_v37, 0.0  ;;  %v14337_v40 = vld [vmem:[#allocation2 + $0xa0] sm:$0xff]  ;;  %v14339_v41 = vld [vmem:[#allocation2 + $0xa8] sm:$0xff]  ;;  %v14345_v44 = vld [vmem:[#allocation2 + $0xb0] sm:$0xff] }
  0x39   :  { %v178_v42 = vsel %vm117_vm0, %v14337_v40, 0.0  ;;  %v181_v43 = vsel %vm117_vm0, %v14339_v41, 0.0  ;;  %v14347_v45 = vld [vmem:[#allocation2 + $0xb8] sm:$0xff]  ;;  %v184_v46 = vsel %vm117_vm0, %v14345_v44, 0.0  ;;  %v14353_v48 = vld [vmem:[#allocation2 + $0xc0] sm:$0xff]  ;;  %v14355_v49 = vld [vmem:[#allocation2 + $0xc8] sm:$0xff] }
  0x3a   :  { %v187_v47 = vsel %vm117_vm0, %v14347_v45, 0.0  ;;  %v190_v50 = vsel %vm117_vm0, %v14353_v48, 0.0  ;;  %v193_v51 = vsel %vm117_vm0, %v14355_v49, 0.0  ;;  %v14361_v52 = vld [vmem:[#allocation2 + $0xd0] sm:$0xff]  ;;  %v14363_v53 = vld [vmem:[#allocation2 + $0xd8] sm:$0xff]  ;;  %v14369_v56 = vld [vmem:[#allocation2 + $0xe0] sm:$0xff] }
  0x3b   :  { %131 = vadd.xlane.f32.xlu0 %v130_v10  ;;  %134 = vadd.xlane.f32.xlu1 %v133_v11  ;;  %v196_v54 = vsel %vm117_vm0, %v14361_v52, 0.0  ;;  %v199_v55 = vsel %vm117_vm0, %v14363_v53, 0.0  ;;  %v14371_v57 = vld [vmem:[#allocation2 + $0xe8] sm:$0xff]  ;;  %v202_v58 = vsel %vm117_vm0, %v14369_v56, 0.0  ;;  %s14178_s28 = smov 88   ;;  %s14179_s29 = smov 120  }
  0x3c   :  { %v205_v59 = vsel %vm117_vm0, %v14371_v57, 0.0  ;;  %s14180_s30 = smov 56   ;;  %s14181_s9 = smov 80  }
  0x3d   :  { %s14182_s12 = smov 112   ;;  %s14183_s13 = smov 48  }
  0x3e   :  { %s14184_s14 = smov 72   ;;  %s14185_s15 = smov 104  }
  0x3f   :  { %137 = vadd.xlane.f32.xlu0 %v136_v14  ;;  %140 = vadd.xlane.f32.xlu1 %v139_v15  ;;  %s14186_s16 = smov 40  }
  0x43   :  { %143 = vadd.xlane.f32.xlu0 %v142_v18  ;;  %146 = vadd.xlane.f32.xlu1 %v145_v19 }
  0x47   :  { %149 = vadd.xlane.f32.xlu0 %v148_v22  ;;  %152 = vadd.xlane.f32.xlu1 %v151_v23 }
  0x4b   :  { %161 = vadd.xlane.f32.xlu0 %v160_v26  ;;  %164 = vadd.xlane.f32.xlu1 %v163_v27 }
  0x4f   :  { %167 = vadd.xlane.f32.xlu0 %v166_v30  ;;  %170 = vadd.xlane.f32.xlu1 %v169_v31  ;;  %v14397_v31 = vld [vmem:[#allocation2 + $0xf0] sm:$0xff] }
  0x53   :  { %155 = vadd.xlane.f32.xlu0 %v154_v34  ;;  %173 = vadd.xlane.f32.xlu1 %v172_v35 }
  0x57   :  { %158 = vadd.xlane.f32.xlu0 %v157_v38  ;;  %176 = vadd.xlane.f32.xlu1 %v175_v39  ;;  %v208_v38 = vsel %vm117_vm0, %v14397_v31, 0.0 }
  0x5b   :  { %179 = vadd.xlane.f32.xlu0 %v178_v42  ;;  %182 = vadd.xlane.f32.xlu1 %v181_v43 }
  0x5f   :  { %185 = vadd.xlane.f32.xlu0 %v184_v46  ;;  %188 = vadd.xlane.f32.xlu1 %v187_v47 }
  0x63   :  { %191 = vadd.xlane.f32.xlu0 %v190_v50  ;;  %194 = vadd.xlane.f32.xlu1 %v193_v51  ;;  %v14411_v50 = vld [vmem:[#allocation2 + $0xf8] sm:$0xff] }
  0x67   :  { %197 = vadd.xlane.f32.xlu0 %v196_v54  ;;  %200 = vadd.xlane.f32.xlu1 %v199_v55  ;;  %v211_v54 = vsel %vm117_vm0, %v14411_v50, 0.0 }
  0x6b   :  { %203 = vadd.xlane.f32.xlu0 %v202_v58  ;;  %206 = vadd.xlane.f32.xlu1 %v205_v59 }
  0xbc   :  { %v120_v60 = vpop.xlane.xlu0 %119  ;;  %v126_v61 = vpop.xlane.xlu1 %125 }
  0xbd   :  { %v215_v62 = vmul.f32 0.03125, %v120_v60  ;;  %v217_v63 = vmul.f32 0.03125, %v126_v61 }
  0xbf   :  { %v14378_v3 = vsub.f32 %v14257_v0, %v215_v62  ;;  %v14381_v4 = vsub.f32 %v14259_v1, %v217_v63 }
  0xc0   :  { %v123_v6 = vpop.xlane.xlu0 %122  ;;  %v129_v7 = vpop.xlane.xlu1 %128 }
  0xc1   :  { %v216_v10 = vmul.f32 0.03125, %v123_v6  ;;  %v218_v11 = vmul.f32 0.03125, %v129_v7  ;;  %v279_v14 = vmul.f32 %v14378_v3, %v14378_v3  ;;  %v281_v15 = vmul.f32 %v14381_v4, %v14381_v4 }
  0xc3   :  { %v14388_v18 = vsub.f32 %v14261_v2, %v216_v10  ;;  %v14391_v19 = vsub.f32 %v14267_v5, %v218_v11  ;;  %v311_v0 = vsel %vm117_vm0, %v279_v14, 0.0  ;;  %v317_v1 = vsel %vm117_vm0, %v281_v15, 0.0 }
  0xc4   :  { %312 = vadd.xlane.f32.xlu0 %v311_v0  ;;  %v132_v22 = vpop.xlane.xlu0 %131  ;;  %v135_v23 = vpop.xlane.xlu1 %134 }
  0xc5   :  { %v280_v26 = vmul.f32 %v14388_v18, %v14388_v18  ;;  %v219_v27 = vmul.f32 0.03125, %v132_v22  ;;  %v220_v30 = vmul.f32 0.03125, %v135_v23  ;;  %v282_v2 = vmul.f32 %v14391_v19, %v14391_v19 }
  0xc7   :  { %v314_v5 = vsel %vm117_vm0, %v280_v26, 0.0  ;;  %v14403_v34 = vsub.f32 %v14273_v8, %v219_v27  ;;  %v14406_v35 = vsub.f32 %v14275_v9, %v220_v30  ;;  %v320_v43 = vsel %vm117_vm0, %v282_v2, 0.0 }
  0xc8   :  { %318 = vadd.xlane.f32.xlu0 %v317_v1  ;;  %315 = vadd.xlane.f32.xlu1 %v314_v5  ;;  %v138_v39 = vpop.xlane.xlu0 %137  ;;  %v141_v42 = vpop.xlane.xlu1 %140 }
  0xc9   :  { %v221_v46 = vmul.f32 0.03125, %v138_v39  ;;  %v222_v47 = vmul.f32 0.03125, %v141_v42  ;;  %v283_v8 = vmul.f32 %v14403_v34, %v14403_v34  ;;  %v284_v59 = vmul.f32 %v14406_v35, %v14406_v35 }
  0xcb   :  { %v14416_v51 = vsub.f32 %v14281_v12, %v221_v46  ;;  %v14419_v9 = vsub.f32 %v14283_v13, %v222_v47  ;;  %v323_v60 = vsel %vm117_vm0, %v283_v8, 0.0  ;;  %v326_v6 = vsel %vm117_vm0, %v284_v59, 0.0 }
  0xcc   :  { %209 = vadd.xlane.f32.xlu0 %v208_v38  ;;  %321 = vadd.xlane.f32.xlu1 %v320_v43  ;;  %v144_v55 = vpop.xlane.xlu0 %143  ;;  %v147_v58 = vpop.xlane.xlu1 %146 }
  0xcd   :  { %v223_v61 = vmul.f32 0.03125, %v144_v55  ;;  %v224_v62 = vmul.f32 0.03125, %v147_v58  ;;  %v285_v12 = vmul.f32 %v14416_v51, %v14416_v51  ;;  %v286_v11 = vmul.f32 %v14419_v9, %v14419_v9 }
  0xcf   :  { %v14429_v63 = vsub.f32 %v14289_v16, %v223_v61  ;;  %v14432_v13 = vsub.f32 %v14291_v17, %v224_v62  ;;  %v329_v14 = vsel %vm117_vm0, %v285_v12, 0.0  ;;  %v332_v22 = vsel %vm117_vm0, %v286_v11, 0.0 }
  0xd0   :  { %212 = vadd.xlane.f32.xlu1 %v211_v54  ;;  %324 = vadd.xlane.f32.xlu0 %v323_v60  ;;  %v150_v7 = vpop.xlane.xlu0 %149  ;;  %v153_v10 = vpop.xlane.xlu1 %152 }
  0xd1   :  { %v225_v15 = vmul.f32 0.03125, %v150_v7  ;;  %v226_v0 = vmul.f32 0.03125, %v153_v10  ;;  %v287_v16 = vmul.f32 %v14429_v63, %v14429_v63  ;;  %v288_v27 = vmul.f32 %v14432_v13, %v14432_v13 }
  0xd3   :  { %v14441_v1 = vsub.f32 %v14297_v20, %v225_v15  ;;  %v14444_v17 = vsub.f32 %v14299_v21, %v226_v0  ;;  %v335_v30 = vsel %vm117_vm0, %v287_v16, 0.0  ;;  %v338_v39 = vsel %vm117_vm0, %v288_v27, 0.0 }
  0xd4   :  { %327 = vadd.xlane.f32.xlu1 %v326_v6  ;;  %330 = vadd.xlane.f32.xlu0 %v329_v14  ;;  %v162_v23 = vpop.xlane.xlu0 %161  ;;  %v165_v26 = vpop.xlane.xlu1 %164 }
  0xd5   :  { %v229_v2 = vmul.f32 0.03125, %v162_v23  ;;  %v230_v5 = vmul.f32 0.03125, %v165_v26  ;;  %v289_v20 = vmul.f32 %v14441_v1, %v14441_v1  ;;  %v290_v46 = vmul.f32 %v14444_v17, %v14444_v17  ;;  %v616_v23 = vld [vmem:[#allocation5 + $0x18] sm:$0xff] }
  0xd6   :  { %12307 = vmatprep.subr.mxu0 %v616_v23  ;;  %13459 = vmatprep.subr.mxu1 %v616_v23 }
  0xd7   :  { %v14453_v38 = vsub.f32 %v14305_v24, %v229_v2  ;;  %v14456_v21 = vsub.f32 %v14307_v25, %v230_v5  ;;  %v341_v47 = vsel %vm117_vm0, %v289_v20, 0.0  ;;  %v344_v58 = vsel %vm117_vm0, %v290_v46, 0.0  ;;  %v615_v20 = vld [vmem:[#allocation5 + $0x10] sm:$0xff]  ;;  %12308 = vmatpush3.msra.mxu0 %v616_v23  ;;  %13463 = vmatpush3.msra.mxu1 %v616_v23 }
  0xd8   :  { %333 = vadd.xlane.f32.xlu1 %v332_v22  ;;  %336 = vadd.xlane.f32.xlu0 %v335_v30  ;;  %v168_v42 = vpop.xlane.xlu0 %167  ;;  %v171_v43 = vpop.xlane.xlu1 %170 }
  0xd9   :  { %v231_v8 = vmul.f32 0.03125, %v168_v42  ;;  %v232_v54 = vmul.f32 0.03125, %v171_v43  ;;  %v293_v24 = vmul.f32 %v14453_v38, %v14453_v38  ;;  %v294_v61 = vmul.f32 %v14456_v21, %v14456_v21  ;;  %12309 = vmatprep.subr.mxu0 %v615_v20  ;;  %13460 = vmatprep.subr.mxu1 %v615_v20 }
  0xda   :  { %12310 = vmatpush3.msra.mxu0 %v615_v20  ;;  %13464 = vmatpush3.msra.mxu1 %v615_v20 }
  0xdb   :  { %v14465_v55 = vsub.f32 %v14313_v28, %v231_v8  ;;  %v14468_v25 = vsub.f32 %v14315_v29, %v232_v54  ;;  %v353_v62 = vsel %vm117_vm0, %v293_v24, 0.0  ;;  %v356_v10 = vsel %vm117_vm0, %v294_v61, 0.0 }
  0xdc   :  { %339 = vadd.xlane.f32.xlu1 %v338_v39  ;;  %342 = vadd.xlane.f32.xlu0 %v341_v47  ;;  %v156_v59 = vpop.xlane.xlu0 %155  ;;  %v174_v60 = vpop.xlane.xlu1 %173 }
  0xdd   :  { %v227_v12 = vmul.f32 0.03125, %v156_v59  ;;  %v233_v6 = vmul.f32 0.03125, %v174_v60  ;;  %v295_v28 = vmul.f32 %v14465_v55, %v14465_v55  ;;  %v296_v15 = vmul.f32 %v14468_v25, %v14468_v25  ;;  %v613_v59 = vld [vmem:[#allocation5] sm:$0xff] }
  0xdf   :  { %v14477_v7 = vsub.f32 %v14321_v32, %v227_v12  ;;  %v14480_v29 = vsub.f32 %v14323_v33, %v233_v6  ;;  %v359_v0 = vsel %vm117_vm0, %v295_v28, 0.0  ;;  %v362_v27 = vsel %vm117_vm0, %v296_v15, 0.0 }
  0xe0   :  { %345 = vadd.xlane.f32.xlu1 %v344_v58  ;;  %354 = vadd.xlane.f32.xlu0 %v353_v62  ;;  %v159_v11 = vpop.xlane.xlu0 %158  ;;  %v177_v14 = vpop.xlane.xlu1 %176 }
  0xe1   :  { %v228_v16 = vmul.f32 0.03125, %v159_v11  ;;  %v234_v22 = vmul.f32 0.03125, %v177_v14  ;;  %v291_v32 = vmul.f32 %v14477_v7, %v14477_v7  ;;  %v297_v5 = vmul.f32 %v14480_v29, %v14480_v29 }
  0xe3   :  { %v14489_v26 = vsub.f32 %v14329_v36, %v228_v16  ;;  %v14492_v33 = vsub.f32 %v14331_v37, %v234_v22  ;;  %v347_v39 = vsel %vm117_vm0, %v291_v32, 0.0  ;;  %v614_v37 = vld [vmem:[#allocation5 + $0x8] sm:$0xff]  ;;  %v365_v8 = vsel %vm117_vm0, %v297_v5, 0.0 }
  0xe4   :  { %357 = vadd.xlane.f32.xlu1 %v356_v10  ;;  %360 = vadd.xlane.f32.xlu0 %v359_v0  ;;  %v180_v30 = vpop.xlane.xlu0 %179  ;;  %v183_v2 = vpop.xlane.xlu1 %182 }
  0xe5   :  { %v235_v42 = vmul.f32 0.03125, %v180_v30  ;;  %v236_v36 = vmul.f32 0.03125, %v183_v2  ;;  %v292_v43 = vmul.f32 %v14489_v26, %v14489_v26  ;;  %v298_v58 = vmul.f32 %v14492_v33, %v14492_v33  ;;  %12311 = vmatprep.subr.mxu0 %v614_v37  ;;  %13461 = vmatprep.subr.mxu1 %v614_v37 }
  0xe6   :  { %12312 = vmatpush3.msra.mxu0 %v614_v37  ;;  %13465 = vmatpush3.msra.mxu1 %v614_v37 }
  0xe7   :  { %v14501_v46 = vsub.f32 %v14337_v40, %v235_v42  ;;  %v14504_v47 = vsub.f32 %v14339_v41, %v236_v36  ;;  %v350_v60 = vsel %vm117_vm0, %v292_v43, 0.0  ;;  %12313 = vmatprep.subr.mxu0 %v613_v59  ;;  %13462 = vmatprep.subr.mxu1 %v613_v59  ;;  %v368_v6 = vsel %vm117_vm0, %v298_v58, 0.0 }
  0xe8   :  { %363 = vadd.xlane.f32.xlu1 %v362_v27  ;;  %348 = vadd.xlane.f32.xlu0 %v347_v39  ;;  %v186_v54 = vpop.xlane.xlu0 %185  ;;  %v189_v24 = vpop.xlane.xlu1 %188 }
  0xe9   :  { %v237_v61 = vmul.f32 0.03125, %v186_v54  ;;  %v238_v40 = vmul.f32 0.03125, %v189_v24  ;;  %v299_v62 = vmul.f32 %v14501_v46, %v14501_v46  ;;  %v300_v11 = vmul.f32 %v14504_v47, %v14504_v47  ;;  %12314 = vmatpush3.msra.mxu0 %v613_v59  ;;  %13466 = vmatpush3.msra.mxu1 %v613_v59 }
  0xeb   :  { %v14513_v41 = vsub.f32 %v14345_v44, %v237_v61  ;;  %v14516_v12 = vsub.f32 %v14347_v45, %v238_v40  ;;  %v371_v14 = vsel %vm117_vm0, %v299_v62, 0.0  ;;  %v374_v22 = vsel %vm117_vm0, %v300_v11, 0.0 }
  0xec   :  { %366 = vadd.xlane.f32.xlu1 %v365_v8  ;;  %351 = vadd.xlane.f32.xlu0 %v350_v60  ;;  %v192_v28 = vpop.xlane.xlu0 %191  ;;  %v195_v10 = vpop.xlane.xlu1 %194 }
  0xed   :  { %v239_v15 = vmul.f32 0.03125, %v192_v28  ;;  %v240_v0 = vmul.f32 0.03125, %v195_v10  ;;  %v301_v44 = vmul.f32 %v14513_v41, %v14513_v41  ;;  %v302_v27 = vmul.f32 %v14516_v12, %v14516_v12 }
  0xef   :  { %v14525_v16 = vsub.f32 %v14353_v48, %v239_v15  ;;  %v14528_v45 = vsub.f32 %v14355_v49, %v240_v0  ;;  %v377_v30 = vsel %vm117_vm0, %v301_v44, 0.0  ;;  %v380_v39 = vsel %vm117_vm0, %v302_v27, 0.0 }
  0xf0   :  { %369 = vadd.xlane.f32.xlu1 %v368_v6  ;;  %372 = vadd.xlane.f32.xlu0 %v371_v14  ;;  %v198_v32 = vpop.xlane.xlu0 %197  ;;  %v201_v23 = vpop.xlane.xlu1 %200 }
  0xf1   :  { %v241_v2 = vmul.f32 0.03125, %v198_v32  ;;  %v242_v5 = vmul.f32 0.03125, %v201_v23  ;;  %v303_v48 = vmul.f32 %v14525_v16, %v14525_v16  ;;  %v304_v43 = vmul.f32 %v14528_v45, %v14528_v45 }
  0xf3   :  { %v14537_v20 = vsub.f32 %v14361_v52, %v241_v2  ;;  %v14540_v49 = vsub.f32 %v14363_v53, %v242_v5  ;;  %v383_v37 = vsel %vm117_vm0, %v303_v48, 0.0  ;;  %v386_v53 = vsel %vm117_vm0, %v304_v43, 0.0 }
  0xf4   :  { %375 = vadd.xlane.f32.xlu1 %v374_v22  ;;  %378 = vadd.xlane.f32.xlu0 %v377_v30  ;;  %v204_v42 = vpop.xlane.xlu0 %203  ;;  %v207_v36 = vpop.xlane.xlu1 %206 }
  0xf5   :  { %v243_v8 = vmul.f32 0.03125, %v204_v42  ;;  %v244_v54 = vmul.f32 0.03125, %v207_v36  ;;  %v305_v52 = vmul.f32 %v14537_v20, %v14537_v20  ;;  %v306_v60 = vmul.f32 %v14540_v49, %v14540_v49 }
  0xf7   :  { %v14549_v24 = vsub.f32 %v14369_v56, %v243_v8  ;;  %v14553_v58 = vsub.f32 %v14371_v57, %v244_v54  ;;  %v389_v59 = vsel %vm117_vm0, %v305_v52, 0.0  ;;  %v392_v56 = vsel %vm117_vm0, %v306_v60, 0.0 }
  0xf8   :  { %381 = vadd.xlane.f32.xlu1 %v380_v39  ;;  %384 = vadd.xlane.f32.xlu0 %v383_v37 }
  0xf9   :  { %v307_v61 = vmul.f32 %v14549_v24, %v14549_v24  ;;  %v308_v62 = vmul.f32 %v14553_v58, %v14553_v58 }
  0xfb   :  { %v395_v40 = vsel %vm117_vm0, %v307_v61, 0.0  ;;  %v398_v57 = vsel %vm117_vm0, %v308_v62, 0.0 }
  0xfc   :  { %387 = vadd.xlane.f32.xlu1 %v386_v53  ;;  %390 = vadd.xlane.f32.xlu0 %v389_v59 }
 0x100   :  { %393 = vadd.xlane.f32.xlu1 %v392_v56  ;;  %396 = vadd.xlane.f32.xlu0 %v395_v40  ;;  %v14579_v56 = vld [vmem:[%s18924_s6] ss:$0 sm:$0xff] }
 0x104   :  { %399 = vadd.xlane.f32.xlu1 %v398_v57 }
 0x14d   :  { %v313_v6 = vpop.xlane.xlu0 %312 }
 0x14e   :  { %v407_v28 = vmul.f32 0.03125, %v313_v6 }
 0x150   :  { %v439_v10 = vadd.f32 1e-05, %v407_v28 }
 0x151   :  { %v316_v11 = vpop.xlane.xlu1 %315  ;;  %v319_v14 = vpop.xlane.xlu0 %318 }
 0x152   :  { %13485 = vrsqrt.f32 %v439_v10  ;;  %v408_v15 = vmul.f32 0.03125, %v316_v11  ;;  %v409_v0 = vmul.f32 0.03125, %v319_v14  ;;  %v14586_v10 = vld [vmem:[%s18925_s7] ss:$0 sm:$0xff] }
 0x154   :  { %v440_v44 = vadd.f32 1e-05, %v408_v15  ;;  %v441_v22 = vadd.f32 1e-05, %v409_v0 }
 0x155   :  { %v322_v32 = vpop.xlane.xlu1 %321  ;;  %v210_v23 = vpop.xlane.xlu0 %209 }
 0x156   :  { %13487 = vrsqrt.f32 %v440_v44  ;;  %v410_v27 = vmul.f32 0.03125, %v322_v32  ;;  %v245_v30 = vmul.f32 0.03125, %v210_v23 }
 0x157   :  { %13489 = vrsqrt.f32 %v441_v22 }
 0x158   :  { %v442_v2 = vadd.f32 1e-05, %v410_v27  ;;  %v14566_v5 = vsub.f32 %v14397_v31, %v245_v30 }
 0x159   :  { %v213_v48 = vpop.xlane.xlu1 %212  ;;  %v325_v39 = vpop.xlane.xlu0 %324 }
 0x15a   :  { %13491 = vrsqrt.f32 %v442_v2  ;;  %v246_v42 = vmul.f32 0.03125, %v213_v48  ;;  %v411_v36 = vmul.f32 0.03125, %v325_v39  ;;  %v309_v43 = vmul.f32 %v14566_v5, %v14566_v5 }
 0x15c   :  { %v14571_v37 = vsub.f32 %v14411_v50, %v246_v42  ;;  %v443_v8 = vadd.f32 1e-05, %v411_v36  ;;  %v401_v54 = vsel %vm117_vm0, %v309_v43, 0.0 }
 0x15d   :  { %v328_v52 = vpop.xlane.xlu1 %327  ;;  %402 = vadd.xlane.f32.xlu0 %v401_v54  ;;  %v331_v53 = vpop.xlane.xlu0 %330 }
 0x15e   :  { %13493 = vrsqrt.f32 %v443_v8  ;;  %v412_v31 = vmul.f32 0.03125, %v328_v52  ;;  %v413_v59 = vmul.f32 0.03125, %v331_v53  ;;  %v310_v60 = vmul.f32 %v14571_v37, %v14571_v37 }
 0x15f   :  { %v13486_v61 = vpop.eup %13485 }
 0x160   :  { %v444_v50 = vadd.f32 1e-05, %v412_v31  ;;  %v445_v40 = vadd.f32 1e-05, %v413_v59  ;;  %v404_v62 = vsel %vm117_vm0, %v310_v60, 0.0  ;;  %v503_v57 = vmul.f32 %v13486_v61, %v14378_v3 }
 0x161   :  { %405 = vadd.xlane.f32.xlu1 %v404_v62  ;;  %v334_v6 = vpop.xlane.xlu1 %333  ;;  %v337_v28 = vpop.xlane.xlu0 %336 }
 0x162   :  { %13495 = vrsqrt.f32 %v444_v50  ;;  %v414_v11 = vmul.f32 0.03125, %v334_v6  ;;  %v415_v14 = vmul.f32 0.03125, %v337_v28  ;;  %v542_v15 = vmul.f32 %v14579_v56, %v503_v57 }
 0x163   :  { %v13488_v0 = vpop.eup %13487  ;;  %13497 = vrsqrt.f32 %v445_v40 }
 0x164   :  { %v13490_v44 = vpop.eup %13489  ;;  %v446_v22 = vadd.f32 1e-05, %v414_v11  ;;  %v447_v32 = vadd.f32 1e-05, %v415_v14  ;;  %v581_v3 = vadd.f32 %v14586_v10, %v542_v15  ;;  %v504_v23 = vmul.f32 %v13488_v0, %v14388_v18 }
 0x165   :  { %v340_v27 = vpop.xlane.xlu1 %339  ;;  %v343_v30 = vpop.xlane.xlu0 %342  ;;  %v505_v2 = vmul.f32 %v13490_v44, %v14381_v4 }
 0x166   :  { %13499 = vrsqrt.f32 %v446_v22  ;;  %v416_v48 = vmul.f32 0.03125, %v340_v27  ;;  %v417_v39 = vmul.f32 0.03125, %v343_v30  ;;  %12315 = vmatprep.mubr.msk.f32.mxu0 %vm117_vm0, %v581_v3  ;;  %v543_v42 = vmul.f32 %v14579_v56, %v504_v23 }
 0x167   :  { %v13492_v36 = vpop.eup %13491  ;;  %13501 = vrsqrt.f32 %v447_v32  ;;  %v544_v43 = vmul.f32 %v14579_v56, %v505_v2 }
 0x168   :  { %v448_v8 = vadd.f32 1e-05, %v416_v48  ;;  %v449_v54 = vadd.f32 1e-05, %v417_v39  ;;  %v582_v52 = vadd.f32 %v14586_v10, %v543_v42  ;;  %v506_v18 = vmul.f32 %v13492_v36, %v14391_v19 }
 0x169   :  { %v346_v53 = vpop.xlane.xlu1 %345  ;;  %v355_v31 = vpop.xlane.xlu0 %354  ;;  %v583_v4 = vadd.f32 %v14586_v10, %v544_v43 }
 0x16a   :  { %13503 = vrsqrt.f32 %v448_v8  ;;  %v418_v59 = vmul.f32 0.03125, %v346_v53  ;;  %v421_v60 = vmul.f32 0.03125, %v355_v31  ;;  %12316 = vmatmul.mubr.msk.f32.vlgmr.msra.gmra.mxu0 %vm117_vm0, %v582_v52  ;;  %v545_v61 = vmul.f32 %v14579_v56, %v506_v18 }
 0x16b   :  { %v13494_v50 = vpop.eup %13493  ;;  %13505 = vrsqrt.f32 %v449_v54  ;;  %12318 = vmatprep.mubr.msk.f32.mxu0 %vm117_vm0, %v583_v4 }
 0x16c   :  { %v450_v40 = vadd.f32 1e-05, %v418_v59  ;;  %v453_v62 = vadd.f32 1e-05, %v421_v60  ;;  %v584_v57 = vadd.f32 %v14586_v10, %v545_v61  ;;  %v507_v19 = vmul.f32 %v13494_v50, %v14403_v34 }
 0x16d   :  { %v358_v6 = vpop.xlane.xlu1 %357  ;;  %v361_v28 = vpop.xlane.xlu0 %360 }
 0x16e   :  { %13507 = vrsqrt.f32 %v450_v40  ;;  %v422_v11 = vmul.f32 0.03125, %v358_v6  ;;  %v423_v14 = vmul.f32 0.03125, %v361_v28  ;;  %12319 = vmatmul.mubr.msk.f32.gmra.mxu0 %vm117_vm0, %v584_v57  ;;  %v546_v15 = vmul.f32 %v14579_v56, %v507_v19 }
 0x16f   :  { %v13496_v0 = vpop.eup %13495  ;;  %13509 = vrsqrt.f32 %v453_v62 }
 0x170   :  { %v13498_v44 = vpop.eup %13497  ;;  %v454_v22 = vadd.f32 1e-05, %v422_v11  ;;  %v455_v32 = vadd.f32 1e-05, %v423_v14  ;;  %v585_v3 = vadd.f32 %v14586_v10, %v546_v15  ;;  %v508_v23 = vmul.f32 %v13496_v0, %v14406_v35 }
 0x171   :  { %v364_v27 = vpop.xlane.xlu1 %363  ;;  %v349_v34 = vpop.xlane.xlu0 %348  ;;  %v509_v30 = vmul.f32 %v13498_v44, %v14416_v51 }
 0x172   :  { %13511 = vrsqrt.f32 %v454_v22  ;;  %v424_v2 = vmul.f32 0.03125, %v364_v27  ;;  %v419_v48 = vmul.f32 0.03125, %v349_v34  ;;  %12321 = vmatprep.mubr.msk.f32.mxu0 %vm117_vm0, %v585_v3  ;;  %v547_v39 = vmul.f32 %v14579_v56, %v508_v23 }
 0x173   :  { %v13500_v42 = vpop.eup %13499  ;;  %13513 = vrsqrt.f32 %v455_v32  ;;  %v548_v36 = vmul.f32 %v14579_v56, %v509_v30 }
 0x174   :  { %v13502_v43 = vpop.eup %13501  ;;  %v456_v8 = vadd.f32 1e-05, %v424_v2  ;;  %v451_v54 = vadd.f32 1e-05, %v419_v48  ;;  %v586_v35 = vadd.f32 %v14586_v10, %v547_v39  ;;  %v510_v52 = vmul.f32 %v13500_v42, %v14419_v9 }
 0x175   :  { %v367_v18 = vpop.xlane.xlu1 %366  ;;  %v352_v51 = vpop.xlane.xlu0 %351  ;;  %v587_v53 = vadd.f32 %v14586_v10, %v548_v36  ;;  %v511_v31 = vmul.f32 %v13502_v43, %v14429_v63 }
 0x176   :  { %13515 = vrsqrt.f32 %v456_v8  ;;  %v425_v4 = vmul.f32 0.03125, %v367_v18  ;;  %v420_v59 = vmul.f32 0.03125, %v352_v51  ;;  %12322 = vmatmul.mubr.msk.f32.gmra.mxu0 %vm117_vm0, %v586_v35  ;;  %v549_v60 = vmul.f32 %v14579_v56, %v510_v52 }
 0x177   :  { %v13504_v61 = vpop.eup %13503  ;;  %13517 = vrsqrt.f32 %v451_v54  ;;  %12324 = vmatprep.mubr.msk.f32.mxu0 %vm117_vm0, %v587_v53  ;;  %v550_v50 = vmul.f32 %v14579_v56, %v511_v31 }
 0x178   :  { %v13506_v9 = vpop.eup %13505  ;;  %v457_v40 = vadd.f32 1e-05, %v425_v4  ;;  %v452_v62 = vadd.f32 1e-05, %v420_v59  ;;  %v588_v57 = vadd.f32 %v14586_v10, %v549_v60  ;;  %v512_v63 = vmul.f32 %v13504_v61, %v14432_v13 }
 0x179   :  { %v370_v19 = vpop.xlane.xlu1 %369  ;;  %v373_v6 = vpop.xlane.xlu0 %372  ;;  %v589_v28 = vadd.f32 %v14586_v10, %v550_v50  ;;  %v513_v11 = vmul.f32 %v13506_v9, %v14441_v1 }
 0x17a   :  { %13519 = vrsqrt.f32 %v457_v40  ;;  %v426_v14 = vmul.f32 0.03125, %v370_v19  ;;  %v427_v15 = vmul.f32 0.03125, %v373_v6  ;;  %12325 = vmatmul.mubr.msk.f32.gmra.mxu0 %vm117_vm0, %v588_v57  ;;  %v551_v0 = vmul.f32 %v14579_v56, %v512_v63 }
 0x17b   :  { %v13508_v44 = vpop.eup %13507  ;;  %13521 = vrsqrt.f32 %v452_v62  ;;  %12327 = vmatprep.mubr.msk.f32.mxu0 %vm117_vm0, %v589_v28  ;;  %v552_v22 = vmul.f32 %v14579_v56, %v513_v11 }
 0x17c   :  { %v13510_v13 = vpop.eup %13509  ;;  %v458_v32 = vadd.f32 1e-05, %v426_v14  ;;  %v459_v3 = vadd.f32 1e-05, %v427_v15  ;;  %v590_v23 = vadd.f32 %v14586_v10, %v551_v0  ;;  %v514_v1 = vmul.f32 %v13508_v44, %v14444_v17 }
 0x17d   :  { %v376_v27 = vpop.xlane.xlu1 %375  ;;  %v379_v34 = vpop.xlane.xlu0 %378  ;;  %v591_v30 = vadd.f32 %v14586_v10, %v552_v22  ;;  %v517_v2 = vmul.f32 %v13510_v13, %v14453_v38 }
 0x17e   :  { %13523 = vrsqrt.f32 %v458_v32  ;;  %v428_v48 = vmul.f32 0.03125, %v376_v27  ;;  %v429_v39 = vmul.f32 0.03125, %v379_v34  ;;  %12328 = vmatmul.mubr.msk.f32.gmra.mxu0 %vm117_vm0, %v590_v23  ;;  %v553_v42 = vmul.f32 %v14579_v56, %v514_v1 }
 0x17f   :  { %v13512_v36 = vpop.eup %13511  ;;  %13525 = vrsqrt.f32 %v459_v3  ;;  %12330 = vmatprep.mubr.msk.f32.mxu0 %vm117_vm0, %v591_v30  ;;  %v556_v43 = vmul.f32 %v14579_v56, %v517_v2 }
 0x180   :  { %v13514_v17 = vpop.eup %13513  ;;  %v460_v8 = vadd.f32 1e-05, %v428_v48  ;;  %v461_v54 = vadd.f32 1e-05, %v429_v39  ;;  %v592_v35 = vadd.f32 %v14586_v10, %v553_v42  ;;  %v518_v38 = vmul.f32 %v13512_v36, %v14456_v21 }
 0x181   :  { %v382_v52 = vpop.xlane.xlu1 %381  ;;  %v385_v18 = vpop.xlane.xlu0 %384  ;;  %v595_v51 = vadd.f32 %v14586_v10, %v556_v43  ;;  %v519_v53 = vmul.f32 %v13514_v17, %v14465_v55 }
 0x182   :  { %13527 = vrsqrt.f32 %v460_v8  ;;  %v430_v31 = vmul.f32 0.03125, %v382_v52  ;;  %v431_v4 = vmul.f32 0.03125, %v385_v18  ;;  %12331 = vmatmul.mubr.msk.f32.gmra.mxu0 %vm117_vm0, %v592_v35  ;;  %v557_v59 = vmul.f32 %v14579_v56, %v518_v38 }
 0x183   :  { %v13516_v60 = vpop.eup %13515  ;;  %13529 = vrsqrt.f32 %v461_v54  ;;  %12336 = vmatprep.mubr.msk.f32.mxu1 %vm117_vm0, %v595_v51  ;;  %v558_v61 = vmul.f32 %v14579_v56, %v519_v53 }
 0x184   :  { %v13518_v21 = vpop.eup %13517  ;;  %v462_v50 = vadd.f32 1e-05, %v430_v31  ;;  %v463_v9 = vadd.f32 1e-05, %v431_v4  ;;  %v596_v40 = vadd.f32 %v14586_v10, %v557_v59  ;;  %v520_v55 = vmul.f32 %v13516_v60, %v14468_v25 }
 0x185   :  { %v388_v62 = vpop.xlane.xlu1 %387  ;;  %v391_v57 = vpop.xlane.xlu0 %390  ;;  %v597_v63 = vadd.f32 %v14586_v10, %v558_v61  ;;  %v515_v19 = vmul.f32 %v13518_v21, %v14477_v7 }
 0x186   :  { %13531 = vrsqrt.f32 %v462_v50  ;;  %v432_v6 = vmul.f32 0.03125, %v388_v62  ;;  %v433_v28 = vmul.f32 0.03125, %v391_v57  ;;  %12337 = vmatmul.mubr.msk.f32.vlgmr.msra.gmra.mxu1 %vm117_vm0, %v596_v40  ;;  %v559_v11 = vmul.f32 %v14579_v56, %v520_v55 }
 0x187   :  { %v13520_v14 = vpop.eup %13519  ;;  %13533 = vrsqrt.f32 %v463_v9  ;;  %12339 = vmatprep.mubr.msk.f32.mxu1 %vm117_vm0, %v597_v63  ;;  %v554_v15 = vmul.f32 %v14579_v56, %v515_v19 }
 0x188   :  { %v13522_v25 = vpop.eup %13521  ;;  %v464_v0 = vadd.f32 1e-05, %v432_v6  ;;  %v465_v44 = vadd.f32 1e-05, %v433_v28  ;;  %v598_v22 = vadd.f32 %v14586_v10, %v559_v11  ;;  %v521_v7 = vmul.f32 %v13520_v14, %v14480_v29 }
 0x189   :  { %v394_v13 = vpop.xlane.xlu1 %393  ;;  %v397_v32 = vpop.xlane.xlu0 %396  ;;  %v593_v3 = vadd.f32 %v14586_v10, %v554_v15  ;;  %v516_v23 = vmul.f32 %v13522_v25, %v14489_v26 }
 0x18a   :  { %13535 = vrsqrt.f32 %v464_v0  ;;  %v434_v1 = vmul.f32 0.03125, %v394_v13  ;;  %v435_v27 = vmul.f32 0.03125, %v397_v32  ;;  %12340 = vmatmul.mubr.msk.f32.gmra.mxu1 %vm117_vm0, %v598_v22  ;;  %v560_v34 = vmul.f32 %v14579_v56, %v521_v7 }
 0x18b   :  { %v13524_v30 = vpop.eup %13523  ;;  %13537 = vrsqrt.f32 %v465_v44  ;;  %12333 = vmatprep.mubr.msk.f32.mxu0 %vm117_vm0, %v593_v3  ;;  %v555_v2 = vmul.f32 %v14579_v56, %v516_v23 }
 0x18c   :  { %v13526_v29 = vpop.eup %13525  ;;  %v466_v48 = vadd.f32 1e-05, %v434_v1  ;;  %v467_v39 = vadd.f32 1e-05, %v435_v27  ;;  %v599_v42 = vadd.f32 %v14586_v10, %v560_v34  ;;  %v522_v26 = vmul.f32 %v13524_v30, %v14492_v33 }
 0x18d   :  { %v400_v36 = vpop.xlane.xlu1 %399  ;;  %v594_v43 = vadd.f32 %v14586_v10, %v555_v2  ;;  %v523_v17 = vmul.f32 %v13526_v29, %v14501_v46 }
 0x18e   :  { %13539 = vrsqrt.f32 %v466_v48  ;;  %v436_v8 = vmul.f32 0.03125, %v400_v36  ;;  %12342 = vmatprep.mubr.msk.f32.mxu1 %vm117_vm0, %v599_v42  ;;  %v561_v54 = vmul.f32 %v14579_v56, %v522_v26 }
 0x18f   :  { %v13528_v35 = vpop.eup %13527  ;;  %13541 = vrsqrt.f32 %v467_v39  ;;  %12334 = vmatmul.mubr.msk.f32.gmra.mxu0 %vm117_vm0, %v594_v43  ;;  %v562_v38 = vmul.f32 %v14579_v56, %v523_v17 }
 0x190   :  { %v13530_v52 = vpop.eup %13529  ;;  %v468_v18 = vadd.f32 1e-05, %v436_v8  ;;  %v600_v33 = vadd.f32 %v14586_v10, %v561_v54  ;;  %v524_v51 = vmul.f32 %v13528_v35, %v14504_v47 }
 0x191   :  { %v601_v46 = vadd.f32 %v14586_v10, %v562_v38  ;;  %v525_v53 = vmul.f32 %v13530_v52, %v14513_v41 }
 0x192   :  { %13543 = vrsqrt.f32 %v468_v18  ;;  %12343 = vmatmul.mubr.msk.f32.gmra.mxu1 %vm117_vm0, %v600_v33  ;;  %v563_v31 = vmul.f32 %v14579_v56, %v524_v51 }
 0x193   :  { %v13532_v4 = vpop.eup %13531  ;;  %12345 = vmatprep.mubr.msk.f32.mxu1 %vm117_vm0, %v601_v46  ;;  %v564_v59 = vmul.f32 %v14579_v56, %v525_v53 }
 0x194   :  { %v13534_v60 = vpop.eup %13533  ;;  %v602_v61 = vadd.f32 %v14586_v10, %v563_v31  ;;  %v526_v21 = vmul.f32 %v13532_v4, %v14516_v12 }
 0x195   :  { %v603_v47 = vadd.f32 %v14586_v10, %v564_v59  ;;  %v527_v50 = vmul.f32 %v13534_v60, %v14525_v16 }
 0x196   :  { %12346 = vmatmul.mubr.msk.f32.gmra.mxu1 %vm117_vm0, %v602_v61  ;;  %v565_v41 = vmul.f32 %v14579_v56, %v526_v21 }
 0x197   :  { %v13536_v9 = vpop.eup %13535  ;;  %12348 = vmatprep.mubr.msk.f32.mxu1 %vm117_vm0, %v603_v47  ;;  %v566_v40 = vmul.f32 %v14579_v56, %v527_v50 }
 0x198   :  { %v13538_v55 = vpop.eup %13537  ;;  %v604_v62 = vadd.f32 %v14586_v10, %v565_v41  ;;  %v528_v57 = vmul.f32 %v13536_v9, %v14528_v45 }
 0x199   :  { %v605_v12 = vadd.f32 %v14586_v10, %v566_v40  ;;  %v529_v63 = vmul.f32 %v13538_v55, %v14537_v20 }
 0x19a   :  { %12349 = vmatmul.mubr.msk.f32.gmra.mxu1 %vm117_vm0, %v604_v62  ;;  %v567_v16 = vmul.f32 %v14579_v56, %v528_v57 }
 0x19b   :  { %v13540_v19 = vpop.eup %13539  ;;  %12351 = vmatprep.mubr.msk.f32.mxu1 %vm117_vm0, %v605_v12  ;;  %v568_v6 = vmul.f32 %v14579_v56, %v529_v63 }
 0x19c   :  { %v13542_v28 = vpop.eup %13541  ;;  %v606_v11 = vadd.f32 %v14586_v10, %v567_v16  ;;  %v530_v14 = vmul.f32 %v13540_v19, %v14540_v49 }
 0x19d   :  { %v607_v45 = vadd.f32 %v14586_v10, %v568_v6  ;;  %v531_v15 = vmul.f32 %v13542_v28, %v14549_v24 }
 0x19e   :  { %12352 = vmatmul.mubr.msk.f32.gmra.mxu1 %vm117_vm0, %v606_v11  ;;  %v569_v20 = vmul.f32 %v14579_v56, %v530_v14 }
 0x19f   :  { %v13544_v25 = vpop.eup %13543  ;;  %12354 = vmatprep.mubr.msk.f32.mxu1 %vm117_vm0, %v607_v45  ;;  %v570_v0 = vmul.f32 %v14579_v56, %v531_v15 }
 0x1a0   :  { %v608_v44 = vadd.f32 %v14586_v10, %v569_v20  ;;  %v532_v22 = vmul.f32 %v13544_v25, %v14553_v58 }
 0x1a1   :  { %v609_v7 = vadd.f32 %v14586_v10, %v570_v0 }
 0x1a2   :  { %12355 = vmatmul.mubr.msk.f32.gmra.mxu1 %vm117_vm0, %v608_v44  ;;  %v571_v49 = vmul.f32 %v14579_v56, %v532_v22 }
 0x1a3   :  { %12357 = vmatprep.mubr.msk.f32.mxu1 %vm117_vm0, %v609_v7 }
 0x1a4   :  { %v610_v24 = vadd.f32 %v14586_v10, %v571_v49 }
 0x1a6   :  { %12358 = vmatmul.mubr.msk.f32.gmra.mxu1 %vm117_vm0, %v610_v24 }
 0x1e6   :  { %v403_v13 = vpop.xlane.xlu0 %402 }
 0x1e7   :  { %v437_v32 = vmul.f32 0.03125, %v403_v13 }
 0x1e9   :  { %v469_v3 = vadd.f32 1e-05, %v437_v32 }
 0x1ea   :  { %v406_v23 = vpop.xlane.xlu1 %405 }
 0x1eb   :  { %13545 = vrsqrt.f32 %v469_v3  ;;  %v438_v1 = vmul.f32 0.03125, %v406_v23 }
 0x1ed   :  { %v470_v27 = vadd.f32 1e-05, %v438_v1 }
 0x1ef   :  { %13547 = vrsqrt.f32 %v470_v27 }
 0x1f8   :  { %v13546_v58 = vpop.eup %13545 }
 0x1f9   :  { %v533_v34 = vmul.f32 %v13546_v58, %v14566_v5  ;;  %v14718_v5 = vld [vmem:[%s18920_s2] ss:$0 sm:$0xff]  ;;  %s14177_s2 = smov 64  }
 0x1fb   :  { %v572_v30 = vmul.f32 %v14579_v56, %v533_v34 }
 0x1fc   :  { %v13548_v2 = vpop.eup %13547 }
 0x1fd   :  { %v611_v29 = vadd.f32 %v14586_v10, %v572_v30  ;;  %v534_v48 = vmul.f32 %v13548_v2, %v14571_v37 }
 0x1ff   :  { %12360 = vmatprep.mubr.msk.f32.mxu1 %vm117_vm0, %v611_v29  ;;  %v573_v39 = vmul.f32 %v14579_v56, %v534_v48 }
 0x201   :  { %v612_v42 = vadd.f32 %v14586_v10, %v573_v39 }
 0x203   :  { %12361 = vmatmul.mubr.msk.f32.gmra.mxu1 %vm117_vm0, %v612_v42 }
 0x22a   :  { %v12317_v26 = vpop.f32.mrf.mxu0 }
 0x22b   :  { %v14739_v54 = vadd.f32 %v12317_v26, %v14718_v5 }
 0x22c   :  { %v786_v36 = vpop.f32.mrf.mxu0 }
 0x22d   :  { %v14721_v43 = vadd.f32 %v14718_v5, %v786_v36  ;;  %19157 = vst [vmem:[#allocation19_spill] sm:$0xff] %v14739_v54 }
 0x22e   :  { %v12320_v17 = vpop.f32.mrf.mxu0 }
 0x22f   :  { %19153 = vst [vmem:[#allocation15_spill] sm:$0xff] %v14721_v43  ;;  %v14724_v37 = vadd.f32 %v12320_v17, %v14718_v5  ;;  %v14727_v56 = vmul.f32 0.35355338, %v14721_v43 }
 0x230   :  { %v796_v10 = vpop.f32.mrf.mxu0 }
 0x231   :  { %19154 = vst [vmem:[#allocation16_spill] sm:$0xff] %v14724_v37  ;;  %19155 = vst [vmem:[#allocation17_spill] sm:$0xff] %v14727_v56  ;;  %v14730_v8 = vadd.f32 %v14718_v5, %v796_v10  ;;  %991 = vrot.lane.b32.xlu0 %v14724_v37, %s14176_s27  ;;  %12371 = vmatprep.mubr.msk.f32.mxu1 %vm993_vm1, %v14727_v56  ;;  %v14915_v10 = vmul.f32 0.35355338, %v14739_v54 }
 0x233   :  { %19156 = vst [vmem:[#allocation18_spill] sm:$0xff] %v14730_v8  ;;  %989 = vrot.lane.b32.xlu1 %v14730_v8, %s14176_s27  ;;  %19184 = vst [vmem:[#allocation46_spill] sm:$0xff] %v14915_v10 }
 0x236   :  { %v12323_v35 = vpop.f32.mrf.mxu0 }
 0x237   :  { %987 = vrot.lane.b32.xlu1 %v14739_v54, %s14176_s27  ;;  %v14754_v53 = vadd.f32 %v12323_v35, %v14718_v5 }
 0x238   :  { %v806_v38 = vpop.f32.mrf.mxu0 }
 0x239   :  { %19160 = vst [vmem:[#allocation22_spill] sm:$0xff] %v14754_v53  ;;  %v14759_v4 = vadd.f32 %v14718_v5, %v806_v38  ;;  %v14918_v38 = vmul.f32 0.35355338, %v14730_v8 }
 0x23a   :  { %v12326_v52 = vpop.f32.mrf.mxu0 }
 0x23b   :  { %v14744_v18 = vadd.f32 %v12326_v52, %v14718_v5  ;;  %985 = vrot.lane.b32.xlu1 %v14721_v43, %s14176_s27  ;;  %19161 = vst [vmem:[#allocation23_spill] sm:$0xff] %v14759_v4  ;;  %19185 = vst [vmem:[#allocation47_spill] sm:$0xff] %v14918_v38 }
 0x23c   :  { %v816_v33 = vpop.f32.mrf.mxu0 }
 0x23d   :  { %19158 = vst [vmem:[#allocation20_spill] sm:$0xff] %v14744_v18  ;;  %v14749_v51 = vadd.f32 %v14718_v5, %v816_v33  ;;  %1109 = vrot.lane.b32.xlu0 %v14744_v18, %s14176_s27  ;;  %v14927_v33 = vmul.f32 0.35355338, %v14724_v37 }
 0x23e   :  { %v12329_v46 = vpop.f32.mrf.mxu0 }
 0x23f   :  { %19159 = vst [vmem:[#allocation21_spill] sm:$0xff] %v14749_v51  ;;  %1107 = vrot.lane.b32.xlu1 %v14749_v51, %s14176_s27  ;;  %v14774_v50 = vadd.f32 %v12329_v46, %v14718_v5  ;;  %19186 = vst [vmem:[#allocation48_spill] sm:$0xff] %v14927_v33 }
 0x240   :  { %v826_v31 = vpop.f32.mrf.mxu0 }
 0x241   :  { %1105 = vrot.lane.b32.xlu0 %v14754_v53, %s14176_s27  ;;  %19164 = vst [vmem:[#allocation26_spill] sm:$0xff] %v14774_v50  ;;  %v14779_v9 = vadd.f32 %v14718_v5, %v826_v31  ;;  %v14930_v31 = vmul.f32 0.35355338, %v14759_v4 }
 0x242   :  { %v12332_v59 = vpop.f32.mrf.mxu0 }
 0x243   :  { %v14764_v60 = vadd.f32 %v12332_v59, %v14718_v5  ;;  %1103 = vrot.lane.b32.xlu1 %v14759_v4, %s14176_s27  ;;  %19165 = vst [vmem:[#allocation27_spill] sm:$0xff] %v14779_v9  ;;  %19187 = vst [vmem:[#allocation49_spill] sm:$0xff] %v14930_v31 }
 0x244   :  { %v836_v61 = vpop.f32.mrf.mxu0 }
 0x245   :  { %19162 = vst [vmem:[#allocation24_spill] sm:$0xff] %v14764_v60  ;;  %v14769_v21 = vadd.f32 %v14718_v5, %v836_v61  ;;  %1226 = vrot.lane.b32.xlu0 %v14764_v60, %s14176_s27 }
 0x246   :  { %v12338_v47 = vpop.f32.mrf.mxu1 }
 0x247   :  { %19163 = vst [vmem:[#allocation25_spill] sm:$0xff] %v14769_v21  ;;  %1224 = vrot.lane.b32.xlu1 %v14769_v21, %s14176_s27  ;;  %v14784_v55 = vadd.f32 %v12338_v47, %v14718_v5 }
 0x248   :  { %v856_v41 = vpop.f32.mrf.mxu1 }
 0x249   :  { %1222 = vrot.lane.b32.xlu0 %v14774_v50, %s14176_s27  ;;  %19166 = vst [vmem:[#allocation28_spill] sm:$0xff] %v14784_v55  ;;  %v14789_v57 = vadd.f32 %v14718_v5, %v856_v41 }
 0x24a   :  { %v12341_v40 = vpop.f32.mrf.mxu1 }
 0x24b   :  { %1220 = vrot.lane.b32.xlu1 %v14779_v9, %s14176_s27  ;;  %19167 = vst [vmem:[#allocation29_spill] sm:$0xff] %v14789_v57  ;;  %v14822_v25 = vadd.f32 %v12341_v40, %v14718_v5 }
 0x24c   :  { %v866_v62 = vpop.f32.mrf.mxu1 }
 0x24d   :  { %v14792_v12 = vadd.f32 %v14718_v5, %v866_v62  ;;  %1343 = vrot.lane.b32.xlu0 %v14784_v55, %s14176_s27  ;;  %19174 = vst [vmem:[#allocation36_spill] sm:$0xff] %v14822_v25  ;;  %v14943_v62 = vmul.f32 0.35355338, %v14754_v53 }
 0x24f   :  { %19168 = vst [vmem:[#allocation30_spill] sm:$0xff] %v14792_v12  ;;  %v12335_v63 = vpop.f32.mrf.mxu0  ;;  %1341 = vrot.lane.b32.xlu1 %v14789_v57, %s14176_s27  ;;  %v14799_v16 = vmul.f32 0.35355338, %v14792_v12  ;;  %19188 = vst [vmem:[#allocation50_spill] sm:$0xff] %v14943_v62 }
 0x250   :  { %v14802_v19 = vadd.f32 %v12335_v63, %v14718_v5 }
 0x251   :  { %19169 = vst [vmem:[#allocation31_spill] sm:$0xff] %v14799_v16  ;;  %v846_v6 = vpop.f32.mrf.mxu0  ;;  %12427 = vmatprep.mubr.msk.f32.mxu0 %vm993_vm1, %v14799_v16 }
 0x252   :  { %19170 = vst [vmem:[#allocation32_spill] sm:$0xff] %v14802_v19  ;;  %1339 = vrot.lane.b32.xlu0 %v14802_v19, %s14176_s27  ;;  %v12344_v28 = vpop.f32.mrf.mxu1  ;;  %v14812_v14 = vadd.f32 %v14718_v5, %v846_v6 }
 0x253   :  { %v14809_v11 = vadd.f32 %v12344_v28, %v14718_v5  ;;  %v14948_v28 = vmul.f32 0.35355338, %v14749_v51 }
 0x254   :  { %19172 = vst [vmem:[#allocation34_spill] sm:$0xff] %v14812_v14  ;;  %v876_v45 = vpop.f32.mrf.mxu1 }
 0x255   :  { %19171 = vst [vmem:[#allocation33_spill] sm:$0xff] %v14809_v11  ;;  %1460 = vrot.lane.b32.xlu1 %v14809_v11, %s14176_s27  ;;  %v14819_v20 = vadd.f32 %v14718_v5, %v876_v45  ;;  %19189 = vst [vmem:[#allocation51_spill] sm:$0xff] %v14948_v28 }
 0x256   :  { %1337 = vrot.lane.b32.xlu0 %v14812_v14, %s14176_s27  ;;  %v12347_v15 = vpop.f32.mrf.mxu1 }
 0x257   :  { %19173 = vst [vmem:[#allocation35_spill] sm:$0xff] %v14819_v20  ;;  %v14839_v13 = vadd.f32 %v12347_v15, %v14718_v5 }
 0x258   :  { %v886_v0 = vpop.f32.mrf.mxu1 }
 0x259   :  { %1458 = vrot.lane.b32.xlu1 %v14819_v20, %s14176_s27  ;;  %19177 = vst [vmem:[#allocation39_spill] sm:$0xff] %v14839_v13  ;;  %v14849_v1 = vadd.f32 %v14718_v5, %v886_v0 }
 0x25a   :  { %1456 = vrot.lane.b32.xlu0 %v14822_v25, %s14176_s27  ;;  %v12350_v44 = vpop.f32.mrf.mxu1 }
 0x25b   :  { %v14829_v22 = vadd.f32 %v12350_v44, %v14718_v5  ;;  %19179 = vst [vmem:[#allocation41_spill] sm:$0xff] %v14849_v1  ;;  %v14965_v44 = vmul.f32 0.35355338, %v14744_v18 }
 0x25c   :  { %v896_v7 = vpop.f32.mrf.mxu1 }
 0x25d   :  { %19175 = vst [vmem:[#allocation37_spill] sm:$0xff] %v14829_v22  ;;  %1577 = vrot.lane.b32.xlu1 %v14829_v22, %s14176_s27  ;;  %v14836_v24 = vadd.f32 %v14718_v5, %v896_v7  ;;  %19191 = vst [vmem:[#allocation53_spill] sm:$0xff] %v14965_v44 }
 0x25e   :  { %1454 = vrot.lane.b32.xlu0 %v14792_v12, %s14176_s27  ;;  %v12353_v49 = vpop.f32.mrf.mxu1 }
 0x25f   :  { %19176 = vst [vmem:[#allocation38_spill] sm:$0xff] %v14836_v24  ;;  %v14859_v34 = vadd.f32 %v12353_v49, %v14718_v5  ;;  %v14969_v49 = vmul.f32 0.35355338, %v14779_v9 }
 0x260   :  { %v906_v32 = vpop.f32.mrf.mxu1 }
 0x261   :  { %1575 = vrot.lane.b32.xlu1 %v14836_v24, %s14176_s27  ;;  %19181 = vst [vmem:[#allocation43_spill] sm:$0xff] %v14859_v34  ;;  %v14866_v30 = vadd.f32 %v14718_v5, %v906_v32  ;;  %19192 = vst [vmem:[#allocation54_spill] sm:$0xff] %v14969_v49 }
 0x262   :  { %1573 = vrot.lane.b32.xlu0 %v14839_v13, %s14176_s27  ;;  %v12356_v3 = vpop.f32.mrf.mxu1 }
 0x263   :  { %v14846_v23 = vadd.f32 %v12356_v3, %v14718_v5  ;;  %19182 = vst [vmem:[#allocation44_spill] sm:$0xff] %v14866_v30 }
 0x264   :  { %v916_v27 = vpop.f32.mrf.mxu1 }
 0x265   :  { %19178 = vst [vmem:[#allocation40_spill] sm:$0xff] %v14846_v23  ;;  %1694 = vrot.lane.b32.xlu1 %v14846_v23, %s14176_s27  ;;  %v14856_v58 = vadd.f32 %v14718_v5, %v916_v27 }
 0x266   :  { %1571 = vrot.lane.b32.xlu0 %v14849_v1, %s14176_s27  ;;  %v12359_v2 = vpop.f32.mrf.mxu1 }
 0x267   :  { %19180 = vst [vmem:[#allocation42_spill] sm:$0xff] %v14856_v58  ;;  %v14871_v29 = vadd.f32 %v12359_v2, %v14718_v5 }
 0x268   :  { %v926_v40 = vpop.f32.mrf.mxu1 }
 0x269   :  { %1692 = vrot.lane.b32.xlu1 %v14856_v58, %s14176_s27  ;;  %19183 = vst [vmem:[#allocation45_spill] sm:$0xff] %v14871_v29 }
 0x26a   :  { %1690 = vrot.lane.b32.xlu0 %v14859_v34, %s14176_s27 }
 0x26e   :  { %1688 = vrot.lane.b32.xlu0 %v14866_v30, %s14176_s27 }
 0x272   :  { %1807 = vrot.lane.b32.xlu0 %v14871_v29, %s14176_s27 }
 0x276   :  { %2276 = vrot.lane.b32.xlu0 %v14724_v37, %s14177_s2 }
 0x27a   :  { %2272 = vrot.lane.b32.xlu0 %v14739_v54, %s14177_s2 }
 0x27e   :  { %2383 = vrot.lane.b32.xlu0 %v14749_v51, %s14177_s2 }
 0x282   :  { %2492 = vrot.lane.b32.xlu0 %v14769_v21, %s14177_s2 }
 0x286   :  { %2381 = vrot.lane.b32.xlu0 %v14754_v53, %s14177_s2 }
 0x28a   :  { %2603 = vrot.lane.b32.xlu0 %v14784_v55, %s14177_s2 }
 0x28e   :  { %2712 = vrot.lane.b32.xlu0 %v14809_v11, %s14177_s2 }
 0x292   :  { %2710 = vrot.lane.b32.xlu0 %v14819_v20, %s14177_s2 }
 0x296   :  { %2599 = vrot.lane.b32.xlu0 %v14802_v19, %s14177_s2 }
 0x29a   :  { %2708 = vrot.lane.b32.xlu0 %v14822_v25, %s14177_s2 }
 0x29e   :  { %2597 = vrot.lane.b32.xlu0 %v14812_v14, %s14177_s2 }
 0x2a2   :  { %2821 = vrot.lane.b32.xlu0 %v14829_v22, %s14177_s2 }
 0x2a3   :  { %v992_v48 = vpop.permute.xlu0 %991 }
 0x2a4   :  { %12363 = vmatprep.subr.msk.mxu1 %vm993_vm1, %v992_v48 }
 0x2a5   :  { %v990_v39 = vpop.permute.xlu1 %989  ;;  %12364 = vmatpush3.xpose.msk.msra.mxu1 %vm993_vm1, %v992_v48  ;;  %v14990_v48 = vadd.f32 %v14718_v5, %v926_v40  ;;  %v15059_v40 = vmul.f32 0.35355338, %v14809_v11 }
 0x2a6   :  { %2819 = vrot.lane.b32.xlu0 %v14836_v24, %s14177_s2  ;;  %12365 = vmatprep.subr.msk.mxu1 %vm993_vm1, %v990_v39 }
 0x2a7   :  { %19194 = vst [vmem:[#allocation56_spill] sm:$0xff] %v14990_v48  ;;  %19201 = vst [vmem:[#allocation63_spill] sm:$0xff] %v15059_v40 }
 0x2a9   :  { %v988_v42 = vpop.permute.xlu1 %987  ;;  %12366 = vmatpush3.xpose.msk.msra.mxu1 %vm993_vm1, %v990_v39 }
 0x2aa   :  { %2817 = vrot.lane.b32.xlu0 %v14839_v13, %s14177_s2  ;;  %12367 = vmatprep.subr.msk.mxu1 %vm993_vm1, %v988_v42 }
 0x2ad   :  { %v986_v26 = vpop.permute.xlu1 %985  ;;  %12368 = vmatpush3.xpose.msk.msra.mxu1 %vm993_vm1, %v988_v42 }
 0x2ae   :  { %2815 = vrot.lane.b32.xlu0 %v14849_v1, %s14177_s2  ;;  %12369 = vmatprep.subr.msk.mxu1 %vm993_vm1, %v986_v26 }
 0x2af   :  { %v1110_v36 = vpop.permute.xlu0 %1109 }
 0x2b1   :  { %v1108_v17 = vpop.permute.xlu1 %1107  ;;  %12370 = vmatpush3.xpose.msk.msra.mxu1 %vm993_vm1, %v986_v26 }
 0x2b2   :  { %12377 = vmatprep.subr.msk.mxu1 %vm993_vm1, %v1110_v36 }
 0x2b3   :  { %v1106_v35 = vpop.permute.xlu0 %1105 }
 0x2b4   :  { %12372 = vmatmul.mubr.msk.f32.vlgmr.msra.gmra.mxu1 %vm993_vm1, %v14915_v10 }
 0x2b5   :  { %v1104_v52 = vpop.permute.xlu1 %1103  ;;  %12374 = vmatprep.mubr.msk.f32.mxu1 %vm993_vm1, %v14918_v38  ;;  %12378 = vmatpush3.xpose.msk.msra.mxu1 %vm993_vm1, %v1110_v36  ;;  %v15013_v36 = vmul.f32 0.35355338, %v14769_v21 }
 0x2b6   :  { %12379 = vmatprep.subr.msk.mxu1 %vm993_vm1, %v1108_v17 }
 0x2b7   :  { %v1227_v46 = vpop.permute.xlu0 %1226  ;;  %19196 = vst [vmem:[#allocation58_spill] sm:$0xff] %v15013_v36 }
 0x2b8   :  { %12375 = vmatmul.mubr.msk.f32.gmra.mxu1 %vm993_vm1, %v14927_v33 }
 0x2b9   :  { %v1225_v59 = vpop.permute.xlu1 %1224  ;;  %12380 = vmatpush3.xpose.msk.msra.mxu1 %vm993_vm1, %v1108_v17  ;;  %12385 = vmatprep.mubr.msk.f32.mxu1 %vm993_vm1, %v14930_v31 }
 0x2ba   :  { %12381 = vmatprep.subr.msk.mxu1 %vm993_vm1, %v1106_v35 }
 0x2bb   :  { %v1223_v61 = vpop.permute.xlu0 %1222 }
 0x2bd   :  { %v1221_v47 = vpop.permute.xlu1 %1220  ;;  %12382 = vmatpush3.xpose.msk.msra.mxu1 %vm993_vm1, %v1106_v35  ;;  %v15027_v35 = vmul.f32 0.35355338, %v14764_v60 }
 0x2be   :  { %12383 = vmatprep.subr.msk.mxu1 %vm993_vm1, %v1104_v52 }
 0x2bf   :  { %v1344_v41 = vpop.permute.xlu0 %1343  ;;  %19197 = vst [vmem:[#allocation59_spill] sm:$0xff] %v15027_v35 }
 0x2c1   :  { %12384 = vmatpush3.xpose.msk.msra.mxu1 %vm993_vm1, %v1104_v52  ;;  %v14945_v63 = vpop.permute.xlu1 %1341 }
 0x2c2   :  { %12391 = vmatprep.subr.msk.mxu1 %vm993_vm1, %v1227_v46 }
 0x2c3   :  { %v12362_v6 = vpop.f32.mrf.mxu1 }
 0x2c4   :  { %v14951_v45 = vadd.f32 %v12362_v6, %v14718_v5  ;;  %v14953_v15 = vpop.permute.xlu0 %1339  ;;  %12386 = vmatmul.mubr.msk.f32.vlgmr.msra.gmra.mxu1 %vm993_vm1, %v14943_v62  ;;  %v15066_v6 = vmul.f32 0.35355338, %v14866_v30 }
 0x2c5   :  { %12388 = vmatprep.mubr.msk.f32.mxu1 %vm993_vm1, %v14948_v28  ;;  %12392 = vmatpush3.xpose.msk.msra.mxu1 %vm993_vm1, %v1227_v46  ;;  %v936_v0 = vpop.f32.mrf.mxu1  ;;  %v15034_v46 = vmul.f32 0.35355338, %v14822_v25 }
 0x2c6   :  { %19190 = vst [vmem:[#allocation52_spill] sm:$0xff] %v14951_v45  ;;  %3039 = vrot.lane.b32.xlu0 %v14951_v45, %s14177_s2  ;;  %1811 = vrot.lane.b32.xlu1 %v14951_v45, %s14176_s27  ;;  %v14977_v3 = vadd.f32 %v14718_v5, %v936_v0  ;;  %v15005_v5 = vmul.f32 0.35355338, %v14774_v50  ;;  %19202 = vst [vmem:[#allocation64_spill] sm:$0xff] %v15066_v6 }
 0x2c7   :  { %12393 = vmatprep.subr.msk.mxu1 %vm993_vm1, %v1225_v59  ;;  %v1461_v7 = vpop.permute.xlu1 %1460  ;;  %19198 = vst [vmem:[#allocation60_spill] sm:$0xff] %v15034_v46 }
 0x2c8   :  { %v14971_v32 = vpop.permute.xlu0 %1337  ;;  %12389 = vmatmul.mubr.msk.f32.gmra.mxu1 %vm993_vm1, %v14965_v44  ;;  %12419 = vmatprep.subr.msk.mxu0 %vm993_vm1, %v1461_v7  ;;  %19193 = vst [vmem:[#allocation55_spill] sm:$0xff] %v14977_v3  ;;  %19195 = vst [vmem:[#allocation57_spill] sm:$0xff] %v15005_v5 }
 0x2c9   :  { %12394 = vmatpush3.xpose.msk.msra.mxu1 %vm993_vm1, %v1225_v59  ;;  %12399 = vmatprep.mubr.msk.f32.mxu1 %vm993_vm1, %v14969_v49 }
 0x2ca   :  { %12420 = vmatpush3.xpose.msk.msra.mxu0 %vm993_vm1, %v1461_v7  ;;  %3160 = vrot.lane.b32.xlu0 %v14730_v8, %s14178_s28 }
 0x2cb   :  { %1809 = vrot.lane.b32.xlu1 %v14977_v3, %s14176_s27  ;;  %12395 = vmatprep.subr.msk.mxu1 %vm993_vm1, %v1223_v61  ;;  %v1459_v27 = vpop.permute.xlu1 %1458 }
 0x2cc   :  { %v1457_v2 = vpop.permute.xlu0 %1456  ;;  %12421 = vmatprep.subr.msk.mxu0 %vm993_vm1, %v1459_v27 }
 0x2cd   :  { %12396 = vmatpush3.xpose.msk.msra.mxu1 %vm993_vm1, %v1223_v61  ;;  %v15042_v61 = vmul.f32 0.35355338, %v14812_v14 }
 0x2ce   :  { %12422 = vmatpush3.xpose.msk.msra.mxu0 %vm993_vm1, %v1459_v27  ;;  %3158 = vrot.lane.b32.xlu0 %v14739_v54, %s14178_s28  ;;  %v15097_v27 = vmul.f32 0.35355338, %v14789_v57 }
 0x2cf   :  { %1805 = vrot.lane.b32.xlu1 %v14990_v48, %s14176_s27  ;;  %12397 = vmatprep.subr.msk.mxu1 %vm993_vm1, %v1221_v47  ;;  %v1578_v39 = vpop.permute.xlu1 %1577  ;;  %19199 = vst [vmem:[#allocation61_spill] sm:$0xff] %v15042_v61 }
 0x2d0   :  { %12423 = vmatprep.subr.msk.mxu0 %vm993_vm1, %v1457_v2  ;;  %v1455_v42 = vpop.permute.xlu0 %1454  ;;  %19204 = vst [vmem:[#allocation66_spill] sm:$0xff] %v15097_v27 }
 0x2d1   :  { %12398 = vmatpush3.xpose.msk.msra.mxu1 %vm993_vm1, %v1221_v47  ;;  %v15045_v47 = vmul.f32 0.35355338, %v14819_v20 }
 0x2d2   :  { %12424 = vmatpush3.xpose.msk.msra.mxu0 %vm993_vm1, %v1457_v2  ;;  %3156 = vrot.lane.b32.xlu0 %v14721_v43, %s14178_s28 }
 0x2d3   :  { %2274 = vrot.lane.b32.xlu1 %v14730_v8, %s14177_s2  ;;  %12405 = vmatprep.subr.msk.mxu1 %vm993_vm1, %v1344_v41  ;;  %v15010_v26 = vpop.permute.xlu1 %1575  ;;  %19200 = vst [vmem:[#allocation62_spill] sm:$0xff] %v15045_v47 }
 0x2d4   :  { %12425 = vmatprep.subr.msk.mxu0 %vm993_vm1, %v1455_v42  ;;  %v15016_v17 = vpop.permute.xlu0 %1573  ;;  %12400 = vmatmul.mubr.msk.f32.vlgmr.msra.gmra.mxu1 %vm993_vm1, %v15005_v5 }
 0x2d5   :  { %12402 = vmatprep.mubr.msk.f32.mxu1 %vm993_vm1, %v15013_v36  ;;  %12406 = vmatpush3.xpose.msk.msra.mxu1 %vm993_vm1, %v1344_v41 }
 0x2d6   :  { %12426 = vmatpush3.xpose.msk.msra.mxu0 %vm993_vm1, %v1455_v42  ;;  %3148 = vrot.lane.b32.xlu0 %v14727_v56, %s14179_s29  ;;  %v15116_v42 = vmul.f32 0.35355338, %v14859_v34  ;;  %v15282_v56 = vld [vmem:[#allocation8] sm:$0xff] }
 0x2d7   :  { %2270 = vrot.lane.b32.xlu1 %v14721_v43, %s14177_s2  ;;  %12407 = vmatprep.subr.msk.mxu1 %vm993_vm1, %v14945_v63  ;;  %v1695_v52 = vpop.permute.xlu1 %1694 }
 0x2d8   :  { %v15036_v59 = vpop.permute.xlu0 %1571  ;;  %12403 = vmatmul.mubr.msk.f32.gmra.mxu1 %vm993_vm1, %v15027_v35  ;;  %12447 = vmatprep.subr.msk.mxu0 %vm993_vm1, %v1695_v52  ;;  %19206 = vst [vmem:[#allocation68_spill] sm:$0xff] %v15116_v42 }
 0x2d9   :  { %12428 = vmatmul.mubr.msk.f32.vlgmr.msra.gmra.mxu0 %vm993_vm1, %v15034_v46  ;;  %12408 = vmatpush3.xpose.msk.msra.mxu1 %vm993_vm1, %v14945_v63 }
 0x2da   :  { %12413 = vmatprep.mubr.msk.f32.mxu1 %vm993_vm1, %v15042_v61  ;;  %12430 = vmatprep.mubr.msk.f32.mxu0 %vm993_vm1, %v15045_v47 }
 0x2db   :  { %12448 = vmatpush3.xpose.msk.msra.mxu0 %vm993_vm1, %v1695_v52  ;;  %3275 = vrot.lane.b32.xlu0 %v14754_v53, %s14178_s28  ;;  %v1693_v41 = vpop.permute.xlu1 %1692  ;;  %v15124_v52 = vmul.f32 0.35355338, %v14856_v58 }
 0x2dc   :  { %2385 = vrot.lane.b32.xlu1 %v14744_v18, %s14177_s2  ;;  %12409 = vmatprep.subr.msk.mxu1 %vm993_vm1, %v14953_v15  ;;  %v1691_v63 = vpop.permute.xlu0 %1690 }
 0x2dd   :  { %12431 = vmatmul.mubr.msk.f32.gmra.mxu0 %vm993_vm1, %v15059_v40  ;;  %12449 = vmatprep.subr.msk.mxu0 %vm993_vm1, %v1693_v41  ;;  %19208 = vst [vmem:[#allocation70_spill] sm:$0xff] %v15124_v52 }
 0x2de   :  { %12410 = vmatpush3.xpose.msk.msra.mxu1 %vm993_vm1, %v14953_v15  ;;  %12455 = vmatprep.mubr.msk.f32.mxu0 %vm993_vm1, %v15066_v6  ;;  %v15089_v15 = vmul.f32 0.35355338, %v14802_v19 }
 0x2df   :  { %12450 = vmatpush3.xpose.msk.msra.mxu0 %vm993_vm1, %v1693_v41  ;;  %3152 = vrot.lane.b32.xlu0 %v14918_v38, %s14179_s29  ;;  %v15137_v41 = vmul.f32 0.35355338, %v14846_v23 }
 0x2e0   :  { %2494 = vrot.lane.b32.xlu1 %v14764_v60, %s14177_s2  ;;  %12411 = vmatprep.subr.msk.mxu1 %vm993_vm1, %v14971_v32  ;;  %v1689_v0 = vpop.permute.xlu0 %1688  ;;  %19203 = vst [vmem:[#allocation65_spill] sm:$0xff] %v15089_v15 }
 0x2e1   :  { %12451 = vmatprep.subr.msk.mxu0 %vm993_vm1, %v1691_v63  ;;  %19209 = vst [vmem:[#allocation71_spill] sm:$0xff] %v15137_v41 }
 0x2e2   :  { %12412 = vmatpush3.xpose.msk.msra.mxu1 %vm993_vm1, %v14971_v32  ;;  %v15109_v32 = vmul.f32 0.35355338, %v14784_v55 }
 0x2e3   :  { %12452 = vmatpush3.xpose.msk.msra.mxu0 %vm993_vm1, %v1691_v63  ;;  %3273 = vrot.lane.b32.xlu0 %v14759_v4, %s14178_s28  ;;  %v15175_v63 = vmul.f32 0.35355338, %v14990_v48 }
 0x2e4   :  { %2490 = vrot.lane.b32.xlu1 %v14774_v50, %s14177_s2  ;;  %12433 = vmatprep.subr.msk.mxu1 %vm993_vm1, %v1578_v39  ;;  %v15094_v7 = vpop.permute.xlu0 %1807  ;;  %19205 = vst [vmem:[#allocation67_spill] sm:$0xff] %v15109_v32 }
 0x2e5   :  { %12453 = vmatprep.subr.msk.mxu0 %vm993_vm1, %v1689_v0  ;;  %12414 = vmatmul.mubr.msk.f32.vlgmr.msra.gmra.mxu1 %vm993_vm1, %v15089_v15  ;;  %19213 = vst [vmem:[#allocation75_spill] sm:$0xff] %v15175_v63 }
 0x2e6   :  { %12416 = vmatprep.mubr.msk.f32.mxu1 %vm993_vm1, %v15097_v27  ;;  %12434 = vmatpush3.xpose.msk.msra.mxu1 %vm993_vm1, %v1578_v39  ;;  %v15121_v39 = vmul.f32 0.35355338, %v14849_v1 }
 0x2e7   :  { %12454 = vmatpush3.xpose.msk.msra.mxu0 %vm993_vm1, %v1689_v0  ;;  %3265 = vrot.lane.b32.xlu0 %v14930_v31, %s14179_s29 }
 0x2e8   :  { %2379 = vrot.lane.b32.xlu1 %v14759_v4, %s14177_s2  ;;  %12435 = vmatprep.subr.msk.mxu1 %vm993_vm1, %v15010_v26  ;;  %v2277_v2 = vpop.permute.xlu0 %2276  ;;  %19207 = vst [vmem:[#allocation69_spill] sm:$0xff] %v15121_v39 }
 0x2e9   :  { %12417 = vmatmul.mubr.msk.f32.gmra.mxu1 %vm993_vm1, %v15109_v32  ;;  %12475 = vmatprep.subr.mxu0 %v2277_v2 }
 0x2ea   :  { %12456 = vmatmul.mubr.msk.f32.vlgmr.msra.gmra.mxu0 %vm993_vm1, %v15116_v42  ;;  %12436 = vmatpush3.xpose.msk.msra.mxu1 %vm993_vm1, %v15010_v26  ;;  %v15156_v26 = vmul.f32 0.35355338, %v14839_v13 }
 0x2eb   :  { %12441 = vmatprep.mubr.msk.f32.mxu1 %vm993_vm1, %v15121_v39  ;;  %12458 = vmatprep.mubr.msk.f32.mxu0 %vm993_vm1, %v15124_v52 }
 0x2ec   :  { %12476 = vmatpush3.msra.mxu0 %v2277_v2  ;;  %3392 = vrot.lane.b32.xlu0 %v14774_v50, %s14178_s28  ;;  %19210 = vst [vmem:[#allocation72_spill] sm:$0xff] %v15156_v26 }
 0x2ed   :  { %2488 = vrot.lane.b32.xlu1 %v14779_v9, %s14177_s2  ;;  %12437 = vmatprep.subr.msk.mxu1 %vm993_vm1, %v15016_v17 }
 0x2ee   :  { %12459 = vmatmul.mubr.msk.f32.gmra.mxu0 %vm993_vm1, %v15137_v41  ;;  %12438 = vmatpush3.xpose.msk.msra.mxu1 %vm993_vm1, %v15016_v17  ;;  %v15161_v17 = vmul.f32 0.35355338, %v14836_v24 }
 0x2ef   :  { %12439 = vmatprep.subr.msk.mxu1 %vm993_vm1, %v15036_v59 }
 0x2f0   :  { %3269 = vrot.lane.b32.xlu0 %v14948_v28, %s14179_s29  ;;  %19211 = vst [vmem:[#allocation73_spill] sm:$0xff] %v15161_v17 }
 0x2f1   :  { %2601 = vrot.lane.b32.xlu1 %v14789_v57, %s14177_s2 }
 0x2f2   :  { %12440 = vmatpush3.xpose.msk.msra.mxu1 %vm993_vm1, %v15036_v59  ;;  %v15170_v59 = vmul.f32 0.35355338, %v14829_v22 }
 0x2f4   :  { %3390 = vrot.lane.b32.xlu0 %v14779_v9, %s14178_s28  ;;  %19212 = vst [vmem:[#allocation74_spill] sm:$0xff] %v15170_v59 }
 0x2f5   :  { %2706 = vrot.lane.b32.xlu1 %v14792_v12, %s14177_s2  ;;  %12442 = vmatmul.mubr.msk.f32.vlgmr.msra.gmra.mxu1 %vm993_vm1, %v15156_v26 }
 0x2f6   :  { %12444 = vmatprep.mubr.msk.f32.mxu1 %vm993_vm1, %v15161_v17 }
 0x2f8   :  { %3382 = vrot.lane.b32.xlu0 %v14969_v49, %s14179_s29 }
 0x2f9   :  { %2930 = vrot.lane.b32.xlu1 %v14846_v23, %s14177_s2  ;;  %12445 = vmatmul.mubr.msk.f32.gmra.mxu1 %vm993_vm1, %v15170_v59 }
 0x2fa   :  { %12469 = vmatprep.mubr.msk.f32.mxu1 %vm993_vm1, %v15175_v63 }
 0x2fc   :  { %3509 = vrot.lane.b32.xlu0 %v14802_v19, %s14178_s28  ;;  %v15287_v19 = vld [vmem:[#allocation8 + $0x18] sm:$0xff] }
 0x2fd   :  { %2928 = vrot.lane.b32.xlu1 %v14856_v58, %s14177_s2 }
 0x300   :  { %3386 = vrot.lane.b32.xlu0 %v15013_v36, %s14179_s29  ;;  %v2273_v36 = vpop.permute.xlu0 %2272 }
 0x301   :  { %2926 = vrot.lane.b32.xlu1 %v14859_v34, %s14177_s2 }
 0x304   :  { %3507 = vrot.lane.b32.xlu0 %v14812_v14, %s14178_s28  ;;  %v15244_v49 = vpop.permute.xlu0 %2383 }
 0x305   :  { %2924 = vrot.lane.b32.xlu1 %v14866_v30, %s14177_s2 }
 0x308   :  { %3499 = vrot.lane.b32.xlu0 %v15042_v61, %s14179_s29 }
 0x309   :  { %3162 = vrot.lane.b32.xlu1 %v14724_v37, %s14178_s28  ;;  %v15303_v37 = vld [vmem:[#allocation8 + $0x10] sm:$0xff] }
 0x30c   :  { %3037 = vrot.lane.b32.xlu0 %v14977_v3, %s14177_s2 }
 0x30d   :  { %3035 = vrot.lane.b32.xlu1 %v14871_v29, %s14177_s2 }
 0x311   :  { %3033 = vrot.lane.b32.xlu1 %v14990_v48, %s14177_s2 }
 0x315   :  { %3279 = vrot.lane.b32.xlu1 %v14744_v18, %s14178_s28 }
 0x319   :  { %3277 = vrot.lane.b32.xlu1 %v14749_v51, %s14178_s28 }
 0x31d   :  { %3150 = vrot.lane.b32.xlu1 %v14915_v10, %s14179_s29 }
 0x321   :  { %3396 = vrot.lane.b32.xlu1 %v14764_v60, %s14178_s28 }
 0x325   :  { %3154 = vrot.lane.b32.xlu1 %v14927_v33, %s14179_s29  ;;  %v15278_v33 = vld [vmem:[#allocation8 + $0x8] sm:$0xff] }
 0x329   :  { %3394 = vrot.lane.b32.xlu1 %v14769_v21, %s14178_s28 }
 0x32d   :  { %3267 = vrot.lane.b32.xlu1 %v14943_v62, %s14179_s29 }
 0x331   :  { %3513 = vrot.lane.b32.xlu1 %v14784_v55, %s14178_s28 }
 0x335   :  { %3271 = vrot.lane.b32.xlu1 %v14965_v44, %s14179_s29 }
 0x338   :  { %v1812_v0 = vpop.permute.xlu1 %1811 }
 0x339   :  { %3511 = vrot.lane.b32.xlu1 %v14789_v57, %s14178_s28  ;;  %12461 = vmatprep.subr.msk.mxu1 %vm993_vm1, %v1812_v0 }
 0x33a   :  { %12462 = vmatpush3.xpose.msk.msra.mxu1 %vm993_vm1, %v1812_v0 }
 0x33d   :  { %3384 = vrot.lane.b32.xlu1 %v15005_v5, %s14179_s29  ;;  %v1810_v2 = vpop.permute.xlu1 %1809  ;;  %v15249_v5 = vmul.f32 0.35355338, %v14977_v3 }
 0x33e   :  { %12463 = vmatprep.subr.msk.mxu1 %vm993_vm1, %v1810_v2 }
 0x33f   :  { %12464 = vmatpush3.xpose.msk.msra.mxu1 %vm993_vm1, %v1810_v2  ;;  %v15242_v2 = vmul.f32 0.35355338, %v14871_v29  ;;  %19215 = vst [vmem:[#allocation77_spill] sm:$0xff] %v15249_v5 }
 0x340   :  { %12465 = vmatprep.subr.msk.mxu1 %vm993_vm1, %v15094_v7 }
 0x341   :  { %3630 = vrot.lane.b32.xlu1 %v14809_v11, %s14178_s28  ;;  %v1806_v61 = vpop.permute.xlu1 %1805  ;;  %19214 = vst [vmem:[#allocation76_spill] sm:$0xff] %v15242_v2 }
 0x343   :  { %12466 = vmatpush3.xpose.msk.msra.mxu1 %vm993_vm1, %v15094_v7 }
 0x344   :  { %12467 = vmatprep.subr.msk.mxu1 %vm993_vm1, %v1806_v61 }
 0x345   :  { %3388 = vrot.lane.b32.xlu1 %v15027_v35, %s14179_s29  ;;  %v2275_v0 = vpop.permute.xlu1 %2274 }
 0x346   :  { %12477 = vmatprep.subr.mxu0 %v2275_v0 }
 0x347   :  { %12468 = vmatpush3.xpose.msk.msra.mxu1 %vm993_vm1, %v1806_v61  ;;  %12478 = vmatpush3.msra.mxu0 %v2275_v0  ;;  %v15256_v61 = vmul.f32 0.35355338, %v14951_v45 }
 0x348   :  { %12479 = vmatprep.subr.mxu0 %v2273_v36 }
 0x349   :  { %3628 = vrot.lane.b32.xlu1 %v14819_v20, %s14178_s28  ;;  %v2271_v7 = vpop.permute.xlu1 %2270  ;;  %12480 = vmatpush3.msra.mxu0 %v2273_v36  ;;  %19216 = vst [vmem:[#allocation78_spill] sm:$0xff] %v15256_v61  ;;  %v2493_v36 = vpop.permute.xlu0 %2492 }
 0x34a   :  { %12470 = vmatmul.mubr.msk.f32.vlgmr.msra.gmra.mxu1 %vm993_vm1, %v15242_v2  ;;  %12481 = vmatprep.subr.mxu0 %v2271_v7 }
 0x34b   :  { %12472 = vmatprep.mubr.msk.f32.mxu1 %vm993_vm1, %v15249_v5  ;;  %12482 = vmatpush3.msra.mxu0 %v2271_v7 }
 0x34d   :  { %3501 = vrot.lane.b32.xlu1 %v15089_v15, %s14179_s29  ;;  %v15265_v28 = vpop.permute.xlu0 %2381 }
 0x34e   :  { %v15260_v0 = vpop.permute.xlu1 %2385  ;;  %12473 = vmatmul.mubr.msk.f32.gmra.mxu1 %vm993_vm1, %v15256_v61 }
 0x34f   :  { %12489 = vmatprep.subr.mxu0 %v15260_v0 }
 0x351   :  { %v15269_v15 = vpop.permute.xlu0 %2603 }
 0x352   :  { %v2495_v35 = vpop.permute.xlu1 %2494 }
 0x353   :  { %12503 = vmatprep.subr.mxu1 %v2495_v35 }
 0x354   :  { %12504 = vmatpush3.msra.mxu1 %v2495_v35 }
 0x355   :  { %12505 = vmatprep.subr.mxu1 %v2493_v36  ;;  %v15271_v62 = vpop.permute.xlu0 %2712 }
 0x356   :  { %v2491_v7 = vpop.permute.xlu1 %2490  ;;  %12506 = vmatpush3.msra.mxu1 %v2493_v36  ;;  %19217 = vst [vmem:[#allocation79_spill] sm:$0xff] %v15271_v62 }
 0x357   :  { %12507 = vmatprep.subr.mxu1 %v2491_v7 }
 0x358   :  { %12508 = vmatpush3.msra.mxu1 %v2491_v7 }
 0x359   :  { %v15274_v38 = vpop.permute.xlu0 %2710 }
 0x35a   :  { %v15267_v44 = vpop.permute.xlu1 %2379  ;;  %19218 = vst [vmem:[#allocation80_spill] sm:$0xff] %v15274_v38 }
 0x35d   :  { %v15276_v35 = vpop.permute.xlu0 %2599 }
 0x35f   :  { %v2489_v31 = vpop.permute.xlu1 %2488 }
 0x360   :  { %12509 = vmatprep.subr.mxu1 %v2489_v31 }
 0x361   :  { %12510 = vmatpush3.msra.mxu1 %v2489_v31  ;;  %v15289_v31 = vpop.permute.xlu0 %2708 }
 0x362   :  { %12531 = vmatprep.subr.mxu1 %v15271_v62  ;;  %19219 = vst [vmem:[#allocation81_spill] sm:$0xff] %v15289_v31 }
 0x363   :  { %v15280_v36 = vpop.permute.xlu1 %2601 }
 0x365   :  { %v15305_v5 = vpop.permute.xlu0 %2597 }
 0x367   :  { %v15296_v53 = vpop.permute.xlu1 %2706 }
 0x368   :  { %19220 = vst [vmem:[#allocation82_spill] sm:$0xff] %v15296_v53 }
 0x369   :  { %v15316_v41 = vpop.permute.xlu0 %2821 }
 0x36b   :  { %v15312_v63 = vpop.permute.xlu1 %2930 }
 0x36c   :  { %19221 = vst [vmem:[#allocation83_spill] sm:$0xff] %v15312_v63 }
 0x36d   :  { %v15328_v14 = vpop.permute.xlu0 %2819 }
 0x36e   :  { %19223 = vst [vmem:[#allocation85_spill] sm:$0xff] %v15328_v14 }
 0x36f   :  { %v15318_v6 = vpop.permute.xlu1 %2928 }
 0x370   :  { %19222 = vst [vmem:[#allocation84_spill] sm:$0xff] %v15318_v6 }
 0x371   :  { %v15337_v34 = vpop.permute.xlu0 %2817 }
 0x372   :  { %19225 = vst [vmem:[#allocation87_spill] sm:$0xff] %v15337_v34 }
 0x374   :  { %v12373_v7 = vpop.f32.mrf.mxu1 }
 0x375   :  { %v15285_v10 = vadd.f32 %v12373_v7, %v15278_v33  ;;  %v15348_v39 = vpop.permute.xlu0 %2815 }
 0x376   :  { %v1080_v11 = vpop.f32.mrf.mxu1  ;;  %19227 = vst [vmem:[#allocation89_spill] sm:$0xff] %v15348_v39 }
 0x377   :  { %v15292_v55 = vadd.f32 %v1080_v11, %v15282_v56  ;;  %v1921_v50 = vsel %vm117_vm0, %v15285_v10, -inf }
 0x378   :  { %1922 = vmax.xlane.f32.xlu1 %v1921_v50  ;;  %v12376_v60 = vpop.f32.mrf.mxu1 }
 0x379   :  { %v15299_v18 = vadd.f32 %v12376_v60, %v15287_v19  ;;  %v1918_v7 = vsel %vm117_vm0, %v15292_v55, -inf }
 0x37a   :  { %v1090_v54 = vpop.f32.mrf.mxu1  ;;  %1919 = vmax.xlane.f32.xlu0 %v1918_v7 }
 0x37b   :  { %v15308_v11 = vadd.f32 %v1090_v54, %v15303_v37  ;;  %v1927_v50 = vsel %vm117_vm0, %v15299_v18, -inf }
 0x37d   :  { %v1924_v60 = vsel %vm117_vm0, %v15308_v11, -inf }
 0x37e   :  { %1928 = vmax.xlane.f32.xlu0 %v1927_v50 }
 0x382   :  { %1925 = vmax.xlane.f32.xlu0 %v1924_v60  ;;  %v15330_v60 = vpop.permute.xlu1 %2926 }
 0x383   :  { %19224 = vst [vmem:[#allocation86_spill] sm:$0xff] %v15330_v60 }
 0x384   :  { %v12387_v29 = vpop.f32.mrf.mxu1 }
 0x385   :  { %v15321_v7 = vadd.f32 %v12387_v29, %v15278_v33 }
 0x386   :  { %v1197_v54 = vpop.f32.mrf.mxu1  ;;  %v15344_v9 = vpop.permute.xlu1 %2924 }
 0x387   :  { %v15324_v20 = vadd.f32 %v1197_v54, %v15282_v56  ;;  %v1933_v50 = vsel %vm117_vm0, %v15321_v7, -inf  ;;  %19226 = vst [vmem:[#allocation88_spill] sm:$0xff] %v15344_v9 }
 0x388   :  { %1934 = vmax.xlane.f32.xlu0 %v1933_v50  ;;  %v12390_v30 = vpop.f32.mrf.mxu1 }
 0x389   :  { %v15333_v17 = vadd.f32 %v12390_v30, %v15287_v19  ;;  %v1930_v29 = vsel %vm117_vm0, %v15324_v20, -inf }
 0x38a   :  { %v1207_v57 = vpop.f32.mrf.mxu1  ;;  %v15350_v21 = vpop.permute.xlu1 %3162 }
 0x38b   :  { %v15340_v54 = vadd.f32 %v1207_v57, %v15303_v37  ;;  %v1939_v50 = vsel %vm117_vm0, %v15333_v17, -inf  ;;  %19228 = vst [vmem:[#allocation90_spill] sm:$0xff] %v15350_v21 }
 0x38c   :  { %1931 = vmax.xlane.f32.xlu0 %v1930_v29  ;;  %v15352_v29 = vpop.permute.xlu0 %3039 }
 0x38d   :  { %v1936_v30 = vsel %vm117_vm0, %v15340_v54, -inf  ;;  %19229 = vst [vmem:[#allocation91_spill] sm:$0xff] %v15352_v29 }
 0x38e   :  { %v15362_v51 = vpop.permute.xlu1 %3035 }
 0x38f   :  { %19230 = vst [vmem:[#allocation92_spill] sm:$0xff] %v15362_v51 }
 0x390   :  { %1940 = vmax.xlane.f32.xlu0 %v1939_v50  ;;  %v15364_v60 = vpop.permute.xlu0 %3160 }
 0x391   :  { %19231 = vst [vmem:[#allocation93_spill] sm:$0xff] %v15364_v60 }
 0x392   :  { %v15371_v43 = vpop.permute.xlu1 %3033 }
 0x393   :  { %19232 = vst [vmem:[#allocation94_spill] sm:$0xff] %v15371_v43 }
 0x394   :  { %1937 = vmax.xlane.f32.xlu0 %v1936_v30  ;;  %v12401_v9 = vpop.f32.mrf.mxu1  ;;  %v15378_v51 = vpop.permute.xlu0 %3158 }
 0x395   :  { %19233 = vst [vmem:[#allocation95_spill] sm:$0xff] %v15378_v51 }
 0x396   :  { %v15382_v16 = vpop.permute.xlu1 %3279 }
 0x397   :  { %19234 = vst [vmem:[#allocation96_spill] sm:$0xff] %v15382_v16 }
 0x398   :  { %v15384_v29 = vpop.permute.xlu0 %3156 }
 0x399   :  { %v12429_v1 = vpop.f32.mrf.mxu0  ;;  %19235 = vst [vmem:[#allocation97_spill] sm:$0xff] %v15384_v29 }
 0x39a   :  { %v15355_v57 = vadd.f32 %v12429_v1, %v15278_v33  ;;  %v15394_v12 = vpop.permute.xlu1 %3277 }
 0x39b   :  { %v1548_v4 = vpop.f32.mrf.mxu0  ;;  %19236 = vst [vmem:[#allocation98_spill] sm:$0xff] %v15394_v12 }
 0x39c   :  { %v15358_v47 = vadd.f32 %v1548_v4, %v15282_v56  ;;  %v1969_v50 = vsel %vm117_vm0, %v15355_v57, -inf  ;;  %v1314_v4 = vpop.f32.mrf.mxu1  ;;  %v15396_v61 = vpop.permute.xlu0 %3148 }
 0x39d   :  { %1970 = vmax.xlane.f32.xlu1 %v1969_v50  ;;  %v12432_v30 = vpop.f32.mrf.mxu0  ;;  %19237 = vst [vmem:[#allocation99_spill] sm:$0xff] %v15396_v61 }
 0x39e   :  { %v15367_v21 = vadd.f32 %v12432_v30, %v15287_v19  ;;  %v1966_v1 = vsel %vm117_vm0, %v15358_v47, -inf  ;;  %v12404_v60 = vpop.f32.mrf.mxu1  ;;  %v15411_v34 = vpop.permute.xlu1 %3150 }
 0x39f   :  { %v1558_v13 = vpop.f32.mrf.mxu0  ;;  %19238 = vst [vmem:[#allocation100_spill] sm:$0xff] %v15411_v34 }
 0x3a0   :  { %v15374_v6 = vadd.f32 %v1558_v13, %v15303_v37  ;;  %v1975_v50 = vsel %vm117_vm0, %v15367_v21, -inf  ;;  %v15418_v61 = vpop.permute.xlu0 %3275 }
 0x3a1   :  { %1967 = vmax.xlane.f32.xlu1 %v1966_v1  ;;  %v1324_v1 = vpop.f32.mrf.mxu1  ;;  %19239 = vst [vmem:[#allocation101_spill] sm:$0xff] %v15418_v61 }
 0x3a2   :  { %v1972_v30 = vsel %vm117_vm0, %v15374_v6, -inf  ;;  %v15430_v14 = vpop.permute.xlu1 %3396 }
 0x3a3   :  { %19240 = vst [vmem:[#allocation102_spill] sm:$0xff] %v15430_v14 }
 0x3a4   :  { %v15437_v61 = vpop.permute.xlu0 %3152 }
 0x3a5   :  { %1976 = vmax.xlane.f32.xlu1 %v1975_v50  ;;  %v12415_v43 = vpop.f32.mrf.mxu1  ;;  %19241 = vst [vmem:[#allocation103_spill] sm:$0xff] %v15437_v61 }
 0x3a6   :  { %v15407_v53 = vadd.f32 %v12415_v43, %v15278_v33  ;;  %v15449_v14 = vpop.permute.xlu1 %3154 }
 0x3a7   :  { %19242 = vst [vmem:[#allocation104_spill] sm:$0xff] %v15449_v14 }
 0x3a8   :  { %v1957_v43 = vsel %vm117_vm0, %v15407_v53, -inf  ;;  %v15456_v2 = vpop.permute.xlu0 %3273 }
 0x3a9   :  { %1973 = vmax.xlane.f32.xlu1 %v1972_v30  ;;  %v1431_v30 = vpop.f32.mrf.mxu1  ;;  %19243 = vst [vmem:[#allocation105_spill] sm:$0xff] %v15456_v2 }
 0x3aa   :  { %v12457_v8 = vpop.f32.mrf.mxu0  ;;  %v15468_v14 = vpop.permute.xlu1 %3394 }
 0x3ab   :  { %v15387_v13 = vadd.f32 %v12457_v8, %v15278_v33  ;;  %v12418_v12 = vpop.f32.mrf.mxu1  ;;  %19244 = vst [vmem:[#allocation106_spill] sm:$0xff] %v15468_v14 }
 0x3ac   :  { %v1782_v63 = vpop.f32.mrf.mxu0  ;;  %v15475_v38 = vpop.permute.xlu0 %3265 }
 0x3ad   :  { %v15390_v39 = vadd.f32 %v1782_v63, %v15282_v56  ;;  %v1993_v50 = vsel %vm117_vm0, %v15387_v13, -inf  ;;  %v1441_v31 = vpop.f32.mrf.mxu1  ;;  %19245 = vst [vmem:[#allocation107_spill] sm:$0xff] %v15475_v38 }
 0x3ae   :  { %1994 = vmax.xlane.f32.xlu1 %v1993_v50  ;;  %v12460_v51 = vpop.f32.mrf.mxu0 }
 0x3af   :  { %v15399_v29 = vadd.f32 %v12460_v51, %v15287_v19  ;;  %v1990_v63 = vsel %vm117_vm0, %v15390_v39, -inf  ;;  %v15414_v51 = vadd.f32 %v12401_v9, %v15278_v33 }
 0x3b0   :  { %v1792_v16 = vpop.f32.mrf.mxu0  ;;  %v15486_v14 = vpop.permute.xlu0 %3392 }
 0x3b1   :  { %v15402_v8 = vadd.f32 %v1792_v16, %v15303_v37  ;;  %v1999_v16 = vsel %vm117_vm0, %v15399_v29, -inf  ;;  %v1945_v9 = vsel %vm117_vm0, %v15414_v51, -inf  ;;  %19247 = vst [vmem:[#allocation109_spill] sm:$0xff] %v15486_v14 }
 0x3b2   :  { %1991 = vmax.xlane.f32.xlu1 %v1990_v63  ;;  %v15421_v63 = vadd.f32 %v1431_v30, %v15282_v56 }
 0x3b3   :  { %v1996_v50 = vsel %vm117_vm0, %v15402_v8, -inf }
 0x3b4   :  { %1997 = vmax.xlane.f32.xlu0 %v1996_v50  ;;  %v15426_v50 = vadd.f32 %v1314_v4, %v15282_v56  ;;  %v1954_v30 = vsel %vm117_vm0, %v15421_v63, -inf  ;;  %v15492_v62 = vpop.permute.xlu0 %3269 }
 0x3b5   :  { %v12443_v34 = vpop.f32.mrf.mxu1  ;;  %19249 = vst [vmem:[#allocation111_spill] sm:$0xff] %v15492_v62 }
 0x3b6   :  { %2000 = vmax.xlane.f32.xlu1 %v1999_v16  ;;  %v15433_v16 = vadd.f32 %v12418_v12, %v15287_v19  ;;  %v1942_v4 = vsel %vm117_vm0, %v15426_v50, -inf }
 0x3b7   :  { %v1665_v27 = vpop.f32.mrf.mxu1 }
 0x3b8   :  { %1958 = vmax.xlane.f32.xlu0 %v1957_v43  ;;  %v15440_v43 = vadd.f32 %v12404_v60, %v15287_v19  ;;  %v1963_v12 = vsel %vm117_vm0, %v15433_v16, -inf }
 0x3b9   :  { %v12446_v61 = vpop.f32.mrf.mxu1 }
 0x3ba   :  { %1946 = vmax.xlane.f32.xlu1 %v1945_v9  ;;  %v15445_v9 = vadd.f32 %v1441_v31, %v15303_v37  ;;  %v1951_v60 = vsel %vm117_vm0, %v15440_v43, -inf }
 0x3bb   :  { %v1675_v2 = vpop.f32.mrf.mxu1 }
 0x3bc   :  { %1955 = vmax.xlane.f32.xlu0 %v1954_v30  ;;  %v15452_v30 = vadd.f32 %v1324_v1, %v15303_v37  ;;  %v1960_v31 = vsel %vm117_vm0, %v15445_v9, -inf }
 0x3be   :  { %1943 = vmax.xlane.f32.xlu1 %v1942_v4  ;;  %v15459_v4 = vadd.f32 %v12443_v34, %v15278_v33  ;;  %v1948_v1 = vsel %vm117_vm0, %v15452_v30, -inf }
 0x3c0   :  { %1964 = vmax.xlane.f32.xlu0 %v1963_v12  ;;  %v15464_v12 = vadd.f32 %v12446_v61, %v15287_v19  ;;  %v1981_v34 = vsel %vm117_vm0, %v15459_v4, -inf }
 0x3c2   :  { %1952 = vmax.xlane.f32.xlu1 %v1951_v60  ;;  %v15471_v60 = vadd.f32 %v1665_v27, %v15282_v56  ;;  %v1987_v61 = vsel %vm117_vm0, %v15464_v12, -inf  ;;  %v15484_v27 = vpop.permute.xlu1 %3267 }
 0x3c3   :  { %19246 = vst [vmem:[#allocation108_spill] sm:$0xff] %v15484_v27 }
 0x3c4   :  { %1961 = vmax.xlane.f32.xlu0 %v1960_v31  ;;  %v15480_v31 = vadd.f32 %v1675_v2, %v15303_v37  ;;  %v15496_v2 = vpop.permute.xlu0 %3390 }
 0x3c5   :  { %19251 = vst [vmem:[#allocation113_spill] sm:$0xff] %v15496_v2 }
 0x3c6   :  { %1949 = vmax.xlane.f32.xlu1 %v1948_v1  ;;  %v1978_v1 = vsel %vm117_vm0, %v15471_v60, -inf  ;;  %v15490_v38 = vpop.permute.xlu1 %3513 }
 0x3c7   :  { %19248 = vst [vmem:[#allocation110_spill] sm:$0xff] %v15490_v38 }
 0x3c8   :  { %1982 = vmax.xlane.f32.xlu0 %v1981_v34  ;;  %v1984_v34 = vsel %vm117_vm0, %v15480_v31, -inf  ;;  %v15500_v52 = vpop.permute.xlu0 %3382 }
 0x3c9   :  { %19253 = vst [vmem:[#allocation115_spill] sm:$0xff] %v15500_v52 }
 0x3ca   :  { %1988 = vmax.xlane.f32.xlu1 %v1987_v61  ;;  %v15494_v61 = vpop.permute.xlu1 %3271 }
 0x3cb   :  { %19250 = vst [vmem:[#allocation112_spill] sm:$0xff] %v15494_v61 }
 0x3cc   :  { %1979 = vmax.xlane.f32.xlu0 %v1978_v1  ;;  %v15504_v27 = vpop.permute.xlu0 %3509 }
 0x3cd   :  { %19255 = vst [vmem:[#allocation117_spill] sm:$0xff] %v15504_v27 }
 0x3ce   :  { %v15498_v48 = vpop.permute.xlu1 %3511 }
 0x3cf   :  { %19252 = vst [vmem:[#allocation114_spill] sm:$0xff] %v15498_v48 }
 0x3d0   :  { %1985 = vmax.xlane.f32.xlu0 %v1984_v34  ;;  %v15508_v42 = vpop.permute.xlu0 %3386 }
 0x3d1   :  { %19257 = vst [vmem:[#allocation119_spill] sm:$0xff] %v15508_v42 }
 0x3d2   :  { %v15502_v1 = vpop.permute.xlu1 %3384 }
 0x3d3   :  { %19254 = vst [vmem:[#allocation116_spill] sm:$0xff] %v15502_v1 }
 0x3d4   :  { %v15512_v38 = vpop.permute.xlu0 %3507 }
 0x3d5   :  { %19259 = vst [vmem:[#allocation121_spill] sm:$0xff] %v15512_v38 }
 0x3d6   :  { %v15506_v14 = vpop.permute.xlu1 %3630 }
 0x3d7   :  { %19256 = vst [vmem:[#allocation118_spill] sm:$0xff] %v15506_v14 }
 0x3d8   :  { %v15516_v61 = vpop.permute.xlu0 %3499 }
 0x3d9   :  { %19261 = vst [vmem:[#allocation123_spill] sm:$0xff] %v15516_v61 }
 0x3da   :  { %v15510_v34 = vpop.permute.xlu1 %3388 }
 0x3db   :  { %19258 = vst [vmem:[#allocation120_spill] sm:$0xff] %v15510_v34 }
 0x3dc   :  { %v15520_v48 = vpop.permute.xlu0 %3037 }
 0x3dd   :  { %19263 = vst [vmem:[#allocation125_spill] sm:$0xff] %v15520_v48 }
 0x3de   :  { %v15514_v62 = vpop.permute.xlu1 %3628 }
 0x3df   :  { %19260 = vst [vmem:[#allocation122_spill] sm:$0xff] %v15514_v62 }
 0x3e2   :  { %v15518_v2 = vpop.permute.xlu1 %3501 }
 0x3e3   :  { %19262 = vst [vmem:[#allocation124_spill] sm:$0xff] %v15518_v2 }
 0x401   :  { %v1923_v52 = vpop.xlane.xlu1 %1922 }
 0x402   :  { %v2015_v1 = vsub.f32 %v15285_v10, %v1923_v52 }
 0x403   :  { %v1920_v27 = vpop.xlane.xlu0 %1919 }
 0x404   :  { %v2048_v3 = vmul.f32 1.442695, %v2015_v1  ;;  %v2014_v14 = vsub.f32 %v15292_v55, %v1920_v27 }
 0x406   :  { %13549 = vpow2.f32 %v2048_v3  ;;  %v2046_v42 = vmul.f32 1.442695, %v2014_v14 }
 0x407   :  { %v1929_v34 = vpop.xlane.xlu0 %1928 }
 0x408   :  { %13551 = vpow2.f32 %v2046_v42  ;;  %v2017_v38 = vsub.f32 %v15299_v18, %v1929_v34 }
 0x40a   :  { %v2052_v62 = vmul.f32 1.442695, %v2017_v38  ;;  %v12471_v59 = vpop.f32.mrf.mxu1 }
 0x40b   :  { %v15526_v61 = vadd.f32 %v12471_v59, %v15278_v33  ;;  %v1926_v2 = vpop.xlane.xlu0 %1925 }
 0x40c   :  { %13553 = vpow2.f32 %v2052_v62  ;;  %v1899_v48 = vpop.f32.mrf.mxu1  ;;  %v2016_v10 = vsub.f32 %v15308_v11, %v1926_v2 }
 0x40d   :  { %v15530_v52 = vadd.f32 %v1899_v48, %v15282_v56  ;;  %v2005_v55 = vsel %vm117_vm0, %v15526_v61, -inf }
 0x40e   :  { %v2050_v14 = vmul.f32 1.442695, %v2016_v10  ;;  %2006 = vmax.xlane.f32.xlu1 %v2005_v55  ;;  %v12474_v3 = vpop.f32.mrf.mxu1 }
 0x40f   :  { %v15535_v18 = vadd.f32 %v12474_v3, %v15287_v19  ;;  %v2002_v38 = vsel %vm117_vm0, %v15530_v52, -inf }
 0x410   :  { %13555 = vpow2.f32 %v2050_v14  ;;  %v1909_v33 = vpop.f32.mrf.mxu1  ;;  %2003 = vmax.xlane.f32.xlu0 %v2002_v38 }
 0x411   :  { %v15540_v62 = vadd.f32 %v1909_v33, %v15303_v37  ;;  %v2011_v56 = vsel %vm117_vm0, %v15535_v18, -inf  ;;  %v1935_v48 = vpop.xlane.xlu0 %1934 }
 0x412   :  { %2012 = vmax.xlane.f32.xlu1 %v2011_v56  ;;  %v2019_v42 = vsub.f32 %v15321_v7, %v1935_v48 }
 0x413   :  { %v15545_v59 = vpop.eup %13549  ;;  %v2008_v19 = vsel %vm117_vm0, %v15540_v62, -inf }
 0x414   :  { %v2056_v11 = vmul.f32 1.442695, %v2019_v42  ;;  %2009 = vmax.xlane.f32.xlu0 %v2008_v19  ;;  %v2113_v27 = vsel %vm117_vm0, %v15545_v59, 0.0 }
 0x415   :  { %v15551_v2 = vpop.eup %13551  ;;  %v1932_v37 = vpop.xlane.xlu0 %1931 }
 0x416   :  { %13557 = vpow2.f32 %v2056_v11  ;;  %2114 = vadd.xlane.f32.xlu1 %v2113_v27  ;;  %v2018_v1 = vsub.f32 %v15324_v20, %v1932_v37  ;;  %v2110_v7 = vsel %vm117_vm0, %v15551_v2, 0.0 }
 0x418   :  { %v2054_v34 = vmul.f32 1.442695, %v2018_v1  ;;  %2111 = vadd.xlane.f32.xlu0 %v2110_v7 }
 0x419   :  { %v15556_v10 = vpop.eup %13553  ;;  %v1941_v55 = vpop.xlane.xlu0 %1940 }
 0x41a   :  { %13559 = vpow2.f32 %v2054_v34  ;;  %v2021_v14 = vsub.f32 %v15333_v17, %v1941_v55  ;;  %v2119_v3 = vsel %vm117_vm0, %v15556_v10, 0.0 }
 0x41b   :  { %2120 = vadd.xlane.f32.xlu1 %v2119_v3 }
 0x41c   :  { %v2060_v38 = vmul.f32 1.442695, %v2021_v14 }
 0x41d   :  { %v15561_v33 = vpop.eup %13555  ;;  %v1938_v56 = vpop.xlane.xlu0 %1937 }
 0x41e   :  { %13561 = vpow2.f32 %v2060_v38  ;;  %v2020_v20 = vsub.f32 %v15340_v54, %v1938_v56  ;;  %v2116_v48 = vsel %vm117_vm0, %v15561_v33, 0.0 }
 0x41f   :  { %2117 = vadd.xlane.f32.xlu0 %v2116_v48 }
 0x420   :  { %v2058_v42 = vmul.f32 1.442695, %v2020_v20 }
 0x422   :  { %13563 = vpow2.f32 %v2058_v42 }
 0x423   :  { %v15566_v19 = vpop.eup %13557 }
 0x424   :  { %v2125_v17 = vsel %vm117_vm0, %v15566_v19, 0.0 }
 0x425   :  { %2126 = vadd.xlane.f32.xlu0 %v2125_v17 }
 0x426   :  { %v1971_v11 = vpop.xlane.xlu1 %1970 }
 0x427   :  { %v15570_v27 = vpop.eup %13559  ;;  %v2031_v37 = vsub.f32 %v15355_v57, %v1971_v11 }
 0x428   :  { %v2122_v54 = vsel %vm117_vm0, %v15570_v27, 0.0 }
 0x429   :  { %v2080_v1 = vmul.f32 1.442695, %v2031_v37  ;;  %2123 = vadd.xlane.f32.xlu0 %v2122_v54 }
 0x42a   :  { %v1968_v7 = vpop.xlane.xlu1 %1967 }
 0x42b   :  { %v15575_v34 = vpop.eup %13561  ;;  %13565 = vpow2.f32 %v2080_v1  ;;  %v2030_v55 = vsub.f32 %v15358_v47, %v1968_v7 }
 0x42c   :  { %v2131_v14 = vsel %vm117_vm0, %v15575_v34, 0.0 }
 0x42d   :  { %v2078_v3 = vmul.f32 1.442695, %v2030_v55  ;;  %2132 = vadd.xlane.f32.xlu0 %v2131_v14 }
 0x42e   :  { %v1977_v38 = vpop.xlane.xlu1 %1976 }
 0x42f   :  { %v15580_v56 = vpop.eup %13563  ;;  %13567 = vpow2.f32 %v2078_v3  ;;  %v2033_v57 = vsub.f32 %v15367_v21, %v1977_v38 }
 0x430   :  { %v2128_v20 = vsel %vm117_vm0, %v15580_v56, 0.0 }
 0x431   :  { %v2084_v48 = vmul.f32 1.442695, %v2033_v57  ;;  %2129 = vadd.xlane.f32.xlu0 %v2128_v20 }
 0x432   :  { %v1974_v42 = vpop.xlane.xlu1 %1973 }
 0x433   :  { %13569 = vpow2.f32 %v2084_v48  ;;  %v2032_v47 = vsub.f32 %v15374_v6, %v1974_v42 }
 0x435   :  { %v2082_v17 = vmul.f32 1.442695, %v2032_v47 }
 0x437   :  { %13571 = vpow2.f32 %v2082_v17  ;;  %v1995_v11 = vpop.xlane.xlu1 %1994 }
 0x438   :  { %v15586_v37 = vpop.eup %13565  ;;  %v2039_v54 = vsub.f32 %v15387_v13, %v1995_v11 }
 0x439   :  { %v2161_v1 = vsel %vm117_vm0, %v15586_v37, 0.0 }
 0x43a   :  { %v2096_v21 = vmul.f32 1.442695, %v2039_v54  ;;  %2162 = vadd.xlane.f32.xlu1 %v2161_v1 }
 0x43b   :  { %v1992_v7 = vpop.xlane.xlu1 %1991 }
 0x43c   :  { %v15591_v55 = vpop.eup %13567  ;;  %13573 = vpow2.f32 %v2096_v21  ;;  %v2038_v14 = vsub.f32 %v15390_v39, %v1992_v7 }
 0x43d   :  { %v1998_v3 = vpop.xlane.xlu0 %1997  ;;  %v2158_v6 = vsel %vm117_vm0, %v15591_v55, 0.0 }
 0x43e   :  { %v2094_v38 = vmul.f32 1.442695, %v2038_v14  ;;  %v2040_v57 = vsub.f32 %v15402_v8, %v1998_v3  ;;  %2159 = vadd.xlane.f32.xlu1 %v2158_v6 }
 0x43f   :  { %v2001_v13 = vpop.xlane.xlu1 %2000 }
 0x440   :  { %v15597_v20 = vpop.eup %13569  ;;  %13575 = vpow2.f32 %v2094_v38  ;;  %v2098_v48 = vmul.f32 1.442695, %v2040_v57  ;;  %v2041_v42 = vsub.f32 %v15399_v29, %v2001_v13 }
 0x441   :  { %v1959_v47 = vpop.xlane.xlu0 %1958  ;;  %v2167_v17 = vsel %vm117_vm0, %v15597_v20, 0.0 }
 0x442   :  { %13577 = vpow2.f32 %v2098_v48  ;;  %v2100_v39 = vmul.f32 1.442695, %v2041_v42  ;;  %v2027_v11 = vsub.f32 %v15407_v53, %v1959_v47  ;;  %2168 = vadd.xlane.f32.xlu1 %v2167_v17 }
 0x443   :  { %v1947_v54 = vpop.xlane.xlu1 %1946 }
 0x444   :  { %v15603_v1 = vpop.eup %13571  ;;  %13579 = vpow2.f32 %v2100_v39  ;;  %v2072_v8 = vmul.f32 1.442695, %v2027_v11  ;;  %v2023_v21 = vsub.f32 %v15414_v51, %v1947_v54 }
 0x445   :  { %v1956_v7 = vpop.xlane.xlu0 %1955  ;;  %v2164_v29 = vsel %vm117_vm0, %v15603_v1, 0.0 }
 0x446   :  { %13581 = vpow2.f32 %v2072_v8  ;;  %v2064_v14 = vmul.f32 1.442695, %v2023_v21  ;;  %v2026_v3 = vsub.f32 %v15421_v63, %v1956_v7  ;;  %2165 = vadd.xlane.f32.xlu1 %v2164_v29 }
 0x447   :  { %v1944_v6 = vpop.xlane.xlu1 %1943 }
 0x448   :  { %13583 = vpow2.f32 %v2064_v14  ;;  %v2070_v53 = vmul.f32 1.442695, %v2026_v3  ;;  %v2022_v38 = vsub.f32 %v15426_v50, %v1944_v6 }
 0x449   :  { %v15610_v57 = vpop.eup %13573  ;;  %v1965_v13 = vpop.xlane.xlu0 %1964 }
 0x44a   :  { %13585 = vpow2.f32 %v2070_v53  ;;  %v2062_v48 = vmul.f32 1.442695, %v2022_v38  ;;  %v2185_v51 = vsel %vm117_vm0, %v15610_v57, 0.0  ;;  %v2029_v17 = vsub.f32 %v15433_v16, %v1965_v13 }
 0x44b   :  { %v1953_v42 = vpop.xlane.xlu1 %1952  ;;  %2186 = vadd.xlane.f32.xlu1 %v2185_v51 }
 0x44c   :  { %13587 = vpow2.f32 %v2062_v48  ;;  %v2025_v47 = vsub.f32 %v15440_v43, %v1953_v42  ;;  %v2076_v14 = vmul.f32 1.442695, %v2029_v17 }
 0x44d   :  { %v15615_v63 = vpop.eup %13575  ;;  %v1962_v39 = vpop.xlane.xlu0 %1961 }
 0x44e   :  { %v2068_v11 = vmul.f32 1.442695, %v2025_v47  ;;  %v2028_v50 = vsub.f32 %v15445_v9, %v1962_v39  ;;  %v2182_v54 = vsel %vm117_vm0, %v15615_v63, 0.0 }
 0x44f   :  { %v15621_v8 = vpop.eup %13577  ;;  %v1950_v21 = vpop.xlane.xlu1 %1949  ;;  %2183 = vadd.xlane.f32.xlu1 %v2182_v54 }
 0x450   :  { %13589 = vpow2.f32 %v2068_v11  ;;  %v2074_v7 = vmul.f32 1.442695, %v2028_v50  ;;  %v2024_v29 = vsub.f32 %v15452_v30, %v1950_v21  ;;  %v2188_v16 = vsel %vm117_vm0, %v15621_v8, 0.0 }
 0x451   :  { %v15624_v43 = vpop.eup %13579  ;;  %v1983_v3 = vpop.xlane.xlu0 %1982 }
 0x452   :  { %13591 = vpow2.f32 %v2074_v7  ;;  %v2066_v9 = vmul.f32 1.442695, %v2024_v29  ;;  %v2035_v6 = vsub.f32 %v15459_v4, %v1983_v3  ;;  %v2191_v53 = vsel %vm117_vm0, %v15624_v43, 0.0 }
 0x453   :  { %v15631_v38 = vpop.eup %13581  ;;  %v1989_v13 = vpop.xlane.xlu1 %1988  ;;  %2192 = vadd.xlane.f32.xlu0 %v2191_v53  ;;  %2189 = vadd.xlane.f32.xlu1 %v2188_v16 }
 0x454   :  { %13593 = vpow2.f32 %v2066_v9  ;;  %v2088_v48 = vmul.f32 1.442695, %v2035_v6  ;;  %v2037_v51 = vsub.f32 %v15464_v12, %v1989_v13  ;;  %v2149_v17 = vsel %vm117_vm0, %v15631_v38, 0.0 }
 0x455   :  { %v15633_v30 = vpop.eup %13583  ;;  %v1980_v42 = vpop.xlane.xlu0 %1979  ;;  %13595 = vpow2.f32 %v2076_v14 }
 0x456   :  { %v2034_v47 = vsub.f32 %v15471_v60, %v1980_v42  ;;  %v2137_v4 = vsel %vm117_vm0, %v15633_v30, 0.0  ;;  %13597 = vpow2.f32 %v2088_v48  ;;  %v2092_v54 = vmul.f32 1.442695, %v2037_v51 }
 0x457   :  { %v15641_v39 = vpop.eup %13585  ;;  %2138 = vadd.xlane.f32.xlu1 %v2137_v4  ;;  %2150 = vadd.xlane.f32.xlu0 %v2149_v17 }
 0x458   :  { %v2086_v11 = vmul.f32 1.442695, %v2034_v47  ;;  %v2146_v7 = vsel %vm117_vm0, %v15641_v39, 0.0 }
 0x459   :  { %v15643_v50 = vpop.eup %13587  ;;  %v1986_v12 = vpop.xlane.xlu0 %1985 }
 0x45a   :  { %13599 = vpow2.f32 %v2086_v11  ;;  %v2036_v21 = vsub.f32 %v15480_v31, %v1986_v12  ;;  %v2134_v60 = vsel %vm117_vm0, %v15643_v50, 0.0 }
 0x45b   :  { %2135 = vadd.xlane.f32.xlu1 %v2134_v60  ;;  %2147 = vadd.xlane.f32.xlu0 %v2146_v7  ;;  %13601 = vpow2.f32 %v2092_v54 }
 0x45c   :  { %v2090_v29 = vmul.f32 1.442695, %v2036_v21 }
 0x45d   :  { %v15650_v14 = vpop.eup %13589 }
 0x45e   :  { %13603 = vpow2.f32 %v2090_v29  ;;  %v2143_v3 = vsel %vm117_vm0, %v15650_v14, 0.0 }
 0x45f   :  { %v15654_v16 = vpop.eup %13591  ;;  %2144 = vadd.xlane.f32.xlu1 %v2143_v3 }
 0x460   :  { %v2152_v31 = vsel %vm117_vm0, %v15654_v16, 0.0 }
 0x461   :  { %v15658_v9 = vpop.eup %13593  ;;  %2153 = vadd.xlane.f32.xlu0 %v2152_v31 }
 0x462   :  { %v2140_v6 = vsel %vm117_vm0, %v15658_v9, 0.0  ;;  %v15662_v53 = vpop.eup %13595 }
 0x463   :  { %2141 = vadd.xlane.f32.xlu1 %v2140_v6  ;;  %v15664_v13 = vpop.eup %13597  ;;  %v2155_v48 = vsel %vm117_vm0, %v15662_v53, 0.0 }
 0x464   :  { %v2173_v4 = vsel %vm117_vm0, %v15664_v13, 0.0 }
 0x467   :  { %v15668_v51 = vpop.eup %13599  ;;  %2156 = vadd.xlane.f32.xlu1 %v2155_v48 }
 0x468   :  { %v2170_v42 = vsel %vm117_vm0, %v15668_v51, 0.0  ;;  %v15672_v47 = vpop.eup %13601 }
 0x469   :  { %2171 = vadd.xlane.f32.xlu0 %v2170_v42  ;;  %v2179_v54 = vsel %vm117_vm0, %v15672_v47, 0.0 }
 0x46b   :  { %v15676_v17 = vpop.eup %13603  ;;  %2174 = vadd.xlane.f32.xlu1 %v2173_v4 }
 0x46c   :  { %v2176_v11 = vsel %vm117_vm0, %v15676_v17, 0.0 }
 0x46d   :  { %2177 = vadd.xlane.f32.xlu0 %v2176_v11 }
 0x46f   :  { %2180 = vadd.xlane.f32.xlu1 %v2179_v54 }
 0x480   :  { %3747 = vrot.lane.b32.xlu1 %v14829_v22, %s14178_s28 }
 0x497   :  { %v2007_v12 = vpop.xlane.xlu1 %2006 }
 0x498   :  { %v2043_v21 = vsub.f32 %v15526_v61, %v2007_v12 }
 0x499   :  { %v2004_v60 = vpop.xlane.xlu0 %2003 }
 0x49a   :  { %v2104_v7 = vmul.f32 1.442695, %v2043_v21  ;;  %v2042_v29 = vsub.f32 %v15530_v52, %v2004_v60 }
 0x49b   :  { %v2013_v3 = vpop.xlane.xlu1 %2012 }
 0x49c   :  { %13605 = vpow2.f32 %v2104_v7  ;;  %v2102_v31 = vmul.f32 1.442695, %v2042_v29  ;;  %v2045_v6 = vsub.f32 %v15535_v18, %v2013_v3 }
 0x49d   :  { %v15687_v48 = vpop.xlane.xlu0 %2009 }
 0x49e   :  { %13607 = vpow2.f32 %v2102_v31  ;;  %v2108_v42 = vmul.f32 1.442695, %v2045_v6 }
 0x49f   :  { %v2115_v4 = vpop.xlane.xlu1 %2114 }
 0x4a0   :  { %13609 = vpow2.f32 %v2108_v42 }
 0x4a1   :  { %v2112_v11 = vpop.xlane.xlu0 %2111  ;;  %13611 = vrcp.f32 %v2115_v4 }
 0x4a2   :  { %13613 = vrcp.f32 %v2112_v11 }
 0x4a4   :  { %v2121_v54 = vpop.xlane.xlu1 %2120 }
 0x4a5   :  { %13615 = vrcp.f32 %v2121_v54 }
 0x4a8   :  { %v2118_v61 = vpop.xlane.xlu0 %2117 }
 0x4a9   :  { %v15689_v12 = vpop.eup %13605  ;;  %13617 = vrcp.f32 %v2118_v61 }
 0x4aa   :  { %v2197_v52 = vsel %vm117_vm0, %v15689_v12, 0.0 }
 0x4ab   :  { %v15693_v21 = vpop.eup %13607  ;;  %2198 = vadd.xlane.f32.xlu0 %v2197_v52 }
 0x4ac   :  { %v2194_v18 = vsel %vm117_vm0, %v15693_v21, 0.0 }
 0x4ad   :  { %v15697_v60 = vpop.eup %13609  ;;  %2195 = vadd.xlane.f32.xlu1 %v2194_v18 }
 0x4ae   :  { %v2127_v7 = vpop.xlane.xlu0 %2126  ;;  %v13612_v29 = vpop.eup %13611  ;;  %v2203_v31 = vsel %vm117_vm0, %v15697_v60, 0.0 }
 0x4af   :  { %v13614_v3 = vpop.eup %13613  ;;  %v2239_v42 = vmul.f32 %v13612_v29, %v15545_v59  ;;  %13619 = vrcp.f32 %v2127_v7 }
 0x4b0   :  { %v2238_v6 = vmul.f32 %v13614_v3, %v15551_v2 }
 0x4b1   :  { %2204 = vadd.xlane.f32.xlu1 %v2203_v31 }
 0x4b2   :  { %v2124_v4 = vpop.xlane.xlu0 %2123  ;;  %12483 = vmatprep.mubr.msk.f32.mxu0 %vm117_vm0, %v2238_v6  ;;  %v13616_v11 = vpop.eup %13615 }
 0x4b3   :  { %13621 = vrcp.f32 %v2124_v4  ;;  %12484 = vmatmul.mubr.msk.f32.vlgmr.msra.gmra.mxu0 %vm117_vm0, %v2239_v42  ;;  %v2241_v59 = vmul.f32 %v13616_v11, %v15556_v10  ;;  %v19264_v42 = vld [vmem:[#allocation74_spill] sm:$0xff] }
 0x4b4   :  { %12490 = vmatpush3.msra.mxu0 %v15260_v0 }
 0x4b5   :  { %12491 = vmatprep.subr.mxu0 %v15244_v49 }
 0x4b6   :  { %v13618_v54 = vpop.eup %13617  ;;  %v2133_v61 = vpop.xlane.xlu0 %2132  ;;  %12492 = vmatpush3.msra.mxu0 %v15244_v49 }
 0x4b7   :  { %v2240_v2 = vmul.f32 %v13618_v54, %v15561_v33  ;;  %12493 = vmatprep.subr.mxu0 %v15265_v28  ;;  %13623 = vrcp.f32 %v2133_v61  ;;  %v19265_v54 = vld [vmem:[#allocation55_spill] sm:$0xff] }
 0x4b8   :  { %12494 = vmatpush3.msra.mxu0 %v15265_v28 }
 0x4b9   :  { %12486 = vmatprep.mubr.msk.f32.mxu0 %vm117_vm0, %v2240_v2  ;;  %12495 = vmatprep.subr.mxu0 %v15267_v44 }
 0x4ba   :  { %12487 = vmatmul.mubr.msk.f32.gmra.mxu0 %vm117_vm0, %v2241_v59  ;;  %v2130_v0 = vpop.xlane.xlu0 %2129  ;;  %v19266_v59 = vld [vmem:[#allocation68_spill] sm:$0xff] }
 0x4bb   :  { %12496 = vmatpush3.msra.mxu0 %v15267_v44  ;;  %13625 = vrcp.f32 %v2130_v0 }
 0x4bc   :  { %12517 = vmatprep.subr.mxu0 %v15269_v15  ;;  %v13620_v49 = vpop.eup %13619 }
 0x4bd   :  { %v2243_v10 = vmul.f32 %v13620_v49, %v15566_v19  ;;  %v2044_v19 = vsub.f32 %v15540_v62, %v15687_v48  ;;  %v19267_v49 = vld [vmem:[#allocation70_spill] sm:$0xff] }
 0x4bf   :  { %v2106_v29 = vmul.f32 1.442695, %v2044_v19 }
 0x4c0   :  { %v13622_v33 = vpop.eup %13621 }
 0x4c1   :  { %3626 = vrot.lane.b32.xlu0 %v14822_v25, %s14178_s28  ;;  %v2242_v28 = vmul.f32 %v13622_v33, %v15570_v27  ;;  %13627 = vpow2.f32 %v2106_v29 }
 0x4c2   :  { %3505 = vrot.lane.b32.xlu1 %v15109_v32, %s14179_s29 }
 0x4c3   :  { %v15723_v52 = vpop.xlane.xlu1 %2162  ;;  %12497 = vmatprep.mubr.msk.f32.mxu0 %vm117_vm0, %v2242_v28 }
 0x4c4   :  { %12498 = vmatmul.mubr.msk.f32.vlgmr.msra.gmra.mxu0 %vm117_vm0, %v2243_v10  ;;  %v13624_v44 = vpop.eup %13623 }
 0x4c5   :  { %12518 = vmatpush3.msra.mxu0 %v15269_v15  ;;  %v2245_v15 = vmul.f32 %v13624_v44, %v15575_v34 }
 0x4c6   :  { %3745 = vrot.lane.b32.xlu1 %v14836_v24, %s14178_s28  ;;  %12519 = vmatprep.subr.mxu0 %v15280_v36 }
 0x4c7   :  { %v2160_v27 = vpop.xlane.xlu1 %2159  ;;  %12520 = vmatpush3.msra.mxu0 %v15280_v36 }
 0x4c8   :  { %v13626_v18 = vpop.eup %13625  ;;  %12521 = vmatprep.subr.mxu0 %v15276_v35 }
 0x4c9   :  { %12522 = vmatpush3.msra.mxu0 %v15276_v35  ;;  %v2244_v7 = vmul.f32 %v13626_v18, %v15580_v56  ;;  %v19268_v18 = vld [vmem:[#allocation56_spill] sm:$0xff] }
 0x4ca   :  { %3618 = vrot.lane.b32.xlu1 %v15034_v46, %s14179_s29  ;;  %12523 = vmatprep.subr.mxu0 %v15305_v5 }
 0x4cb   :  { %v15741_v3 = vpop.xlane.xlu1 %2168  ;;  %12524 = vmatpush3.msra.mxu0 %v15305_v5  ;;  %12500 = vmatprep.mubr.msk.f32.mxu0 %vm117_vm0, %v2244_v7 }
 0x4cc   :  { %12545 = vmatprep.subr.mxu0 %v15316_v41  ;;  %12501 = vmatmul.mubr.msk.f32.gmra.mxu0 %vm117_vm0, %v2245_v15 }
 0x4ce   :  { %3864 = vrot.lane.b32.xlu1 %v14846_v23, %s14178_s28  ;;  %v15757_v62 = vpop.eup %13627 }
 0x4cf   :  { %v2166_v35 = vpop.xlane.xlu1 %2165  ;;  %v2200_v48 = vsel %vm117_vm0, %v15757_v62, 0.0 }
 0x4d2   :  { %3622 = vrot.lane.b32.xlu1 %v15059_v40, %s14179_s29 }
 0x4d4   :  { %v15751_v36 = vpop.xlane.xlu1 %2186 }
 0x4d6   :  { %3862 = vrot.lane.b32.xlu1 %v14856_v58, %s14178_s28 }
 0x4d8   :  { %v2184_v5 = vpop.xlane.xlu1 %2183 }
 0x4da   :  { %3735 = vrot.lane.b32.xlu1 %v15156_v26, %s14179_s29 }
 0x4dc   :  { %v15759_v34 = vpop.xlane.xlu1 %2189  ;;  %v15761_v56 = vpop.xlane.xlu0 %2192 }
 0x4de   :  { %3981 = vrot.lane.b32.xlu1 %v14951_v45, %s14178_s28 }
 0x4e0   :  { %v2139_v31 = vpop.xlane.xlu1 %2138  ;;  %v2151_v6 = vpop.xlane.xlu0 %2150  ;;  %2201 = vadd.xlane.f32.xlu0 %v2200_v48 }
 0x4e1   :  { %13629 = vrcp.f32 %v2139_v31 }
 0x4e2   :  { %3739 = vrot.lane.b32.xlu1 %v19264_v42, %s14179_s29  ;;  %13631 = vrcp.f32 %v2151_v6  ;;  %v19270_v6 = vld [vmem:[#allocation80_spill] sm:$0xff] }
 0x4e4   :  { %v2136_v4 = vpop.xlane.xlu1 %2135  ;;  %v2148_v11 = vpop.xlane.xlu0 %2147 }
 0x4e5   :  { %13633 = vrcp.f32 %v2136_v4  ;;  %v19273_v4 = vld [vmem:[#allocation85_spill] sm:$0xff] }
 0x4e6   :  { %13635 = vrcp.f32 %v2148_v11  ;;  %3979 = vrot.lane.b32.xlu1 %v19265_v54, %s14178_s28 }
 0x4e8   :  { %v2145_v61 = vpop.xlane.xlu1 %2144 }
 0x4ea   :  { %v2154_v2 = vpop.xlane.xlu0 %2153  ;;  %3852 = vrot.lane.b32.xlu1 %v19266_v59, %s14179_s29 }
 0x4eb   :  { %13637 = vrcp.f32 %v2154_v2  ;;  %v19275_v2 = vld [vmem:[#allocation87_spill] sm:$0xff] }
 0x4ec   :  { %v2142_v0 = vpop.xlane.xlu1 %2141 }
 0x4ed   :  { %13639 = vrcp.f32 %v2142_v0 }
 0x4ee   :  { %3854 = vrot.lane.b32.xlu1 %v19267_v49, %s14179_s29  ;;  %13641 = vrcp.f32 %v2160_v27  ;;  %v13630_v33 = vpop.eup %13629  ;;  %v19342_v49 = vld [vmem:[#allocation107_spill] sm:$0xff] }
 0x4ef   :  { %13643 = vrcp.f32 %v2145_v61  ;;  %v13632_v10 = vpop.eup %13631  ;;  %v2247_v29 = vmul.f32 %v13630_v33, %v15633_v30 }
 0x4f0   :  { %v2157_v28 = vpop.xlane.xlu1 %2156  ;;  %v2251_v31 = vmul.f32 %v13632_v10, %v15631_v38  ;;  %v19271_v38 = vld [vmem:[#allocation76_spill] sm:$0xff]  ;;  %v19277_v10 = vld [vmem:[#allocation78_spill] sm:$0xff] }
 0x4f1   :  { %13645 = vrcp.f32 %v2157_v28 }
 0x4f2   :  { %v13634_v44 = vpop.eup %13633  ;;  %v2172_v19 = vpop.xlane.xlu0 %2171  ;;  %3975 = vrot.lane.b32.xlu1 %v19268_v18, %s14178_s28 }
 0x4f3   :  { %v13636_v7 = vpop.eup %13635  ;;  %13647 = vrcp.f32 %v2172_v19  ;;  %v2246_v15 = vmul.f32 %v13634_v44, %v15643_v50  ;;  %v19269_v50 = vld [vmem:[#allocation79_spill] sm:$0xff]  ;;  %v19278_v44 = vld [vmem:[#allocation30_spill] sm:$0xff] }
 0x4f4   :  { %13649 = vrcp.f32 %v15723_v52  ;;  %v2175_v48 = vpop.xlane.xlu1 %2174  ;;  %v2250_v27 = vmul.f32 %v13636_v7, %v15641_v39  ;;  %v19272_v39 = vld [vmem:[#allocation66_spill] sm:$0xff] }
 0x4f5   :  { %13651 = vrcp.f32 %v2166_v35  ;;  %12511 = vmatprep.mubr.msk.f32.mxu1 %vm117_vm0, %v2246_v15 }
 0x4f6   :  { %13653 = vrcp.f32 %v2175_v48  ;;  %12525 = vmatprep.mubr.msk.f32.mxu0 %vm117_vm0, %v2250_v27  ;;  %12512 = vmatmul.mubr.msk.f32.vlgmr.msra.gmra.mxu1 %vm117_vm0, %v2247_v29  ;;  %v2178_v30 = vpop.xlane.xlu0 %2177  ;;  %v19280_v29 = vld [vmem:[#allocation83_spill] sm:$0xff] }
 0x4f7   :  { %12526 = vmatmul.mubr.msk.f32.vlgmr.msra.gmra.mxu0 %vm117_vm0, %v2251_v31  ;;  %12532 = vmatpush3.msra.mxu1 %v19269_v50  ;;  %13655 = vrcp.f32 %v15741_v3 }
 0x4f8   :  { %v13638_v52 = vpop.eup %13637  ;;  %12546 = vmatpush3.msra.mxu0 %v15316_v41  ;;  %12533 = vmatprep.subr.mxu1 %v19270_v6  ;;  %13657 = vrcp.f32 %v2184_v5  ;;  %v2181_v11 = vpop.xlane.xlu1 %2180  ;;  %v19274_v41 = vld [vmem:[#allocation81_spill] sm:$0xff]  ;;  %v19276_v5 = vld [vmem:[#allocation82_spill] sm:$0xff] }
 0x4f9   :  { %3969 = vrot.lane.b32.xlu1 %v19271_v38, %s14179_s29  ;;  %3503 = vrot.lane.b32.xlu0 %v19272_v39, %s14179_s29  ;;  %13659 = vrcp.f32 %v2178_v30  ;;  %v2252_v3 = vmul.f32 %v13638_v52, %v15654_v16  ;;  %v19279_v16 = vld [vmem:[#allocation89_spill] sm:$0xff] }
 0x4fa   :  { %v13640_v35 = vpop.eup %13639  ;;  %12547 = vmatprep.subr.mxu0 %v19273_v4  ;;  %12534 = vmatpush3.msra.mxu1 %v19270_v6  ;;  %13661 = vrcp.f32 %v2181_v11  ;;  %v19285_v6 = vld [vmem:[#allocation15_spill] sm:$0xff] }
 0x4fb   :  { %12548 = vmatpush3.msra.mxu0 %v19273_v4  ;;  %12535 = vmatprep.subr.mxu1 %v19274_v41  ;;  %v13642_v61 = vpop.eup %13641  ;;  %v2248_v33 = vmul.f32 %v13640_v35, %v15658_v9  ;;  %13663 = vrcp.f32 %v15751_v36  ;;  %v19281_v36 = vld [vmem:[#allocation91_spill] sm:$0xff]  ;;  %v19287_v4 = vld [vmem:[#allocation86_spill] sm:$0xff] }
 0x4fc   :  { %12549 = vmatprep.subr.mxu0 %v19275_v2  ;;  %12536 = vmatpush3.msra.mxu1 %v19274_v41  ;;  %v13644_v0 = vpop.eup %13643  ;;  %v2254_v48 = vmul.f32 %v13642_v61, %v15591_v55  ;;  %13665 = vrcp.f32 %v15759_v34  ;;  %v19283_v55 = vld [vmem:[#allocation31_spill] sm:$0xff] }
 0x4fd   :  { %12550 = vmatpush3.msra.mxu0 %v19275_v2  ;;  %12537 = vmatprep.subr.mxu1 %v19276_v5  ;;  %v2249_v9 = vmul.f32 %v13644_v0, %v15650_v14  ;;  %v19282_v14 = vld [vmem:[#allocation18_spill] sm:$0xff]  ;;  %13667 = vrcp.f32 %v15761_v56  ;;  %v19284_v56 = vld [vmem:[#allocation84_spill] sm:$0xff]  ;;  %v19290_v0 = vld [vmem:[#allocation21_spill] sm:$0xff] }
 0x4fe   :  { %v13646_v28 = vpop.eup %13645  ;;  %3973 = vrot.lane.b32.xlu1 %v19277_v10, %s14179_s29  ;;  %3624 = vrot.lane.b32.xlu0 %v19278_v44, %s14178_s28  ;;  %v19289_v2 = vld [vmem:[#allocation88_spill] sm:$0xff] }
 0x4ff   :  { %12528 = vmatprep.mubr.msk.f32.mxu0 %vm117_vm0, %v2252_v3  ;;  %12551 = vmatprep.subr.mxu0 %v19279_v16  ;;  %v2253_v7 = vmul.f32 %v13646_v28, %v15662_v53  ;;  %v19288_v3 = vld [vmem:[#allocation125_spill] sm:$0xff] }
 0x500   :  { %v13648_v19 = vpop.eup %13647  ;;  %12538 = vmatpush3.msra.mxu1 %v19276_v5  ;;  %12552 = vmatpush3.msra.mxu0 %v19279_v16  ;;  %v19291_v5 = vld [vmem:[#allocation62_spill] sm:$0xff] }
 0x501   :  { %v13650_v15 = vpop.eup %13649  ;;  %12514 = vmatprep.mubr.msk.f32.mxu1 %vm117_vm0, %v2248_v33  ;;  %12559 = vmatprep.subr.mxu1 %v19280_v29  ;;  %v2258_v27 = vmul.f32 %v13648_v19, %v15668_v51  ;;  %v19292_v33 = vld [vmem:[#allocation92_spill] sm:$0xff]  ;;  %v19294_v19 = vld [vmem:[#allocation94_spill] sm:$0xff] }
 0x502   :  { %v13652_v31 = vpop.eup %13651  ;;  %12573 = vmatprep.subr.mxu0 %v19281_v36  ;;  %12515 = vmatmul.mubr.msk.f32.gmra.mxu1 %vm117_vm0, %v2249_v9  ;;  %v2255_v53 = vmul.f32 %v13650_v15, %v15586_v37  ;;  %v19297_v15 = vld [vmem:[#allocation41_spill] sm:$0xff] }
 0x503   :  { %v13654_v50 = vpop.eup %13653  ;;  %12539 = vmatprep.mubr.msk.f32.mxu1 %vm117_vm0, %v2254_v48  ;;  %4440 = vrot.lane.b32.xlu1 %v19282_v14, %s14180_s30  ;;  %v2256_v51 = vmul.f32 %v13652_v31, %v15603_v1  ;;  %v19286_v1 = vld [vmem:[#allocation39_spill] sm:$0xff]  ;;  %v19301_v48 = vld [vmem:[#allocation25_spill] sm:$0xff] }
 0x504   :  { %3616 = vrot.lane.b32.xlu0 %v19283_v55, %s14179_s29  ;;  %12529 = vmatmul.mubr.msk.f32.gmra.mxu0 %vm117_vm0, %v2253_v7  ;;  %v13656_v34 = vpop.eup %13655  ;;  %v2259_v52 = vmul.f32 %v13654_v50, %v15664_v13  ;;  %v19296_v7 = vld [vmem:[#allocation23_spill] sm:$0xff]  ;;  %v19303_v31 = vld [vmem:[#allocation97_spill] sm:$0xff] }
 0x505   :  { %12553 = vmatprep.mubr.msk.f32.mxu0 %vm117_vm0, %v2258_v27  ;;  %v13658_v30 = vpop.eup %13657  ;;  %v2257_v13 = vmul.f32 %v13656_v34, %v15597_v20  ;;  %v19302_v27 = vld [vmem:[#allocation69_spill] sm:$0xff]  ;;  %v19305_v50 = vld [vmem:[#allocation43_spill] sm:$0xff] }
 0x506   :  { %12540 = vmatmul.mubr.msk.f32.vlgmr.msra.gmra.mxu1 %vm117_vm0, %v2255_v53  ;;  %v13660_v37 = vpop.eup %13659  ;;  %v2262_v11 = vmul.f32 %v13658_v30, %v15615_v63  ;;  %v19306_v53 = vld [vmem:[#allocation102_spill] sm:$0xff]  ;;  %v19308_v34 = vld [vmem:[#allocation73_spill] sm:$0xff]  ;;  %v19310_v30 = vld [vmem:[#allocation103_spill] sm:$0xff] }
 0x507   :  { %12560 = vmatpush3.msra.mxu1 %v19280_v29  ;;  %12542 = vmatprep.mubr.msk.f32.mxu1 %vm117_vm0, %v2256_v51  ;;  %v13662_v35 = vpop.eup %13661  ;;  %v2260_v41 = vmul.f32 %v13660_v37, %v15676_v17  ;;  %v19299_v29 = vld [vmem:[#allocation95_spill] sm:$0xff]  ;;  %v19307_v51 = vld [vmem:[#allocation29_spill] sm:$0xff]  ;;  %v19311_v37 = vld [vmem:[#allocation106_spill] sm:$0xff] }
 0x508   :  { %12561 = vmatprep.subr.mxu1 %v19284_v56  ;;  %4436 = vrot.lane.b32.xlu1 %v19285_v6, %s14180_s30  ;;  %v13664_v61 = vpop.eup %13663  ;;  %v2261_v20 = vmul.f32 %v13662_v35, %v15672_v47  ;;  %v19293_v47 = vld [vmem:[#allocation90_spill] sm:$0xff]  ;;  %v19314_v35 = vld [vmem:[#allocation104_spill] sm:$0xff] }
 0x509   :  { %3743 = vrot.lane.b32.xlu0 %v19286_v1, %s14178_s28  ;;  %12562 = vmatpush3.msra.mxu1 %v19284_v56  ;;  %v13666_v63 = vpop.eup %13665  ;;  %v2263_v17 = vmul.f32 %v13664_v61, %v15610_v57  ;;  %v19295_v57 = vld [vmem:[#allocation93_spill] sm:$0xff]  ;;  %v19312_v56 = vld [vmem:[#allocation34_spill] sm:$0xff] }
 0x50a   :  { %12554 = vmatmul.mubr.msk.f32.vlgmr.msra.gmra.mxu0 %vm117_vm0, %v2259_v52  ;;  %12563 = vmatprep.subr.mxu1 %v19287_v4  ;;  %v13668_v28 = vpop.eup %13667  ;;  %v2264_v16 = vmul.f32 %v13666_v63, %v15621_v8  ;;  %v19298_v8 = vld [vmem:[#allocation96_spill] sm:$0xff]  ;;  %v19319_v61 = vld [vmem:[#allocation113_spill] sm:$0xff]  ;;  %v19322_v63 = vld [vmem:[#allocation71_spill] sm:$0xff] }
 0x50b   :  { %12574 = vmatpush3.msra.mxu0 %v19281_v36  ;;  %12543 = vmatmul.mubr.msk.f32.gmra.mxu1 %vm117_vm0, %v2257_v13  ;;  %v2265_v9 = vmul.f32 %v13668_v28, %v15624_v43  ;;  %v19300_v43 = vld [vmem:[#allocation99_spill] sm:$0xff]  ;;  %v19309_v52 = vld [vmem:[#allocation100_spill] sm:$0xff] }
 0x50c   :  { %12564 = vmatpush3.msra.mxu1 %v19287_v4  ;;  %12575 = vmatprep.subr.mxu0 %v19288_v3  ;;  %v19304_v36 = vld [vmem:[#allocation27_spill] sm:$0xff]  ;;  %v19313_v13 = vld [vmem:[#allocation44_spill] sm:$0xff] }
 0x50d   :  { %12565 = vmatprep.subr.mxu1 %v19289_v2  ;;  %12567 = vmatprep.mubr.msk.f32.mxu1 %vm117_vm0, %v2262_v11  ;;  %v19315_v4 = vld [vmem:[#allocation115_spill] sm:$0xff]  ;;  %v19316_v11 = vld [vmem:[#allocation109_spill] sm:$0xff] }
 0x50e   :  { %4549 = vrot.lane.b32.xlu1 %v19290_v0, %s14180_s30  ;;  %3620 = vrot.lane.b32.xlu0 %v19291_v5, %s14179_s29  ;;  %v19324_v28 = vld [vmem:[#allocation119_spill] sm:$0xff] }
 0x50f   :  { %12556 = vmatprep.mubr.msk.f32.mxu0 %vm117_vm0, %v2260_v41  ;;  %12576 = vmatpush3.msra.mxu0 %v19288_v3  ;;  %v19317_v41 = vld [vmem:[#allocation35_spill] sm:$0xff]  ;;  %v19318_v3 = vld [vmem:[#allocation64_spill] sm:$0xff] }
 0x510   :  { %12566 = vmatpush3.msra.mxu1 %v19289_v2  ;;  %12577 = vmatprep.subr.mxu0 %v19292_v33  ;;  %v19320_v2 = vld [vmem:[#allocation45_spill] sm:$0xff] }
 0x511   :  { %12557 = vmatmul.mubr.msk.f32.gmra.mxu0 %vm117_vm0, %v2261_v20  ;;  %12587 = vmatprep.subr.msk.mxu1 %vm993_vm1, %v19293_v47  ;;  %v19321_v20 = vld [vmem:[#allocation118_spill] sm:$0xff] }
 0x512   :  { %12578 = vmatpush3.msra.mxu0 %v19292_v33  ;;  %12568 = vmatmul.mubr.msk.f32.vlgmr.msra.gmra.mxu1 %vm117_vm0, %v2263_v17  ;;  %v15950_v17 = vpop.permute.xlu1 %3747  ;;  %v19323_v33 = vld [vmem:[#allocation116_spill] sm:$0xff] }
 0x513   :  { %12579 = vmatprep.subr.mxu0 %v19294_v19  ;;  %12588 = vmatpush3.xpose.msk.msra.mxu1 %vm993_vm1, %v19293_v47  ;;  %v19325_v47 = vld [vmem:[#allocation122_spill] sm:$0xff] }
 0x514   :  { %12570 = vmatprep.mubr.msk.f32.mxu1 %vm117_vm0, %v2264_v16  ;;  %12589 = vmatprep.subr.msk.mxu1 %vm993_vm1, %v19295_v57 }
 0x515   :  { %4545 = vrot.lane.b32.xlu1 %v19296_v7, %s14180_s30  ;;  %3741 = vrot.lane.b32.xlu0 %v19297_v15, %s14178_s28 }
 0x516   :  { %12580 = vmatpush3.msra.mxu0 %v19294_v19  ;;  %12571 = vmatmul.mubr.msk.f32.gmra.mxu1 %vm117_vm0, %v2265_v9  ;;  %v19326_v19 = vld [vmem:[#allocation75_spill] sm:$0xff] }
 0x517   :  { %12601 = vmatprep.subr.msk.mxu0 %vm993_vm1, %v19298_v8  ;;  %12590 = vmatpush3.xpose.msk.msra.mxu1 %vm993_vm1, %v19295_v57  ;;  %v19327_v57 = vld [vmem:[#allocation120_spill] sm:$0xff] }
 0x518   :  { %12591 = vmatprep.subr.msk.mxu1 %vm993_vm1, %v19299_v29  ;;  %12595 = vmatprep.mubr.msk.f32.mxu1 %vm993_vm1, %v19300_v43  ;;  %v19328_v43 = vld [vmem:[#allocation77_spill] sm:$0xff] }
 0x519   :  { %4658 = vrot.lane.b32.xlu1 %v19301_v48, %s14180_s30  ;;  %3733 = vrot.lane.b32.xlu0 %v19302_v27, %s14179_s29 }
 0x51b   :  { %12592 = vmatpush3.xpose.msk.msra.mxu1 %vm993_vm1, %v19299_v29 }
 0x51c   :  { %12593 = vmatprep.subr.msk.mxu1 %vm993_vm1, %v19303_v31 }
 0x51d   :  { %4654 = vrot.lane.b32.xlu1 %v19304_v36, %s14180_s30  ;;  %3860 = vrot.lane.b32.xlu0 %v19305_v50, %s14178_s28 }
 0x51f   :  { %12594 = vmatpush3.xpose.msk.msra.mxu1 %vm993_vm1, %v19303_v31  ;;  %v19329_v31 = vld [vmem:[#allocation16_spill] sm:$0xff] }
 0x520   :  { %12615 = vmatprep.subr.msk.mxu1 %vm993_vm1, %v19306_v53 }
 0x521   :  { %4767 = vrot.lane.b32.xlu1 %v19307_v51, %s14180_s30  ;;  %3737 = vrot.lane.b32.xlu0 %v19308_v34, %s14179_s29 }
 0x522   :  { %12596 = vmatmul.mubr.msk.f32.vlgmr.msra.gmra.mxu1 %vm993_vm1, %v19309_v52 }
 0x523   :  { %12598 = vmatprep.mubr.msk.f32.mxu1 %vm993_vm1, %v19310_v30  ;;  %12616 = vmatpush3.xpose.msk.msra.mxu1 %vm993_vm1, %v19306_v53  ;;  %v19330_v53 = vld [vmem:[#allocation19_spill] sm:$0xff] }
 0x524   :  { %12617 = vmatprep.subr.msk.mxu1 %vm993_vm1, %v19311_v37 }
 0x525   :  { %4763 = vrot.lane.b32.xlu1 %v19312_v56, %s14180_s30  ;;  %3858 = vrot.lane.b32.xlu0 %v19313_v13, %s14178_s28 }
 0x526   :  { %12599 = vmatmul.mubr.msk.f32.gmra.mxu1 %vm993_vm1, %v19314_v35 }
 0x527   :  { %12618 = vmatpush3.xpose.msk.msra.mxu1 %vm993_vm1, %v19311_v37  ;;  %12623 = vmatprep.mubr.msk.f32.mxu1 %vm993_vm1, %v19315_v4  ;;  %v19331_v37 = vld [vmem:[#allocation20_spill] sm:$0xff] }
 0x528   :  { %12619 = vmatprep.subr.msk.mxu1 %vm993_vm1, %v19316_v11 }
 0x529   :  { %4876 = vrot.lane.b32.xlu1 %v19317_v41, %s14180_s30  ;;  %3850 = vrot.lane.b32.xlu0 %v19318_v3, %s14179_s29 }
 0x52b   :  { %12620 = vmatpush3.xpose.msk.msra.mxu1 %vm993_vm1, %v19316_v11  ;;  %v19332_v11 = vld [vmem:[#allocation22_spill] sm:$0xff] }
 0x52c   :  { %12621 = vmatprep.subr.msk.mxu1 %vm993_vm1, %v19319_v61 }
 0x52d   :  { %4872 = vrot.lane.b32.xlu1 %v19278_v44, %s14180_s30  ;;  %3977 = vrot.lane.b32.xlu0 %v19320_v2, %s14178_s28 }
 0x52f   :  { %12622 = vmatpush3.xpose.msk.msra.mxu1 %vm993_vm1, %v19319_v61  ;;  %v19333_v61 = vld [vmem:[#allocation98_spill] sm:$0xff] }
 0x530   :  { %12643 = vmatprep.subr.msk.mxu1 %vm993_vm1, %v19321_v20 }
 0x531   :  { %4985 = vrot.lane.b32.xlu1 %v14836_v24, %s14180_s30  ;;  %3856 = vrot.lane.b32.xlu0 %v19322_v63, %s14179_s29 }
 0x532   :  { %12624 = vmatmul.mubr.msk.f32.vlgmr.msra.gmra.mxu1 %vm993_vm1, %v19323_v33  ;;  %v19334_v33 = vld [vmem:[#allocation24_spill] sm:$0xff] }
 0x533   :  { %12626 = vmatprep.mubr.msk.f32.mxu1 %vm993_vm1, %v19324_v28  ;;  %12644 = vmatpush3.xpose.msk.msra.mxu1 %vm993_vm1, %v19321_v20  ;;  %v19336_v28 = vld [vmem:[#allocation26_spill] sm:$0xff] }
 0x534   :  { %12645 = vmatprep.subr.msk.mxu1 %vm993_vm1, %v19325_v47  ;;  %v2199_v16 = vpop.xlane.xlu0 %2198 }
 0x535   :  { %4983 = vrot.lane.b32.xlu1 %v19286_v1, %s14180_s30  ;;  %3967 = vrot.lane.b32.xlu0 %v19326_v19, %s14179_s29  ;;  %13669 = vrcp.f32 %v2199_v16  ;;  %v19339_v16 = vld [vmem:[#allocation110_spill] sm:$0xff] }
 0x536   :  { %12627 = vmatmul.mubr.msk.f32.gmra.mxu1 %vm993_vm1, %v19327_v57  ;;  %v2196_v9 = vpop.xlane.xlu1 %2195 }
 0x537   :  { %12646 = vmatpush3.xpose.msk.msra.mxu1 %vm993_vm1, %v19325_v47  ;;  %13671 = vrcp.f32 %v2196_v9  ;;  %v19338_v47 = vld [vmem:[#allocation28_spill] sm:$0xff] }
 0x538   :  { %v3627_v29 = vpop.permute.xlu0 %3626  ;;  %v19340_v9 = vld [vmem:[#allocation32_spill] sm:$0xff] }
 0x539   :  { %4981 = vrot.lane.b32.xlu1 %v19297_v15, %s14180_s30  ;;  %3971 = vrot.lane.b32.xlu0 %v19328_v43, %s14179_s29 }
 0x53a   :  { %12647 = vmatprep.subr.msk.mxu1 %vm993_vm1, %v3627_v29  ;;  %v2205_v20 = vpop.xlane.xlu1 %2204 }
 0x53b   :  { %12648 = vmatpush3.xpose.msk.msra.mxu1 %vm993_vm1, %v3627_v29  ;;  %13673 = vrcp.f32 %v2205_v20 }
 0x53d   :  { %5094 = vrot.lane.b32.xlu1 %v14856_v58, %s14180_s30  ;;  %4442 = vrot.lane.b32.xlu0 %v19329_v31, %s14180_s30 }
 0x541   :  { %5090 = vrot.lane.b32.xlu1 %v19313_v13, %s14180_s30  ;;  %4438 = vrot.lane.b32.xlu0 %v19330_v53, %s14180_s30 }
 0x542   :  { %v13670_v52 = vpop.eup %13669 }
 0x543   :  { %v2267_v4 = vmul.f32 %v13670_v52, %v15689_v12  ;;  %v19335_v12 = vld [vmem:[#allocation101_spill] sm:$0xff] }
 0x544   :  { %v13672_v30 = vpop.eup %13671  ;;  %v19341_v52 = vld [vmem:[#allocation33_spill] sm:$0xff] }
 0x545   :  { %4551 = vrot.lane.b32.xlu0 %v19331_v37, %s14180_s30  ;;  %v2266_v35 = vmul.f32 %v13672_v30, %v15693_v21  ;;  %v16000_v21 = vpop.permute.xlu1 %3505 }
 0x547   :  { %12581 = vmatprep.mubr.msk.f32.mxu0 %vm117_vm0, %v2266_v35 }
 0x548   :  { %12582 = vmatmul.mubr.msk.f32.vlgmr.msra.gmra.mxu0 %vm117_vm0, %v2267_v4  ;;  %v13674_v20 = vpop.eup %13673 }
 0x549   :  { %4547 = vrot.lane.b32.xlu0 %v19332_v11, %s14180_s30  ;;  %12602 = vmatpush3.xpose.msk.msra.mxu0 %vm993_vm1, %v19298_v8  ;;  %v19337_v8 = vld [vmem:[#allocation105_spill] sm:$0xff]  ;;  %v16014_v57 = vpop.permute.xlu1 %3745  ;;  %v2269_v38 = vmul.f32 %v13674_v20, %v15697_v60  ;;  %v19344_v60 = vld [vmem:[#allocation111_spill] sm:$0xff] }
 0x54a   :  { %12603 = vmatprep.subr.msk.mxu0 %vm993_vm1, %v19333_v61  ;;  %v19349_v20 = vld [vmem:[#allocation121_spill] sm:$0xff] }
 0x54d   :  { %4660 = vrot.lane.b32.xlu0 %v19334_v33, %s14180_s30  ;;  %12604 = vmatpush3.xpose.msk.msra.mxu0 %vm993_vm1, %v19333_v61  ;;  %v3619_v29 = vpop.permute.xlu1 %3618 }
 0x54e   :  { %12605 = vmatprep.subr.msk.mxu0 %vm993_vm1, %v19335_v12 }
 0x551   :  { %4656 = vrot.lane.b32.xlu0 %v19336_v28, %s14180_s30  ;;  %12606 = vmatpush3.xpose.msk.msra.mxu0 %vm993_vm1, %v19335_v12  ;;  %v3865_v30 = vpop.permute.xlu1 %3864 }
 0x552   :  { %12607 = vmatprep.subr.msk.mxu0 %vm993_vm1, %v19337_v8 }
 0x555   :  { %4769 = vrot.lane.b32.xlu0 %v19338_v47, %s14180_s30  ;;  %12608 = vmatpush3.xpose.msk.msra.mxu0 %vm993_vm1, %v19337_v8  ;;  %v3623_v35 = vpop.permute.xlu1 %3622 }
 0x556   :  { %12629 = vmatprep.subr.msk.mxu0 %vm993_vm1, %v19339_v16 }
 0x559   :  { %4765 = vrot.lane.b32.xlu0 %v19340_v9, %s14180_s30  ;;  %v3863_v12 = vpop.permute.xlu1 %3862 }
 0x55d   :  { %4878 = vrot.lane.b32.xlu0 %v19341_v52, %s14180_s30  ;;  %v16031_v43 = vpop.permute.xlu1 %3735 }
 0x561   :  { %4874 = vrot.lane.b32.xlu0 %v14822_v25, %s14180_s30 }
 0x565   :  { %4987 = vrot.lane.b32.xlu0 %v14829_v22, %s14180_s30 }
 0x569   :  { %5096 = vrot.lane.b32.xlu0 %v14846_v23, %s14180_s30  ;;  %v2202_v4 = vpop.xlane.xlu0 %2201 }
 0x56a   :  { %13675 = vrcp.f32 %v2202_v4 }
 0x56d   :  { %5092 = vrot.lane.b32.xlu0 %v19305_v50, %s14180_s30  ;;  %v3504_v61 = vpop.permute.xlu0 %3503 }
 0x571   :  { %v3625_v8 = vpop.permute.xlu0 %3624 }
 0x572   :  { %12649 = vmatprep.subr.msk.mxu1 %vm993_vm1, %v3625_v8 }
 0x573   :  { %12650 = vmatpush3.xpose.msk.msra.mxu1 %vm993_vm1, %v3625_v8  ;;  %v3982_v8 = vpop.permute.xlu1 %3981 }
 0x574   :  { %12671 = vmatprep.subr.msk.mxu1 %vm993_vm1, %v3865_v30 }
 0x576   :  { %v3617_v10 = vpop.permute.xlu0 %3616 }
 0x577   :  { %v13676_v19 = vpop.eup %13675  ;;  %12651 = vmatprep.mubr.msk.f32.mxu1 %vm993_vm1, %v3617_v10  ;;  %v19343_v10 = vld [vmem:[#allocation108_spill] sm:$0xff] }
 0x578   :  { %12652 = vmatmul.mubr.msk.f32.vlgmr.msra.gmra.mxu1 %vm993_vm1, %v3619_v29  ;;  %v2268_v4 = vmul.f32 %v13676_v19, %v15757_v62  ;;  %v3740_v19 = vpop.permute.xlu1 %3739  ;;  %v19345_v29 = vld [vmem:[#allocation114_spill] sm:$0xff] }
 0x579   :  { %12672 = vmatpush3.xpose.msk.msra.mxu1 %vm993_vm1, %v3865_v30 }
 0x57a   :  { %12673 = vmatprep.subr.msk.mxu1 %vm993_vm1, %v3863_v12  ;;  %12584 = vmatprep.mubr.msk.f32.mxu0 %vm117_vm0, %v2268_v4 }
 0x57b   :  { %v3744_v63 = vpop.permute.xlu0 %3743  ;;  %12585 = vmatmul.mubr.msk.f32.gmra.mxu0 %vm117_vm0, %v2269_v38  ;;  %v19347_v38 = vld [vmem:[#allocation123_spill] sm:$0xff] }
 0x57c   :  { %12609 = vmatprep.mubr.msk.f32.mxu0 %vm993_vm1, %v19342_v49  ;;  %v19346_v49 = vld [vmem:[#allocation112_spill] sm:$0xff]  ;;  %v3980_v30 = vpop.permute.xlu1 %3979 }
 0x57d   :  { %12674 = vmatpush3.xpose.msk.msra.mxu1 %vm993_vm1, %v3863_v12 }
 0x57f   :  { %12610 = vmatmul.mubr.msk.f32.vlgmr.msra.gmra.mxu0 %vm993_vm1, %v19343_v10 }
 0x580   :  { %v3621_v62 = vpop.permute.xlu0 %3620  ;;  %12630 = vmatpush3.xpose.msk.msra.mxu0 %vm993_vm1, %v19339_v16  ;;  %12612 = vmatprep.mubr.msk.f32.mxu0 %vm993_vm1, %v19344_v60  ;;  %v19348_v16 = vld [vmem:[#allocation117_spill] sm:$0xff]  ;;  %v3853_v4 = vpop.permute.xlu1 %3852 }
 0x581   :  { %12654 = vmatprep.mubr.msk.f32.mxu1 %vm993_vm1, %v3621_v62  ;;  %12631 = vmatprep.subr.msk.mxu0 %vm993_vm1, %v19345_v29  ;;  %v19350_v62 = vld [vmem:[#allocation124_spill] sm:$0xff] }
 0x582   :  { %12655 = vmatmul.mubr.msk.f32.gmra.mxu1 %vm993_vm1, %v3623_v35 }
 0x583   :  { %12613 = vmatmul.mubr.msk.f32.gmra.mxu0 %vm993_vm1, %v19346_v49 }
 0x584   :  { %12632 = vmatpush3.xpose.msk.msra.mxu0 %vm993_vm1, %v19345_v29  ;;  %12637 = vmatprep.mubr.msk.f32.mxu0 %vm993_vm1, %v19347_v38  ;;  %v3855_v60 = vpop.permute.xlu1 %3854 }
 0x585   :  { %12633 = vmatprep.subr.msk.mxu0 %vm993_vm1, %v19348_v16 }
 0x587   :  { %v3742_v12 = vpop.permute.xlu0 %3741 }
 0x588   :  { %12634 = vmatpush3.xpose.msk.msra.mxu0 %vm993_vm1, %v19348_v16  ;;  %v3976_v49 = vpop.permute.xlu1 %3975 }
 0x589   :  { %12635 = vmatprep.subr.msk.mxu0 %vm993_vm1, %v19349_v20 }
 0x58b   :  { %v3734_v35 = vpop.permute.xlu0 %3733 }
 0x58c   :  { %12636 = vmatpush3.xpose.msk.msra.mxu0 %vm993_vm1, %v19349_v20 }
 0x58d   :  { %12657 = vmatprep.subr.msk.mxu0 %vm993_vm1, %v15950_v17 }
 0x58f   :  { %v3861_v10 = vpop.permute.xlu0 %3860  ;;  %12638 = vmatmul.mubr.msk.f32.vlgmr.msra.gmra.mxu0 %vm993_vm1, %v19350_v62 }
 0x590   :  { %12675 = vmatprep.subr.msk.mxu1 %vm993_vm1, %v3861_v10  ;;  %12640 = vmatprep.mubr.msk.f32.mxu0 %vm993_vm1, %v3504_v61 }
 0x591   :  { %12676 = vmatpush3.xpose.msk.msra.mxu1 %vm993_vm1, %v3861_v10  ;;  %12658 = vmatpush3.xpose.msk.msra.mxu0 %vm993_vm1, %v15950_v17 }
 0x592   :  { %12659 = vmatprep.subr.msk.mxu0 %vm993_vm1, %v16014_v57 }
 0x593   :  { %v3738_v29 = vpop.permute.xlu0 %3737  ;;  %12641 = vmatmul.mubr.msk.f32.gmra.mxu0 %vm993_vm1, %v16000_v21  ;;  %v3970_v21 = vpop.permute.xlu1 %3969 }
 0x594   :  { %12665 = vmatprep.mubr.msk.f32.mxu0 %vm993_vm1, %v3734_v35 }
 0x595   :  { %12660 = vmatpush3.xpose.msk.msra.mxu0 %vm993_vm1, %v16014_v57 }
 0x596   :  { %12661 = vmatprep.subr.msk.mxu0 %vm993_vm1, %v3744_v63 }
 0x597   :  { %v3859_v61 = vpop.permute.xlu0 %3858  ;;  %v3974_v38 = vpop.permute.xlu1 %3973 }
 0x598   :  { %12677 = vmatprep.subr.msk.mxu1 %vm993_vm1, %v3859_v61 }
 0x599   :  { %12678 = vmatpush3.xpose.msk.msra.mxu1 %vm993_vm1, %v3859_v61  ;;  %12662 = vmatpush3.xpose.msk.msra.mxu0 %vm993_vm1, %v3744_v63 }
 0x59a   :  { %12663 = vmatprep.subr.msk.mxu0 %vm993_vm1, %v3742_v12 }
 0x59b   :  { %v3851_v17 = vpop.permute.xlu0 %3850 }
 0x59c   :  { %12679 = vmatprep.mubr.msk.f32.mxu1 %vm993_vm1, %v3851_v17 }
 0x59d   :  { %12680 = vmatmul.mubr.msk.f32.vlgmr.msra.gmra.mxu1 %vm993_vm1, %v3853_v4  ;;  %12664 = vmatpush3.xpose.msk.msra.mxu0 %vm993_vm1, %v3742_v12 }
 0x59e   :  { %12682 = vmatprep.mubr.msk.f32.mxu1 %vm993_vm1, %v3855_v60  ;;  %12685 = vmatprep.subr.msk.mxu0 %vm993_vm1, %v3982_v8 }
 0x59f   :  { %v3978_v57 = vpop.permute.xlu0 %3977 }
 0x5a0   :  { %12666 = vmatmul.mubr.msk.f32.vlgmr.msra.gmra.mxu0 %vm993_vm1, %v16031_v43  ;;  %v4441_v43 = vpop.permute.xlu1 %4440 }
 0x5a1   :  { %12668 = vmatprep.mubr.msk.f32.mxu0 %vm993_vm1, %v3738_v29  ;;  %12686 = vmatpush3.xpose.msk.msra.mxu0 %vm993_vm1, %v3982_v8 }
 0x5a2   :  { %12687 = vmatprep.subr.msk.mxu0 %vm993_vm1, %v3980_v30 }
 0x5a3   :  { %v3857_v63 = vpop.permute.xlu0 %3856 }
 0x5a4   :  { %12683 = vmatmul.mubr.msk.f32.gmra.mxu1 %vm993_vm1, %v3857_v63  ;;  %12669 = vmatmul.mubr.msk.f32.gmra.mxu0 %vm993_vm1, %v3740_v19  ;;  %v4437_v19 = vpop.permute.xlu1 %4436 }
 0x5a5   :  { %12688 = vmatpush3.xpose.msk.msra.mxu0 %vm993_vm1, %v3980_v30 }
 0x5a6   :  { %12689 = vmatprep.subr.msk.mxu0 %vm993_vm1, %v3978_v57 }
 0x5a7   :  { %v3968_v16 = vpop.permute.xlu0 %3967 }
 0x5a8   :  { %12693 = vmatprep.mubr.msk.f32.mxu0 %vm993_vm1, %v3968_v16  ;;  %v4550_v20 = vpop.permute.xlu1 %4549 }
 0x5a9   :  { %12690 = vmatpush3.xpose.msk.msra.mxu0 %vm993_vm1, %v3978_v57 }
 0x5aa   :  { %12691 = vmatprep.subr.msk.mxu0 %vm993_vm1, %v3976_v49 }
 0x5ab   :  { %v3972_v8 = vpop.permute.xlu0 %3971 }
 0x5ac   :  { %v4546_v62 = vpop.permute.xlu1 %4545 }
 0x5ad   :  { %12692 = vmatpush3.xpose.msk.msra.mxu0 %vm993_vm1, %v3976_v49 }
 0x5af   :  { %v4443_v12 = vpop.permute.xlu0 %4442 }
 0x5b0   :  { %12699 = vmatprep.subr.mxu1 %v4443_v12  ;;  %12694 = vmatmul.mubr.msk.f32.vlgmr.msra.gmra.mxu0 %vm993_vm1, %v3970_v21 }
 0x5b1   :  { %12700 = vmatpush3.msra.mxu1 %v4443_v12  ;;  %12696 = vmatprep.mubr.msk.f32.mxu0 %vm993_vm1, %v3972_v8 }
 0x5b2   :  { %12701 = vmatprep.subr.mxu1 %v4441_v43 }
 0x5b3   :  { %12702 = vmatpush3.msra.mxu1 %v4441_v43  ;;  %v4439_v30 = vpop.permute.xlu0 %4438 }
 0x5b4   :  { %12703 = vmatprep.subr.mxu1 %v4439_v30  ;;  %12697 = vmatmul.mubr.msk.f32.gmra.mxu0 %vm993_vm1, %v3974_v38 }
 0x5b5   :  { %12704 = vmatpush3.msra.mxu1 %v4439_v30  ;;  %v16142_v30 = vld [vmem:[#allocation8 + $0x28] sm:$0xff] }
 0x5b6   :  { %12705 = vmatprep.subr.mxu1 %v4437_v19  ;;  %v16110_v10 = vpop.f32.mrf.mxu1 }
 0x5b7   :  { %12706 = vmatpush3.msra.mxu1 %v4437_v19  ;;  %v4552_v35 = vpop.permute.xlu0 %4551  ;;  %19351 = vst [vmem:[#allocation79_spill] sm:$0xff] %v16110_v10 }
 0x5b8   :  { %12713 = vmatprep.subr.mxu0 %v4552_v35  ;;  %v16114_v29 = vpop.f32.mrf.mxu1 }
 0x5b9   :  { %12714 = vmatpush3.msra.mxu0 %v4552_v35  ;;  %19352 = vst [vmem:[#allocation80_spill] sm:$0xff] %v16114_v29  ;;  %v16144_v35 = vld [vmem:[#allocation8 + $0x20] sm:$0xff] }
 0x5ba   :  { %12715 = vmatprep.subr.mxu0 %v4550_v20 }
 0x5bb   :  { %12716 = vmatpush3.msra.mxu0 %v4550_v20  ;;  %v4548_v4 = vpop.permute.xlu0 %4547 }
 0x5bc   :  { %12717 = vmatprep.subr.mxu0 %v4548_v4 }
 0x5bd   :  { %12718 = vmatpush3.msra.mxu0 %v4548_v4 }
 0x5be   :  { %12719 = vmatprep.subr.mxu0 %v4546_v62 }
 0x5bf   :  { %12720 = vmatpush3.msra.mxu0 %v4546_v62  ;;  %v16112_v60 = vpop.permute.xlu0 %4660 }
 0x5c0   :  { %12727 = vmatprep.subr.mxu1 %v16112_v60 }
 0x5c2   :  { %v16117_v61 = vpop.f32.mrf.mxu1 }
 0x5c3   :  { %19353 = vst [vmem:[#allocation85_spill] sm:$0xff] %v16117_v61  ;;  %v16119_v49 = vpop.permute.xlu0 %4656 }
 0x5c4   :  { %v16121_v17 = vpop.f32.mrf.mxu1 }
 0x5c5   :  { %19354 = vst [vmem:[#allocation81_spill] sm:$0xff] %v16121_v17 }
 0x5c6   :  { %v16123_v21 = vpop.f32.mrf.mxu1 }
 0x5c7   :  { %19355 = vst [vmem:[#allocation87_spill] sm:$0xff] %v16123_v21  ;;  %v16125_v57 = vpop.permute.xlu0 %4769 }
 0x5c8   :  { %19356 = vst [vmem:[#allocation82_spill] sm:$0xff] %v16125_v57  ;;  %12741 = vmatprep.subr.mxu0 %v16125_v57  ;;  %v16128_v63 = vpop.f32.mrf.mxu1 }
 0x5c9   :  { %19357 = vst [vmem:[#allocation89_spill] sm:$0xff] %v16128_v63 }
 0x5cb   :  { %v16130_v38 = vpop.f32.mrf.mxu1 }
 0x5cc   :  { %19358 = vst [vmem:[#allocation83_spill] sm:$0xff] %v16130_v38  ;;  %v16149_v38 = vld [vmem:[#allocation8 + $0x38] sm:$0xff] }
 0x5cd   :  { %v16132_v16 = vpop.f32.mrf.mxu1 }
 0x5ce   :  { %19359 = vst [vmem:[#allocation91_spill] sm:$0xff] %v16132_v16 }
 0x5d2   :  { %v16134_v43 = vpop.f32.mrf.mxu1 }
 0x5d3   :  { %19360 = vst [vmem:[#allocation18_spill] sm:$0xff] %v16134_v43 }
 0x5d4   :  { %v16136_v8 = vpop.f32.mrf.mxu1 }
 0x5d5   :  { %19361 = vst [vmem:[#allocation84_spill] sm:$0xff] %v16136_v8 }
 0x5d6   :  { %v16138_v12 = vpop.f32.mrf.mxu1 }
 0x5d7   :  { %19362 = vst [vmem:[#allocation86_spill] sm:$0xff] %v16138_v12 }
 0x5d8   :  { %v16140_v19 = vpop.f32.mrf.mxu1 }
 0x5d9   :  { %19363 = vst [vmem:[#allocation125_spill] sm:$0xff] %v16140_v19 }
 0x5e2   :  { %v12597_v20 = vpop.f32.mrf.mxu1 }
 0x5e3   :  { %v16147_v4 = vadd.f32 %v12597_v20, %v16142_v30  ;;  %v16161_v20 = vld [vmem:[#allocation8 + $0x30] sm:$0xff] }
 0x5e4   :  { %v3246_v62 = vpop.f32.mrf.mxu1 }
 0x5e5   :  { %v16152_v16 = vadd.f32 %v3246_v62, %v16144_v35  ;;  %v4087_v43 = vsel %vm117_vm0, %v16147_v4, -inf }
 0x5e6   :  { %4088 = vmax.xlane.f32.xlu1 %v4087_v43  ;;  %v12600_v12 = vpop.f32.mrf.mxu1 }
 0x5e7   :  { %v16157_v19 = vadd.f32 %v12600_v12, %v16149_v38  ;;  %v4084_v8 = vsel %vm117_vm0, %v16152_v16, -inf }
 0x5e8   :  { %v3256_v21 = vpop.f32.mrf.mxu1  ;;  %4085 = vmax.xlane.f32.xlu0 %v4084_v8 }
 0x5e9   :  { %v16164_v63 = vadd.f32 %v3256_v21, %v16161_v20  ;;  %v4093_v62 = vsel %vm117_vm0, %v16157_v19, -inf }
 0x5eb   :  { %v4090_v43 = vsel %vm117_vm0, %v16164_v63, -inf }
 0x5ec   :  { %4094 = vmax.xlane.f32.xlu0 %v4093_v62 }
 0x5f0   :  { %4091 = vmax.xlane.f32.xlu0 %v4090_v43 }
 0x5f2   :  { %v12625_v12 = vpop.f32.mrf.mxu1 }
 0x5f3   :  { %v16171_v61 = vadd.f32 %v12625_v12, %v16142_v30 }
 0x5f4   :  { %v3480_v17 = vpop.f32.mrf.mxu1 }
 0x5f5   :  { %v16174_v10 = vadd.f32 %v3480_v17, %v16144_v35  ;;  %v4111_v21 = vsel %vm117_vm0, %v16171_v61, -inf }
 0x5f6   :  { %4112 = vmax.xlane.f32.xlu1 %v4111_v21  ;;  %v12628_v8 = vpop.f32.mrf.mxu1  ;;  %v16190_v21 = vpop.f32.mrf.mxu0 }
 0x5f7   :  { %v16179_v29 = vadd.f32 %v12628_v8, %v16149_v38  ;;  %v4108_v62 = vsel %vm117_vm0, %v16174_v10, -inf  ;;  %19364 = vst [vmem:[#allocation88_spill] sm:$0xff] %v16190_v21 }
 0x5f8   :  { %v3490_v43 = vpop.f32.mrf.mxu1  ;;  %4109 = vmax.xlane.f32.xlu0 %v4108_v62  ;;  %v16192_v8 = vpop.f32.mrf.mxu0 }
 0x5f9   :  { %v16184_v12 = vadd.f32 %v3490_v43, %v16161_v20  ;;  %v4117_v17 = vsel %vm117_vm0, %v16179_v29, -inf  ;;  %19365 = vst [vmem:[#allocation21_spill] sm:$0xff] %v16192_v8 }
 0x5fa   :  { %4118 = vmax.xlane.f32.xlu1 %v4117_v17  ;;  %v16194_v59 = vpop.f32.mrf.mxu0 }
 0x5fb   :  { %v4114_v3 = vsel %vm117_vm0, %v16184_v12, -inf  ;;  %19366 = vst [vmem:[#allocation92_spill] sm:$0xff] %v16194_v59 }
 0x5fc   :  { %4115 = vmax.xlane.f32.xlu0 %v4114_v3  ;;  %v16196_v13 = vpop.f32.mrf.mxu0 }
 0x5fd   :  { %19367 = vst [vmem:[#allocation90_spill] sm:$0xff] %v16196_v13  ;;  %v16218_v13 = vpop.permute.xlu1 %4658 }
 0x5fe   :  { %v16198_v62 = vpop.f32.mrf.mxu0 }
 0x5ff   :  { %19368 = vst [vmem:[#allocation94_spill] sm:$0xff] %v16198_v62 }
 0x600   :  { %v16200_v43 = vpop.f32.mrf.mxu0 }
 0x601   :  { %19369 = vst [vmem:[#allocation93_spill] sm:$0xff] %v16200_v43 }
 0x602   :  { %v16202_v34 = vpop.f32.mrf.mxu0 }
 0x603   :  { %19370 = vst [vmem:[#allocation96_spill] sm:$0xff] %v16202_v34  ;;  %v16224_v34 = vpop.permute.xlu1 %4654 }
 0x604   :  { %v16204_v42 = vpop.f32.mrf.mxu0 }
 0x605   :  { %19371 = vst [vmem:[#allocation95_spill] sm:$0xff] %v16204_v42 }
 0x606   :  { %v16206_v17 = vpop.f32.mrf.mxu0 }
 0x607   :  { %19372 = vst [vmem:[#allocation99_spill] sm:$0xff] %v16206_v17 }
 0x608   :  { %v16208_v50 = vpop.f32.mrf.mxu0 }
 0x609   :  { %19373 = vst [vmem:[#allocation97_spill] sm:$0xff] %v16208_v50  ;;  %v16230_v50 = vpop.permute.xlu1 %4767 }
 0x60a   :  { %v16210_v3 = vpop.f32.mrf.mxu0  ;;  %19382 = vst [vmem:[#allocation118_spill] sm:$0xff] %v16230_v50 }
 0x60b   :  { %19374 = vst [vmem:[#allocation102_spill] sm:$0xff] %v16210_v3 }
 0x60c   :  { %v16212_v21 = vpop.f32.mrf.mxu0 }
 0x60d   :  { %19375 = vst [vmem:[#allocation100_spill] sm:$0xff] %v16212_v21  ;;  %v16236_v27 = vpop.permute.xlu1 %4763 }
 0x60e   :  { %v16214_v8 = vpop.f32.mrf.mxu0  ;;  %19385 = vst [vmem:[#allocation122_spill] sm:$0xff] %v16236_v27 }
 0x60f   :  { %19376 = vst [vmem:[#allocation103_spill] sm:$0xff] %v16214_v8 }
 0x610   :  { %v16216_v59 = vpop.f32.mrf.mxu0 }
 0x611   :  { %19377 = vst [vmem:[#allocation106_spill] sm:$0xff] %v16216_v59  ;;  %v16259_v40 = vpop.permute.xlu1 %4876 }
 0x612   :  { %v16220_v62 = vpop.f32.mrf.mxu0 }
 0x613   :  { %19378 = vst [vmem:[#allocation104_spill] sm:$0xff] %v16220_v62 }
 0x614   :  { %v16222_v43 = vpop.f32.mrf.mxu0 }
 0x615   :  { %19379 = vst [vmem:[#allocation115_spill] sm:$0xff] %v16222_v43 }
 0x616   :  { %v16226_v42 = vpop.f32.mrf.mxu0 }
 0x617   :  { %19380 = vst [vmem:[#allocation109_spill] sm:$0xff] %v16226_v42 }
 0x618   :  { %v16228_v17 = vpop.f32.mrf.mxu0 }
 0x619   :  { %19381 = vst [vmem:[#allocation113_spill] sm:$0xff] %v16228_v17 }
 0x638   :  { %v12653_v21 = vpop.f32.mrf.mxu1 }
 0x639   :  { %v16242_v15 = vadd.f32 %v12653_v21, %v16142_v30 }
 0x63a   :  { %v3714_v43 = vpop.f32.mrf.mxu1 }
 0x63b   :  { %v16232_v3 = vpop.f32.mrf.mxu0 }
 0x63c   :  { %19383 = vst [vmem:[#allocation116_spill] sm:$0xff] %v16232_v3 }
 0x63d   :  { %v16234_v8 = vpop.f32.mrf.mxu0 }
 0x63e   :  { %19384 = vst [vmem:[#allocation119_spill] sm:$0xff] %v16234_v8  ;;  %v16250_v8 = vadd.f32 %v3714_v43, %v16144_v35 }
 0x63f   :  { %v12611_v59 = vpop.f32.mrf.mxu0 }
 0x640   :  { %v16239_v62 = vadd.f32 %v12611_v59, %v16142_v30  ;;  %v4132_v43 = vsel %vm117_vm0, %v16250_v8, -inf }
 0x641   :  { %v3363_v26 = vpop.f32.mrf.mxu0 }
 0x642   :  { %v16245_v42 = vadd.f32 %v3363_v26, %v16144_v35  ;;  %v4099_v3 = vsel %vm117_vm0, %v16239_v62, -inf  ;;  %v12656_v58 = vpop.f32.mrf.mxu1  ;;  %v4135_v26 = vsel %vm117_vm0, %v16242_v15, -inf }
 0x643   :  { %4100 = vmax.xlane.f32.xlu1 %v4099_v3  ;;  %v12614_v17 = vpop.f32.mrf.mxu0  ;;  %v16267_v23 = vadd.f32 %v12656_v58, %v16149_v38 }
 0x644   :  { %v4096_v59 = vsel %vm117_vm0, %v16245_v42, -inf  ;;  %v16255_v21 = vadd.f32 %v12614_v17, %v16149_v38  ;;  %v3724_v1 = vpop.f32.mrf.mxu1 }
 0x645   :  { %v3373_v5 = vpop.f32.mrf.mxu0  ;;  %4097 = vmax.xlane.f32.xlu0 %v4096_v59  ;;  %v16272_v59 = vadd.f32 %v3724_v1, %v16161_v20  ;;  %v4141_v55 = vsel %vm117_vm0, %v16267_v23, -inf }
 0x646   :  { %v16262_v3 = vadd.f32 %v3373_v5, %v16161_v20  ;;  %v4105_v17 = vsel %vm117_vm0, %v16255_v21, -inf  ;;  %v16276_v5 = vpop.permute.xlu1 %4872 }
 0x647   :  { %4136 = vmax.xlane.f32.xlu1 %v4135_v26  ;;  %v4138_v1 = vsel %vm117_vm0, %v16272_v59, -inf }
 0x648   :  { %v4102_v26 = vsel %vm117_vm0, %v16262_v3, -inf }
 0x649   :  { %4133 = vmax.xlane.f32.xlu0 %v4132_v43  ;;  %v16280_v43 = vpop.permute.xlu0 %4765 }
 0x64a   :  { %19386 = vst [vmem:[#allocation120_spill] sm:$0xff] %v16280_v43  ;;  %v16292_v24 = vpop.permute.xlu1 %4985 }
 0x64b   :  { %4106 = vmax.xlane.f32.xlu1 %v4105_v17  ;;  %19387 = vst [vmem:[#allocation16_spill] sm:$0xff] %v16292_v24 }
 0x64d   :  { %4103 = vmax.xlane.f32.xlu0 %v4102_v26  ;;  %v16296_v39 = vpop.permute.xlu0 %4878 }
 0x64f   :  { %v12639_v58 = vpop.f32.mrf.mxu0  ;;  %4142 = vmax.xlane.f32.xlu1 %v4141_v55 }
 0x650   :  { %v16283_v46 = vadd.f32 %v12639_v58, %v16142_v30  ;;  %v16298_v58 = vpop.permute.xlu1 %4983 }
 0x651   :  { %v3597_v17 = vpop.f32.mrf.mxu0  ;;  %4139 = vmax.xlane.f32.xlu0 %v4138_v1  ;;  %19388 = vst [vmem:[#allocation19_spill] sm:$0xff] %v16298_v58  ;;  %v16300_v25 = vpop.permute.xlu0 %4874 }
 0x652   :  { %v16288_v44 = vadd.f32 %v3597_v17, %v16144_v35  ;;  %v4123_v26 = vsel %vm117_vm0, %v16283_v46, -inf }
 0x653   :  { %4124 = vmax.xlane.f32.xlu1 %v4123_v26  ;;  %v12642_v32 = vpop.f32.mrf.mxu0 }
 0x654   :  { %v4120_v55 = vsel %vm117_vm0, %v16288_v44, -inf  ;;  %v16305_v56 = vpop.permute.xlu1 %4981  ;;  %v16308_v26 = vadd.f32 %v12642_v32, %v16149_v38 }
 0x655   :  { %4121 = vmax.xlane.f32.xlu0 %v4120_v55  ;;  %v3607_v17 = vpop.f32.mrf.mxu0  ;;  %19389 = vst [vmem:[#allocation20_spill] sm:$0xff] %v16305_v56  ;;  %v16315_v9 = vpop.permute.xlu0 %4987 }
 0x656   :  { %19390 = vst [vmem:[#allocation98_spill] sm:$0xff] %v16315_v9  ;;  %v16318_v52 = vadd.f32 %v3607_v17, %v16161_v20 }
 0x658   :  { %v16324_v27 = vpop.permute.xlu1 %5094  ;;  %v4126_v17 = vsel %vm117_vm0, %v16318_v52, -inf }
 0x659   :  { %19391 = vst [vmem:[#allocation101_spill] sm:$0xff] %v16324_v27 }
 0x65c   :  { %v16346_v57 = vpop.permute.xlu1 %5090 }
 0x65d   :  { %v12681_v1 = vpop.f32.mrf.mxu1  ;;  %19392 = vst [vmem:[#allocation105_spill] sm:$0xff] %v16346_v57 }
 0x65e   :  { %v16303_v22 = vadd.f32 %v12681_v1, %v16142_v30 }
 0x65f   :  { %v3948_v41 = vpop.f32.mrf.mxu1 }
 0x660   :  { %v16311_v24 = vadd.f32 %v3948_v41, %v16144_v35  ;;  %v4159_v55 = vsel %vm117_vm0, %v16303_v22, -inf  ;;  %v12667_v58 = vpop.f32.mrf.mxu0  ;;  %v4129_v41 = vsel %vm117_vm0, %v16308_v26, -inf }
 0x661   :  { %4160 = vmax.xlane.f32.xlu1 %v4159_v55  ;;  %v16331_v55 = vpop.permute.xlu0 %5096  ;;  %v16339_v51 = vadd.f32 %v12667_v58, %v16142_v30 }
 0x662   :  { %v4156_v1 = vsel %vm117_vm0, %v16311_v24, -inf  ;;  %v3831_v56 = vpop.f32.mrf.mxu0 }
 0x663   :  { %4157 = vmax.xlane.f32.xlu0 %v4156_v1 }
 0x664   :  { %v12684_v32 = vpop.f32.mrf.mxu1  ;;  %v12670_v1 = vpop.f32.mrf.mxu0 }
 0x665   :  { %v16327_v36 = vadd.f32 %v12684_v32, %v16149_v38  ;;  %4130 = vmax.xlane.f32.xlu1 %v4129_v41  ;;  %v16344_v41 = vadd.f32 %v3831_v56, %v16144_v35  ;;  %v16353_v28 = vpop.permute.xlu0 %5092 }
 0x666   :  { %v3958_v9 = vpop.f32.mrf.mxu1  ;;  %v3841_v27 = vpop.f32.mrf.mxu0  ;;  %19393 = vst [vmem:[#allocation110_spill] sm:$0xff] %v16353_v28 }
 0x667   :  { %v16334_v43 = vadd.f32 %v3958_v9, %v16161_v20  ;;  %4127 = vmax.xlane.f32.xlu0 %v4126_v17  ;;  %v4165_v50 = vsel %vm117_vm0, %v16327_v36, -inf  ;;  %v16349_v9 = vadd.f32 %v12670_v1, %v16149_v38  ;;  %v4147_v17 = vsel %vm117_vm0, %v16339_v51, -inf }
 0x668   :  { %v4144_v56 = vsel %vm117_vm0, %v16344_v41, -inf }
 0x669   :  { %4166 = vmax.xlane.f32.xlu1 %v4165_v50  ;;  %v4162_v32 = vsel %vm117_vm0, %v16334_v43, -inf  ;;  %v16356_v50 = vadd.f32 %v3841_v27, %v16161_v20  ;;  %v4153_v1 = vsel %vm117_vm0, %v16349_v9, -inf }
 0x66b   :  { %4163 = vmax.xlane.f32.xlu0 %v4162_v32  ;;  %v4150_v28 = vsel %vm117_vm0, %v16356_v50, -inf }
 0x66d   :  { %4148 = vmax.xlane.f32.xlu1 %v4147_v17 }
 0x66f   :  { %v4089_v58 = vpop.xlane.xlu1 %4088  ;;  %4145 = vmax.xlane.f32.xlu0 %v4144_v56 }
 0x670   :  { %v4181_v57 = vsub.f32 %v16147_v4, %v4089_v58  ;;  %v12695_v32 = vpop.f32.mrf.mxu0 }
 0x671   :  { %v4086_v47 = vpop.xlane.xlu0 %4085  ;;  %4154 = vmax.xlane.f32.xlu1 %v4153_v1  ;;  %v16364_v7 = vadd.f32 %v12695_v32, %v16142_v30 }
 0x672   :  { %v4214_v17 = vmul.f32 1.442695, %v4181_v57  ;;  %v4180_v27 = vsub.f32 %v16152_v16, %v4086_v47  ;;  %v4065_v48 = vpop.f32.mrf.mxu0 }
 0x673   :  { %4151 = vmax.xlane.f32.xlu0 %v4150_v28  ;;  %v16370_v56 = vadd.f32 %v4065_v48, %v16144_v35  ;;  %v4171_v4 = vsel %vm117_vm0, %v16364_v7, -inf }
 0x674   :  { %13677 = vpow2.f32 %v4214_v17  ;;  %v4212_v58 = vmul.f32 1.442695, %v4180_v27  ;;  %v12698_v1 = vpop.f32.mrf.mxu0 }
 0x675   :  { %v4095_v11 = vpop.xlane.xlu0 %4094  ;;  %4172 = vmax.xlane.f32.xlu1 %v4171_v4  ;;  %v16375_v57 = vadd.f32 %v12698_v1, %v16149_v38  ;;  %v4168_v47 = vsel %vm117_vm0, %v16370_v56, -inf }
 0x676   :  { %13679 = vpow2.f32 %v4212_v58  ;;  %v4183_v28 = vsub.f32 %v16157_v19, %v4095_v11  ;;  %v4075_v16 = vpop.f32.mrf.mxu0 }
 0x677   :  { %4169 = vmax.xlane.f32.xlu0 %v4168_v47  ;;  %v16381_v48 = vadd.f32 %v4075_v16, %v16161_v20  ;;  %v4177_v30 = vsel %vm117_vm0, %v16375_v57, -inf }
 0x678   :  { %v4218_v35 = vmul.f32 1.442695, %v4183_v28 }
 0x679   :  { %v4092_v32 = vpop.xlane.xlu0 %4091  ;;  %4178 = vmax.xlane.f32.xlu1 %v4177_v30  ;;  %v4174_v38 = vsel %vm117_vm0, %v16381_v48, -inf }
 0x67a   :  { %13681 = vpow2.f32 %v4218_v35  ;;  %v4182_v17 = vsub.f32 %v16164_v63, %v4092_v32 }
 0x67b   :  { %4175 = vmax.xlane.f32.xlu0 %v4174_v38 }
 0x67c   :  { %v4216_v27 = vmul.f32 1.442695, %v4182_v17 }
 0x67e   :  { %13683 = vpow2.f32 %v4216_v27 }
 0x67f   :  { %v4113_v11 = vpop.xlane.xlu1 %4112 }
 0x680   :  { %v4189_v19 = vsub.f32 %v16171_v61, %v4113_v11 }
 0x681   :  { %v16389_v20 = vpop.eup %13677  ;;  %v4110_v4 = vpop.xlane.xlu0 %4109 }
 0x682   :  { %v4230_v58 = vmul.f32 1.442695, %v4189_v19  ;;  %v4188_v1 = vsub.f32 %v16174_v10, %v4110_v4  ;;  %v4279_v47 = vsel %vm117_vm0, %v16389_v20, 0.0 }
 0x683   :  { %v16394_v28 = vpop.eup %13679  ;;  %v4119_v16 = vpop.xlane.xlu1 %4118  ;;  %4280 = vadd.xlane.f32.xlu1 %v4279_v47 }
 0x684   :  { %13685 = vpow2.f32 %v4230_v58  ;;  %v4228_v63 = vmul.f32 1.442695, %v4188_v1  ;;  %v4191_v30 = vsub.f32 %v16179_v29, %v4119_v16  ;;  %v4276_v61 = vsel %vm117_vm0, %v16394_v28, 0.0 }
 0x685   :  { %v4116_v35 = vpop.xlane.xlu0 %4115  ;;  %4277 = vadd.xlane.f32.xlu0 %v4276_v61 }
 0x686   :  { %13687 = vpow2.f32 %v4228_v63  ;;  %v4234_v32 = vmul.f32 1.442695, %v4191_v30  ;;  %v4190_v10 = vsub.f32 %v16184_v12, %v4116_v35 }
 0x687   :  { %v16400_v38 = vpop.eup %13681 }
 0x688   :  { %13689 = vpow2.f32 %v4234_v32  ;;  %v4232_v17 = vmul.f32 1.442695, %v4190_v10  ;;  %v4285_v27 = vsel %vm117_vm0, %v16400_v38, 0.0 }
 0x689   :  { %4286 = vadd.xlane.f32.xlu1 %v4285_v27 }
 0x68a   :  { %13691 = vpow2.f32 %v4232_v17 }
 0x68b   :  { %v16404_v11 = vpop.eup %13683 }
 0x68c   :  { %v4282_v29 = vsel %vm117_vm0, %v16404_v11, 0.0 }
 0x68d   :  { %4283 = vadd.xlane.f32.xlu0 %v4282_v29 }
 0x691   :  { %v16408_v19 = vpop.eup %13685 }
 0x692   :  { %v4303_v12 = vsel %vm117_vm0, %v16408_v19, 0.0 }
 0x693   :  { %v16412_v4 = vpop.eup %13687  ;;  %4304 = vadd.xlane.f32.xlu1 %v4303_v12 }
 0x694   :  { %v4300_v58 = vsel %vm117_vm0, %v16412_v4, 0.0 }
 0x695   :  { %v16416_v1 = vpop.eup %13689  ;;  %4301 = vadd.xlane.f32.xlu0 %v4300_v58 }
 0x696   :  { %v4309_v47 = vsel %vm117_vm0, %v16416_v1, 0.0 }
 0x697   :  { %v16420_v16 = vpop.eup %13691  ;;  %4310 = vadd.xlane.f32.xlu1 %v4309_v47 }
 0x698   :  { %v4306_v63 = vsel %vm117_vm0, %v16420_v16, 0.0 }
 0x699   :  { %4307 = vadd.xlane.f32.xlu0 %v4306_v63 }
 0x6cc   :  { %v4101_v30 = vpop.xlane.xlu1 %4100 }
 0x6cd   :  { %v4185_v61 = vsub.f32 %v16239_v62, %v4101_v30 }
 0x6ce   :  { %v4098_v35 = vpop.xlane.xlu0 %4097 }
 0x6cf   :  { %v4222_v32 = vmul.f32 1.442695, %v4185_v61  ;;  %v4184_v10 = vsub.f32 %v16245_v42, %v4098_v35 }
 0x6d0   :  { %v4137_v17 = vpop.xlane.xlu1 %4136 }
 0x6d1   :  { %13693 = vpow2.f32 %v4222_v32  ;;  %v4197_v27 = vsub.f32 %v16242_v15, %v4137_v17  ;;  %v4220_v29 = vmul.f32 1.442695, %v4184_v10 }
 0x6d2   :  { %v4134_v12 = vpop.xlane.xlu0 %4133 }
 0x6d3   :  { %v4246_v58 = vmul.f32 1.442695, %v4197_v27  ;;  %v4196_v47 = vsub.f32 %v16250_v8, %v4134_v12 }
 0x6d4   :  { %v4107_v33 = vpop.xlane.xlu1 %4106 }
 0x6d5   :  { %13695 = vpow2.f32 %v4246_v58  ;;  %v4244_v6 = vmul.f32 1.442695, %v4196_v47  ;;  %v4187_v63 = vsub.f32 %v16255_v21, %v4107_v33 }
 0x6d6   :  { %13697 = vpow2.f32 %v4220_v29  ;;  %v4104_v62 = vpop.xlane.xlu0 %4103 }
 0x6d7   :  { %13699 = vpow2.f32 %v4244_v6  ;;  %v4226_v30 = vmul.f32 1.442695, %v4187_v63  ;;  %v4186_v42 = vsub.f32 %v16262_v3, %v4104_v62 }
 0x6d8   :  { %v4143_v61 = vpop.xlane.xlu1 %4142 }
 0x6d9   :  { %13701 = vpow2.f32 %v4226_v30  ;;  %v4199_v15 = vsub.f32 %v16267_v23, %v4143_v61  ;;  %v4224_v35 = vmul.f32 1.442695, %v4186_v42 }
 0x6da   :  { %v4140_v32 = vpop.xlane.xlu0 %4139 }
 0x6db   :  { %v4250_v10 = vmul.f32 1.442695, %v4199_v15  ;;  %v4198_v8 = vsub.f32 %v16272_v59, %v4140_v32 }
 0x6dc   :  { %v4125_v17 = vpop.xlane.xlu1 %4124 }
 0x6dd   :  { %13703 = vpow2.f32 %v4250_v10  ;;  %v4248_v27 = vmul.f32 1.442695, %v4198_v8  ;;  %v4193_v33 = vsub.f32 %v16283_v46, %v4125_v17 }
 0x6de   :  { %v16433_v21 = vpop.eup %13693  ;;  %13705 = vpow2.f32 %v4224_v35  ;;  %v4122_v6 = vpop.xlane.xlu0 %4121 }
 0x6df   :  { %13707 = vpow2.f32 %v4248_v27  ;;  %v4238_v3 = vmul.f32 1.442695, %v4193_v33  ;;  %v4192_v29 = vsub.f32 %v16288_v44, %v4122_v6  ;;  %v4291_v23 = vsel %vm117_vm0, %v16433_v21, 0.0 }
 0x6e0   :  { %4292 = vadd.xlane.f32.xlu1 %v4291_v23 }
 0x6e1   :  { %v4236_v12 = vmul.f32 1.442695, %v4192_v29  ;;  %13709 = vpow2.f32 %v4238_v3 }
 0x6e2   :  { %v16438_v58 = vpop.eup %13695 }
 0x6e3   :  { %v16440_v59 = vpop.eup %13697  ;;  %13711 = vpow2.f32 %v4236_v12  ;;  %v4327_v46 = vsel %vm117_vm0, %v16438_v58, 0.0 }
 0x6e4   :  { %v16444_v47 = vpop.eup %13699  ;;  %4328 = vadd.xlane.f32.xlu0 %v4327_v46  ;;  %v4288_v62 = vsel %vm117_vm0, %v16440_v59, 0.0 }
 0x6e5   :  { %v4324_v44 = vsel %vm117_vm0, %v16444_v47, 0.0 }
 0x6e6   :  { %v16448_v63 = vpop.eup %13701  ;;  %4325 = vadd.xlane.f32.xlu1 %v4324_v44 }
 0x6e7   :  { %19394 = vst [vmem:[#allocation107_spill] sm:$0xff] %v16448_v63  ;;  %v4297_v30 = vsel %vm117_vm0, %v16448_v63, 0.0 }
 0x6e8   :  { %4289 = vadd.xlane.f32.xlu0 %v4288_v62 }
 0x6ea   :  { %v16454_v42 = vpop.eup %13703  ;;  %v4161_v61 = vpop.xlane.xlu1 %4160  ;;  %4298 = vadd.xlane.f32.xlu1 %v4297_v30 }
 0x6eb   :  { %v16456_v15 = vpop.eup %13705  ;;  %v4205_v35 = vsub.f32 %v16303_v22, %v4161_v61  ;;  %v4333_v32 = vsel %vm117_vm0, %v16454_v42, 0.0 }
 0x6ec   :  { %v16461_v10 = vpop.eup %13707  ;;  %v4158_v8 = vpop.xlane.xlu0 %4157  ;;  %4334 = vadd.xlane.f32.xlu0 %v4333_v32  ;;  %v4294_v23 = vsel %vm117_vm0, %v16456_v15, 0.0 }
 0x6ed   :  { %v4262_v17 = vmul.f32 1.442695, %v4205_v35  ;;  %v4204_v27 = vsub.f32 %v16311_v24, %v4158_v8  ;;  %v4330_v33 = vsel %vm117_vm0, %v16461_v10, 0.0 }
 0x6ee   :  { %v4131_v6 = vpop.xlane.xlu1 %4130  ;;  %4331 = vadd.xlane.f32.xlu1 %v4330_v33  ;;  %v16466_v3 = vpop.eup %13709 }
 0x6ef   :  { %19395 = vst [vmem:[#allocation108_spill] sm:$0xff] %v16466_v3  ;;  %13713 = vpow2.f32 %v4262_v17  ;;  %v4260_v29 = vmul.f32 1.442695, %v4204_v27  ;;  %v4195_v22 = vsub.f32 %v16308_v26, %v4131_v6  ;;  %v4315_v30 = vsel %vm117_vm0, %v16466_v3, 0.0 }
 0x6f0   :  { %v16471_v12 = vpop.eup %13711  ;;  %v4128_v46 = vpop.xlane.xlu0 %4127  ;;  %4295 = vadd.xlane.f32.xlu0 %v4294_v23 }
 0x6f1   :  { %19396 = vst [vmem:[#allocation111_spill] sm:$0xff] %v16471_v12  ;;  %13715 = vpow2.f32 %v4260_v29  ;;  %v4242_v24 = vmul.f32 1.442695, %v4195_v22  ;;  %v4312_v44 = vsel %vm117_vm0, %v16471_v12, 0.0  ;;  %v4194_v3 = vsub.f32 %v16318_v52, %v4128_v46 }
 0x6f2   :  { %v4167_v62 = vpop.xlane.xlu1 %4166  ;;  %4313 = vadd.xlane.f32.xlu1 %v4312_v44 }
 0x6f3   :  { %13717 = vpow2.f32 %v4242_v24 }
 0x6f4   :  { %v4164_v61 = vpop.xlane.xlu0 %4163  ;;  %4316 = vadd.xlane.f32.xlu0 %v4315_v30 }
 0x6f6   :  { %v4149_v26 = vpop.xlane.xlu1 %4148 }
 0x6f8   :  { %v16477_v35 = vpop.xlane.xlu0 %4145 }
 0x6fa   :  { %v16481_v8 = vpop.xlane.xlu1 %4154 }
 0x6fc   :  { %v16479_v32 = vpop.eup %13713  ;;  %v16487_v33 = vpop.xlane.xlu0 %4151 }
 0x6fd   :  { %19397 = vst [vmem:[#allocation114_spill] sm:$0xff] %v16479_v32  ;;  %v4351_v17 = vsel %vm117_vm0, %v16479_v32, 0.0 }
 0x6fe   :  { %v16485_v27 = vpop.eup %13715  ;;  %4352 = vadd.xlane.f32.xlu0 %v4351_v17  ;;  %v16493_v22 = vpop.xlane.xlu1 %4172 }
 0x6ff   :  { %19398 = vst [vmem:[#allocation112_spill] sm:$0xff] %v16485_v27  ;;  %v4348_v6 = vsel %vm117_vm0, %v16485_v27, 0.0 }
 0x700   :  { %v16491_v29 = vpop.eup %13717  ;;  %4349 = vadd.xlane.f32.xlu1 %v4348_v6  ;;  %v16497_v24 = vpop.xlane.xlu0 %4169 }
 0x701   :  { %19399 = vst [vmem:[#allocation123_spill] sm:$0xff] %v16491_v29  ;;  %v4321_v23 = vsel %vm117_vm0, %v16491_v29, 0.0 }
 0x702   :  { %4322 = vadd.xlane.f32.xlu0 %v4321_v23  ;;  %v16499_v44 = vpop.xlane.xlu1 %4178 }
 0x704   :  { %v16501_v30 = vpop.xlane.xlu0 %4175 }
 0x70c   :  { %v4281_v32 = vpop.xlane.xlu1 %4280 }
 0x70d   :  { %13719 = vrcp.f32 %v4281_v32  ;;  %v4207_v32 = vsub.f32 %v16327_v36, %v4167_v62  ;;  %v4211_v62 = vsub.f32 %v16375_v57, %v16499_v44 }
 0x70e   :  { %v4278_v17 = vpop.xlane.xlu0 %4277 }
 0x70f   :  { %13721 = vrcp.f32 %v4278_v17  ;;  %v4266_v52 = vmul.f32 1.442695, %v4207_v32  ;;  %v4274_v57 = vmul.f32 1.442695, %v4211_v62  ;;  %v19409_v62 = vld [vmem:[#allocation50_spill] sm:$0xff] }
 0x711   :  { %5203 = vrot.lane.b32.xlu1 %v19265_v54, %s14180_s30 }
 0x712   :  { %v4287_v6 = vpop.xlane.xlu1 %4286 }
 0x713   :  { %13723 = vrcp.f32 %v4287_v6  ;;  %v4206_v6 = vsub.f32 %v16334_v43, %v4164_v61  ;;  %v4200_v43 = vsub.f32 %v16344_v41, %v16477_v35 }
 0x715   :  { %v4252_v41 = vmul.f32 1.442695, %v4200_v43 }
 0x716   :  { %v4284_v27 = vpop.xlane.xlu0 %4283 }
 0x717   :  { %13725 = vrcp.f32 %v4284_v27  ;;  %v4240_v27 = vmul.f32 1.442695, %v4194_v3 }
 0x718   :  { %5205 = vrot.lane.b32.xlu0 %v14951_v45, %s14180_s30 }
 0x71a   :  { %v13720_v23 = vpop.eup %13719 }
 0x71b   :  { %v4405_v17 = vmul.f32 %v13720_v23, %v16389_v20 }
 0x71c   :  { %v13722_v29 = vpop.eup %13721  ;;  %v4305_v63 = vpop.xlane.xlu1 %4304 }
 0x71d   :  { %v4404_v12 = vmul.f32 %v13722_v29, %v16394_v28  ;;  %13727 = vrcp.f32 %v4305_v63  ;;  %v4201_v28 = vsub.f32 %v16339_v51, %v4149_v26  ;;  %v4264_v63 = vmul.f32 1.442695, %v4206_v6 }
 0x71e   :  { %v4302_v54 = vpop.xlane.xlu0 %4301 }
 0x71f   :  { %13729 = vrcp.f32 %v4302_v54  ;;  %12707 = vmatprep.mubr.msk.f32.mxu1 %vm117_vm0, %v4404_v12 }
 0x720   :  { %v4311_v45 = vpop.xlane.xlu1 %4310  ;;  %12708 = vmatmul.mubr.msk.f32.vlgmr.msra.gmra.mxu1 %vm117_vm0, %v4405_v17  ;;  %v13724_v20 = vpop.eup %13723 }
 0x721   :  { %12728 = vmatpush3.msra.mxu1 %v16112_v60  ;;  %13731 = vrcp.f32 %v4311_v45  ;;  %v4254_v45 = vmul.f32 1.442695, %v4201_v28  ;;  %v4203_v60 = vsub.f32 %v16349_v9, %v16481_v8  ;;  %v4209_v9 = vsub.f32 %v16364_v7, %v16493_v22 }
 0x722   :  { %12729 = vmatprep.subr.mxu1 %v16218_v13  ;;  %v4308_v36 = vpop.xlane.xlu0 %4307  ;;  %v4210_v8 = vsub.f32 %v16381_v48, %v16501_v30 }
 0x723   :  { %13733 = vrcp.f32 %v4308_v36  ;;  %12730 = vmatpush3.msra.mxu1 %v16218_v13  ;;  %v4407_v13 = vmul.f32 %v13724_v20, %v16400_v38 }
 0x724   :  { %v13726_v54 = vpop.eup %13725  ;;  %13735 = vpow2.f32 %v4240_v27  ;;  %12731 = vmatprep.subr.mxu1 %v16119_v49  ;;  %v4272_v48 = vmul.f32 1.442695, %v4210_v8 }
 0x725   :  { %12732 = vmatpush3.msra.mxu1 %v16119_v49  ;;  %v4406_v51 = vmul.f32 %v13726_v54, %v16404_v11  ;;  %13737 = vpow2.f32 %v4266_v52  ;;  %v4202_v49 = vsub.f32 %v16356_v50, %v16487_v33  ;;  %v4258_v11 = vmul.f32 1.442695, %v4203_v60  ;;  %v19400_v54 = vld [vmem:[#allocation15_spill] sm:$0xff]  ;;  %v19403_v60 = vld [vmem:[#allocation24_spill] sm:$0xff] }
 0x726   :  { %12733 = vmatprep.subr.mxu1 %v16224_v34  ;;  %13739 = vpow2.f32 %v4264_v63  ;;  %v4270_v50 = vmul.f32 1.442695, %v4209_v9  ;;  %v19401_v63 = vld [vmem:[#allocation46_spill] sm:$0xff] }
 0x727   :  { %12710 = vmatprep.mubr.msk.f32.mxu1 %vm117_vm0, %v4406_v51  ;;  %12734 = vmatpush3.msra.mxu1 %v16224_v34  ;;  %13741 = vpow2.f32 %v4254_v45  ;;  %v4256_v12 = vmul.f32 1.442695, %v4202_v49  ;;  %v4208_v34 = vsub.f32 %v16370_v56, %v16497_v24  ;;  %v19402_v51 = vld [vmem:[#allocation17_spill] sm:$0xff] }
 0x728   :  { %12711 = vmatmul.mubr.msk.f32.gmra.mxu1 %vm117_vm0, %v4407_v13  ;;  %12755 = vmatprep.subr.mxu1 %v16296_v39  ;;  %13743 = vpow2.f32 %v4252_v41  ;;  %v19404_v41 = vld [vmem:[#allocation22_spill] sm:$0xff] }
 0x729   :  { %13745 = vpow2.f32 %v4258_v11  ;;  %v4268_v35 = vmul.f32 1.442695, %v4208_v34  ;;  %v19405_v11 = vld [vmem:[#allocation48_spill] sm:$0xff] }
 0x72a   :  { %v13728_v3 = vpop.eup %13727  ;;  %13747 = vpow2.f32 %v4256_v12  ;;  %v19407_v12 = vld [vmem:[#allocation25_spill] sm:$0xff] }
 0x72b   :  { %v4413_v61 = vmul.f32 %v13728_v3, %v16408_v19  ;;  %13749 = vpow2.f32 %v4270_v50  ;;  %v19406_v3 = vld [vmem:[#allocation47_spill] sm:$0xff] }
 0x72c   :  { %v13730_v38 = vpop.eup %13729  ;;  %13751 = vpow2.f32 %v4268_v35  ;;  %v19410_v35 = vld [vmem:[#allocation49_spill] sm:$0xff] }
 0x72d   :  { %v4412_v46 = vmul.f32 %v13730_v38, %v16412_v4  ;;  %13753 = vpow2.f32 %v4274_v57  ;;  %v19411_v57 = vld [vmem:[#allocation28_spill] sm:$0xff] }
 0x72e   :  { %v13732_v26 = vpop.eup %13731  ;;  %13755 = vpow2.f32 %v4272_v48 }
 0x72f   :  { %12735 = vmatprep.mubr.msk.f32.mxu1 %vm117_vm0, %v4412_v46  ;;  %v4415_v19 = vmul.f32 %v13732_v26, %v16416_v1  ;;  %v19408_v46 = vld [vmem:[#allocation23_spill] sm:$0xff] }
 0x730   :  { %v13734_v7 = vpop.eup %13733  ;;  %12736 = vmatmul.mubr.msk.f32.vlgmr.msra.gmra.mxu1 %vm117_vm0, %v4413_v61 }
 0x731   :  { %v16545_v56 = vpop.eup %13735  ;;  %12756 = vmatpush3.msra.mxu1 %v16296_v39  ;;  %v4414_v4 = vmul.f32 %v13734_v7, %v16420_v16 }
 0x732   :  { %12757 = vmatprep.subr.mxu1 %v16259_v40  ;;  %v16551_v33 = vpop.eup %13737  ;;  %v4318_v39 = vsel %vm117_vm0, %v16545_v56, 0.0 }
 0x733   :  { %12758 = vmatpush3.msra.mxu1 %v16259_v40  ;;  %12738 = vmatprep.mubr.msk.f32.mxu1 %vm117_vm0, %v4414_v4  ;;  %v16559_v16 = vpop.eup %13739  ;;  %v4357_v40 = vsel %vm117_vm0, %v16551_v33, 0.0 }
 0x734   :  { %12759 = vmatprep.subr.mxu1 %v16300_v25  ;;  %12739 = vmatmul.mubr.msk.f32.gmra.mxu1 %vm117_vm0, %v4415_v19  ;;  %v16565_v1 = vpop.eup %13741  ;;  %v4354_v29 = vsel %vm117_vm0, %v16559_v16, 0.0 }
 0x735   :  { %12760 = vmatpush3.msra.mxu1 %v16300_v25  ;;  %4319 = vadd.xlane.f32.xlu1 %v4318_v39  ;;  %v16571_v22 = vpop.eup %13743  ;;  %v4339_v25 = vsel %vm117_vm0, %v16565_v1, 0.0 }
 0x736   :  { %12761 = vmatprep.subr.mxu1 %v16276_v5  ;;  %v16575_v24 = vpop.eup %13745  ;;  %v4336_v44 = vsel %vm117_vm0, %v16571_v22, 0.0 }
 0x737   :  { %12762 = vmatpush3.msra.mxu1 %v16276_v5  ;;  %4358 = vadd.xlane.f32.xlu0 %v4357_v40  ;;  %v16579_v5 = vpop.eup %13747  ;;  %v4345_v30 = vsel %vm117_vm0, %v16575_v24, 0.0 }
 0x738   :  { %12783 = vmatprep.subr.mxu1 %v16331_v55  ;;  %v16583_v23 = vpop.eup %13749  ;;  %v4342_v32 = vsel %vm117_vm0, %v16579_v5, 0.0 }
 0x739   :  { %4355 = vadd.xlane.f32.xlu1 %v4354_v29  ;;  %v16587_v17 = vpop.eup %13751  ;;  %v4363_v27 = vsel %vm117_vm0, %v16583_v23, 0.0  ;;  %v19412_v29 = vld [vmem:[#allocation26_spill] sm:$0xff] }
 0x73a   :  { %v16591_v6 = vpop.eup %13753  ;;  %v4360_v52 = vsel %vm117_vm0, %v16587_v17, 0.0 }
 0x73b   :  { %4340 = vadd.xlane.f32.xlu0 %v4339_v25  ;;  %v16595_v28 = vpop.eup %13755  ;;  %v4369_v36 = vsel %vm117_vm0, %v16591_v6, 0.0 }
 0x73c   :  { %v4366_v20 = vsel %vm117_vm0, %v16595_v28, 0.0 }
 0x73d   :  { %4337 = vadd.xlane.f32.xlu1 %v4336_v44  ;;  %v19413_v44 = vld [vmem:[#allocation53_spill] sm:$0xff] }
 0x73f   :  { %4346 = vadd.xlane.f32.xlu0 %v4345_v30  ;;  %v19416_v30 = vld [vmem:[#allocation82_spill] sm:$0xff] }
 0x741   :  { %4343 = vadd.xlane.f32.xlu1 %v4342_v32  ;;  %v19418_v32 = vld [vmem:[#allocation118_spill] sm:$0xff] }
 0x743   :  { %4364 = vadd.xlane.f32.xlu0 %v4363_v27 }
 0x745   :  { %4361 = vadd.xlane.f32.xlu1 %v4360_v52  ;;  %v19419_v52 = vld [vmem:[#allocation110_spill] sm:$0xff] }
 0x747   :  { %4370 = vadd.xlane.f32.xlu0 %v4369_v36 }
 0x749   :  { %4367 = vadd.xlane.f32.xlu1 %v4366_v20  ;;  %v19420_v20 = vld [vmem:[#allocation120_spill] sm:$0xff] }
 0x75a   :  { %5199 = vrot.lane.b32.xlu1 %v19268_v18, %s14180_s30 }
 0x75d   :  { %5201 = vrot.lane.b32.xlu0 %v19320_v2, %s14180_s30 }
 0x75e   :  { %5968 = vrot.lane.b32.xlu1 %v19282_v14, %s14181_s9 }
 0x761   :  { %5970 = vrot.lane.b32.xlu0 %v19329_v31, %s14181_s9 }
 0x762   :  { %6087 = vrot.lane.b32.xlu1 %v19331_v37, %s14181_s9 }
 0x765   :  { %5966 = vrot.lane.b32.xlu0 %v19330_v53, %s14181_s9 }
 0x766   :  { %6085 = vrot.lane.b32.xlu1 %v19290_v0, %s14181_s9 }
 0x769   :  { %5964 = vrot.lane.b32.xlu0 %v19400_v54, %s14181_s9  ;;  %v4293_v43 = vpop.xlane.xlu1 %4292 }
 0x76a   :  { %5958 = vrot.lane.b32.xlu1 %v19401_v63, %s14182_s12 }
 0x76d   :  { %5956 = vrot.lane.b32.xlu0 %v19402_v51, %s14182_s12  ;;  %v4329_v45 = vpop.xlane.xlu0 %4328 }
 0x76e   :  { %6204 = vrot.lane.b32.xlu1 %v19403_v60, %s14181_s9  ;;  %13757 = vrcp.f32 %v4329_v45 }
 0x76f   :  { %v4326_v13 = vpop.xlane.xlu1 %4325 }
 0x770   :  { %13759 = vrcp.f32 %v4326_v13  ;;  %v19421_v13 = vld [vmem:[#allocation27_spill] sm:$0xff] }
 0x771   :  { %13761 = vrcp.f32 %v4293_v43  ;;  %6083 = vrot.lane.b32.xlu0 %v19404_v41, %s14181_s9  ;;  %v4290_v49 = vpop.xlane.xlu0 %4289 }
 0x772   :  { %5962 = vrot.lane.b32.xlu1 %v19405_v11, %s14182_s12  ;;  %13763 = vrcp.f32 %v4290_v49 }
 0x773   :  { %v4299_v9 = vpop.xlane.xlu1 %4298 }
 0x775   :  { %5960 = vrot.lane.b32.xlu0 %v19406_v3, %s14182_s12  ;;  %v4335_v38 = vpop.xlane.xlu0 %4334 }
 0x776   :  { %6202 = vrot.lane.b32.xlu1 %v19407_v12, %s14181_s9 }
 0x777   :  { %v4332_v34 = vpop.xlane.xlu1 %4331 }
 0x778   :  { %13765 = vrcp.f32 %v4332_v34  ;;  %v19423_v34 = vld [vmem:[#allocation57_spill] sm:$0xff] }
 0x779   :  { %6081 = vrot.lane.b32.xlu0 %v19408_v46, %s14181_s9  ;;  %v4296_v50 = vpop.xlane.xlu0 %4295 }
 0x77a   :  { %6075 = vrot.lane.b32.xlu1 %v19409_v62, %s14182_s12  ;;  %13767 = vrcp.f32 %v4296_v50 }
 0x77b   :  { %13769 = vrcp.f32 %v4335_v38  ;;  %v4314_v61 = vpop.xlane.xlu1 %4313  ;;  %v13758_v26 = vpop.eup %13757 }
 0x77c   :  { %13771 = vrcp.f32 %v4314_v61  ;;  %v4421_v39 = vmul.f32 %v13758_v26, %v16438_v58  ;;  %v19414_v58 = vld [vmem:[#allocation101_spill] sm:$0xff] }
 0x77d   :  { %v13760_v7 = vpop.eup %13759  ;;  %13773 = vrcp.f32 %v4299_v9  ;;  %6073 = vrot.lane.b32.xlu0 %v19410_v35, %s14182_s12  ;;  %v4317_v8 = vpop.xlane.xlu0 %4316  ;;  %v19422_v9 = vld [vmem:[#allocation105_spill] sm:$0xff] }
 0x77e   :  { %v13762_v4 = vpop.eup %13761  ;;  %6321 = vrot.lane.b32.xlu1 %v19411_v57, %s14181_s9  ;;  %v4420_v19 = vmul.f32 %v13760_v7, %v16444_v47  ;;  %13775 = vrcp.f32 %v4317_v8  ;;  %v19415_v47 = vld [vmem:[#allocation51_spill] sm:$0xff] }
 0x77f   :  { %v13764_v48 = vpop.eup %13763  ;;  %v4409_v25 = vmul.f32 %v13762_v4, %v16433_v21  ;;  %v19417_v21 = vld [vmem:[#allocation29_spill] sm:$0xff]  ;;  %v19425_v7 = vld [vmem:[#allocation111_spill] sm:$0xff]  ;;  %v19426_v4 = vld [vmem:[#allocation54_spill] sm:$0xff] }
 0x780   :  { %12763 = vmatprep.mubr.msk.f32.mxu1 %vm117_vm0, %v4420_v19  ;;  %v4408_v40 = vmul.f32 %v13764_v48, %v16440_v59  ;;  %v19427_v19 = vld [vmem:[#allocation107_spill] sm:$0xff]  ;;  %v5308_v48 = vld [vmem:[#allocation7 + $0x8] sm:$0xff] }
 0x781   :  { %6200 = vrot.lane.b32.xlu0 %v19412_v29, %s14181_s9  ;;  %12764 = vmatmul.mubr.msk.f32.vlgmr.msra.gmra.mxu1 %vm117_vm0, %v4421_v39  ;;  %v19428_v39 = vld [vmem:[#allocation33_spill] sm:$0xff] }
 0x782   :  { %6079 = vrot.lane.b32.xlu1 %v19413_v44, %s14182_s12  ;;  %12784 = vmatpush3.msra.mxu1 %v16331_v55 }
 0x783   :  { %12721 = vmatprep.mubr.msk.f32.mxu0 %vm117_vm0, %v4408_v40  ;;  %12785 = vmatprep.subr.mxu1 %v19414_v58 }
 0x784   :  { %12722 = vmatmul.mubr.msk.f32.vlgmr.msra.gmra.mxu0 %vm117_vm0, %v4409_v25  ;;  %12786 = vmatpush3.msra.mxu1 %v19414_v58  ;;  %v19430_v25 = vld [vmem:[#allocation98_spill] sm:$0xff]  ;;  %v19431_v58 = vld [vmem:[#allocation32_spill] sm:$0xff] }
 0x785   :  { %v13766_v59 = vpop.eup %13765  ;;  %6077 = vrot.lane.b32.xlu0 %v19415_v47, %s14182_s12  ;;  %12742 = vmatpush3.msra.mxu0 %v19416_v30 }
 0x786   :  { %6319 = vrot.lane.b32.xlu1 %v19417_v21, %s14181_s9  ;;  %12743 = vmatprep.subr.mxu0 %v19418_v32  ;;  %v4422_v43 = vmul.f32 %v13766_v59, %v16461_v10  ;;  %v19424_v10 = vld [vmem:[#allocation122_spill] sm:$0xff]  ;;  %v19432_v59 = vld [vmem:[#allocation59_spill] sm:$0xff] }
 0x787   :  { %v13768_v55 = vpop.eup %13767  ;;  %v4353_v27 = vpop.xlane.xlu0 %4352  ;;  %12787 = vmatprep.subr.mxu1 %v19419_v52  ;;  %12744 = vmatpush3.msra.mxu0 %v19418_v32  ;;  %v19433_v32 = vld [vmem:[#allocation58_spill] sm:$0xff] }
 0x788   :  { %v13770_v36 = vpop.eup %13769  ;;  %12788 = vmatpush3.msra.mxu1 %v19419_v52  ;;  %12745 = vmatprep.subr.mxu0 %v19420_v20  ;;  %13777 = vrcp.f32 %v4353_v27  ;;  %v4410_v50 = vmul.f32 %v13768_v55, %v16456_v15  ;;  %v19434_v55 = vld [vmem:[#allocation16_spill] sm:$0xff]  ;;  %v19435_v52 = vld [vmem:[#allocation35_spill] sm:$0xff] }
 0x789   :  { %v13772_v45 = vpop.eup %13771  ;;  %6198 = vrot.lane.b32.xlu0 %v19421_v13, %s14181_s9  ;;  %v4350_v49 = vpop.xlane.xlu1 %4349  ;;  %12789 = vmatprep.subr.mxu1 %v19422_v9  ;;  %v4423_v61 = vmul.f32 %v13770_v36, %v16454_v42  ;;  %v19429_v42 = vld [vmem:[#allocation108_spill] sm:$0xff] }
 0x78a   :  { %v13774_v38 = vpop.eup %13773  ;;  %13779 = vrcp.f32 %v4350_v49  ;;  %6192 = vrot.lane.b32.xlu1 %v19423_v34, %s14182_s12  ;;  %12746 = vmatpush3.msra.mxu0 %v19420_v20  ;;  %v4416_v8 = vmul.f32 %v13772_v45, %v19425_v7  ;;  %v19436_v20 = vld [vmem:[#allocation19_spill] sm:$0xff]  ;;  %v19438_v49 = vld [vmem:[#allocation114_spill] sm:$0xff]  ;;  %v19443_v7 = vld [vmem:[#allocation37_spill] sm:$0xff] }
 0x78b   :  { %12790 = vmatpush3.msra.mxu1 %v19422_v9  ;;  %12747 = vmatprep.subr.mxu0 %v19424_v10  ;;  %v13776_v26 = vpop.eup %13775  ;;  %v4411_v15 = vmul.f32 %v13774_v38, %v19427_v19  ;;  %v4323_v30 = vpop.xlane.xlu0 %4322  ;;  %v19439_v38 = vld [vmem:[#allocation34_spill] sm:$0xff]  ;;  %v19445_v19 = vld [vmem:[#allocation67_spill] sm:$0xff] }
 0x78c   :  { %12766 = vmatprep.mubr.msk.f32.mxu1 %vm117_vm0, %v4422_v43  ;;  %12748 = vmatpush3.msra.mxu0 %v19424_v10  ;;  %v4417_v40 = vmul.f32 %v13776_v26, %v19429_v42  ;;  %v19437_v43 = vld [vmem:[#allocation112_spill] sm:$0xff]  ;;  %v19441_v10 = vld [vmem:[#allocation65_spill] sm:$0xff]  ;;  %v19447_v42 = vld [vmem:[#allocation38_spill] sm:$0xff]  ;;  %13781 = vrcp.f32 %v4323_v30 }
 0x78d   :  { %6190 = vrot.lane.b32.xlu0 %v19426_v4, %s14182_s12  ;;  %12767 = vmatmul.mubr.msk.f32.gmra.mxu1 %vm117_vm0, %v4423_v61  ;;  %v19442_v26 = vld [vmem:[#allocation61_spill] sm:$0xff]  ;;  %v19467_v34 = vld [vmem:[#allocation70_spill] sm:$0xff]  ;;  %v19468_v4 = vld [vmem:[#allocation123_spill] sm:$0xff] }
 0x78e   :  { %6438 = vrot.lane.b32.xlu1 %v19428_v39, %s14181_s9  ;;  %12724 = vmatprep.mubr.msk.f32.mxu0 %vm117_vm0, %v4410_v50  ;;  %v19440_v50 = vld [vmem:[#allocation20_spill] sm:$0xff] }
 0x78f   :  { %12769 = vmatprep.subr.mxu0 %v19430_v25  ;;  %12725 = vmatmul.mubr.msk.f32.gmra.mxu0 %vm117_vm0, %v4411_v15  ;;  %v16711_v61 = vpop.permute.xlu0 %5205  ;;  %v19446_v15 = vld [vmem:[#allocation66_spill] sm:$0xff] }
 0x790   :  { %12749 = vmatprep.mubr.msk.f32.mxu0 %vm117_vm0, %v4416_v8  ;;  %12811 = vmatprep.subr.mxu1 %v5308_v48  ;;  %v19444_v8 = vld [vmem:[#allocation36_spill] sm:$0xff] }
 0x791   :  { %6317 = vrot.lane.b32.xlu0 %v19431_v58, %s14181_s9 }
 0x792   :  { %6196 = vrot.lane.b32.xlu1 %v19432_v59, %s14182_s12 }
 0x793   :  { %12750 = vmatmul.mubr.msk.f32.vlgmr.msra.gmra.mxu0 %vm117_vm0, %v4417_v40  ;;  %v19449_v40 = vld [vmem:[#allocation60_spill] sm:$0xff] }
 0x794   :  { %12770 = vmatpush3.msra.mxu0 %v19430_v25  ;;  %v19450_v25 = vld [vmem:[#allocation31_spill] sm:$0xff] }
 0x795   :  { %6194 = vrot.lane.b32.xlu0 %v19433_v32, %s14182_s12  ;;  %12771 = vmatprep.subr.mxu0 %v19434_v55  ;;  %v13778_v27 = vpop.eup %13777  ;;  %v19465_v32 = vld [vmem:[#allocation68_spill] sm:$0xff] }
 0x796   :  { %6436 = vrot.lane.b32.xlu1 %v19435_v52, %s14181_s9  ;;  %12772 = vmatpush3.msra.mxu0 %v19434_v55  ;;  %v4429_v9 = vmul.f32 %v13778_v27, %v19438_v49  ;;  %v19451_v55 = vld [vmem:[#allocation40_spill] sm:$0xff]  ;;  %v19452_v27 = vld [vmem:[#allocation39_spill] sm:$0xff]  ;;  %v16746_v49 = vpop.permute.xlu1 %5203 }
 0x797   :  { %v13780_v36 = vpop.eup %13779  ;;  %12773 = vmatprep.subr.mxu0 %v19436_v20 }
 0x798   :  { %12774 = vmatpush3.msra.mxu0 %v19436_v20  ;;  %v4428_v45 = vmul.f32 %v13780_v36, %v19437_v43  ;;  %v19453_v36 = vld [vmem:[#allocation63_spill] sm:$0xff]  ;;  %v19454_v20 = vld [vmem:[#allocation62_spill] sm:$0xff] }
 0x799   :  { %6315 = vrot.lane.b32.xlu0 %v19439_v38, %s14181_s9  ;;  %12775 = vmatprep.subr.mxu0 %v19440_v50  ;;  %v19455_v43 = vld [vmem:[#allocation42_spill] sm:$0xff] }
 0x79a   :  { %6309 = vrot.lane.b32.xlu1 %v19441_v10, %s14182_s12  ;;  %12791 = vmatprep.mubr.msk.f32.mxu1 %vm117_vm0, %v4428_v45  ;;  %v19456_v45 = vld [vmem:[#allocation41_spill] sm:$0xff]  ;;  %v19464_v10 = vld [vmem:[#allocation44_spill] sm:$0xff] }
 0x79b   :  { %12776 = vmatpush3.msra.mxu0 %v19440_v50  ;;  %12792 = vmatmul.mubr.msk.f32.vlgmr.msra.gmra.mxu1 %vm117_vm0, %v4429_v9  ;;  %v19457_v9 = vld [vmem:[#allocation72_spill] sm:$0xff]  ;;  %v19458_v50 = vld [vmem:[#allocation69_spill] sm:$0xff] }
 0x79c   :  { %12797 = vmatprep.subr.mxu0 %v16711_v61  ;;  %12812 = vmatpush3.msra.mxu1 %v5308_v48  ;;  %v19448_v48 = vld [vmem:[#allocation30_spill] sm:$0xff] }
 0x79d   :  { %6307 = vrot.lane.b32.xlu0 %v19442_v26, %s14182_s12  ;;  %v19462_v26 = vld [vmem:[#allocation73_spill] sm:$0xff] }
 0x79e   :  { %6555 = vrot.lane.b32.xlu1 %v19443_v7, %s14181_s9 }
 0x7a1   :  { %6434 = vrot.lane.b32.xlu0 %v19444_v8, %s14181_s9 }
 0x7a2   :  { %6313 = vrot.lane.b32.xlu1 %v19445_v19, %s14182_s12  ;;  %v19461_v19 = vld [vmem:[#allocation74_spill] sm:$0xff] }
 0x7a5   :  { %6311 = vrot.lane.b32.xlu0 %v19446_v15, %s14182_s12 }
 0x7a6   :  { %6553 = vrot.lane.b32.xlu1 %v19447_v42, %s14181_s9 }
 0x7a9   :  { %6432 = vrot.lane.b32.xlu0 %v19448_v48, %s14181_s9 }
 0x7aa   :  { %6426 = vrot.lane.b32.xlu1 %v19449_v40, %s14182_s12  ;;  %v19460_v40 = vld [vmem:[#allocation43_spill] sm:$0xff] }
 0x7ad   :  { %6424 = vrot.lane.b32.xlu0 %v19450_v25, %s14182_s12 }
 0x7ae   :  { %6672 = vrot.lane.b32.xlu1 %v19451_v55, %s14181_s9 }
 0x7b1   :  { %6551 = vrot.lane.b32.xlu0 %v19452_v27, %s14181_s9 }
 0x7b2   :  { %6430 = vrot.lane.b32.xlu1 %v19453_v36, %s14182_s12  ;;  %v19459_v36 = vld [vmem:[#allocation52_spill] sm:$0xff] }
 0x7b5   :  { %6428 = vrot.lane.b32.xlu0 %v19454_v20, %s14182_s12 }
 0x7b6   :  { %6670 = vrot.lane.b32.xlu1 %v19455_v43, %s14181_s9 }
 0x7b9   :  { %6549 = vrot.lane.b32.xlu0 %v19456_v45, %s14181_s9 }
 0x7ba   :  { %6543 = vrot.lane.b32.xlu1 %v19457_v9, %s14182_s12 }
 0x7bd   :  { %6541 = vrot.lane.b32.xlu0 %v19458_v50, %s14182_s12  ;;  %v19463_v50 = vld [vmem:[#allocation55_spill] sm:$0xff] }
 0x7be   :  { %v4320_v25 = vpop.xlane.xlu1 %4319  ;;  %6789 = vrot.lane.b32.xlu1 %v19459_v36, %s14181_s9 }
 0x7bf   :  { %13783 = vrcp.f32 %v4320_v25 }
 0x7c0   :  { %v4359_v20 = vpop.xlane.xlu0 %4358 }
 0x7c1   :  { %6668 = vrot.lane.b32.xlu0 %v19460_v40, %s14181_s9  ;;  %13785 = vrcp.f32 %v4359_v20 }
 0x7c2   :  { %v4356_v15 = vpop.xlane.xlu1 %4355  ;;  %6547 = vrot.lane.b32.xlu1 %v19461_v19, %s14182_s12 }
 0x7c3   :  { %13787 = vrcp.f32 %v4356_v15  ;;  %v13782_v15 = vpop.eup %13781 }
 0x7c4   :  { %v4341_v9 = vpop.xlane.xlu0 %4340 }
 0x7c5   :  { %6545 = vrot.lane.b32.xlu0 %v19462_v26, %s14182_s12  ;;  %13789 = vrcp.f32 %v4341_v9  ;;  %v19466_v9 = vld [vmem:[#allocation64_spill] sm:$0xff] }
 0x7c6   :  { %v4338_v30 = vpop.xlane.xlu1 %4337  ;;  %6787 = vrot.lane.b32.xlu1 %v19463_v50, %s14181_s9 }
 0x7c7   :  { %13791 = vrcp.f32 %v4338_v30 }
 0x7c8   :  { %v4347_v25 = vpop.xlane.xlu0 %4346 }
 0x7c9   :  { %6666 = vrot.lane.b32.xlu0 %v19464_v10, %s14181_s9  ;;  %13793 = vrcp.f32 %v4347_v25  ;;  %v4419_v25 = vmul.f32 %v13782_v15, %v19468_v4 }
 0x7ca   :  { %v4344_v20 = vpop.xlane.xlu1 %4343  ;;  %6660 = vrot.lane.b32.xlu1 %v19465_v32, %s14182_s12 }
 0x7cb   :  { %13795 = vrcp.f32 %v4344_v20 }
 0x7cc   :  { %v13784_v19 = vpop.eup %13783  ;;  %v4365_v59 = vpop.xlane.xlu0 %4364 }
 0x7cd   :  { %6658 = vrot.lane.b32.xlu0 %v19466_v9, %s14182_s12  ;;  %v4418_v26 = vmul.f32 %v13784_v19, %v16545_v56  ;;  %13797 = vrcp.f32 %v4365_v59  ;;  %v19495_v9 = vld [vmem:[#allocation103_spill] sm:$0xff] }
 0x7ce   :  { %v4362_v30 = vpop.xlane.xlu1 %4361  ;;  %6662 = vrot.lane.b32.xlu1 %v19467_v34, %s14182_s12  ;;  %v13786_v44 = vpop.eup %13785 }
 0x7cf   :  { %13799 = vrcp.f32 %v4362_v30  ;;  %12752 = vmatprep.mubr.msk.f32.mxu0 %vm117_vm0, %v4418_v26  ;;  %v4431_v19 = vmul.f32 %v13786_v44, %v16551_v33  ;;  %v19469_v30 = vld [vmem:[#allocation71_spill] sm:$0xff] }
 0x7d0   :  { %v13788_v32 = vpop.eup %13787  ;;  %12753 = vmatmul.mubr.msk.f32.gmra.mxu0 %vm117_vm0, %v4419_v25  ;;  %v4371_v20 = vpop.xlane.xlu0 %4370  ;;  %v19470_v25 = vld [vmem:[#allocation76_spill] sm:$0xff] }
 0x7d1   :  { %6785 = vrot.lane.b32.xlu0 %v19320_v2, %s14181_s9  ;;  %v4430_v56 = vmul.f32 %v13788_v32, %v16559_v16 }
 0x7d2   :  { %6783 = vrot.lane.b32.xlu1 %v19268_v18, %s14181_s9  ;;  %v4368_v59 = vpop.xlane.xlu1 %4367  ;;  %v13790_v4 = vpop.eup %13789 }
 0x7d3   :  { %13801 = vrcp.f32 %v4368_v59  ;;  %12794 = vmatprep.mubr.msk.f32.mxu1 %vm117_vm0, %v4430_v56  ;;  %v4425_v32 = vmul.f32 %v13790_v4, %v16565_v1  ;;  %v19471_v59 = vld [vmem:[#allocation75_spill] sm:$0xff]  ;;  %v19472_v4 = vld [vmem:[#allocation78_spill] sm:$0xff] }
 0x7d4   :  { %v13792_v26 = vpop.eup %13791  ;;  %13803 = vrcp.f32 %v4371_v20  ;;  %12795 = vmatmul.mubr.msk.f32.gmra.mxu1 %vm117_vm0, %v4431_v19  ;;  %v5202_v15 = vpop.permute.xlu0 %5201 }
 0x7d5   :  { %6664 = vrot.lane.b32.xlu0 %v19469_v30, %s14182_s12  ;;  %v4424_v16 = vmul.f32 %v13792_v26, %v16571_v22  ;;  %v19493_v30 = vld [vmem:[#allocation83_spill] sm:$0xff] }
 0x7d6   :  { %6777 = vrot.lane.b32.xlu1 %v19470_v25, %s14182_s12  ;;  %v5200_v33 = vpop.permute.xlu1 %5199  ;;  %v13794_v44 = vpop.eup %13793  ;;  %v19492_v25 = vld [vmem:[#allocation91_spill] sm:$0xff] }
 0x7d7   :  { %12777 = vmatprep.mubr.msk.f32.mxu0 %vm117_vm0, %v4424_v16  ;;  %v4427_v26 = vmul.f32 %v13794_v44, %v16575_v24 }
 0x7d8   :  { %v13796_v56 = vpop.eup %13795  ;;  %12778 = vmatmul.mubr.msk.f32.vlgmr.msra.gmra.mxu0 %vm117_vm0, %v4425_v32  ;;  %v5971_v20 = vpop.permute.xlu0 %5970 }
 0x7d9   :  { %12798 = vmatpush3.msra.mxu0 %v16711_v61  ;;  %6775 = vrot.lane.b32.xlu0 %v19471_v59, %s14182_s12  ;;  %v4426_v22 = vmul.f32 %v13796_v56, %v16579_v5  ;;  %v19473_v5 = vld [vmem:[#allocation77_spill] sm:$0xff]  ;;  %v3142_v59 = vld [vmem:[#allocation7] sm:$0xff] }
 0x7da   :  { %12799 = vmatprep.subr.mxu0 %v16746_v49  ;;  %12911 = vmatprep.subr.msk.mxu1 %vm993_vm1, %v5971_v20  ;;  %v5969_v1 = vpop.permute.xlu1 %5968  ;;  %v13798_v19 = vpop.eup %13797 }
 0x7db   :  { %6781 = vrot.lane.b32.xlu1 %v19472_v4, %s14182_s12  ;;  %12800 = vmatpush3.msra.mxu0 %v16746_v49  ;;  %v4433_v4 = vmul.f32 %v13798_v19, %v16583_v23 }
 0x7dc   :  { %v13800_v16 = vpop.eup %13799  ;;  %12780 = vmatprep.mubr.msk.f32.mxu0 %vm117_vm0, %v4426_v22  ;;  %12801 = vmatprep.subr.mxu0 %v5202_v15  ;;  %v5967_v61 = vpop.permute.xlu0 %5966 }
 0x7dd   :  { %12781 = vmatmul.mubr.msk.f32.gmra.mxu0 %vm117_vm0, %v4427_v26  ;;  %6779 = vrot.lane.b32.xlu0 %v19473_v5, %s14182_s12  ;;  %v4432_v32 = vmul.f32 %v13800_v16, %v16587_v17  ;;  %v19475_v26 = vld [vmem:[#allocation88_spill] sm:$0xff]  ;;  %v19491_v5 = vld [vmem:[#allocation87_spill] sm:$0xff] }
 0x7de   :  { %12802 = vmatpush3.msra.mxu0 %v5202_v15  ;;  %v6088_v56 = vpop.permute.xlu1 %6087 }
 0x7df   :  { %12803 = vmatprep.subr.mxu0 %v5200_v33  ;;  %7248 = vrot.lane.b32.xlu1 %v19282_v14, %s14183_s13 }
 0x7e0   :  { %v13802_v24 = vpop.eup %13801  ;;  %v12709_v49 = vpop.f32.mrf.mxu1  ;;  %12804 = vmatpush3.msra.mxu0 %v5200_v33  ;;  %12805 = vmatprep.mubr.msk.f32.mxu0 %vm117_vm0, %v4432_v32 }
 0x7e1   :  { %v5965_v44 = vpop.permute.xlu0 %5964  ;;  %v13804_v22 = vpop.eup %13803  ;;  %12861 = vmatprep.subr.mxu0 %v3142_v59  ;;  %12806 = vmatmul.mubr.msk.f32.vlgmr.msra.gmra.mxu0 %vm117_vm0, %v4433_v4  ;;  %v4434_v17 = vmul.f32 %v13802_v24, %v16595_v28 }
 0x7e2   :  { %v4526_v15 = vpop.f32.mrf.mxu1  ;;  %12862 = vmatpush3.msra.mxu0 %v3142_v59  ;;  %7250 = vrot.lane.b32.xlu0 %v19329_v31, %s14183_s13  ;;  %v6086_v23 = vpop.permute.xlu1 %6085  ;;  %v4435_v33 = vmul.f32 %v13804_v22, %v16591_v6  ;;  %v19474_v59 = vld [vmem:[#allocation21_spill] sm:$0xff] }
 0x7e3   :  { %12813 = vmatprep.mubr.msk.f32.mxu1 %vm993_vm1, %v4526_v15  ;;  %12925 = vmatprep.subr.msk.mxu0 %vm993_vm1, %v6088_v56  ;;  %v19478_v22 = vld [vmem:[#allocation93_spill] sm:$0xff] }
 0x7e4   :  { %12814 = vmatmul.mubr.msk.f32.vlgmr.msra.gmra.mxu1 %vm993_vm1, %v12709_v49  ;;  %7244 = vrot.lane.b32.xlu1 %v19400_v54, %s14183_s13 }
 0x7e5   :  { %v16819_v19 = vpop.permute.xlu0 %5956  ;;  %12912 = vmatpush3.xpose.msk.msra.mxu1 %vm993_vm1, %v5971_v20  ;;  %12808 = vmatprep.mubr.msk.f32.mxu0 %vm117_vm0, %v4434_v17  ;;  %v19479_v17 = vld [vmem:[#allocation94_spill] sm:$0xff] }
 0x7e6   :  { %12913 = vmatprep.subr.msk.mxu1 %vm993_vm1, %v5969_v1  ;;  %12809 = vmatmul.mubr.msk.f32.gmra.mxu0 %vm117_vm0, %v4435_v33  ;;  %v16825_v28 = vpop.permute.xlu1 %5958  ;;  %v19481_v33 = vld [vmem:[#allocation96_spill] sm:$0xff] }
 0x7e7   :  { %7246 = vrot.lane.b32.xlu0 %v19330_v53, %s14183_s13  ;;  %12863 = vmatprep.mubr.msk.f32.mxu0 %vm993_vm1, %v19474_v59 }
 0x7e8   :  { %v12712_v4 = vpop.f32.mrf.mxu1  ;;  %7357 = vrot.lane.b32.xlu1 %v19290_v0, %s14183_s13 }
 0x7e9   :  { %v6084_v6 = vpop.permute.xlu0 %6083  ;;  %12914 = vmatpush3.xpose.msk.msra.mxu1 %vm993_vm1, %v5969_v1  ;;  %v19476_v1 = vld [vmem:[#allocation90_spill] sm:$0xff] }
 0x7ea   :  { %v4536_v20 = vpop.f32.mrf.mxu1  ;;  %12915 = vmatprep.subr.msk.mxu1 %vm993_vm1, %v5967_v61  ;;  %12864 = vmatmul.mubr.msk.f32.vlgmr.msra.gmra.mxu0 %vm993_vm1, %v19475_v26  ;;  %v16837_v16 = vpop.permute.xlu1 %6204  ;;  %v19484_v26 = vld [vmem:[#allocation81_spill] sm:$0xff] }
 0x7eb   :  { %12816 = vmatprep.mubr.msk.f32.mxu1 %vm993_vm1, %v4536_v20  ;;  %12926 = vmatpush3.xpose.msk.msra.mxu0 %vm993_vm1, %v6088_v56  ;;  %v19477_v56 = vld [vmem:[#allocation92_spill] sm:$0xff]  ;;  %v19483_v20 = vld [vmem:[#allocation79_spill] sm:$0xff] }
 0x7ec   :  { %12817 = vmatmul.mubr.msk.f32.gmra.mxu1 %vm993_vm1, %v12712_v4  ;;  %7359 = vrot.lane.b32.xlu0 %v19331_v37, %s14183_s13  ;;  %v19482_v4 = vld [vmem:[#allocation80_spill] sm:$0xff] }
 0x7ed   :  { %v16844_v32 = vpop.permute.xlu0 %5960  ;;  %12866 = vmatprep.mubr.msk.f32.mxu0 %vm993_vm1, %v19476_v1  ;;  %12916 = vmatpush3.xpose.msk.msra.mxu1 %vm993_vm1, %v5967_v61 }
 0x7ee   :  { %12927 = vmatprep.subr.msk.mxu0 %vm993_vm1, %v6086_v23  ;;  %7353 = vrot.lane.b32.xlu1 %v19408_v46, %s14183_s13  ;;  %v16852_v24 = vpop.permute.xlu1 %5962 }
 0x7ef   :  { %12917 = vmatprep.subr.msk.mxu1 %vm993_vm1, %v5965_v44  ;;  %12867 = vmatmul.mubr.msk.f32.gmra.mxu0 %vm993_vm1, %v19477_v56 }
 0x7f0   :  { %12928 = vmatpush3.xpose.msk.msra.mxu0 %vm993_vm1, %v6086_v23  ;;  %7355 = vrot.lane.b32.xlu0 %v19404_v41, %s14183_s13 }
 0x7f1   :  { %v6082_v49 = vpop.permute.xlu0 %6081  ;;  %12869 = vmatprep.mubr.msk.f32.mxu0 %vm993_vm1, %v19478_v22  ;;  %12918 = vmatpush3.xpose.msk.msra.mxu1 %vm993_vm1, %v5965_v44  ;;  %v19480_v44 = vld [vmem:[#allocation95_spill] sm:$0xff]  ;;  %v19486_v22 = vld [vmem:[#allocation97_spill] sm:$0xff] }
 0x7f2   :  { %12929 = vmatprep.subr.msk.mxu0 %vm993_vm1, %v6084_v6  ;;  %7466 = vrot.lane.b32.xlu1 %v19407_v12, %s14183_s13  ;;  %v16866_v61 = vpop.permute.xlu1 %6202 }
 0x7f3   :  { %12939 = vmatprep.subr.msk.mxu1 %vm993_vm1, %v16837_v16  ;;  %12870 = vmatmul.mubr.msk.f32.gmra.mxu0 %vm993_vm1, %v19479_v17 }
 0x7f4   :  { %12930 = vmatpush3.xpose.msk.msra.mxu0 %vm993_vm1, %v6084_v6  ;;  %7468 = vrot.lane.b32.xlu0 %v19403_v60, %s14183_s13 }
 0x7f5   :  { %v16875_v15 = vpop.permute.xlu0 %6073  ;;  %12872 = vmatprep.mubr.msk.f32.mxu0 %vm993_vm1, %v19480_v44  ;;  %12931 = vmatprep.subr.msk.mxu0 %vm993_vm1, %v6082_v49 }
 0x7f6   :  { %7462 = vrot.lane.b32.xlu1 %v19421_v13, %s14183_s13  ;;  %v16882_v23 = vpop.permute.xlu1 %6075 }
 0x7f7   :  { %12873 = vmatmul.mubr.msk.f32.gmra.mxu0 %vm993_vm1, %v19481_v33  ;;  %v19487_v33 = vld [vmem:[#allocation99_spill] sm:$0xff] }
 0x7f8   :  { %12932 = vmatpush3.xpose.msk.msra.mxu0 %vm993_vm1, %v6082_v49  ;;  %7464 = vrot.lane.b32.xlu0 %v19412_v29, %s14183_s13  ;;  %v19485_v49 = vld [vmem:[#allocation85_spill] sm:$0xff] }
 0x7f9   :  { %v16889_v59 = vpop.permute.xlu0 %6200  ;;  %12875 = vmatprep.mubr.msk.f32.mxu0 %vm993_vm1, %v19482_v4  ;;  %v19488_v4 = vld [vmem:[#allocation100_spill] sm:$0xff] }
 0x7fa   :  { %7575 = vrot.lane.b32.xlu1 %v19417_v21, %s14183_s13  ;;  %v16895_v6 = vpop.permute.xlu1 %6321 }
 0x7fb   :  { %12876 = vmatmul.mubr.msk.f32.gmra.mxu0 %vm993_vm1, %v19483_v20  ;;  %12953 = vmatprep.subr.msk.mxu0 %vm993_vm1, %v16895_v6 }
 0x7fc   :  { %7577 = vrot.lane.b32.xlu0 %v19411_v57, %s14183_s13  ;;  %12878 = vmatprep.mubr.msk.f32.mxu0 %vm993_vm1, %v19484_v26 }
 0x7fd   :  { %v6078_v1 = vpop.permute.xlu0 %6077 }
 0x7fe   :  { %7571 = vrot.lane.b32.xlu1 %v19439_v38, %s14183_s13  ;;  %v16907_v56 = vpop.permute.xlu1 %6079  ;;  %v19503_v38 = vld [vmem:[#allocation109_spill] sm:$0xff] }
 0x7ff   :  { %12879 = vmatmul.mubr.msk.f32.gmra.mxu0 %vm993_vm1, %v19485_v49  ;;  %v19489_v49 = vld [vmem:[#allocation102_spill] sm:$0xff] }
 0x800   :  { %7573 = vrot.lane.b32.xlu0 %v19431_v58, %s14183_s13  ;;  %12881 = vmatprep.mubr.msk.f32.mxu0 %vm993_vm1, %v19486_v22  ;;  %v19490_v22 = vld [vmem:[#allocation89_spill] sm:$0xff] }
 0x801   :  { %v16915_v17 = vpop.permute.xlu0 %6198 }
 0x802   :  { %7684 = vrot.lane.b32.xlu1 %v19435_v52, %s14183_s13  ;;  %v6320_v44 = vpop.permute.xlu1 %6319  ;;  %v19505_v52 = vld [vmem:[#allocation116_spill] sm:$0xff] }
 0x803   :  { %12882 = vmatmul.mubr.msk.f32.gmra.mxu0 %vm993_vm1, %v19487_v33 }
 0x804   :  { %7686 = vrot.lane.b32.xlu0 %v19428_v39, %s14183_s13  ;;  %12884 = vmatprep.mubr.msk.f32.mxu0 %vm993_vm1, %v19488_v4 }
 0x805   :  { %v16925_v20 = vpop.permute.xlu0 %6190 }
 0x806   :  { %7680 = vrot.lane.b32.xlu1 %v19448_v48, %s14183_s13  ;;  %v16929_v26 = vpop.permute.xlu1 %6192 }
 0x807   :  { %12885 = vmatmul.mubr.msk.f32.gmra.mxu0 %vm993_vm1, %v19489_v49 }
 0x808   :  { %7682 = vrot.lane.b32.xlu0 %v19444_v8, %s14183_s13  ;;  %12887 = vmatprep.mubr.msk.f32.mxu0 %vm993_vm1, %v19490_v22  ;;  %v19501_v8 = vld [vmem:[#allocation86_spill] sm:$0xff] }
 0x809   :  { %v6318_v33 = vpop.permute.xlu0 %6317 }
 0x80a   :  { %7793 = vrot.lane.b32.xlu1 %v19447_v42, %s14183_s13  ;;  %v16939_v4 = vpop.permute.xlu1 %6438 }
 0x80b   :  { %12888 = vmatmul.mubr.msk.f32.gmra.mxu0 %vm993_vm1, %v19491_v5  ;;  %v19494_v5 = vld [vmem:[#allocation106_spill] sm:$0xff] }
 0x80c   :  { %7795 = vrot.lane.b32.xlu0 %v19443_v7, %s14183_s13  ;;  %12890 = vmatprep.mubr.msk.f32.mxu0 %vm993_vm1, %v19492_v25 }
 0x80d   :  { %v16947_v49 = vpop.permute.xlu0 %6194 }
 0x80e   :  { %7791 = vrot.lane.b32.xlu1 %v19452_v27, %s14183_s13  ;;  %v16951_v22 = vpop.permute.xlu1 %6196  ;;  %v19496_v27 = vld [vmem:[#allocation115_spill] sm:$0xff] }
 0x80f   :  { %12891 = vmatmul.mubr.msk.f32.gmra.mxu0 %vm993_vm1, %v19493_v30 }
 0x810   :  { %7904 = vrot.lane.b32.xlu0 %v19451_v55, %s14183_s13  ;;  %12893 = vmatprep.mubr.msk.f32.mxu0 %vm993_vm1, %v19494_v5  ;;  %v19497_v55 = vld [vmem:[#allocation104_spill] sm:$0xff] }
 0x811   :  { %v6316_v34 = vpop.permute.xlu0 %6315 }
 0x812   :  { %7789 = vrot.lane.b32.xlu1 %v19456_v45, %s14183_s13  ;;  %v16961_v25 = vpop.permute.xlu1 %6436  ;;  %v19498_v45 = vld [vmem:[#allocation84_spill] sm:$0xff] }
 0x813   :  { %12894 = vmatmul.mubr.msk.f32.gmra.mxu0 %vm993_vm1, %v19495_v9 }
 0x814   :  { %7900 = vrot.lane.b32.xlu0 %v19460_v40, %s14183_s13  ;;  %12896 = vmatprep.mubr.msk.f32.mxu0 %vm993_vm1, %v19496_v27  ;;  %v19499_v40 = vld [vmem:[#allocation18_spill] sm:$0xff]  ;;  %v19500_v27 = vld [vmem:[#allocation125_spill] sm:$0xff] }
 0x815   :  { %v6308_v30 = vpop.permute.xlu0 %6307 }
 0x816   :  { %7902 = vrot.lane.b32.xlu1 %v19455_v43, %s14183_s13  ;;  %v6310_v5 = vpop.permute.xlu1 %6309 }
 0x817   :  { %12897 = vmatmul.mubr.msk.f32.gmra.mxu0 %vm993_vm1, %v19497_v55  ;;  %v19502_v55 = vld [vmem:[#allocation113_spill] sm:$0xff] }
 0x818   :  { %12899 = vmatprep.mubr.msk.f32.mxu0 %vm993_vm1, %v19498_v45 }
 0x819   :  { %v16975_v48 = vpop.permute.xlu0 %6434 }
 0x81a   :  { %7898 = vrot.lane.b32.xlu1 %v19464_v10, %s14183_s13  ;;  %v6556_v9 = vpop.permute.xlu1 %6555  ;;  %v19504_v10 = vld [vmem:[#allocation119_spill] sm:$0xff] }
 0x81b   :  { %12900 = vmatmul.mubr.msk.f32.gmra.mxu0 %vm993_vm1, %v19499_v40 }
 0x81c   :  { %12902 = vmatprep.mubr.msk.f32.mxu0 %vm993_vm1, %v19500_v27 }
 0x81d   :  { %v6312_v43 = vpop.permute.xlu0 %6311 }
 0x81e   :  { %v6314_v42 = vpop.permute.xlu1 %6313 }
 0x81f   :  { %12903 = vmatmul.mubr.msk.f32.gmra.mxu0 %vm993_vm1, %v19501_v8 }
 0x820   :  { %12905 = vmatprep.mubr.msk.f32.mxu0 %vm993_vm1, %v19502_v55 }
 0x821   :  { %v16987_v45 = vpop.permute.xlu0 %6432 }
 0x822   :  { %v6554_v7 = vpop.permute.xlu1 %6553 }
 0x823   :  { %12906 = vmatmul.mubr.msk.f32.gmra.mxu0 %vm993_vm1, %v19503_v38 }
 0x824   :  { %12908 = vmatprep.mubr.msk.f32.mxu0 %vm993_vm1, %v19504_v10 }
 0x825   :  { %v16993_v40 = vpop.permute.xlu0 %6424 }
 0x826   :  { %v16995_v27 = vpop.permute.xlu1 %6426 }
 0x827   :  { %12909 = vmatmul.mubr.msk.f32.gmra.mxu0 %vm993_vm1, %v19505_v52 }
 0x828   :  { %12933 = vmatprep.mubr.msk.f32.mxu0 %vm993_vm1, %v16875_v15 }
 0x829   :  { %v6552_v8 = vpop.permute.xlu0 %6551 }
 0x82a   :  { %v17001_v55 = vpop.permute.xlu1 %6672 }
 0x82b   :  { %12934 = vmatmul.mubr.msk.f32.vlgmr.msra.gmra.mxu0 %vm993_vm1, %v16882_v23 }
 0x82c   :  { %12954 = vmatpush3.xpose.msk.msra.mxu0 %vm993_vm1, %v16895_v6  ;;  %12936 = vmatprep.mubr.msk.f32.mxu0 %vm993_vm1, %v6078_v1 }
 0x82d   :  { %v17008_v38 = vpop.permute.xlu0 %6428  ;;  %12955 = vmatprep.subr.msk.mxu0 %vm993_vm1, %v6320_v44 }
 0x82e   :  { %v17011_v10 = vpop.permute.xlu1 %6430 }
 0x82f   :  { %12937 = vmatmul.mubr.msk.f32.gmra.mxu0 %vm993_vm1, %v16907_v56 }
 0x830   :  { %12956 = vmatpush3.xpose.msk.msra.mxu0 %vm993_vm1, %v6320_v44  ;;  %12961 = vmatprep.mubr.msk.f32.mxu0 %vm993_vm1, %v6308_v30 }
 0x831   :  { %v6550_v52 = vpop.permute.xlu0 %6549  ;;  %12957 = vmatprep.subr.msk.mxu0 %vm993_vm1, %v6318_v33 }
 0x832   :  { %v17018_v15 = vpop.permute.xlu1 %6670 }
 0x834   :  { %12958 = vmatpush3.xpose.msk.msra.mxu0 %vm993_vm1, %v6318_v33 }
 0x835   :  { %v6542_v23 = vpop.permute.xlu0 %6541  ;;  %12959 = vmatprep.subr.msk.mxu0 %vm993_vm1, %v6316_v34 }
 0x836   :  { %v6544_v6 = vpop.permute.xlu1 %6543 }
 0x838   :  { %12960 = vmatpush3.xpose.msk.msra.mxu0 %vm993_vm1, %v6316_v34 }
 0x839   :  { %v17023_v1 = vpop.permute.xlu0 %6668  ;;  %12981 = vmatprep.subr.msk.mxu0 %vm993_vm1, %v6556_v9 }
 0x83a   :  { %v6790_v56 = vpop.permute.xlu1 %6789 }
 0x83b   :  { %12962 = vmatmul.mubr.msk.f32.vlgmr.msra.gmra.mxu0 %vm993_vm1, %v6310_v5 }
 0x83c   :  { %12964 = vmatprep.mubr.msk.f32.mxu0 %vm993_vm1, %v6312_v43  ;;  %12982 = vmatpush3.xpose.msk.msra.mxu0 %vm993_vm1, %v6556_v9 }
 0x83d   :  { %v6546_v44 = vpop.permute.xlu0 %6545  ;;  %12983 = vmatprep.subr.msk.mxu0 %vm993_vm1, %v6554_v7 }
 0x83e   :  { %v6548_v33 = vpop.permute.xlu1 %6547 }
 0x83f   :  { %12965 = vmatmul.mubr.msk.f32.gmra.mxu0 %vm993_vm1, %v6314_v42 }
 0x840   :  { %12984 = vmatpush3.xpose.msk.msra.mxu0 %vm993_vm1, %v6554_v7  ;;  %12989 = vmatprep.mubr.msk.f32.mxu0 %vm993_vm1, %v6542_v23 }
 0x841   :  { %v17033_v34 = vpop.permute.xlu0 %6666  ;;  %12985 = vmatprep.subr.msk.mxu0 %vm993_vm1, %v6552_v8 }
 0x842   :  { %v6788_v30 = vpop.permute.xlu1 %6787 }
 0x844   :  { %12986 = vmatpush3.xpose.msk.msra.mxu0 %vm993_vm1, %v6552_v8  ;;  %v12723_v5 = vpop.f32.mrf.mxu0  ;;  %v12737_v8 = vpop.f32.mrf.mxu1 }
 0x845   :  { %v17037_v43 = vpop.permute.xlu0 %6658  ;;  %12987 = vmatprep.subr.msk.mxu0 %vm993_vm1, %v6550_v52 }
 0x846   :  { %v17040_v9 = vpop.permute.xlu1 %6660  ;;  %v4635_v58 = vpop.f32.mrf.mxu0 }
 0x847   :  { %12819 = vmatprep.mubr.msk.f32.mxu1 %vm993_vm1, %v4635_v58 }
 0x848   :  { %12988 = vmatpush3.xpose.msk.msra.mxu0 %vm993_vm1, %v6550_v52  ;;  %12820 = vmatmul.mubr.msk.f32.gmra.mxu1 %vm993_vm1, %v12723_v5  ;;  %v4744_v52 = vpop.f32.mrf.mxu1 }
 0x849   :  { %v6786_v7 = vpop.permute.xlu0 %6785  ;;  %13009 = vmatprep.subr.msk.mxu0 %vm993_vm1, %v6790_v56 }
 0x84a   :  { %v17046_v42 = vpop.permute.xlu1 %6662 }
 0x84b   :  { %12990 = vmatmul.mubr.msk.f32.vlgmr.msra.gmra.mxu0 %vm993_vm1, %v6544_v6 }
 0x84c   :  { %12992 = vmatprep.mubr.msk.f32.mxu0 %vm993_vm1, %v6546_v44  ;;  %13010 = vmatpush3.xpose.msk.msra.mxu0 %vm993_vm1, %v6790_v56  ;;  %v12740_v56 = vpop.f32.mrf.mxu1 }
 0x84d   :  { %v17051_v23 = vpop.permute.xlu0 %6664  ;;  %13011 = vmatprep.subr.msk.mxu0 %vm993_vm1, %v6788_v30 }
 0x84e   :  { %v6784_v58 = vpop.permute.xlu1 %6783 }
 0x84f   :  { %12993 = vmatmul.mubr.msk.f32.gmra.mxu0 %vm993_vm1, %v6548_v33  ;;  %v12726_v5 = vpop.f32.mrf.mxu0 }
 0x850   :  { %13012 = vmatpush3.xpose.msk.msra.mxu0 %vm993_vm1, %v6788_v30  ;;  %v4754_v30 = vpop.f32.mrf.mxu1 }
 0x851   :  { %v6776_v39 = vpop.permute.xlu0 %6775  ;;  %13013 = vmatprep.subr.msk.mxu0 %vm993_vm1, %v6786_v7  ;;  %v4645_v6 = vpop.f32.mrf.mxu0 }
 0x852   :  { %13017 = vmatprep.mubr.msk.f32.mxu0 %vm993_vm1, %v6776_v39  ;;  %v6778_v44 = vpop.permute.xlu1 %6777  ;;  %12822 = vmatprep.mubr.msk.f32.mxu1 %vm993_vm1, %v4645_v6 }
 0x853   :  { %12823 = vmatmul.mubr.msk.f32.gmra.mxu1 %vm993_vm1, %v12726_v5  ;;  %v12751_v57 = vpop.f32.mrf.mxu0 }
 0x854   :  { %13014 = vmatpush3.xpose.msk.msra.mxu0 %vm993_vm1, %v6786_v7  ;;  %12825 = vmatprep.mubr.msk.f32.mxu1 %vm993_vm1, %v4744_v52 }
 0x855   :  { %v6780_v21 = vpop.permute.xlu0 %6779  ;;  %13015 = vmatprep.subr.msk.mxu0 %vm993_vm1, %v6784_v58  ;;  %v4853_v5 = vpop.f32.mrf.mxu0 }
 0x856   :  { %v6782_v33 = vpop.permute.xlu1 %6781 }
 0x857   :  { %12826 = vmatmul.mubr.msk.f32.gmra.mxu1 %vm993_vm1, %v12737_v8 }
 0x858   :  { %13016 = vmatpush3.xpose.msk.msra.mxu0 %vm993_vm1, %v6784_v58  ;;  %12828 = vmatprep.mubr.msk.f32.mxu1 %vm993_vm1, %v4754_v30 }
 0x859   :  { %v17065_v39 = vpop.permute.xlu0 %7250 }
 0x85a   :  { %v17068_v6 = vpop.permute.xlu1 %7248 }
 0x85b   :  { %13018 = vmatmul.mubr.msk.f32.vlgmr.msra.gmra.mxu0 %vm993_vm1, %v6778_v44  ;;  %12829 = vmatmul.mubr.msk.f32.gmra.mxu1 %vm993_vm1, %v12740_v56 }
 0x85c   :  { %13020 = vmatprep.mubr.msk.f32.mxu0 %vm993_vm1, %v6780_v21  ;;  %12831 = vmatprep.mubr.msk.f32.mxu1 %vm993_vm1, %v4853_v5 }
 0x85d   :  { %v17073_v7 = vpop.permute.xlu0 %7246 }
 0x85e   :  { %v17076_v8 = vpop.permute.xlu1 %7244 }
 0x85f   :  { %13021 = vmatmul.mubr.msk.f32.gmra.mxu0 %vm993_vm1, %v6782_v33  ;;  %12832 = vmatmul.mubr.msk.f32.gmra.mxu1 %vm993_vm1, %v12751_v57  ;;  %v12765_v57 = vpop.f32.mrf.mxu1 }
 0x861   :  { %v7360_v58 = vpop.permute.xlu0 %7359  ;;  %v4962_v13 = vpop.f32.mrf.mxu1 }
 0x862   :  { %13037 = vmatprep.subr.mxu0 %v7360_v58  ;;  %v7358_v52 = vpop.permute.xlu1 %7357 }
 0x863   :  { %13038 = vmatpush3.msra.mxu0 %v7360_v58 }
 0x864   :  { %13039 = vmatprep.subr.mxu0 %v7358_v52 }
 0x865   :  { %13040 = vmatpush3.msra.mxu0 %v7358_v52  ;;  %v7356_v44 = vpop.permute.xlu0 %7355  ;;  %v12768_v52 = vpop.f32.mrf.mxu1 }
 0x866   :  { %13041 = vmatprep.subr.mxu0 %v7356_v44  ;;  %v7354_v56 = vpop.permute.xlu1 %7353 }
 0x867   :  { %13042 = vmatpush3.msra.mxu0 %v7356_v44  ;;  %v4972_v44 = vpop.f32.mrf.mxu1 }
 0x868   :  { %13043 = vmatprep.subr.mxu0 %v7354_v56 }
 0x869   :  { %13044 = vmatpush3.msra.mxu0 %v7354_v56  ;;  %v17080_v21 = vpop.permute.xlu0 %7468  ;;  %v12793_v29 = vpop.f32.mrf.mxu1 }
 0x86a   :  { %19506 = vst [vmem:[#allocation117_spill] sm:$0xff] %v17080_v21 }
 0x86d   :  { %v17082_v30 = vpop.permute.xlu0 %7464 }
 0x86e   :  { %19507 = vst [vmem:[#allocation121_spill] sm:$0xff] %v17082_v30 }
 0x871   :  { %v17084_v5 = vpop.permute.xlu0 %7577 }
 0x872   :  { %13065 = vmatprep.subr.mxu0 %v17084_v5 }
 0x890   :  { %v12754_v33 = vpop.f32.mrf.mxu0 }
 0x892   :  { %v4863_v58 = vpop.f32.mrf.mxu0 }
 0x893   :  { %12834 = vmatprep.mubr.msk.f32.mxu1 %vm993_vm1, %v4863_v58  ;;  %v5180_v58 = vpop.f32.mrf.mxu1 }
 0x894   :  { %12835 = vmatmul.mubr.msk.f32.gmra.mxu1 %vm993_vm1, %v12754_v33 }
 0x895   :  { %12837 = vmatprep.mubr.msk.f32.mxu1 %vm993_vm1, %v4962_v13  ;;  %v12796_v13 = vpop.f32.mrf.mxu1 }
 0x898   :  { %v12779_v56 = vpop.f32.mrf.mxu0  ;;  %12838 = vmatmul.mubr.msk.f32.gmra.mxu1 %vm993_vm1, %v12765_v57 }
 0x899   :  { %12840 = vmatprep.mubr.msk.f32.mxu1 %vm993_vm1, %v4972_v44  ;;  %v5190_v44 = vpop.f32.mrf.mxu1 }
 0x89a   :  { %v5071_v30 = vpop.f32.mrf.mxu0 }
 0x89c   :  { %12841 = vmatmul.mubr.msk.f32.gmra.mxu1 %vm993_vm1, %v12768_v52 }
 0x89d   :  { %v12782_v47 = vpop.f32.mrf.mxu0  ;;  %12843 = vmatprep.mubr.msk.f32.mxu1 %vm993_vm1, %v5071_v30 }
 0x89f   :  { %v5081_v62 = vpop.f32.mrf.mxu0 }
 0x8a0   :  { %12844 = vmatmul.mubr.msk.f32.gmra.mxu1 %vm993_vm1, %v12779_v56 }
 0x8a1   :  { %v12807_v33 = vpop.f32.mrf.mxu0  ;;  %12846 = vmatprep.mubr.msk.f32.mxu1 %vm993_vm1, %v5081_v62 }
 0x8a3   :  { %v5289_v12 = vpop.f32.mrf.mxu0 }
 0x8a4   :  { %12847 = vmatmul.mubr.msk.f32.gmra.mxu1 %vm993_vm1, %v12782_v47  ;;  %v12815_v35 = vpop.f32.mrf.mxu1 }
 0x8a5   :  { %12849 = vmatprep.mubr.msk.f32.mxu1 %vm993_vm1, %v5180_v58 }
 0x8a6   :  { %v12810_v57 = vpop.f32.mrf.mxu0  ;;  %v17105_v62 = vpop.f32.mrf.mxu1 }
 0x8a7   :  { %19510 = vst [vmem:[#allocation46_spill] sm:$0xff] %v17105_v62 }
 0x8a8   :  { %v5299_v52 = vpop.f32.mrf.mxu0  ;;  %12850 = vmatmul.mubr.msk.f32.gmra.mxu1 %vm993_vm1, %v12793_v29 }
 0x8a9   :  { %12852 = vmatprep.mubr.msk.f32.mxu1 %vm993_vm1, %v5190_v44 }
 0x8aa   :  { %v12865_v30 = vpop.f32.mrf.mxu0 }
 0x8ab   :  { %v17100_v56 = vadd.f32 %v12865_v30, %v12815_v35  ;;  %v17261_v30 = vld [vmem:[#allocation8 + $0x58] sm:$0xff] }
 0x8ac   :  { %v17102_v60 = vpop.f32.mrf.mxu0  ;;  %12853 = vmatmul.mubr.msk.f32.gmra.mxu1 %vm993_vm1, %v12796_v13  ;;  %v12818_v47 = vpop.f32.mrf.mxu1 }
 0x8ad   :  { %19508 = vst [vmem:[#allocation124_spill] sm:$0xff] %v17100_v56  ;;  %19509 = vst [vmem:[#allocation15_spill] sm:$0xff] %v17102_v60  ;;  %12855 = vmatprep.mubr.msk.f32.mxu1 %vm993_vm1, %v5289_v12 }
 0x8af   :  { %v12868_v58 = vpop.f32.mrf.mxu0 }
 0x8b0   :  { %v17108_v46 = vadd.f32 %v12868_v58, %v12818_v47  ;;  %12856 = vmatmul.mubr.msk.f32.gmra.mxu1 %vm993_vm1, %v12807_v33  ;;  %v17270_v47 = vld [vmem:[#allocation8 + $0x50] sm:$0xff] }
 0x8b1   :  { %v17111_v29 = vpop.f32.mrf.mxu0  ;;  %12858 = vmatprep.mubr.msk.f32.mxu1 %vm993_vm1, %v5299_v52 }
 0x8b2   :  { %19511 = vst [vmem:[#allocation17_spill] sm:$0xff] %v17108_v46  ;;  %19512 = vst [vmem:[#allocation22_spill] sm:$0xff] %v17111_v29 }
 0x8b3   :  { %v17114_v35 = vpop.f32.mrf.mxu0 }
 0x8b4   :  { %19513 = vst [vmem:[#allocation47_spill] sm:$0xff] %v17114_v35  ;;  %12859 = vmatmul.mubr.msk.f32.gmra.mxu1 %vm993_vm1, %v12810_v57 }
 0x8b5   :  { %v17117_v44 = vpop.f32.mrf.mxu0  ;;  %12919 = vmatprep.mubr.msk.f32.mxu1 %vm993_vm1, %v16819_v19 }
 0x8b6   :  { %19514 = vst [vmem:[#allocation101_spill] sm:$0xff] %v17117_v44 }
 0x8b7   :  { %v17121_v12 = vpop.f32.mrf.mxu0 }
 0x8b8   :  { %19515 = vst [vmem:[#allocation82_spill] sm:$0xff] %v17121_v12  ;;  %12920 = vmatmul.mubr.msk.f32.vlgmr.msra.gmra.mxu1 %vm993_vm1, %v16825_v28 }
 0x8b9   :  { %v17125_v13 = vpop.f32.mrf.mxu0  ;;  %12940 = vmatpush3.xpose.msk.msra.mxu1 %vm993_vm1, %v16837_v16  ;;  %12922 = vmatprep.mubr.msk.f32.mxu1 %vm993_vm1, %v16844_v32 }
 0x8ba   :  { %19516 = vst [vmem:[#allocation118_spill] sm:$0xff] %v17125_v13  ;;  %12941 = vmatprep.subr.msk.mxu1 %vm993_vm1, %v16866_v61 }
 0x8bb   :  { %v17133_v33 = vpop.f32.mrf.mxu0 }
 0x8bc   :  { %19517 = vst [vmem:[#allocation110_spill] sm:$0xff] %v17133_v33  ;;  %12923 = vmatmul.mubr.msk.f32.gmra.mxu1 %vm993_vm1, %v16852_v24 }
 0x8bd   :  { %v17137_v19 = vpop.f32.mrf.mxu0  ;;  %12942 = vmatpush3.xpose.msk.msra.mxu1 %vm993_vm1, %v16866_v61  ;;  %12947 = vmatprep.mubr.msk.f32.mxu1 %vm993_vm1, %v16925_v20 }
 0x8be   :  { %19518 = vst [vmem:[#allocation120_spill] sm:$0xff] %v17137_v19  ;;  %12943 = vmatprep.subr.msk.mxu1 %vm993_vm1, %v16889_v59 }
 0x8bf   :  { %v17145_v28 = vpop.f32.mrf.mxu0 }
 0x8c0   :  { %19519 = vst [vmem:[#allocation105_spill] sm:$0xff] %v17145_v28 }
 0x8c1   :  { %v17147_v16 = vpop.f32.mrf.mxu0  ;;  %12944 = vmatpush3.xpose.msk.msra.mxu1 %vm993_vm1, %v16889_v59 }
 0x8c2   :  { %19520 = vst [vmem:[#allocation122_spill] sm:$0xff] %v17147_v16  ;;  %12945 = vmatprep.subr.msk.mxu1 %vm993_vm1, %v16915_v17 }
 0x8c3   :  { %v17153_v32 = vpop.f32.mrf.mxu0 }
 0x8c4   :  { %19521 = vst [vmem:[#allocation111_spill] sm:$0xff] %v17153_v32 }
 0x8c5   :  { %v17155_v24 = vpop.f32.mrf.mxu0  ;;  %12946 = vmatpush3.xpose.msk.msra.mxu1 %vm993_vm1, %v16915_v17 }
 0x8c6   :  { %19522 = vst [vmem:[#allocation107_spill] sm:$0xff] %v17155_v24  ;;  %12967 = vmatprep.subr.msk.mxu1 %vm993_vm1, %v16939_v4 }
 0x8c7   :  { %v17161_v61 = vpop.f32.mrf.mxu0 }
 0x8c8   :  { %19523 = vst [vmem:[#allocation108_spill] sm:$0xff] %v17161_v61  ;;  %12948 = vmatmul.mubr.msk.f32.vlgmr.msra.gmra.mxu1 %vm993_vm1, %v16929_v26 }
 0x8c9   :  { %v17165_v20 = vpop.f32.mrf.mxu0  ;;  %12950 = vmatprep.mubr.msk.f32.mxu1 %vm993_vm1, %v16947_v49  ;;  %12968 = vmatpush3.xpose.msk.msra.mxu1 %vm993_vm1, %v16939_v4 }
 0x8ca   :  { %19524 = vst [vmem:[#allocation98_spill] sm:$0xff] %v17165_v20  ;;  %12969 = vmatprep.subr.msk.mxu1 %vm993_vm1, %v16961_v25 }
 0x8cb   :  { %v17173_v59 = vpop.f32.mrf.mxu0 }
 0x8cc   :  { %19525 = vst [vmem:[#allocation16_spill] sm:$0xff] %v17173_v59  ;;  %12951 = vmatmul.mubr.msk.f32.gmra.mxu1 %vm993_vm1, %v16951_v22 }
 0x8cd   :  { %v17177_v17 = vpop.f32.mrf.mxu0  ;;  %12970 = vmatpush3.xpose.msk.msra.mxu1 %vm993_vm1, %v16961_v25  ;;  %12975 = vmatprep.mubr.msk.f32.mxu1 %vm993_vm1, %v16993_v40 }
 0x8ce   :  { %19526 = vst [vmem:[#allocation19_spill] sm:$0xff] %v17177_v17  ;;  %12971 = vmatprep.subr.msk.mxu1 %vm993_vm1, %v16975_v48 }
 0x8cf   :  { %v17185_v26 = vpop.f32.mrf.mxu0 }
 0x8d0   :  { %19527 = vst [vmem:[#allocation112_spill] sm:$0xff] %v17185_v26 }
 0x8d1   :  { %v17187_v4 = vpop.f32.mrf.mxu0  ;;  %12972 = vmatpush3.xpose.msk.msra.mxu1 %vm993_vm1, %v16975_v48 }
 0x8d2   :  { %19528 = vst [vmem:[#allocation114_spill] sm:$0xff] %v17187_v4  ;;  %12973 = vmatprep.subr.msk.mxu1 %vm993_vm1, %v16987_v45 }
 0x8d3   :  { %v17193_v49 = vpop.f32.mrf.mxu0 }
 0x8d4   :  { %19529 = vst [vmem:[#allocation20_spill] sm:$0xff] %v17193_v49 }
 0x8d5   :  { %v17195_v22 = vpop.f32.mrf.mxu0  ;;  %12974 = vmatpush3.xpose.msk.msra.mxu1 %vm993_vm1, %v16987_v45 }
 0x8d6   :  { %19530 = vst [vmem:[#allocation123_spill] sm:$0xff] %v17195_v22  ;;  %12995 = vmatprep.subr.msk.mxu1 %vm993_vm1, %v17001_v55 }
 0x8d7   :  { %v17201_v25 = vpop.f32.mrf.mxu0 }
 0x8d8   :  { %19531 = vst [vmem:[#allocation21_spill] sm:$0xff] %v17201_v25  ;;  %12976 = vmatmul.mubr.msk.f32.vlgmr.msra.gmra.mxu1 %vm993_vm1, %v16995_v27 }
 0x8d9   :  { %v17205_v40 = vpop.f32.mrf.mxu0  ;;  %12978 = vmatprep.mubr.msk.f32.mxu1 %vm993_vm1, %v17008_v38  ;;  %12996 = vmatpush3.xpose.msk.msra.mxu1 %vm993_vm1, %v17001_v55 }
 0x8da   :  { %19532 = vst [vmem:[#allocation88_spill] sm:$0xff] %v17205_v40  ;;  %12997 = vmatprep.subr.msk.mxu1 %vm993_vm1, %v17018_v15 }
 0x8db   :  { %v17213_v48 = vpop.f32.mrf.mxu0 }
 0x8dc   :  { %19533 = vst [vmem:[#allocation90_spill] sm:$0xff] %v17213_v48  ;;  %12979 = vmatmul.mubr.msk.f32.gmra.mxu1 %vm993_vm1, %v17011_v10 }
 0x8dd   :  { %v17217_v45 = vpop.f32.mrf.mxu0  ;;  %12998 = vmatpush3.xpose.msk.msra.mxu1 %vm993_vm1, %v17018_v15  ;;  %13003 = vmatprep.mubr.msk.f32.mxu1 %vm993_vm1, %v17037_v43 }
 0x8de   :  { %19534 = vst [vmem:[#allocation92_spill] sm:$0xff] %v17217_v45  ;;  %12999 = vmatprep.subr.msk.mxu1 %vm993_vm1, %v17023_v1 }
 0x8df   :  { %v17225_v27 = vpop.f32.mrf.mxu0 }
 0x8e0   :  { %19535 = vst [vmem:[#allocation93_spill] sm:$0xff] %v17225_v27 }
 0x8e1   :  { %v17227_v55 = vpop.f32.mrf.mxu0  ;;  %13000 = vmatpush3.xpose.msk.msra.mxu1 %vm993_vm1, %v17023_v1  ;;  %v17246_v1 = vld [vmem:[#allocation8 + $0x48] sm:$0xff] }
 0x8e2   :  { %19536 = vst [vmem:[#allocation94_spill] sm:$0xff] %v17227_v55  ;;  %13001 = vmatprep.subr.msk.mxu1 %vm993_vm1, %v17033_v34 }
 0x8e3   :  { %v17233_v38 = vpop.f32.mrf.mxu0 }
 0x8e4   :  { %19537 = vst [vmem:[#allocation95_spill] sm:$0xff] %v17233_v38 }
 0x8e5   :  { %v17235_v10 = vpop.f32.mrf.mxu0  ;;  %13002 = vmatpush3.xpose.msk.msra.mxu1 %vm993_vm1, %v17033_v34  ;;  %v17252_v34 = vld [vmem:[#allocation8 + $0x40] sm:$0xff] }
 0x8e6   :  { %19538 = vst [vmem:[#allocation96_spill] sm:$0xff] %v17235_v10  ;;  %13023 = vmatprep.subr.mxu1 %v17065_v39 }
 0x8e7   :  { %v17240_v15 = vpop.f32.mrf.mxu0 }
 0x8e8   :  { %19539 = vst [vmem:[#allocation80_spill] sm:$0xff] %v17240_v15  ;;  %13004 = vmatmul.mubr.msk.f32.vlgmr.msra.gmra.mxu1 %vm993_vm1, %v17040_v9 }
 0x8e9   :  { %v17244_v43 = vpop.f32.mrf.mxu0  ;;  %13006 = vmatprep.mubr.msk.f32.mxu1 %vm993_vm1, %v17046_v42  ;;  %13024 = vmatpush3.msra.mxu1 %v17065_v39 }
 0x8ea   :  { %19540 = vst [vmem:[#allocation79_spill] sm:$0xff] %v17244_v43  ;;  %13025 = vmatprep.subr.mxu1 %v17068_v6 }
 0x8eb   :  { %v12935_v57 = vpop.f32.mrf.mxu0  ;;  %13026 = vmatpush3.msra.mxu1 %v17068_v6 }
 0x8ec   :  { %v17256_v52 = vadd.f32 %v12935_v57, %v17246_v1  ;;  %13007 = vmatmul.mubr.msk.f32.gmra.mxu1 %vm993_vm1, %v17051_v23  ;;  %13027 = vmatprep.subr.mxu1 %v17073_v7 }
 0x8ed   :  { %v6171_v9 = vpop.f32.mrf.mxu0  ;;  %13028 = vmatpush3.msra.mxu1 %v17073_v7 }
 0x8ee   :  { %v17265_v42 = vadd.f32 %v6171_v9, %v17252_v34  ;;  %v6907_v39 = vsel %vm117_vm0, %v17256_v52, -inf  ;;  %13029 = vmatprep.subr.mxu1 %v17076_v8 }
 0x8ef   :  { %6908 = vmax.xlane.f32.xlu1 %v6907_v39  ;;  %v12938_v6 = vpop.f32.mrf.mxu0  ;;  %13030 = vmatpush3.msra.mxu1 %v17076_v8 }
 0x8f0   :  { %v17274_v23 = vadd.f32 %v12938_v6, %v17261_v30  ;;  %v6904_v7 = vsel %vm117_vm0, %v17265_v42, -inf  ;;  %13051 = vmatprep.subr.mxu1 %v17080_v21 }
 0x8f1   :  { %6905 = vmax.xlane.f32.xlu0 %v6904_v7  ;;  %v6181_v58 = vpop.f32.mrf.mxu0 }
 0x8f2   :  { %v17280_v57 = vadd.f32 %v6181_v58, %v17270_v47  ;;  %v6913_v9 = vsel %vm117_vm0, %v17274_v23, -inf }
 0x8f3   :  { %6914 = vmax.xlane.f32.xlu1 %v6913_v9 }
 0x8f4   :  { %v6910_v8 = vsel %vm117_vm0, %v17280_v57, -inf }
 0x8f5   :  { %6911 = vmax.xlane.f32.xlu0 %v6910_v8 }
 0x8fb   :  { %v12963_v39 = vpop.f32.mrf.mxu0 }
 0x8fc   :  { %v17287_v6 = vadd.f32 %v12963_v39, %v17246_v1 }
 0x8fd   :  { %v6405_v16 = vpop.f32.mrf.mxu0 }
 0x8fe   :  { %v17290_v19 = vadd.f32 %v6405_v16, %v17252_v34  ;;  %v6931_v7 = vsel %vm117_vm0, %v17287_v6, -inf }
 0x8ff   :  { %6932 = vmax.xlane.f32.xlu1 %v6931_v7  ;;  %v12966_v58 = vpop.f32.mrf.mxu0 }
 0x900   :  { %v17295_v13 = vadd.f32 %v12966_v58, %v17261_v30  ;;  %v6928_v9 = vsel %vm117_vm0, %v17290_v19, -inf }
 0x901   :  { %6929 = vmax.xlane.f32.xlu0 %v6928_v9  ;;  %v6415_v8 = vpop.f32.mrf.mxu0 }
 0x902   :  { %v17300_v39 = vadd.f32 %v6415_v8, %v17270_v47  ;;  %v6937_v16 = vsel %vm117_vm0, %v17295_v13, -inf }
 0x903   :  { %6938 = vmax.xlane.f32.xlu1 %v6937_v16 }
 0x904   :  { %v6934_v44 = vsel %vm117_vm0, %v17300_v39, -inf }
 0x905   :  { %6935 = vmax.xlane.f32.xlu0 %v6934_v44 }
 0x90b   :  { %v12991_v7 = vpop.f32.mrf.mxu0 }
 0x90c   :  { %v17307_v58 = vadd.f32 %v12991_v7, %v17246_v1 }
 0x90d   :  { %v6639_v29 = vpop.f32.mrf.mxu0 }
 0x90e   :  { %v17310_v60 = vadd.f32 %v6639_v29, %v17252_v34  ;;  %v6955_v9 = vsel %vm117_vm0, %v17307_v58, -inf }
 0x90f   :  { %6956 = vmax.xlane.f32.xlu1 %v6955_v9  ;;  %v12994_v8 = vpop.f32.mrf.mxu0 }
 0x910   :  { %v17315_v62 = vadd.f32 %v12994_v8, %v17261_v30  ;;  %v6952_v16 = vsel %vm117_vm0, %v17310_v60, -inf }
 0x911   :  { %6953 = vmax.xlane.f32.xlu0 %v6952_v16  ;;  %v6649_v44 = vpop.f32.mrf.mxu0 }
 0x912   :  { %v17320_v7 = vadd.f32 %v6649_v44, %v17270_v47  ;;  %v6961_v29 = vsel %vm117_vm0, %v17315_v62, -inf }
 0x913   :  { %6962 = vmax.xlane.f32.xlu1 %v6961_v29 }
 0x914   :  { %v6958_v43 = vsel %vm117_vm0, %v17320_v7, -inf }
 0x915   :  { %6959 = vmax.xlane.f32.xlu0 %v6958_v43 }
 0x91b   :  { %v13019_v9 = vpop.f32.mrf.mxu0 }
 0x91c   :  { %v17327_v8 = vadd.f32 %v13019_v9, %v17246_v1 }
 0x91d   :  { %v6873_v15 = vpop.f32.mrf.mxu0 }
 0x91e   :  { %v17330_v10 = vadd.f32 %v6873_v15, %v17252_v34  ;;  %v6979_v16 = vsel %vm117_vm0, %v17327_v8, -inf }
 0x91f   :  { %6980 = vmax.xlane.f32.xlu1 %v6979_v16  ;;  %v13022_v44 = vpop.f32.mrf.mxu0  ;;  %v17346_v16 = vpop.f32.mrf.mxu1 }
 0x920   :  { %v17335_v38 = vadd.f32 %v13022_v44, %v17261_v30  ;;  %v6976_v29 = vsel %vm117_vm0, %v17330_v10, -inf  ;;  %19541 = vst [vmem:[#allocation81_spill] sm:$0xff] %v17346_v16 }
 0x921   :  { %6977 = vmax.xlane.f32.xlu0 %v6976_v29  ;;  %v6883_v43 = vpop.f32.mrf.mxu0  ;;  %v17348_v44 = vpop.f32.mrf.mxu1 }
 0x922   :  { %v17340_v9 = vadd.f32 %v6883_v43, %v17270_v47  ;;  %v6985_v15 = vsel %vm117_vm0, %v17335_v38, -inf  ;;  %19542 = vst [vmem:[#allocation85_spill] sm:$0xff] %v17348_v44  ;;  %v17354_v29 = vpop.permute.xlu1 %7466 }
 0x923   :  { %6986 = vmax.xlane.f32.xlu1 %v6985_v15  ;;  %v17350_v27 = vpop.f32.mrf.mxu1  ;;  %19545 = vst [vmem:[#allocation100_spill] sm:$0xff] %v17354_v29 }
 0x924   :  { %v6982_v55 = vsel %vm117_vm0, %v17340_v9, -inf  ;;  %19543 = vst [vmem:[#allocation97_spill] sm:$0xff] %v17350_v27 }
 0x925   :  { %6983 = vmax.xlane.f32.xlu0 %v6982_v55  ;;  %v17352_v45 = vpop.f32.mrf.mxu1 }
 0x926   :  { %19544 = vst [vmem:[#allocation99_spill] sm:$0xff] %v17352_v45  ;;  %v17358_v48 = vpop.permute.xlu1 %7462 }
 0x927   :  { %v17356_v43 = vpop.f32.mrf.mxu1  ;;  %19547 = vst [vmem:[#allocation89_spill] sm:$0xff] %v17358_v48 }
 0x928   :  { %19546 = vst [vmem:[#allocation102_spill] sm:$0xff] %v17356_v43 }
 0x929   :  { %v17360_v40 = vpop.f32.mrf.mxu1 }
 0x92a   :  { %19548 = vst [vmem:[#allocation87_spill] sm:$0xff] %v17360_v40  ;;  %v17364_v25 = vpop.permute.xlu1 %7575 }
 0x92b   :  { %v17362_v15 = vpop.f32.mrf.mxu1 }
 0x92c   :  { %19549 = vst [vmem:[#allocation91_spill] sm:$0xff] %v17362_v15  ;;  %v17384_v15 = vpop.permute.xlu0 %7573 }
 0x92d   :  { %v17366_v55 = vpop.f32.mrf.mxu1 }
 0x92e   :  { %19550 = vst [vmem:[#allocation83_spill] sm:$0xff] %v17366_v55  ;;  %v17368_v16 = vpop.permute.xlu1 %7571 }
 0x92f   :  { %v17370_v22 = vpop.f32.mrf.mxu1 }
 0x930   :  { %19551 = vst [vmem:[#allocation106_spill] sm:$0xff] %v17370_v22  ;;  %v17394_v24 = vpop.permute.xlu0 %7686 }
 0x931   :  { %v17372_v27 = vpop.f32.mrf.mxu1  ;;  %19561 = vst [vmem:[#allocation119_spill] sm:$0xff] %v17394_v24 }
 0x932   :  { %19552 = vst [vmem:[#allocation103_spill] sm:$0xff] %v17372_v27  ;;  %v17374_v49 = vpop.permute.xlu1 %7684 }
 0x933   :  { %19553 = vst [vmem:[#allocation115_spill] sm:$0xff] %v17374_v49  ;;  %v17376_v4 = vpop.f32.mrf.mxu1 }
 0x934   :  { %19554 = vst [vmem:[#allocation104_spill] sm:$0xff] %v17376_v4 }
 0x936   :  { %v17380_v26 = vpop.permute.xlu1 %7680 }
 0x937   :  { %19556 = vst [vmem:[#allocation18_spill] sm:$0xff] %v17380_v26 }
 0x93a   :  { %v17390_v61 = vpop.permute.xlu1 %7793 }
 0x954   :  { %v17378_v43 = vpop.f32.mrf.mxu1 }
 0x955   :  { %19555 = vst [vmem:[#allocation84_spill] sm:$0xff] %v17378_v43  ;;  %v17400_v43 = vpop.permute.xlu1 %7791 }
 0x956   :  { %v17382_v17 = vpop.f32.mrf.mxu1 }
 0x957   :  { %19557 = vst [vmem:[#allocation125_spill] sm:$0xff] %v17382_v17  ;;  %v17404_v17 = vpop.permute.xlu0 %7682 }
 0x958   :  { %v17386_v59 = vpop.f32.mrf.mxu1  ;;  %19565 = vst [vmem:[#allocation128_spill] sm:$0xff] %v17404_v17 }
 0x959   :  { %19558 = vst [vmem:[#allocation86_spill] sm:$0xff] %v17386_v59 }
 0x95a   :  { %v17388_v20 = vpop.f32.mrf.mxu1 }
 0x95b   :  { %19559 = vst [vmem:[#allocation113_spill] sm:$0xff] %v17388_v20  ;;  %v17410_v20 = vpop.permute.xlu1 %7789 }
 0x95c   :  { %v17392_v22 = vpop.f32.mrf.mxu1 }
 0x95d   :  { %19560 = vst [vmem:[#allocation109_spill] sm:$0xff] %v17392_v22  ;;  %v17414_v22 = vpop.permute.xlu0 %7795 }
 0x95e   :  { %v17396_v32 = vpop.f32.mrf.mxu1 }
 0x95f   :  { %19562 = vst [vmem:[#allocation116_spill] sm:$0xff] %v17396_v32 }
 0x960   :  { %v17398_v4 = vpop.f32.mrf.mxu1 }
 0x961   :  { %19563 = vst [vmem:[#allocation126_spill] sm:$0xff] %v17398_v4  ;;  %v17420_v4 = vpop.permute.xlu1 %7902 }
 0x962   :  { %v17402_v27 = vpop.f32.mrf.mxu1  ;;  %19571 = vst [vmem:[#allocation134_spill] sm:$0xff] %v17420_v4 }
 0x963   :  { %19564 = vst [vmem:[#allocation127_spill] sm:$0xff] %v17402_v27  ;;  %v17424_v27 = vpop.permute.xlu0 %7904 }
 0x964   :  { %v17406_v28 = vpop.f32.mrf.mxu1  ;;  %19573 = vst [vmem:[#allocation136_spill] sm:$0xff] %v17424_v27 }
 0x965   :  { %19566 = vst [vmem:[#allocation129_spill] sm:$0xff] %v17406_v28 }
 0x966   :  { %v17408_v59 = vpop.f32.mrf.mxu1 }
 0x967   :  { %19567 = vst [vmem:[#allocation130_spill] sm:$0xff] %v17408_v59  ;;  %v17430_v59 = vpop.permute.xlu1 %7898 }
 0x968   :  { %v17412_v55 = vpop.f32.mrf.mxu1  ;;  %19576 = vst [vmem:[#allocation139_spill] sm:$0xff] %v17430_v59 }
 0x969   :  { %19568 = vst [vmem:[#allocation131_spill] sm:$0xff] %v17412_v55  ;;  %v17434_v55 = vpop.permute.xlu0 %7900 }
 0x96a   :  { %v17416_v33 = vpop.f32.mrf.mxu1  ;;  %19578 = vst [vmem:[#allocation141_spill] sm:$0xff] %v17434_v55 }
 0x96b   :  { %19569 = vst [vmem:[#allocation132_spill] sm:$0xff] %v17416_v33 }
 0x96c   :  { %v17418_v32 = vpop.f32.mrf.mxu1 }
 0x96d   :  { %19570 = vst [vmem:[#allocation133_spill] sm:$0xff] %v17418_v32 }
 0x96e   :  { %v17422_v40 = vpop.f32.mrf.mxu1 }
 0x96f   :  { %19572 = vst [vmem:[#allocation135_spill] sm:$0xff] %v17422_v40 }
 0x970   :  { %v17426_v12 = vpop.f32.mrf.mxu1 }
 0x971   :  { %19574 = vst [vmem:[#allocation137_spill] sm:$0xff] %v17426_v12 }
 0x972   :  { %v17428_v28 = vpop.f32.mrf.mxu1 }
 0x973   :  { %19575 = vst [vmem:[#allocation138_spill] sm:$0xff] %v17428_v28 }
 0x974   :  { %v17432_v45 = vpop.f32.mrf.mxu1 }
 0x975   :  { %19577 = vst [vmem:[#allocation140_spill] sm:$0xff] %v17432_v45 }
 0x976   :  { %v17436_v35 = vpop.f32.mrf.mxu1 }
 0x977   :  { %19579 = vst [vmem:[#allocation142_spill] sm:$0xff] %v17436_v35 }
 0x978   :  { %v6909_v33 = vpop.xlane.xlu1 %6908  ;;  %v12921_v32 = vpop.f32.mrf.mxu1 }
 0x979   :  { %v17439_v44 = vadd.f32 %v12921_v32, %v17246_v1  ;;  %v6993_v12 = vsub.f32 %v17256_v52, %v6909_v33 }
 0x97a   :  { %v6906_v40 = vpop.xlane.xlu0 %6905  ;;  %v6054_v46 = vpop.f32.mrf.mxu1 }
 0x97b   :  { %v17442_v56 = vadd.f32 %v6054_v46, %v17252_v34  ;;  %v6895_v28 = vsel %vm117_vm0, %v17439_v44, -inf  ;;  %v6992_v35 = vsub.f32 %v17265_v42, %v6906_v40  ;;  %v7030_v46 = vmul.f32 1.442695, %v6993_v12 }
 0x97c   :  { %v12924_v45 = vpop.f32.mrf.mxu1  ;;  %6896 = vmax.xlane.f32.xlu1 %v6895_v28  ;;  %v6915_v59 = vpop.xlane.xlu1 %6914 }
 0x97d   :  { %v17449_v55 = vadd.f32 %v12924_v45, %v17261_v30  ;;  %v6892_v32 = vsel %vm117_vm0, %v17442_v56, -inf  ;;  %v6995_v26 = vsub.f32 %v17274_v23, %v6915_v59  ;;  %v7028_v17 = vmul.f32 1.442695, %v6992_v35 }
 0x97e   :  { %v6912_v4 = vpop.xlane.xlu0 %6911  ;;  %v6064_v27 = vpop.f32.mrf.mxu1  ;;  %6893 = vmax.xlane.f32.xlu0 %v6892_v32  ;;  %13805 = vpow2.f32 %v7030_v46 }
 0x97f   :  { %v6994_v33 = vsub.f32 %v17280_v57, %v6912_v4  ;;  %v17456_v28 = vadd.f32 %v6064_v27, %v17270_v47  ;;  %v6901_v40 = vsel %vm117_vm0, %v17449_v55, -inf  ;;  %v7034_v45 = vmul.f32 1.442695, %v6995_v26 }
 0x980   :  { %13807 = vpow2.f32 %v7028_v17 }
 0x981   :  { %v7032_v52 = vmul.f32 1.442695, %v6994_v33  ;;  %v6898_v42 = vsel %vm117_vm0, %v17456_v28, -inf  ;;  %13809 = vpow2.f32 %v7034_v45 }
 0x982   :  { %6902 = vmax.xlane.f32.xlu0 %v6901_v40 }
 0x983   :  { %13811 = vpow2.f32 %v7032_v52 }
 0x986   :  { %6899 = vmax.xlane.f32.xlu0 %v6898_v42 }
 0x988   :  { %v12949_v12 = vpop.f32.mrf.mxu1  ;;  %v6933_v35 = vpop.xlane.xlu1 %6932 }
 0x989   :  { %v17463_v59 = vadd.f32 %v12949_v12, %v17246_v1  ;;  %v7001_v46 = vsub.f32 %v17287_v6, %v6933_v35 }
 0x98a   :  { %v6930_v4 = vpop.xlane.xlu0 %6929  ;;  %v6288_v27 = vpop.f32.mrf.mxu1 }
 0x98b   :  { %v17466_v23 = vadd.f32 %v6288_v27, %v17252_v34  ;;  %v6919_v17 = vsel %vm117_vm0, %v17463_v59, -inf  ;;  %v7000_v26 = vsub.f32 %v17290_v19, %v6930_v4  ;;  %v17483_v27 = vpop.eup %13805  ;;  %v7046_v35 = vmul.f32 1.442695, %v7001_v46 }
 0x98c   :  { %v12952_v57 = vpop.f32.mrf.mxu1  ;;  %6920 = vmax.xlane.f32.xlu1 %v6919_v17  ;;  %v6939_v52 = vpop.xlane.xlu1 %6938 }
 0x98d   :  { %v17472_v32 = vadd.f32 %v12952_v57, %v17261_v30  ;;  %v6916_v45 = vsel %vm117_vm0, %v17466_v23, -inf  ;;  %v7044_v12 = vmul.f32 1.442695, %v7000_v26  ;;  %v7003_v17 = vsub.f32 %v17295_v13, %v6939_v52  ;;  %v17488_v57 = vpop.eup %13807 }
 0x98e   :  { %v6936_v33 = vpop.xlane.xlu0 %6935  ;;  %v6298_v40 = vpop.f32.mrf.mxu1  ;;  %6917 = vmax.xlane.f32.xlu0 %v6916_v45  ;;  %v7096_v45 = vsel %vm117_vm0, %v17488_v57, 0.0 }
 0x98f   :  { %v17478_v42 = vadd.f32 %v6298_v40, %v17270_v47  ;;  %v7002_v19 = vsub.f32 %v17300_v39, %v6936_v33  ;;  %v6925_v4 = vsel %vm117_vm0, %v17472_v32, -inf  ;;  %13813 = vpow2.f32 %v7044_v12  ;;  %v17492_v26 = vpop.eup %13809 }
 0x990   :  { %6926 = vmax.xlane.f32.xlu1 %v6925_v4  ;;  %v7099_v39 = vsel %vm117_vm0, %v17483_v27, 0.0  ;;  %13815 = vpow2.f32 %v7046_v35  ;;  %v7050_v33 = vmul.f32 1.442695, %v7003_v17  ;;  %v17496_v4 = vpop.eup %13811  ;;  %v7105_v46 = vsel %vm117_vm0, %v17492_v26, 0.0 }
 0x991   :  { %v6922_v6 = vsel %vm117_vm0, %v17478_v42, -inf  ;;  %v7048_v40 = vmul.f32 1.442695, %v7002_v19  ;;  %v7102_v35 = vsel %vm117_vm0, %v17496_v4, 0.0 }
 0x992   :  { %6923 = vmax.xlane.f32.xlu0 %v6922_v6 }
 0x993   :  { %13817 = vpow2.f32 %v7048_v40 }
 0x994   :  { %7100 = vadd.xlane.f32.xlu1 %v7099_v39  ;;  %13819 = vpow2.f32 %v7050_v33 }
 0x996   :  { %7097 = vadd.xlane.f32.xlu0 %v7096_v45 }
 0x998   :  { %v12977_v13 = vpop.f32.mrf.mxu1  ;;  %v6957_v52 = vpop.xlane.xlu1 %6956  ;;  %7106 = vadd.xlane.f32.xlu1 %v7105_v46 }
 0x999   :  { %v17501_v12 = vadd.f32 %v12977_v13, %v17246_v1  ;;  %v7009_v33 = vsub.f32 %v17307_v58, %v6957_v52 }
 0x99a   :  { %v6954_v19 = vpop.xlane.xlu0 %6953  ;;  %v6522_v6 = vpop.f32.mrf.mxu1  ;;  %7103 = vadd.xlane.f32.xlu0 %v7102_v35 }
 0x99b   :  { %v17506_v17 = vadd.f32 %v6522_v6, %v17252_v34  ;;  %v6943_v40 = vsel %vm117_vm0, %v17501_v12, -inf  ;;  %v7008_v39 = vsub.f32 %v17310_v60, %v6954_v19  ;;  %v7062_v52 = vmul.f32 1.442695, %v7009_v33 }
 0x99c   :  { %v12980_v45 = vpop.f32.mrf.mxu1  ;;  %6944 = vmax.xlane.f32.xlu1 %v6943_v40  ;;  %v6963_v6 = vpop.xlane.xlu1 %6962 }
 0x99d   :  { %v17512_v13 = vadd.f32 %v12980_v45, %v17261_v30  ;;  %v6940_v24 = vsel %vm117_vm0, %v17506_v17, -inf  ;;  %v7060_v48 = vmul.f32 1.442695, %v7008_v39  ;;  %v17523_v45 = vpop.eup %13813  ;;  %v7011_v40 = vsub.f32 %v17315_v62, %v6963_v6 }
 0x99e   :  { %v6960_v46 = vpop.xlane.xlu0 %6959  ;;  %v6532_v49 = vpop.f32.mrf.mxu1  ;;  %6941 = vmax.xlane.f32.xlu0 %v6940_v24 }
 0x99f   :  { %v17518_v35 = vadd.f32 %v6532_v49, %v17270_v47  ;;  %v7010_v60 = vsub.f32 %v17320_v7, %v6960_v46  ;;  %v6949_v19 = vsel %vm117_vm0, %v17512_v13, -inf  ;;  %v17528_v29 = vpop.eup %13815  ;;  %13821 = vpow2.f32 %v7060_v48 }
 0x9a0   :  { %6950 = vmax.xlane.f32.xlu1 %v6949_v19  ;;  %v7120_v49 = vsel %vm117_vm0, %v17523_v45, 0.0  ;;  %v17532_v7 = vpop.eup %13817  ;;  %13823 = vpow2.f32 %v7062_v52  ;;  %v7066_v39 = vmul.f32 1.442695, %v7011_v40  ;;  %v7123_v46 = vsel %vm117_vm0, %v17528_v29, 0.0 }
 0x9a1   :  { %v6946_v58 = vsel %vm117_vm0, %v17518_v35, -inf  ;;  %v7064_v24 = vmul.f32 1.442695, %v7010_v60  ;;  %v17536_v19 = vpop.eup %13819  ;;  %v7126_v48 = vsel %vm117_vm0, %v17532_v7, 0.0 }
 0x9a2   :  { %6947 = vmax.xlane.f32.xlu0 %v6946_v58  ;;  %v7129_v40 = vsel %vm117_vm0, %v17536_v19, 0.0 }
 0x9a3   :  { %13825 = vpow2.f32 %v7064_v24 }
 0x9a4   :  { %7121 = vadd.xlane.f32.xlu1 %v7120_v49  ;;  %13827 = vpow2.f32 %v7066_v39 }
 0x9a6   :  { %7124 = vadd.xlane.f32.xlu0 %v7123_v46 }
 0x9a8   :  { %v6981_v62 = vpop.xlane.xlu1 %6980  ;;  %v13005_v33 = vpop.f32.mrf.mxu1  ;;  %7127 = vadd.xlane.f32.xlu1 %v7126_v48 }
 0x9a9   :  { %v7017_v6 = vsub.f32 %v17327_v8, %v6981_v62  ;;  %v17542_v60 = vadd.f32 %v13005_v33, %v17246_v1 }
 0x9aa   :  { %v6978_v58 = vpop.xlane.xlu0 %6977  ;;  %v6756_v52 = vpop.f32.mrf.mxu1  ;;  %7130 = vadd.xlane.f32.xlu0 %v7129_v40 }
 0x9ab   :  { %v7078_v49 = vmul.f32 1.442695, %v7017_v6  ;;  %v7016_v24 = vsub.f32 %v17330_v10, %v6978_v58  ;;  %v17548_v46 = vadd.f32 %v6756_v52, %v17252_v34  ;;  %v6967_v8 = vsel %vm117_vm0, %v17542_v60, -inf }
 0x9ac   :  { %v6987_v62 = vpop.xlane.xlu1 %6986  ;;  %v13008_v1 = vpop.f32.mrf.mxu1  ;;  %6968 = vmax.xlane.f32.xlu1 %v6967_v8 }
 0x9ad   :  { %v7076_v33 = vmul.f32 1.442695, %v7016_v24  ;;  %v7019_v39 = vsub.f32 %v17335_v38, %v6987_v62  ;;  %v17554_v48 = vadd.f32 %v13008_v1, %v17261_v30  ;;  %13829 = vpow2.f32 %v7078_v49  ;;  %v17564_v30 = vpop.eup %13821 }
 0x9ae   :  { %v6984_v6 = vpop.xlane.xlu0 %6983  ;;  %v6766_v21 = vpop.f32.mrf.mxu1  ;;  %v6964_v10 = vsel %vm117_vm0, %v17548_v46, -inf }
 0x9af   :  { %13831 = vpow2.f32 %v7076_v33  ;;  %v7082_v34 = vmul.f32 1.442695, %v7019_v39  ;;  %v7018_v58 = vsub.f32 %v17340_v9, %v6984_v6  ;;  %v17560_v52 = vadd.f32 %v6766_v21, %v17270_v47  ;;  %6965 = vmax.xlane.f32.xlu0 %v6964_v10  ;;  %v17568_v24 = vpop.eup %13823 }
 0x9b0   :  { %v6973_v38 = vsel %vm117_vm0, %v17554_v48, -inf  ;;  %v7144_v21 = vsel %vm117_vm0, %v17564_v30, 0.0  ;;  %v17572_v47 = vpop.eup %13825  ;;  %v7147_v9 = vsel %vm117_vm0, %v17568_v24, 0.0 }
 0x9b1   :  { %v7080_v40 = vmul.f32 1.442695, %v7018_v58  ;;  %6974 = vmax.xlane.f32.xlu1 %v6973_v38  ;;  %v6970_v49 = vsel %vm117_vm0, %v17560_v52, -inf  ;;  %13833 = vpow2.f32 %v7082_v34  ;;  %v17576_v8 = vpop.eup %13827  ;;  %v7150_v62 = vsel %vm117_vm0, %v17572_v47, 0.0 }
 0x9b2   :  { %v7153_v1 = vsel %vm117_vm0, %v17576_v8, 0.0 }
 0x9b3   :  { %13835 = vpow2.f32 %v7080_v40  ;;  %6971 = vmax.xlane.f32.xlu0 %v6970_v49 }
 0x9b5   :  { %7145 = vadd.xlane.f32.xlu1 %v7144_v21 }
 0x9b7   :  { %7148 = vadd.xlane.f32.xlu0 %v7147_v9 }
 0x9b9   :  { %7151 = vadd.xlane.f32.xlu1 %v7150_v62 }
 0x9ba   :  { %v17582_v33 = vpop.eup %13829 }
 0x9bb   :  { %19580 = vst [vmem:[#allocation143_spill] sm:$0xff] %v17582_v33  ;;  %7154 = vadd.xlane.f32.xlu0 %v7153_v1  ;;  %v7171_v10 = vsel %vm117_vm0, %v17582_v33, 0.0 }
 0x9bc   :  { %v17584_v39 = vpop.eup %13831 }
 0x9bd   :  { %v7168_v6 = vsel %vm117_vm0, %v17584_v39, 0.0 }
 0x9be   :  { %7169 = vadd.xlane.f32.xlu1 %v7168_v6  ;;  %v17590_v34 = vpop.eup %13833 }
 0x9bf   :  { %19581 = vst [vmem:[#allocation144_spill] sm:$0xff] %v17590_v34  ;;  %7172 = vadd.xlane.f32.xlu0 %v7171_v10  ;;  %v7177_v40 = vsel %vm117_vm0, %v17590_v34, 0.0 }
 0x9c0   :  { %v17592_v58 = vpop.eup %13835 }
 0x9c1   :  { %19582 = vst [vmem:[#allocation145_spill] sm:$0xff] %v17592_v58  ;;  %v7174_v38 = vsel %vm117_vm0, %v17592_v58, 0.0 }
 0x9c2   :  { %7175 = vadd.xlane.f32.xlu1 %v7174_v38 }
 0x9c3   :  { %7178 = vadd.xlane.f32.xlu0 %v7177_v40 }
 0xa05   :  { %v6897_v49 = vpop.xlane.xlu1 %6896 }
 0xa06   :  { %v6989_v21 = vsub.f32 %v17439_v44, %v6897_v49 }
 0xa07   :  { %v6894_v62 = vpop.xlane.xlu0 %6893 }
 0xa08   :  { %v7022_v9 = vmul.f32 1.442695, %v6989_v21  ;;  %v6988_v1 = vsub.f32 %v17442_v56, %v6894_v62 }
 0xa0a   :  { %13837 = vpow2.f32 %v7022_v9  ;;  %v7020_v6 = vmul.f32 1.442695, %v6988_v1 }
 0xa0b   :  { %v6903_v10 = vpop.xlane.xlu0 %6902 }
 0xa0c   :  { %13839 = vpow2.f32 %v7020_v6  ;;  %v6991_v33 = vsub.f32 %v17449_v55, %v6903_v10 }
 0xa0e   :  { %v7026_v11 = vmul.f32 1.442695, %v6991_v33 }
 0xa0f   :  { %v6900_v58 = vpop.xlane.xlu0 %6899 }
 0xa10   :  { %13841 = vpow2.f32 %v7026_v11  ;;  %v6990_v38 = vsub.f32 %v17456_v28, %v6900_v58 }
 0xa12   :  { %v7024_v34 = vmul.f32 1.442695, %v6990_v38 }
 0xa14   :  { %13843 = vpow2.f32 %v7024_v34 }
 0xa15   :  { %v6921_v40 = vpop.xlane.xlu1 %6920 }
 0xa16   :  { %v6997_v44 = vsub.f32 %v17463_v59, %v6921_v40 }
 0xa17   :  { %v17603_v49 = vpop.eup %13837  ;;  %v6918_v56 = vpop.xlane.xlu0 %6917 }
 0xa18   :  { %v7038_v21 = vmul.f32 1.442695, %v6997_v44  ;;  %v7087_v9 = vsel %vm117_vm0, %v17603_v49, 0.0  ;;  %v6996_v62 = vsub.f32 %v17466_v23, %v6918_v56 }
 0xa19   :  { %7088 = vadd.xlane.f32.xlu1 %v7087_v9  ;;  %v17608_v55 = vpop.eup %13839  ;;  %v6927_v11 = vpop.xlane.xlu1 %6926 }
 0xa1a   :  { %13845 = vpow2.f32 %v7038_v21  ;;  %v7036_v28 = vmul.f32 1.442695, %v6996_v62  ;;  %v6999_v33 = vsub.f32 %v17472_v32, %v6927_v11  ;;  %v7084_v59 = vsel %vm117_vm0, %v17608_v55, 0.0 }
 0xa1b   :  { %v6924_v34 = vpop.xlane.xlu0 %6923  ;;  %7085 = vadd.xlane.f32.xlu0 %v7084_v59 }
 0xa1c   :  { %13847 = vpow2.f32 %v7036_v28  ;;  %v7042_v58 = vmul.f32 1.442695, %v6999_v33  ;;  %v6998_v1 = vsub.f32 %v17478_v42, %v6924_v34 }
 0xa1d   :  { %v17614_v6 = vpop.eup %13841  ;;  %v7101_v23 = vpop.xlane.xlu1 %7100 }
 0xa1e   :  { %13849 = vpow2.f32 %v7042_v58  ;;  %v7040_v10 = vmul.f32 1.442695, %v6998_v1  ;;  %v7093_v38 = vsel %vm117_vm0, %v17614_v6, 0.0 }
 0xa1f   :  { %13851 = vrcp.f32 %v7101_v23  ;;  %v7098_v40 = vpop.xlane.xlu0 %7097  ;;  %7094 = vadd.xlane.f32.xlu1 %v7093_v38 }
 0xa20   :  { %13853 = vpow2.f32 %v7040_v10 }
 0xa21   :  { %v17618_v32 = vpop.eup %13843  ;;  %13855 = vrcp.f32 %v7098_v40  ;;  %v7107_v44 = vpop.xlane.xlu1 %7106 }
 0xa22   :  { %v7090_v21 = vsel %vm117_vm0, %v17618_v32, 0.0  ;;  %13857 = vrcp.f32 %v7107_v44 }
 0xa23   :  { %v7104_v42 = vpop.xlane.xlu0 %7103  ;;  %7091 = vadd.xlane.f32.xlu0 %v7090_v21 }
 0xa24   :  { %13859 = vrcp.f32 %v7104_v42 }
 0xa25   :  { %v6945_v56 = vpop.xlane.xlu1 %6944 }
 0xa26   :  { %v7005_v62 = vsub.f32 %v17501_v12, %v6945_v56 }
 0xa27   :  { %v17622_v9 = vpop.eup %13845  ;;  %v6942_v11 = vpop.xlane.xlu0 %6941 }
 0xa28   :  { %v7111_v28 = vsel %vm117_vm0, %v17622_v9, 0.0  ;;  %v7054_v33 = vmul.f32 1.442695, %v7005_v62  ;;  %v7004_v59 = vsub.f32 %v17506_v17, %v6942_v11 }
 0xa29   :  { %7112 = vadd.xlane.f32.xlu1 %v7111_v28  ;;  %v17628_v34 = vpop.eup %13847  ;;  %v6951_v58 = vpop.xlane.xlu1 %6950 }
 0xa2a   :  { %13861 = vpow2.f32 %v7054_v33  ;;  %v7052_v1 = vmul.f32 1.442695, %v7004_v59  ;;  %v7007_v23 = vsub.f32 %v17512_v13, %v6951_v58  ;;  %v7108_v10 = vsel %vm117_vm0, %v17628_v34, 0.0 }
 0xa2b   :  { %v17633_v38 = vpop.eup %13849  ;;  %7109 = vadd.xlane.f32.xlu0 %v7108_v10  ;;  %v6948_v12 = vpop.xlane.xlu0 %6947 }
 0xa2c   :  { %v13852_v40 = vpop.eup %13851  ;;  %13863 = vpow2.f32 %v7052_v1  ;;  %v7058_v44 = vmul.f32 1.442695, %v7007_v23  ;;  %v7006_v17 = vsub.f32 %v17518_v35, %v6948_v12  ;;  %v7117_v21 = vsel %vm117_vm0, %v17633_v38, 0.0 }
 0xa2d   :  { %v17638_v42 = vpop.eup %13853  ;;  %v7122_v56 = vpop.xlane.xlu1 %7121  ;;  %7118 = vadd.xlane.f32.xlu1 %v7117_v21  ;;  %v7217_v35 = vmul.f32 %v13852_v40, %v17483_v27 }
 0xa2e   :  { %v13856_v13 = vpop.eup %13855  ;;  %13865 = vpow2.f32 %v7058_v44  ;;  %v7056_v62 = vmul.f32 1.442695, %v7006_v17  ;;  %v7114_v11 = vsel %vm117_vm0, %v17638_v42, 0.0 }
 0xa2f   :  { %13867 = vrcp.f32 %v7122_v56  ;;  %7115 = vadd.xlane.f32.xlu0 %v7114_v11  ;;  %v7125_v28 = vpop.xlane.xlu0 %7124  ;;  %v7216_v33 = vmul.f32 %v13856_v13, %v17488_v57  ;;  %v13858_v59 = vpop.eup %13857 }
 0xa30   :  { %13869 = vpow2.f32 %v7056_v62  ;;  %v7219_v27 = vmul.f32 %v13858_v59, %v17492_v26 }
 0xa31   :  { %v13860_v58 = vpop.eup %13859  ;;  %13871 = vrcp.f32 %v7125_v28  ;;  %13045 = vmatprep.mubr.msk.f32.mxu0 %vm117_vm0, %v7216_v33  ;;  %v7128_v1 = vpop.xlane.xlu1 %7127 }
 0xa32   :  { %13873 = vrcp.f32 %v7128_v1  ;;  %13046 = vmatmul.mubr.msk.f32.vlgmr.msra.gmra.mxu0 %vm117_vm0, %v7217_v35  ;;  %v7218_v23 = vmul.f32 %v13860_v58, %v17496_v4 }
 0xa33   :  { %13066 = vmatpush3.msra.mxu0 %v17084_v5  ;;  %v7131_v10 = vpop.xlane.xlu0 %7130 }
 0xa34   :  { %13067 = vmatprep.subr.mxu0 %v17364_v25  ;;  %13875 = vrcp.f32 %v7131_v10  ;;  %13048 = vmatprep.mubr.msk.f32.mxu0 %vm117_vm0, %v7218_v23 }
 0xa35   :  { %13068 = vmatpush3.msra.mxu0 %v17364_v25  ;;  %v17652_v57 = vpop.xlane.xlu1 %6968 }
 0xa36   :  { %13069 = vmatprep.subr.mxu0 %v17384_v15  ;;  %13049 = vmatmul.mubr.msk.f32.gmra.mxu0 %vm117_vm0, %v7219_v27 }
 0xa37   :  { %v17656_v12 = vpop.eup %13861  ;;  %13070 = vmatpush3.msra.mxu0 %v17384_v15 }
 0xa38   :  { %v17659_v5 = vpop.xlane.xlu0 %6965  ;;  %13071 = vmatprep.subr.mxu0 %v17368_v16  ;;  %v7135_v4 = vsel %vm117_vm0, %v17656_v12, 0.0 }
 0xa39   :  { %v17664_v26 = vpop.eup %13863  ;;  %13072 = vmatpush3.msra.mxu0 %v17368_v16  ;;  %7136 = vadd.xlane.f32.xlu0 %v7135_v4  ;;  %v7012_v4 = vsub.f32 %v17548_v46, %v17659_v5 }
 0xa3a   :  { %v17667_v25 = vpop.xlane.xlu1 %6974  ;;  %13093 = vmatprep.subr.mxu0 %v17414_v22  ;;  %v7132_v40 = vsel %vm117_vm0, %v17664_v26, 0.0 }
 0xa3b   :  { %v17672_v15 = vpop.eup %13865  ;;  %7133 = vadd.xlane.f32.xlu1 %v7132_v40 }
 0xa3c   :  { %v6972_v44 = vpop.xlane.xlu0 %6971  ;;  %v13868_v17 = vpop.eup %13867  ;;  %v7141_v21 = vsel %vm117_vm0, %v17672_v15, 0.0 }
 0xa3d   :  { %v17676_v56 = vpop.eup %13869  ;;  %7142 = vadd.xlane.f32.xlu0 %v7141_v21  ;;  %v7224_v16 = vmul.f32 %v13868_v17, %v17523_v45  ;;  %v7068_v17 = vmul.f32 1.442695, %v7012_v4  ;;  %v7014_v21 = vsub.f32 %v17560_v52, %v6972_v44 }
 0xa3e   :  { %v7146_v13 = vpop.xlane.xlu1 %7145  ;;  %v13872_v62 = vpop.eup %13871  ;;  %v7138_v11 = vsel %vm117_vm0, %v17676_v56, 0.0 }
 0xa3f   :  { %v13874_v28 = vpop.eup %13873  ;;  %v7225_v33 = vmul.f32 %v13872_v62, %v17528_v29  ;;  %13877 = vrcp.f32 %v7146_v13  ;;  %13073 = vmatprep.mubr.msk.f32.mxu0 %vm117_vm0, %v7224_v16  ;;  %7139 = vadd.xlane.f32.xlu1 %v7138_v11  ;;  %v7072_v16 = vmul.f32 1.442695, %v7014_v21  ;;  %v19598_v21 = vld [vmem:[#allocation121_spill] sm:$0xff] }
 0xa40   :  { %v7149_v59 = vpop.xlane.xlu0 %7148  ;;  %v7226_v35 = vmul.f32 %v13874_v28, %v17532_v7 }
 0xa41   :  { %v13876_v58 = vpop.eup %13875  ;;  %13879 = vrcp.f32 %v7149_v59  ;;  %13074 = vmatmul.mubr.msk.f32.vlgmr.msra.gmra.mxu0 %vm117_vm0, %v7225_v33  ;;  %v19584_v33 = vld [vmem:[#allocation23_spill] sm:$0xff] }
 0xa42   :  { %v7152_v1 = vpop.xlane.xlu1 %7151  ;;  %13094 = vmatpush3.msra.mxu0 %v17414_v22  ;;  %13076 = vmatprep.mubr.msk.f32.mxu0 %vm117_vm0, %v7226_v35  ;;  %v7227_v45 = vmul.f32 %v13876_v58, %v17536_v19  ;;  %v19587_v58 = vld [vmem:[#allocation25_spill] sm:$0xff] }
 0xa43   :  { %13881 = vrcp.f32 %v7152_v1  ;;  %13095 = vmatprep.subr.mxu0 %v17390_v61  ;;  %v19588_v1 = vld [vmem:[#allocation50_spill] sm:$0xff] }
 0xa44   :  { %v7155_v29 = vpop.xlane.xlu0 %7154  ;;  %13096 = vmatpush3.msra.mxu0 %v17390_v61 }
 0xa45   :  { %13883 = vrcp.f32 %v7155_v29  ;;  %13097 = vmatprep.subr.mxu0 %v17400_v43  ;;  %13077 = vmatmul.mubr.msk.f32.gmra.mxu0 %vm117_vm0, %v7227_v45  ;;  %v19589_v29 = vld [vmem:[#allocation51_spill] sm:$0xff] }
 0xa46   :  { %13098 = vmatpush3.msra.mxu0 %v17400_v43 }
 0xa47   :  { %v7170_v7 = vpop.xlane.xlu1 %7169  ;;  %13099 = vmatprep.subr.mxu0 %v17410_v20 }
 0xa48   :  { %13885 = vrcp.f32 %v7170_v7  ;;  %13100 = vmatpush3.msra.mxu0 %v17410_v20  ;;  %v19590_v7 = vld [vmem:[#allocation26_spill] sm:$0xff] }
 0xa4b   :  { %v17754_v44 = vpop.xlane.xlu1 %7175 }
 0xa4c   :  { %v13878_v22 = vpop.eup %13877 }
 0xa4d   :  { %v7232_v19 = vmul.f32 %v13878_v22, %v17564_v30 }
 0xa4e   :  { %v13880_v23 = vpop.eup %13879 }
 0xa4f   :  { %v7233_v61 = vmul.f32 %v13880_v23, %v17568_v24  ;;  %13101 = vmatprep.mubr.msk.f32.mxu0 %vm117_vm0, %v7232_v19  ;;  %v19591_v19 = vld [vmem:[#allocation53_spill] sm:$0xff] }
 0xa50   :  { %v13882_v10 = vpop.eup %13881  ;;  %8011 = vrot.lane.b32.xlu1 %v19463_v50, %s14183_s13 }
 0xa51   :  { %v7234_v43 = vmul.f32 %v13882_v10, %v17572_v47  ;;  %13102 = vmatmul.mubr.msk.f32.vlgmr.msra.gmra.mxu0 %vm117_vm0, %v7233_v61  ;;  %v7013_v47 = vsub.f32 %v17542_v60, %v17652_v57 }
 0xa52   :  { %v13884_v27 = vpop.eup %13883 }
 0xa53   :  { %13104 = vmatprep.mubr.msk.f32.mxu0 %vm117_vm0, %v7234_v43  ;;  %v7235_v20 = vmul.f32 %v13884_v27, %v17576_v8  ;;  %8013 = vrot.lane.b32.xlu0 %v19459_v36, %s14183_s13  ;;  %v7070_v40 = vmul.f32 1.442695, %v7013_v47  ;;  %v7015_v8 = vsub.f32 %v17554_v48, %v17667_v25  ;;  %v17750_v25 = vpop.xlane.xlu0 %7172  ;;  %v19592_v27 = vld [vmem:[#allocation27_spill] sm:$0xff]  ;;  %v19594_v47 = vld [vmem:[#allocation117_spill] sm:$0xff] }
 0xa55   :  { %v13886_v30 = vpop.eup %13885  ;;  %13105 = vmatmul.mubr.msk.f32.gmra.mxu0 %vm117_vm0, %v7235_v20  ;;  %13887 = vpow2.f32 %v7070_v40  ;;  %v7074_v13 = vmul.f32 1.442695, %v7015_v8  ;;  %v19597_v8 = vld [vmem:[#allocation29_spill] sm:$0xff] }
 0xa56   :  { %v7240_v24 = vmul.f32 %v13886_v30, %v17584_v39  ;;  %13889 = vpow2.f32 %v7068_v17  ;;  %v19593_v30 = vld [vmem:[#allocation28_spill] sm:$0xff] }
 0xa57   :  { %13891 = vpow2.f32 %v7074_v13  ;;  %v17758_v11 = vpop.xlane.xlu0 %7178 }
 0xa58   :  { %13129 = vmatprep.mubr.msk.f32.mxu0 %vm117_vm0, %v7240_v24  ;;  %13893 = vpow2.f32 %v7072_v16  ;;  %v19599_v16 = vld [vmem:[#allocation57_spill] sm:$0xff] }
 0xa62   :  { %v17716_v39 = vpop.eup %13887 }
 0xa63   :  { %v17718_v62 = vpop.eup %13889  ;;  %v7159_v60 = vsel %vm117_vm0, %v17716_v39, 0.0 }
 0xa64   :  { %v17722_v46 = vpop.eup %13891  ;;  %v7156_v48 = vsel %vm117_vm0, %v17718_v62, 0.0 }
 0xa65   :  { %v17726_v52 = vpop.eup %13893  ;;  %v7165_v57 = vsel %vm117_vm0, %v17722_v46, 0.0 }
 0xa66   :  { %v7162_v5 = vsel %vm117_vm0, %v17726_v52, 0.0 }
 0xa72   :  { %7160 = vadd.xlane.f32.xlu0 %v7159_v60  ;;  %v19600_v60 = vld [vmem:[#allocation89_spill] sm:$0xff] }
 0xa74   :  { %7157 = vadd.xlane.f32.xlu1 %v7156_v48  ;;  %v19601_v48 = vld [vmem:[#allocation33_spill] sm:$0xff] }
 0xa76   :  { %7166 = vadd.xlane.f32.xlu0 %v7165_v57 }
 0xa78   :  { %7163 = vadd.xlane.f32.xlu1 %v7162_v5  ;;  %v19602_v5 = vld [vmem:[#allocation119_spill] sm:$0xff] }
 0xa89   :  { %8007 = vrot.lane.b32.xlu1 %v19268_v18, %s14183_s13 }
 0xa8c   :  { %8009 = vrot.lane.b32.xlu0 %v19320_v2, %s14183_s13 }
 0xa8d   :  { %8487 = vrot.lane.b32.xlu1 %v19282_v14, %s14184_s14 }
 0xa90   :  { %8489 = vrot.lane.b32.xlu0 %v19329_v31, %s14184_s14 }
 0xa91   :  { %8483 = vrot.lane.b32.xlu1 %v19400_v54, %s14184_s14 }
 0xa94   :  { %8485 = vrot.lane.b32.xlu0 %v19330_v53, %s14184_s14 }
 0xa95   :  { %8606 = vrot.lane.b32.xlu1 %v19331_v37, %s14184_s14 }
 0xa98   :  { %8475 = vrot.lane.b32.xlu0 %v19402_v51, %s14185_s15  ;;  %v19583_v51 = vld [vmem:[#allocation48_spill] sm:$0xff] }
 0xa99   :  { %8604 = vrot.lane.b32.xlu1 %v19290_v0, %s14184_s14 }
 0xa9c   :  { %8477 = vrot.lane.b32.xlu0 %v19401_v63, %s14185_s15  ;;  %v19585_v63 = vld [vmem:[#allocation24_spill] sm:$0xff] }
 0xa9d   :  { %8479 = vrot.lane.b32.xlu1 %v19406_v3, %s14185_s15  ;;  %v19586_v3 = vld [vmem:[#allocation49_spill] sm:$0xff] }
 0xaa0   :  { %8602 = vrot.lane.b32.xlu0 %v19404_v41, %s14184_s14 }
 0xaa1   :  { %8481 = vrot.lane.b32.xlu1 %v19583_v51, %s14185_s15 }
 0xaa2   :  { %v7089_v28 = vpop.xlane.xlu1 %7088 }
 0xaa3   :  { %13895 = vrcp.f32 %v7089_v28  ;;  %v19604_v28 = vld [vmem:[#allocation59_spill] sm:$0xff] }
 0xaa4   :  { %8600 = vrot.lane.b32.xlu0 %v19584_v33, %s14184_s14  ;;  %v7086_v59 = vpop.xlane.xlu0 %7085 }
 0xaa5   :  { %8723 = vrot.lane.b32.xlu1 %v19585_v63, %s14184_s14  ;;  %13897 = vrcp.f32 %v7086_v59 }
 0xaa8   :  { %8592 = vrot.lane.b32.xlu0 %v19586_v3, %s14185_s15  ;;  %v7095_v35 = vpop.xlane.xlu1 %7094 }
 0xaa9   :  { %8721 = vrot.lane.b32.xlu1 %v19587_v58, %s14184_s14  ;;  %13899 = vrcp.f32 %v7095_v35 }
 0xaac   :  { %8594 = vrot.lane.b32.xlu0 %v19588_v1, %s14185_s15  ;;  %v7092_v45 = vpop.xlane.xlu0 %7091 }
 0xaad   :  { %8596 = vrot.lane.b32.xlu1 %v19589_v29, %s14185_s15  ;;  %13901 = vrcp.f32 %v7092_v45 }
 0xab0   :  { %8719 = vrot.lane.b32.xlu0 %v19590_v7, %s14184_s14  ;;  %v13896_v22 = vpop.eup %13895 }
 0xab1   :  { %8598 = vrot.lane.b32.xlu1 %v19591_v19, %s14185_s15  ;;  %v7213_v43 = vmul.f32 %v13896_v22, %v17603_v49  ;;  %v19596_v49 = vld [vmem:[#allocation100_spill] sm:$0xff]  ;;  %v19606_v22 = vld [vmem:[#allocation35_spill] sm:$0xff] }
 0xab2   :  { %v7113_v23 = vpop.xlane.xlu1 %7112  ;;  %v13898_v10 = vpop.eup %13897 }
 0xab3   :  { %v7212_v61 = vmul.f32 %v13898_v10, %v17608_v55  ;;  %13903 = vrcp.f32 %v7113_v23  ;;  %v19595_v55 = vld [vmem:[#allocation54_spill] sm:$0xff] }
 0xab4   :  { %8717 = vrot.lane.b32.xlu0 %v19592_v27, %s14184_s14  ;;  %v7110_v20 = vpop.xlane.xlu0 %7109  ;;  %v19608_v10 = vld [vmem:[#allocation34_spill] sm:$0xff] }
 0xab5   :  { %13905 = vrcp.f32 %v7110_v20  ;;  %8840 = vrot.lane.b32.xlu1 %v19593_v30, %s14184_s14  ;;  %13031 = vmatprep.mubr.msk.f32.mxu1 %vm117_vm0, %v7212_v61 }
 0xab6   :  { %v7119_v24 = vpop.xlane.xlu1 %7118  ;;  %13032 = vmatmul.mubr.msk.f32.vlgmr.msra.gmra.mxu1 %vm117_vm0, %v7213_v43  ;;  %v13900_v40 = vpop.eup %13899  ;;  %v19609_v43 = vld [vmem:[#allocation65_spill] sm:$0xff] }
 0xab7   :  { %13052 = vmatpush3.msra.mxu1 %v19594_v47  ;;  %13907 = vrcp.f32 %v7119_v24  ;;  %v7215_v57 = vmul.f32 %v13900_v40, %v17614_v6  ;;  %v19605_v6 = vld [vmem:[#allocation58_spill] sm:$0xff]  ;;  %v19610_v24 = vld [vmem:[#allocation128_spill] sm:$0xff]  ;;  %v19611_v47 = vld [vmem:[#allocation61_spill] sm:$0xff] }
 0xab8   :  { %8709 = vrot.lane.b32.xlu0 %v19595_v55, %s14185_s15  ;;  %13053 = vmatprep.subr.mxu1 %v19596_v49  ;;  %v7116_v4 = vpop.xlane.xlu0 %7115  ;;  %v19615_v40 = vld [vmem:[#allocation36_spill] sm:$0xff] }
 0xab9   :  { %13909 = vrcp.f32 %v7116_v4  ;;  %8838 = vrot.lane.b32.xlu1 %v19597_v8, %s14184_s14  ;;  %13054 = vmatpush3.msra.mxu1 %v19596_v49  ;;  %v19612_v49 = vld [vmem:[#allocation18_spill] sm:$0xff]  ;;  %v19614_v4 = vld [vmem:[#allocation136_spill] sm:$0xff] }
 0xaba   :  { %v13902_v17 = vpop.eup %13901  ;;  %13055 = vmatprep.subr.mxu1 %v19598_v21 }
 0xabb   :  { %13056 = vmatpush3.msra.mxu1 %v19598_v21  ;;  %v7214_v13 = vmul.f32 %v13902_v17, %v17618_v32  ;;  %v19603_v32 = vld [vmem:[#allocation32_spill] sm:$0xff] }
 0xabc   :  { %8711 = vrot.lane.b32.xlu0 %v19599_v16, %s14185_s15  ;;  %13057 = vmatprep.subr.mxu1 %v19600_v60 }
 0xabd   :  { %8957 = vrot.lane.b32.xlu1 %v19601_v48, %s14184_s14  ;;  %13058 = vmatpush3.msra.mxu1 %v19600_v60 }
 0xabe   :  { %13034 = vmatprep.mubr.msk.f32.mxu1 %vm117_vm0, %v7214_v13  ;;  %13079 = vmatprep.subr.mxu1 %v19602_v5  ;;  %v19616_v13 = vld [vmem:[#allocation67_spill] sm:$0xff] }
 0xabf   :  { %13035 = vmatmul.mubr.msk.f32.gmra.mxu1 %vm117_vm0, %v7215_v57  ;;  %v19617_v57 = vld [vmem:[#allocation66_spill] sm:$0xff] }
 0xac0   :  { %8836 = vrot.lane.b32.xlu0 %v19603_v32, %s14184_s14  ;;  %v13904_v51 = vpop.eup %13903 }
 0xac1   :  { %8715 = vrot.lane.b32.xlu1 %v19604_v28, %s14185_s15  ;;  %v7221_v1 = vmul.f32 %v13904_v51, %v17622_v9  ;;  %v19618_v28 = vld [vmem:[#allocation38_spill] sm:$0xff] }
 0xac2   :  { %v13906_v59 = vpop.eup %13905  ;;  %v7137_v3 = vpop.xlane.xlu0 %7136 }
 0xac3   :  { %v7220_v35 = vmul.f32 %v13906_v59, %v17628_v34  ;;  %13911 = vrcp.f32 %v7137_v3  ;;  %v19607_v34 = vld [vmem:[#allocation115_spill] sm:$0xff]  ;;  %v19619_v3 = vld [vmem:[#allocation134_spill] sm:$0xff] }
 0xac4   :  { %8713 = vrot.lane.b32.xlu0 %v19605_v6, %s14185_s15  ;;  %v7134_v45 = vpop.xlane.xlu1 %7133  ;;  %v13908_v29 = vpop.eup %13907  ;;  %v17867_v6 = vld [vmem:[#allocation7 + $0x10] sm:$0xff] }
 0xac5   :  { %13913 = vrcp.f32 %v7134_v45  ;;  %8955 = vrot.lane.b32.xlu1 %v19606_v22, %s14184_s14  ;;  %13059 = vmatprep.mubr.msk.f32.mxu1 %vm117_vm0, %v7220_v35  ;;  %v7223_v20 = vmul.f32 %v13908_v29, %v17633_v38  ;;  %v19613_v38 = vld [vmem:[#allocation37_spill] sm:$0xff]  ;;  %v19621_v35 = vld [vmem:[#allocation60_spill] sm:$0xff]  ;;  %v19624_v45 = vld [vmem:[#allocation139_spill] sm:$0xff] }
 0xac6   :  { %v13910_v19 = vpop.eup %13909  ;;  %13060 = vmatmul.mubr.msk.f32.vlgmr.msra.gmra.mxu1 %vm117_vm0, %v7221_v1  ;;  %v7143_v23 = vpop.xlane.xlu0 %7142  ;;  %v19622_v1 = vld [vmem:[#allocation141_spill] sm:$0xff]  ;;  %v19626_v29 = vld [vmem:[#allocation39_spill] sm:$0xff] }
 0xac7   :  { %13080 = vmatpush3.msra.mxu1 %v19602_v5  ;;  %v7222_v9 = vmul.f32 %v13910_v19, %v17638_v42  ;;  %13915 = vrcp.f32 %v7143_v23  ;;  %v19627_v19 = vld [vmem:[#allocation63_spill] sm:$0xff]  ;;  %v19628_v23 = vld [vmem:[#allocation62_spill] sm:$0xff] }
 0xac8   :  { %13081 = vmatprep.subr.mxu1 %v19607_v34  ;;  %8834 = vrot.lane.b32.xlu0 %v19608_v10, %s14184_s14  ;;  %v7140_v61 = vpop.xlane.xlu1 %7139 }
 0xac9   :  { %13917 = vrcp.f32 %v7140_v61  ;;  %13082 = vmatpush3.msra.mxu1 %v19607_v34  ;;  %8828 = vrot.lane.b32.xlu1 %v19609_v43, %s14185_s15  ;;  %v19630_v34 = vld [vmem:[#allocation41_spill] sm:$0xff]  ;;  %v19631_v61 = vld [vmem:[#allocation72_spill] sm:$0xff] }
 0xaca   :  { %13062 = vmatprep.mubr.msk.f32.mxu1 %vm117_vm0, %v7222_v9  ;;  %13083 = vmatprep.subr.mxu1 %v19610_v24  ;;  %v8014_v42 = vpop.permute.xlu0 %8013  ;;  %v19629_v9 = vld [vmem:[#allocation42_spill] sm:$0xff]  ;;  %v19632_v43 = vld [vmem:[#allocation69_spill] sm:$0xff]  ;;  %13919 = vrcp.f32 %v17750_v25 }
 0xacb   :  { %13063 = vmatmul.mubr.msk.f32.gmra.mxu1 %vm117_vm0, %v7223_v20  ;;  %13121 = vmatprep.subr.mxu0 %v8014_v42  ;;  %v19633_v20 = vld [vmem:[#allocation43_spill] sm:$0xff]  ;;  %13921 = vrcp.f32 %v17754_v44  ;;  %v19639_v25 = vld [vmem:[#allocation70_spill] sm:$0xff] }
 0xacc   :  { %13084 = vmatpush3.msra.mxu1 %v19610_v24  ;;  %8826 = vrot.lane.b32.xlu0 %v19611_v47, %s14185_s15  ;;  %v8012_v55 = vpop.permute.xlu1 %8011  ;;  %v19634_v24 = vld [vmem:[#allocation74_spill] sm:$0xff]  ;;  %v19636_v47 = vld [vmem:[#allocation44_spill] sm:$0xff]  ;;  %13923 = vrcp.f32 %v17758_v11 }
 0xacd   :  { %13085 = vmatprep.subr.mxu1 %v19612_v49  ;;  %13122 = vmatpush3.msra.mxu0 %v8014_v42  ;;  %v19635_v42 = vld [vmem:[#allocation73_spill] sm:$0xff] }
 0xace   :  { %13086 = vmatpush3.msra.mxu1 %v19612_v49  ;;  %9074 = vrot.lane.b32.xlu1 %v19613_v38, %s14184_s14 }
 0xacf   :  { %13107 = vmatprep.subr.mxu1 %v19614_v4  ;;  %13123 = vmatprep.subr.mxu0 %v8012_v55 }
 0xad0   :  { %13124 = vmatpush3.msra.mxu0 %v8012_v55  ;;  %8953 = vrot.lane.b32.xlu0 %v19615_v40, %s14184_s14  ;;  %v13912_v17 = vpop.eup %13911  ;;  %v19637_v55 = vld [vmem:[#allocation68_spill] sm:$0xff] }
 0xad1   :  { %v7229_v60 = vmul.f32 %v13912_v17, %v17656_v12  ;;  %v19620_v12 = vld [vmem:[#allocation30_spill] sm:$0xff] }
 0xad2   :  { %v13914_v21 = vpop.eup %13913  ;;  %8832 = vrot.lane.b32.xlu1 %v19616_v13, %s14185_s15 }
 0xad3   :  { %v7228_v16 = vmul.f32 %v13914_v21, %v17664_v26 }
 0xad4   :  { %8830 = vrot.lane.b32.xlu0 %v19617_v57, %s14185_s15  ;;  %v13916_v5 = vpop.eup %13915 }
 0xad5   :  { %13087 = vmatprep.mubr.msk.f32.mxu1 %vm117_vm0, %v7228_v16  ;;  %v7231_v26 = vmul.f32 %v13916_v5, %v17672_v15  ;;  %v19625_v15 = vld [vmem:[#allocation40_spill] sm:$0xff]  ;;  %v19641_v5 = vld [vmem:[#allocation143_spill] sm:$0xff] }
 0xad6   :  { %v13918_v51 = vpop.eup %13917  ;;  %9072 = vrot.lane.b32.xlu1 %v19618_v28, %s14184_s14  ;;  %13088 = vmatmul.mubr.msk.f32.vlgmr.msra.gmra.mxu1 %vm117_vm0, %v7229_v60  ;;  %v19640_v60 = vld [vmem:[#allocation71_spill] sm:$0xff] }
 0xad7   :  { %13108 = vmatpush3.msra.mxu1 %v19614_v4  ;;  %v7230_v59 = vmul.f32 %v13918_v51, %v17676_v56  ;;  %v19623_v56 = vld [vmem:[#allocation31_spill] sm:$0xff]  ;;  %v19638_v4 = vld [vmem:[#allocation64_spill] sm:$0xff]  ;;  %v13920_v11 = vpop.eup %13919 }
 0xad8   :  { %13109 = vmatprep.subr.mxu1 %v19619_v3  ;;  %8951 = vrot.lane.b32.xlu0 %v19620_v12, %s14184_s14  ;;  %v13922_v16 = vpop.eup %13921  ;;  %v7241_v51 = vmul.f32 %v13920_v11, %v19641_v5 }
 0xad9   :  { %13110 = vmatpush3.msra.mxu1 %v19619_v3  ;;  %13090 = vmatprep.mubr.msk.f32.mxu1 %vm117_vm0, %v7230_v59  ;;  %v19642_v59 = vld [vmem:[#allocation76_spill] sm:$0xff]  ;;  %v13924_v3 = vpop.eup %13923 }
 0xada   :  { %8945 = vrot.lane.b32.xlu1 %v19621_v35, %s14185_s15  ;;  %13111 = vmatprep.subr.mxu1 %v19622_v1  ;;  %v19643_v35 = vld [vmem:[#allocation145_spill] sm:$0xff] }
 0xadb   :  { %13091 = vmatmul.mubr.msk.f32.gmra.mxu1 %vm117_vm0, %v7231_v26 }
 0xadc   :  { %13112 = vmatpush3.msra.mxu1 %v19622_v1  ;;  %8943 = vrot.lane.b32.xlu0 %v19623_v56, %s14185_s15  ;;  %v7242_v1 = vmul.f32 %v13922_v16, %v19643_v35  ;;  %v19644_v56 = vld [vmem:[#allocation75_spill] sm:$0xff] }
 0xadd   :  { %13113 = vmatprep.subr.mxu1 %v19624_v45 }
 0xade   :  { %13114 = vmatpush3.msra.mxu1 %v19624_v45  ;;  %9191 = vrot.lane.b32.xlu1 %v19625_v15, %s14184_s14 }
 0xadf   :  { %13135 = vmatprep.subr.mxu1 %v17867_v6 }
 0xae0   :  { %9070 = vrot.lane.b32.xlu0 %v19626_v29, %s14184_s14 }
 0xae2   :  { %8949 = vrot.lane.b32.xlu1 %v19627_v19, %s14185_s15 }
 0xae4   :  { %8947 = vrot.lane.b32.xlu0 %v19628_v23, %s14185_s15  ;;  %v19645_v23 = vld [vmem:[#allocation78_spill] sm:$0xff] }
 0xae6   :  { %9189 = vrot.lane.b32.xlu1 %v19629_v9, %s14184_s14 }
 0xae8   :  { %9068 = vrot.lane.b32.xlu0 %v19630_v34, %s14184_s14 }
 0xaea   :  { %9062 = vrot.lane.b32.xlu1 %v19631_v61, %s14185_s15  ;;  %v19646_v61 = vld [vmem:[#allocation144_spill] sm:$0xff] }
 0xaec   :  { %9060 = vrot.lane.b32.xlu0 %v19632_v43, %s14185_s15  ;;  %v7243_v43 = vmul.f32 %v13924_v3, %v19646_v61 }
 0xaee   :  { %9308 = vrot.lane.b32.xlu1 %v19459_v36, %s14184_s14 }
 0xaf0   :  { %9187 = vrot.lane.b32.xlu0 %v19633_v20, %s14184_s14 }
 0xaf2   :  { %9066 = vrot.lane.b32.xlu1 %v19634_v24, %s14185_s15 }
 0xaf4   :  { %9064 = vrot.lane.b32.xlu0 %v19635_v42, %s14185_s15 }
 0xaf6   :  { %9306 = vrot.lane.b32.xlu1 %v19463_v50, %s14184_s14  ;;  %v19683_v50 = vld [vmem:[#allocation16_spill] sm:$0xff] }
 0xaf8   :  { %9185 = vrot.lane.b32.xlu0 %v19636_v47, %s14184_s14  ;;  %v19692_v47 = vld [vmem:[#allocation114_spill] sm:$0xff] }
 0xafa   :  { %9179 = vrot.lane.b32.xlu1 %v19637_v55, %s14185_s15  ;;  %v19647_v55 = vld [vmem:[#allocation77_spill] sm:$0xff] }
 0xafb   :  { %v7161_v49 = vpop.xlane.xlu0 %7160 }
 0xafc   :  { %9177 = vrot.lane.b32.xlu0 %v19638_v4, %s14185_s15  ;;  %13925 = vrcp.f32 %v7161_v49 }
 0xafd   :  { %v7158_v17 = vpop.xlane.xlu1 %7157 }
 0xafe   :  { %13927 = vrcp.f32 %v7158_v17  ;;  %9181 = vrot.lane.b32.xlu1 %v19639_v25, %s14185_s15 }
 0xaff   :  { %v7167_v21 = vpop.xlane.xlu0 %7166 }
 0xb00   :  { %9304 = vrot.lane.b32.xlu0 %v19320_v2, %s14184_s14  ;;  %13929 = vrcp.f32 %v7167_v21  ;;  %v19677_v2 = vld [vmem:[#allocation108_spill] sm:$0xff] }
 0xb01   :  { %v7164_v44 = vpop.xlane.xlu1 %7163 }
 0xb02   :  { %9302 = vrot.lane.b32.xlu1 %v19268_v18, %s14184_s14  ;;  %13931 = vrcp.f32 %v7164_v44  ;;  %v19682_v18 = vld [vmem:[#allocation86_spill] sm:$0xff] }
 0xb03   :  { %v8010_v13 = vpop.permute.xlu0 %8009 }
 0xb04   :  { %9183 = vrot.lane.b32.xlu0 %v19640_v60, %s14185_s15  ;;  %13125 = vmatprep.subr.mxu0 %v8010_v13 }
 0xb05   :  { %v8008_v57 = vpop.permute.xlu1 %8007  ;;  %13126 = vmatpush3.msra.mxu0 %v8010_v13 }
 0xb06   :  { %9296 = vrot.lane.b32.xlu1 %v19642_v59, %s14185_s15  ;;  %13127 = vmatprep.subr.mxu0 %v8008_v57 }
 0xb07   :  { %13128 = vmatpush3.msra.mxu0 %v8008_v57  ;;  %v8490_v26 = vpop.permute.xlu0 %8489 }
 0xb08   :  { %9294 = vrot.lane.b32.xlu0 %v19644_v56, %s14185_s15  ;;  %13130 = vmatmul.mubr.msk.f32.vlgmr.msra.gmra.mxu0 %vm117_vm0, %v7241_v51 }
 0xb09   :  { %13185 = vmatprep.subr.msk.mxu0 %vm993_vm1, %v8490_v26  ;;  %v8488_v45 = vpop.permute.xlu1 %8487  ;;  %13132 = vmatprep.mubr.msk.f32.mxu0 %vm117_vm0, %v7242_v1  ;;  %v13926_v19 = vpop.eup %13925 }
 0xb0a   :  { %9300 = vrot.lane.b32.xlu1 %v19645_v23, %s14185_s15  ;;  %13186 = vmatpush3.xpose.msk.msra.mxu0 %vm993_vm1, %v8490_v26  ;;  %v7237_v25 = vmul.f32 %v13926_v19, %v17716_v39 }
 0xb0b   :  { %v13928_v24 = vpop.eup %13927  ;;  %13187 = vmatprep.subr.msk.mxu0 %vm993_vm1, %v8488_v45  ;;  %v8486_v42 = vpop.permute.xlu0 %8485 }
 0xb0c   :  { %9298 = vrot.lane.b32.xlu0 %v19647_v55, %s14185_s15  ;;  %13133 = vmatmul.mubr.msk.f32.gmra.mxu0 %vm117_vm0, %v7243_v43  ;;  %v7236_v49 = vmul.f32 %v13928_v24, %v17718_v62 }
 0xb0d   :  { %v8484_v4 = vpop.permute.xlu1 %8483  ;;  %v13930_v17 = vpop.eup %13929 }
 0xb0e   :  { %9767 = vrot.lane.b32.xlu1 %v19282_v14, %s14186_s16  ;;  %13188 = vmatpush3.xpose.msk.msra.mxu0 %vm993_vm1, %v8488_v45  ;;  %v7239_v14 = vmul.f32 %v13930_v17, %v17722_v46 }
 0xb0f   :  { %v13932_v21 = vpop.eup %13931  ;;  %13115 = vmatprep.mubr.msk.f32.mxu1 %vm117_vm0, %v7236_v49  ;;  %13189 = vmatprep.subr.msk.mxu0 %vm993_vm1, %v8486_v42  ;;  %v8476_v44 = vpop.permute.xlu0 %8475 }
 0xb10   :  { %13116 = vmatmul.mubr.msk.f32.vlgmr.msra.gmra.mxu1 %vm117_vm0, %v7237_v25  ;;  %9769 = vrot.lane.b32.xlu0 %v19329_v31, %s14186_s16  ;;  %v7238_v62 = vmul.f32 %v13932_v21, %v17726_v52 }
 0xb11   :  { %13193 = vmatprep.mubr.msk.f32.mxu0 %vm993_vm1, %v8476_v44  ;;  %v8607_v39 = vpop.permute.xlu1 %8606  ;;  %13136 = vmatpush3.msra.mxu1 %v17867_v6 }
 0xb12   :  { %9763 = vrot.lane.b32.xlu1 %v19400_v54, %s14186_s16  ;;  %13190 = vmatpush3.xpose.msk.msra.mxu0 %vm993_vm1, %v8486_v42 }
 0xb13   :  { %13118 = vmatprep.mubr.msk.f32.mxu1 %vm117_vm0, %v7238_v62  ;;  %13191 = vmatprep.subr.msk.mxu0 %vm993_vm1, %v8484_v4  ;;  %v8478_v11 = vpop.permute.xlu0 %8477 }
 0xb14   :  { %13119 = vmatmul.mubr.msk.f32.gmra.mxu1 %vm117_vm0, %v7239_v14  ;;  %9765 = vrot.lane.b32.xlu0 %v19330_v53, %s14186_s16 }
 0xb15   :  { %v8605_v31 = vpop.permute.xlu1 %8604 }
 0xb16   :  { %9876 = vrot.lane.b32.xlu1 %v19290_v0, %s14186_s16  ;;  %13192 = vmatpush3.xpose.msk.msra.mxu0 %vm993_vm1, %v8484_v4 }
 0xb17   :  { %13199 = vmatprep.subr.msk.mxu0 %vm993_vm1, %v8607_v39  ;;  %v8603_v54 = vpop.permute.xlu0 %8602 }
 0xb18   :  { %9878 = vrot.lane.b32.xlu0 %v19331_v37, %s14186_s16 }
 0xb19   :  { %13194 = vmatmul.mubr.msk.f32.vlgmr.msra.gmra.mxu0 %vm993_vm1, %v8478_v11  ;;  %v8480_v46 = vpop.permute.xlu1 %8479 }
 0xb1a   :  { %9872 = vrot.lane.b32.xlu1 %v19584_v33, %s14186_s16  ;;  %13200 = vmatpush3.xpose.msk.msra.mxu0 %vm993_vm1, %v8607_v39 }
 0xb1b   :  { %13196 = vmatprep.mubr.msk.f32.mxu0 %vm993_vm1, %v8480_v46  ;;  %13201 = vmatprep.subr.msk.mxu0 %vm993_vm1, %v8605_v31  ;;  %v8601_v0 = vpop.permute.xlu0 %8600 }
 0xb1c   :  { %9874 = vrot.lane.b32.xlu0 %v19404_v41, %s14186_s16 }
 0xb1d   :  { %v8482_v53 = vpop.permute.xlu1 %8481 }
 0xb1e   :  { %9985 = vrot.lane.b32.xlu1 %v19587_v58, %s14186_s16  ;;  %13202 = vmatpush3.xpose.msk.msra.mxu0 %vm993_vm1, %v8605_v31 }
 0xb1f   :  { %13197 = vmatmul.mubr.msk.f32.gmra.mxu0 %vm993_vm1, %v8482_v53  ;;  %13203 = vmatprep.subr.msk.mxu0 %vm993_vm1, %v8603_v54  ;;  %v8593_v37 = vpop.permute.xlu0 %8592 }
 0xb20   :  { %9987 = vrot.lane.b32.xlu0 %v19585_v63, %s14186_s16  ;;  %13207 = vmatprep.mubr.msk.f32.mxu0 %vm993_vm1, %v8593_v37 }
 0xb21   :  { %v8724_v52 = vpop.permute.xlu1 %8723 }
 0xb22   :  { %9981 = vrot.lane.b32.xlu1 %v19592_v27, %s14186_s16  ;;  %13204 = vmatpush3.xpose.msk.msra.mxu0 %vm993_vm1, %v8603_v54  ;;  %v13047_v54 = vpop.f32.mrf.mxu0 }
 0xb23   :  { %13205 = vmatprep.subr.msk.mxu0 %vm993_vm1, %v8601_v0  ;;  %v8595_v41 = vpop.permute.xlu0 %8594 }
 0xb24   :  { %9983 = vrot.lane.b32.xlu0 %v19590_v7, %s14186_s16  ;;  %v7443_v53 = vpop.f32.mrf.mxu0 }
 0xb25   :  { %v8722_v33 = vpop.permute.xlu1 %8721 }
 0xb26   :  { %10094 = vrot.lane.b32.xlu1 %v19597_v8, %s14186_s16  ;;  %13206 = vmatpush3.xpose.msk.msra.mxu0 %vm993_vm1, %v8601_v0 }
 0xb27   :  { %13213 = vmatprep.subr.msk.mxu0 %vm993_vm1, %v8724_v52  ;;  %v8720_v63 = vpop.permute.xlu0 %8719 }
 0xb28   :  { %10096 = vrot.lane.b32.xlu0 %v19593_v30, %s14186_s16 }
 0xb29   :  { %13208 = vmatmul.mubr.msk.f32.vlgmr.msra.gmra.mxu0 %vm993_vm1, %v8595_v41  ;;  %v8597_v58 = vpop.permute.xlu1 %8596 }
 0xb2a   :  { %10090 = vrot.lane.b32.xlu1 %v19608_v10, %s14186_s16  ;;  %13214 = vmatpush3.xpose.msk.msra.mxu0 %vm993_vm1, %v8724_v52 }
 0xb2b   :  { %13210 = vmatprep.mubr.msk.f32.mxu0 %vm993_vm1, %v8597_v58  ;;  %13215 = vmatprep.subr.msk.mxu0 %vm993_vm1, %v8722_v33  ;;  %v8718_v7 = vpop.permute.xlu0 %8717 }
 0xb2c   :  { %10092 = vrot.lane.b32.xlu0 %v19603_v32, %s14186_s16 }
 0xb2d   :  { %v8599_v27 = vpop.permute.xlu1 %8598 }
 0xb2e   :  { %10203 = vrot.lane.b32.xlu1 %v19606_v22, %s14186_s16  ;;  %13216 = vmatpush3.xpose.msk.msra.mxu0 %vm993_vm1, %v8722_v33 }
 0xb2f   :  { %13211 = vmatmul.mubr.msk.f32.gmra.mxu0 %vm993_vm1, %v8599_v27  ;;  %13217 = vmatprep.subr.msk.mxu0 %vm993_vm1, %v8720_v63  ;;  %v8710_v30 = vpop.permute.xlu0 %8709 }
 0xb30   :  { %10205 = vrot.lane.b32.xlu0 %v19601_v48, %s14186_s16  ;;  %13221 = vmatprep.mubr.msk.f32.mxu0 %vm993_vm1, %v8710_v30 }
 0xb31   :  { %v8841_v8 = vpop.permute.xlu1 %8840 }
 0xb32   :  { %10199 = vrot.lane.b32.xlu1 %v19620_v12, %s14186_s16  ;;  %13218 = vmatpush3.xpose.msk.msra.mxu0 %vm993_vm1, %v8720_v63  ;;  %v13050_v63 = vpop.f32.mrf.mxu0 }
 0xb33   :  { %13219 = vmatprep.subr.msk.mxu0 %vm993_vm1, %v8718_v7  ;;  %v8712_v32 = vpop.permute.xlu0 %8711 }
 0xb34   :  { %10201 = vrot.lane.b32.xlu0 %v19615_v40, %s14186_s16  ;;  %v7453_v30 = vpop.f32.mrf.mxu0 }
 0xb35   :  { %v8839_v22 = vpop.permute.xlu1 %8838 }
 0xb36   :  { %13220 = vmatpush3.xpose.msk.msra.mxu0 %vm993_vm1, %v8718_v7 }
 0xb37   :  { %13227 = vmatprep.subr.msk.mxu0 %vm993_vm1, %v8841_v8  ;;  %v8837_v48 = vpop.permute.xlu0 %8836 }
 0xb39   :  { %13222 = vmatmul.mubr.msk.f32.vlgmr.msra.gmra.mxu0 %vm993_vm1, %v8712_v32  ;;  %v18013_v10 = vpop.permute.xlu1 %8957 }
 0xb3a   :  { %13228 = vmatpush3.xpose.msk.msra.mxu0 %vm993_vm1, %v8841_v8  ;;  %13241 = vmatprep.subr.msk.mxu1 %vm993_vm1, %v18013_v10 }
 0xb3b   :  { %13229 = vmatprep.subr.msk.mxu0 %vm993_vm1, %v8839_v22  ;;  %v8714_v12 = vpop.permute.xlu0 %8713 }
 0xb3c   :  { %13224 = vmatprep.mubr.msk.f32.mxu0 %vm993_vm1, %v8714_v12 }
 0xb3d   :  { %v8716_v40 = vpop.permute.xlu1 %8715 }
 0xb3e   :  { %13230 = vmatpush3.xpose.msk.msra.mxu0 %vm993_vm1, %v8839_v22 }
 0xb3f   :  { %13225 = vmatmul.mubr.msk.f32.gmra.mxu0 %vm993_vm1, %v8716_v40  ;;  %13231 = vmatprep.subr.msk.mxu0 %vm993_vm1, %v8837_v48  ;;  %v8835_v6 = vpop.permute.xlu0 %8834 }
 0xb41   :  { %v18023_v13 = vpop.permute.xlu1 %8955 }
 0xb42   :  { %13232 = vmatpush3.xpose.msk.msra.mxu0 %vm993_vm1, %v8837_v48  ;;  %v13075_v48 = vpop.f32.mrf.mxu0 }
 0xb43   :  { %13233 = vmatprep.subr.msk.mxu0 %vm993_vm1, %v8835_v6  ;;  %v8827_v16 = vpop.permute.xlu0 %8826 }
 0xb44   :  { %13235 = vmatprep.mubr.msk.f32.mxu0 %vm993_vm1, %v8827_v16 }
 0xb45   :  { %v8829_v60 = vpop.permute.xlu1 %8828 }
 0xb46   :  { %13234 = vmatpush3.xpose.msk.msra.mxu0 %vm993_vm1, %v8835_v6  ;;  %v7661_v6 = vpop.f32.mrf.mxu0 }
 0xb47   :  { %v18029_v57 = vpop.permute.xlu0 %8953 }
 0xb49   :  { %13236 = vmatmul.mubr.msk.f32.vlgmr.msra.gmra.mxu0 %vm993_vm1, %v8829_v60  ;;  %v9075_v5 = vpop.permute.xlu1 %9074 }
 0xb4a   :  { %13255 = vmatprep.subr.msk.mxu0 %vm993_vm1, %v9075_v5 }
 0xb4b   :  { %13256 = vmatpush3.xpose.msk.msra.mxu0 %vm993_vm1, %v9075_v5  ;;  %v8831_v51 = vpop.permute.xlu0 %8830 }
 0xb4c   :  { %13238 = vmatprep.mubr.msk.f32.mxu0 %vm993_vm1, %v8831_v51 }
 0xb4d   :  { %v8833_v59 = vpop.permute.xlu1 %8832 }
 0xb4e   :  { %13239 = vmatmul.mubr.msk.f32.gmra.mxu0 %vm993_vm1, %v8833_v59 }
 0xb4f   :  { %v18036_v3 = vpop.permute.xlu0 %8951 }
 0xb51   :  { %v9073_v26 = vpop.permute.xlu1 %9072 }
 0xb52   :  { %13257 = vmatprep.subr.msk.mxu0 %vm993_vm1, %v9073_v26 }
 0xb53   :  { %13258 = vmatpush3.xpose.msk.msra.mxu0 %vm993_vm1, %v9073_v26  ;;  %v18040_v35 = vpop.permute.xlu0 %8943 }
 0xb55   :  { %v18042_v1 = vpop.permute.xlu1 %8945 }
 0xb57   :  { %v9071_v56 = vpop.permute.xlu0 %9070 }
 0xb58   :  { %13259 = vmatprep.subr.msk.mxu0 %vm993_vm1, %v9071_v56 }
 0xb59   :  { %v18045_v45 = vpop.permute.xlu1 %9191  ;;  %13260 = vmatpush3.xpose.msk.msra.mxu0 %vm993_vm1, %v9071_v56 }
 0xb5b   :  { %v18048_v19 = vpop.permute.xlu0 %8947 }
 0xb5d   :  { %v18050_v23 = vpop.permute.xlu1 %8949 }
 0xb5f   :  { %v9069_v61 = vpop.permute.xlu0 %9068 }
 0xb60   :  { %13261 = vmatprep.subr.msk.mxu0 %vm993_vm1, %v9069_v61 }
 0xb61   :  { %v18053_v43 = vpop.permute.xlu1 %9189  ;;  %13262 = vmatpush3.xpose.msk.msra.mxu0 %vm993_vm1, %v9069_v61 }
 0xb63   :  { %v9061_v24 = vpop.permute.xlu0 %9060 }
 0xb64   :  { %13263 = vmatprep.mubr.msk.f32.mxu0 %vm993_vm1, %v9061_v24 }
 0xb65   :  { %v9063_v42 = vpop.permute.xlu1 %9062 }
 0xb66   :  { %13264 = vmatmul.mubr.msk.f32.vlgmr.msra.gmra.mxu0 %vm993_vm1, %v9063_v42 }
 0xb67   :  { %v18058_v55 = vpop.permute.xlu0 %9187 }
 0xb69   :  { %v9309_v49 = vpop.permute.xlu1 %9308 }
 0xb6a   :  { %13283 = vmatprep.subr.msk.mxu0 %vm993_vm1, %v9309_v49 }
 0xb6b   :  { %13284 = vmatpush3.xpose.msk.msra.mxu0 %vm993_vm1, %v9309_v49  ;;  %v9065_v4 = vpop.permute.xlu0 %9064 }
 0xb6c   :  { %13266 = vmatprep.mubr.msk.f32.mxu0 %vm993_vm1, %v9065_v4 }
 0xb6d   :  { %v9067_v17 = vpop.permute.xlu1 %9066 }
 0xb6e   :  { %13267 = vmatmul.mubr.msk.f32.gmra.mxu0 %vm993_vm1, %v9067_v17 }
 0xb6f   :  { %v18064_v25 = vpop.permute.xlu0 %9185 }
 0xb71   :  { %v9307_v21 = vpop.permute.xlu1 %9306 }
 0xb72   :  { %13285 = vmatprep.subr.msk.mxu0 %vm993_vm1, %v9307_v21 }
 0xb73   :  { %13286 = vmatpush3.xpose.msk.msra.mxu0 %vm993_vm1, %v9307_v21  ;;  %v18068_v44 = vpop.permute.xlu0 %9177 }
 0xb75   :  { %v18070_v62 = vpop.permute.xlu1 %9179 }
 0xb76   :  { %v13033_v39 = vpop.f32.mrf.mxu1 }
 0xb77   :  { %v9305_v14 = vpop.permute.xlu0 %9304 }
 0xb78   :  { %13287 = vmatprep.subr.msk.mxu0 %vm993_vm1, %v9305_v14  ;;  %v7334_v11 = vpop.f32.mrf.mxu1 }
 0xb79   :  { %v18073_v31 = vpop.permute.xlu1 %9181  ;;  %13288 = vmatpush3.xpose.msk.msra.mxu0 %vm993_vm1, %v9305_v14  ;;  %13137 = vmatprep.mubr.msk.f32.mxu1 %vm993_vm1, %v7334_v11 }
 0xb7a   :  { %13138 = vmatmul.mubr.msk.f32.vlgmr.msra.gmra.mxu1 %vm993_vm1, %v13033_v39 }
 0xb7b   :  { %13242 = vmatpush3.xpose.msk.msra.mxu1 %vm993_vm1, %v18013_v10  ;;  %v18080_v46 = vpop.permute.xlu0 %9183 }
 0xb7c   :  { %13243 = vmatprep.subr.msk.mxu1 %vm993_vm1, %v18023_v13 }
 0xb7d   :  { %v9303_v0 = vpop.permute.xlu1 %9302 }
 0xb7e   :  { %13289 = vmatprep.subr.msk.mxu0 %vm993_vm1, %v9303_v0 }
 0xb7f   :  { %v13036_v37 = vpop.f32.mrf.mxu1  ;;  %13244 = vmatpush3.xpose.msk.msra.mxu1 %vm993_vm1, %v18023_v13  ;;  %13290 = vmatpush3.xpose.msk.msra.mxu0 %vm993_vm1, %v9303_v0  ;;  %v9295_v52 = vpop.permute.xlu0 %9294 }
 0xb80   :  { %13245 = vmatprep.subr.msk.mxu1 %vm993_vm1, %v18029_v57  ;;  %13291 = vmatprep.mubr.msk.f32.mxu0 %vm993_vm1, %v9295_v52 }
 0xb81   :  { %v9297_v41 = vpop.permute.xlu1 %9296  ;;  %v7344_v33 = vpop.f32.mrf.mxu1 }
 0xb82   :  { %13140 = vmatprep.mubr.msk.f32.mxu1 %vm993_vm1, %v7344_v33  ;;  %13292 = vmatmul.mubr.msk.f32.vlgmr.msra.gmra.mxu0 %vm993_vm1, %v9297_v41 }
 0xb83   :  { %13141 = vmatmul.mubr.msk.f32.gmra.mxu1 %vm993_vm1, %v13036_v37  ;;  %v9299_v58 = vpop.permute.xlu0 %9298 }
 0xb84   :  { %13246 = vmatpush3.xpose.msk.msra.mxu1 %vm993_vm1, %v18029_v57  ;;  %13143 = vmatprep.mubr.msk.f32.mxu1 %vm993_vm1, %v7443_v53  ;;  %v13078_v57 = vpop.f32.mrf.mxu0 }
 0xb85   :  { %13247 = vmatprep.subr.msk.mxu1 %vm993_vm1, %v18036_v3  ;;  %13294 = vmatprep.mubr.msk.f32.mxu0 %vm993_vm1, %v9299_v58  ;;  %v9301_v7 = vpop.permute.xlu1 %9300 }
 0xb86   :  { %v13061_v27 = vpop.f32.mrf.mxu1  ;;  %13295 = vmatmul.mubr.msk.f32.gmra.mxu0 %vm993_vm1, %v9301_v7 }
 0xb87   :  { %13144 = vmatmul.mubr.msk.f32.gmra.mxu1 %vm993_vm1, %v13047_v54  ;;  %v18102_v8 = vpop.permute.xlu0 %9769 }
 0xb88   :  { %13248 = vmatpush3.xpose.msk.msra.mxu1 %vm993_vm1, %v18036_v3  ;;  %v7552_v32 = vpop.f32.mrf.mxu1  ;;  %13146 = vmatprep.mubr.msk.f32.mxu1 %vm993_vm1, %v7453_v30  ;;  %v7671_v3 = vpop.f32.mrf.mxu0 }
 0xb89   :  { %13269 = vmatprep.subr.msk.mxu1 %vm993_vm1, %v18045_v45  ;;  %v18109_v22 = vpop.permute.xlu1 %9767 }
 0xb8a   :  { %v13103_v24 = vpop.f32.mrf.mxu0 }
 0xb8b   :  { %v13064_v10 = vpop.f32.mrf.mxu1  ;;  %13147 = vmatmul.mubr.msk.f32.gmra.mxu1 %vm993_vm1, %v13050_v63  ;;  %v18112_v12 = vpop.permute.xlu0 %9765 }
 0xb8c   :  { %13149 = vmatprep.mubr.msk.f32.mxu1 %vm993_vm1, %v7552_v32  ;;  %v7879_v17 = vpop.f32.mrf.mxu0  ;;  %v18154_v32 = vld [vmem:[#allocation8 + $0x60] sm:$0xff] }
 0xb8d   :  { %v18115_v40 = vpop.permute.xlu1 %9763  ;;  %v7562_v13 = vpop.f32.mrf.mxu1 }
 0xb8e   :  { %v13106_v14 = vpop.f32.mrf.mxu0 }
 0xb8f   :  { %13150 = vmatmul.mubr.msk.f32.gmra.mxu1 %vm993_vm1, %v13061_v27  ;;  %v18118_v16 = vpop.permute.xlu0 %9878  ;;  %v18150_v27 = vld [vmem:[#allocation8 + $0x68] sm:$0xff] }
 0xb90   :  { %13152 = vmatprep.mubr.msk.f32.mxu1 %vm993_vm1, %v7562_v13  ;;  %v7889_v54 = vpop.f32.mrf.mxu0 }
 0xb91   :  { %v18121_v60 = vpop.permute.xlu1 %9876 }
 0xb93   :  { %13153 = vmatmul.mubr.msk.f32.gmra.mxu1 %vm993_vm1, %v13064_v10  ;;  %v18124_v5 = vpop.permute.xlu0 %9874 }
 0xb94   :  { %13155 = vmatprep.mubr.msk.f32.mxu1 %vm993_vm1, %v7661_v6 }
 0xb95   :  { %v18127_v51 = vpop.permute.xlu1 %9872 }
 0xb96   :  { %v13089_v59 = vpop.f32.mrf.mxu1 }
 0xb97   :  { %13156 = vmatmul.mubr.msk.f32.gmra.mxu1 %vm993_vm1, %v13075_v48  ;;  %v9988_v26 = vpop.permute.xlu0 %9987 }
 0xb98   :  { %v7770_v56 = vpop.f32.mrf.mxu1  ;;  %13158 = vmatprep.mubr.msk.f32.mxu1 %vm993_vm1, %v7671_v3  ;;  %13325 = vmatprep.subr.mxu0 %v9988_v26 }
 0xb99   :  { %v9986_v61 = vpop.permute.xlu1 %9985  ;;  %13326 = vmatpush3.msra.mxu0 %v9988_v26  ;;  %v18170_v26 = vld [vmem:[#allocation8 + $0x70] sm:$0xff] }
 0xb9a   :  { %13327 = vmatprep.subr.mxu0 %v9986_v61 }
 0xb9b   :  { %v13092_v42 = vpop.f32.mrf.mxu1  ;;  %13159 = vmatmul.mubr.msk.f32.gmra.mxu1 %vm993_vm1, %v13078_v57  ;;  %13328 = vmatpush3.msra.mxu0 %v9986_v61  ;;  %v9984_v49 = vpop.permute.xlu0 %9983  ;;  %v18166_v57 = vld [vmem:[#allocation8 + $0x78] sm:$0xff] }
 0xb9c   :  { %13161 = vmatprep.mubr.msk.f32.mxu1 %vm993_vm1, %v7770_v56  ;;  %13329 = vmatprep.subr.mxu0 %v9984_v49  ;;  %19648 = vst [vmem:[#allocation48_spill] sm:$0xff] %v18166_v57 }
 0xb9d   :  { %v9982_v4 = vpop.permute.xlu1 %9981  ;;  %13330 = vmatpush3.msra.mxu0 %v9984_v49  ;;  %v7780_v21 = vpop.f32.mrf.mxu1 }
 0xb9e   :  { %13331 = vmatprep.subr.mxu0 %v9982_v4 }
 0xb9f   :  { %13162 = vmatmul.mubr.msk.f32.gmra.mxu1 %vm993_vm1, %v13089_v59  ;;  %13332 = vmatpush3.msra.mxu0 %v9982_v4  ;;  %v18134_v39 = vpop.permute.xlu0 %10096 }
 0xba0   :  { %13164 = vmatprep.mubr.msk.f32.mxu1 %vm993_vm1, %v7780_v21 }
 0xba3   :  { %13165 = vmatmul.mubr.msk.f32.gmra.mxu1 %vm993_vm1, %v13092_v42  ;;  %v18138_v11 = vpop.permute.xlu0 %10092 }
 0xba4   :  { %13167 = vmatprep.mubr.msk.f32.mxu1 %vm993_vm1, %v7879_v17 }
 0xba7   :  { %13168 = vmatmul.mubr.msk.f32.gmra.mxu1 %vm993_vm1, %v13103_v24  ;;  %v18142_v0 = vpop.permute.xlu0 %10205 }
 0xba8   :  { %13170 = vmatprep.mubr.msk.f32.mxu1 %vm993_vm1, %v7889_v54  ;;  %13353 = vmatprep.subr.mxu0 %v18142_v0 }
 0xbab   :  { %13171 = vmatmul.mubr.msk.f32.gmra.mxu1 %vm993_vm1, %v13106_v14 }
 0xbc8   :  { %v13131_v53 = vpop.f32.mrf.mxu0 }
 0xbca   :  { %v8097_v37 = vpop.f32.mrf.mxu0 }
 0xbcc   :  { %v13134_v33 = vpop.f32.mrf.mxu0 }
 0xbce   :  { %v8107_v7 = vpop.f32.mrf.mxu0 }
 0xbd0   :  { %v13117_v52 = vpop.f32.mrf.mxu1 }
 0xbd2   :  { %v7988_v41 = vpop.f32.mrf.mxu1 }
 0xbd3   :  { %13173 = vmatprep.mubr.msk.f32.mxu1 %vm993_vm1, %v7988_v41 }
 0xbd4   :  { %v13120_v63 = vpop.f32.mrf.mxu1  ;;  %13174 = vmatmul.mubr.msk.f32.gmra.mxu1 %vm993_vm1, %v13117_v52 }
 0xbd6   :  { %v7998_v58 = vpop.f32.mrf.mxu1 }
 0xbd7   :  { %13176 = vmatprep.mubr.msk.f32.mxu1 %vm993_vm1, %v7998_v58 }
 0xbd8   :  { %13177 = vmatmul.mubr.msk.f32.gmra.mxu1 %vm993_vm1, %v13120_v63 }
 0xbd9   :  { %13179 = vmatprep.mubr.msk.f32.mxu1 %vm993_vm1, %v8097_v37  ;;  %v13195_v30 = vpop.f32.mrf.mxu0 }
 0xbda   :  { %v18157_v48 = vadd.f32 %v13195_v30, %v18150_v27 }
 0xbdb   :  { %v8573_v10 = vpop.f32.mrf.mxu0 }
 0xbdc   :  { %v18160_v6 = vadd.f32 %v8573_v10, %v18154_v32  ;;  %13180 = vmatmul.mubr.msk.f32.gmra.mxu1 %vm993_vm1, %v13131_v53  ;;  %v9414_v13 = vsel %vm117_vm0, %v18157_v48, -inf }
 0xbdd   :  { %13182 = vmatprep.mubr.msk.f32.mxu1 %vm993_vm1, %v8107_v7  ;;  %9415 = vmax.xlane.f32.xlu1 %v9414_v13 }
 0xbde   :  { %v9411_v59 = vsel %vm117_vm0, %v18160_v6, -inf }
 0xbdf   :  { %v13198_v3 = vpop.f32.mrf.mxu0  ;;  %9412 = vmax.xlane.f32.xlu0 %v9411_v59 }
 0xbe0   :  { %v18173_v56 = vadd.f32 %v13198_v3, %v18166_v57  ;;  %13183 = vmatmul.mubr.msk.f32.gmra.mxu1 %vm993_vm1, %v13134_v33 }
 0xbe1   :  { %v8583_v61 = vpop.f32.mrf.mxu0  ;;  %13249 = vmatprep.mubr.msk.f32.mxu1 %vm993_vm1, %v18040_v35 }
 0xbe2   :  { %v18179_v24 = vadd.f32 %v8583_v61, %v18170_v26  ;;  %v9420_v42 = vsel %vm117_vm0, %v18173_v56, -inf }
 0xbe3   :  { %9421 = vmax.xlane.f32.xlu0 %v9420_v42 }
 0xbe4   :  { %13250 = vmatmul.mubr.msk.f32.vlgmr.msra.gmra.mxu1 %vm993_vm1, %v18042_v1  ;;  %v9417_v35 = vsel %vm117_vm0, %v18179_v24, -inf }
 0xbe5   :  { %13270 = vmatpush3.xpose.msk.msra.mxu1 %vm993_vm1, %v18045_v45  ;;  %13252 = vmatprep.mubr.msk.f32.mxu1 %vm993_vm1, %v18048_v19 }
 0xbe6   :  { %13271 = vmatprep.subr.msk.mxu1 %vm993_vm1, %v18053_v43 }
 0xbe7   :  { %9418 = vmax.xlane.f32.xlu0 %v9417_v35 }
 0xbe8   :  { %13253 = vmatmul.mubr.msk.f32.gmra.mxu1 %vm993_vm1, %v18050_v23 }
 0xbe9   :  { %13272 = vmatpush3.xpose.msk.msra.mxu1 %vm993_vm1, %v18053_v43  ;;  %v13209_v1 = vpop.f32.mrf.mxu0  ;;  %13277 = vmatprep.mubr.msk.f32.mxu1 %vm993_vm1, %v18068_v44 }
 0xbea   :  { %v18200_v45 = vadd.f32 %v13209_v1, %v18150_v27  ;;  %13273 = vmatprep.subr.msk.mxu1 %vm993_vm1, %v18058_v55 }
 0xbeb   :  { %v8690_v19 = vpop.f32.mrf.mxu0 }
 0xbec   :  { %v18205_v49 = vadd.f32 %v8690_v19, %v18154_v32  ;;  %v9426_v23 = vsel %vm117_vm0, %v18200_v45, -inf }
 0xbed   :  { %13274 = vmatpush3.xpose.msk.msra.mxu1 %vm993_vm1, %v18058_v55  ;;  %9427 = vmax.xlane.f32.xlu1 %v9426_v23 }
 0xbee   :  { %13275 = vmatprep.subr.msk.mxu1 %vm993_vm1, %v18064_v25  ;;  %v9423_v43 = vsel %vm117_vm0, %v18205_v49, -inf }
 0xbef   :  { %v13212_v44 = vpop.f32.mrf.mxu0  ;;  %9424 = vmax.xlane.f32.xlu0 %v9423_v43 }
 0xbf0   :  { %v18216_v4 = vadd.f32 %v13212_v44, %v18166_v57 }
 0xbf1   :  { %13276 = vmatpush3.xpose.msk.msra.mxu1 %vm993_vm1, %v18064_v25  ;;  %v8700_v17 = vpop.f32.mrf.mxu0 }
 0xbf2   :  { %v18221_v21 = vadd.f32 %v8700_v17, %v18170_v26  ;;  %13297 = vmatprep.subr.mxu1 %v18102_v8  ;;  %v9432_v55 = vsel %vm117_vm0, %v18216_v4, -inf }
 0xbf3   :  { %9433 = vmax.xlane.f32.xlu1 %v9432_v55 }
 0xbf4   :  { %13278 = vmatmul.mubr.msk.f32.vlgmr.msra.gmra.mxu1 %vm993_vm1, %v18070_v62  ;;  %v9429_v14 = vsel %vm117_vm0, %v18221_v21, -inf }
 0xbf5   :  { %13280 = vmatprep.mubr.msk.f32.mxu1 %vm993_vm1, %v18073_v31  ;;  %13298 = vmatpush3.msra.mxu1 %v18102_v8 }
 0xbf6   :  { %9430 = vmax.xlane.f32.xlu0 %v9429_v14  ;;  %13299 = vmatprep.subr.mxu1 %v18109_v22 }
 0xbf7   :  { %13300 = vmatpush3.msra.mxu1 %v18109_v22 }
 0xbf8   :  { %13281 = vmatmul.mubr.msk.f32.gmra.mxu1 %vm993_vm1, %v18080_v46  ;;  %13301 = vmatprep.subr.mxu1 %v18112_v12 }
 0xbf9   :  { %13302 = vmatpush3.msra.mxu1 %v18112_v12  ;;  %v13223_v25 = vpop.f32.mrf.mxu0 }
 0xbfa   :  { %v18240_v62 = vadd.f32 %v13223_v25, %v18150_v27  ;;  %13303 = vmatprep.subr.mxu1 %v18115_v40 }
 0xbfb   :  { %13304 = vmatpush3.msra.mxu1 %v18115_v40  ;;  %v8807_v31 = vpop.f32.mrf.mxu0 }
 0xbfc   :  { %v18245_v8 = vadd.f32 %v8807_v31, %v18154_v32  ;;  %13311 = vmatprep.subr.mxu1 %v18118_v16  ;;  %v9438_v46 = vsel %vm117_vm0, %v18240_v62, -inf }
 0xbfd   :  { %9439 = vmax.xlane.f32.xlu1 %v9438_v46 }
 0xbfe   :  { %v9435_v22 = vsel %vm117_vm0, %v18245_v8, -inf }
 0xbff   :  { %9436 = vmax.xlane.f32.xlu0 %v9435_v22  ;;  %v13226_v12 = vpop.f32.mrf.mxu0 }
 0xc00   :  { %v18253_v54 = vadd.f32 %v13226_v12, %v18166_v57  ;;  %v19649_v12 = vld [vmem:[#allocation124_spill] sm:$0xff] }
 0xc01   :  { %v8817_v53 = vpop.f32.mrf.mxu0 }
 0xc02   :  { %v18256_v40 = vadd.f32 %v8817_v53, %v18170_v26  ;;  %v9444_v37 = vsel %vm117_vm0, %v18253_v54, -inf }
 0xc03   :  { %9445 = vmax.xlane.f32.xlu1 %v9444_v37 }
 0xc04   :  { %v9441_v52 = vsel %vm117_vm0, %v18256_v40, -inf }
 0xc05   :  { %9442 = vmax.xlane.f32.xlu0 %v9441_v52 }
 0xc09   :  { %v13237_v41 = vpop.f32.mrf.mxu0 }
 0xc0a   :  { %v18263_v33 = vadd.f32 %v13237_v41, %v18150_v27 }
 0xc0b   :  { %v8924_v63 = vpop.f32.mrf.mxu0 }
 0xc0c   :  { %v18266_v58 = vadd.f32 %v8924_v63, %v18154_v32  ;;  %v9450_v7 = vsel %vm117_vm0, %v18263_v33, -inf }
 0xc0d   :  { %9451 = vmax.xlane.f32.xlu1 %v9450_v7  ;;  %v19652_v7 = vld [vmem:[#allocation17_spill] sm:$0xff] }
 0xc0e   :  { %v9447_v30 = vsel %vm117_vm0, %v18266_v58, -inf  ;;  %v13240_v10 = vpop.f32.mrf.mxu0 }
 0xc0f   :  { %9448 = vmax.xlane.f32.xlu0 %v9447_v30  ;;  %v18273_v13 = vadd.f32 %v13240_v10, %v18166_v57 }
 0xc10   :  { %v8934_v59 = vpop.f32.mrf.mxu0 }
 0xc11   :  { %v18276_v3 = vadd.f32 %v8934_v59, %v18170_v26  ;;  %v9456_v61 = vsel %vm117_vm0, %v18273_v13, -inf }
 0xc12   :  { %9457 = vmax.xlane.f32.xlu1 %v9456_v61 }
 0xc13   :  { %v9453_v42 = vsel %vm117_vm0, %v18276_v3, -inf }
 0xc14   :  { %9454 = vmax.xlane.f32.xlu0 %v9453_v42 }
 0xc26   :  { %v13265_v35 = vpop.f32.mrf.mxu0 }
 0xc27   :  { %v18283_v1 = vadd.f32 %v13265_v35, %v18150_v27  ;;  %v19655_v35 = vld [vmem:[#allocation85_spill] sm:$0xff] }
 0xc28   :  { %v9158_v19 = vpop.f32.mrf.mxu0 }
 0xc29   :  { %v18286_v23 = vadd.f32 %v9158_v19, %v18154_v32  ;;  %v9474_v43 = vsel %vm117_vm0, %v18283_v1, -inf  ;;  %v19656_v19 = vld [vmem:[#allocation47_spill] sm:$0xff] }
 0xc2a   :  { %9475 = vmax.xlane.f32.xlu1 %v9474_v43  ;;  %v5818_v43 = vadd.f32 %v19656_v19, %v19655_v35 }
 0xc2b   :  { %v9471_v44 = vsel %vm117_vm0, %v18286_v23, -inf }
 0xc2c   :  { %9472 = vmax.xlane.f32.xlu0 %v9471_v44 }
 0xc2e   :  { %v13268_v17 = vpop.f32.mrf.mxu0 }
 0xc2f   :  { %v18293_v55 = vadd.f32 %v13268_v17, %v18166_v57 }
 0xc30   :  { %v9168_v14 = vpop.f32.mrf.mxu0 }
 0xc31   :  { %v18296_v25 = vadd.f32 %v9168_v14, %v18170_v26  ;;  %v9480_v31 = vsel %vm117_vm0, %v18293_v55, -inf }
 0xc32   :  { %9481 = vmax.xlane.f32.xlu1 %v9480_v31 }
 0xc33   :  { %v9477_v46 = vsel %vm117_vm0, %v18296_v25, -inf }
 0xc34   :  { %9478 = vmax.xlane.f32.xlu0 %v9477_v46 }
 0xc3a   :  { %v13139_v22 = vpop.f32.mrf.mxu1 }
 0xc3b   :  { %v18303_v53 = vadd.f32 %v13139_v22, %v19649_v12 }
 0xc3c   :  { %v18305_v37 = vpop.f32.mrf.mxu1 }
 0xc3d   :  { %19650 = vst [vmem:[#allocation23_spill] sm:$0xff] %v18303_v53  ;;  %19651 = vst [vmem:[#allocation24_spill] sm:$0xff] %v18305_v37  ;;  %v19674_v37 = vld [vmem:[#allocation107_spill] sm:$0xff] }
 0xc42   :  { %v13293_v52 = vpop.f32.mrf.mxu0 }
 0xc43   :  { %v18308_v41 = vadd.f32 %v13293_v52, %v18150_v27  ;;  %v13142_v63 = vpop.f32.mrf.mxu1 }
 0xc44   :  { %v18311_v30 = vadd.f32 %v13142_v63, %v19652_v7  ;;  %v9392_v10 = vpop.f32.mrf.mxu0  ;;  %v19659_v63 = vld [vmem:[#allocation99_spill] sm:$0xff]  ;;  %v19660_v7 = vld [vmem:[#allocation82_spill] sm:$0xff] }
 0xc45   :  { %v18314_v59 = vadd.f32 %v9392_v10, %v18154_v32  ;;  %v18316_v61 = vpop.f32.mrf.mxu1  ;;  %v9498_v42 = vsel %vm117_vm0, %v18308_v41, -inf  ;;  %v5828_v10 = vadd.f32 %v19660_v7, %v19659_v63  ;;  %v19668_v63 = vld [vmem:[#allocation105_spill] sm:$0xff] }
 0xc46   :  { %19653 = vst [vmem:[#allocation49_spill] sm:$0xff] %v18311_v30  ;;  %19654 = vst [vmem:[#allocation25_spill] sm:$0xff] %v18316_v61  ;;  %9499 = vmax.xlane.f32.xlu1 %v9498_v42  ;;  %v13296_v44 = vpop.f32.mrf.mxu0 }
 0xc47   :  { %v18323_v27 = vadd.f32 %v13296_v44, %v18166_v57  ;;  %v13145_v17 = vpop.f32.mrf.mxu1  ;;  %v9495_v14 = vsel %vm117_vm0, %v18314_v59, -inf  ;;  %v19663_v44 = vld [vmem:[#allocation87_spill] sm:$0xff]  ;;  %v19700_v57 = vld [vmem:[#allocation21_spill] sm:$0xff] }
 0xc48   :  { %v18327_v31 = vadd.f32 %v13145_v17, %v5818_v43  ;;  %9496 = vmax.xlane.f32.xlu0 %v9495_v14  ;;  %v9402_v46 = vpop.f32.mrf.mxu0  ;;  %v19664_v17 = vld [vmem:[#allocation110_spill] sm:$0xff] }
 0xc49   :  { %v18330_v22 = vadd.f32 %v9402_v46, %v18170_v26  ;;  %v18332_v12 = vpop.f32.mrf.mxu1  ;;  %v9504_v52 = vsel %vm117_vm0, %v18323_v27, -inf  ;;  %v5838_v14 = vadd.f32 %v19664_v17, %v19663_v44  ;;  %v19673_v17 = vld [vmem:[#allocation104_spill] sm:$0xff] }
 0xc4a   :  { %19657 = vst [vmem:[#allocation50_spill] sm:$0xff] %v18327_v31  ;;  %19658 = vst [vmem:[#allocation51_spill] sm:$0xff] %v18332_v12  ;;  %9505 = vmax.xlane.f32.xlu1 %v9504_v52  ;;  %v18346_v31 = vpop.permute.xlu1 %10094  ;;  %v19667_v52 = vld [vmem:[#allocation83_spill] sm:$0xff] }
 0xc4b   :  { %v13148_v42 = vpop.f32.mrf.mxu1  ;;  %v9501_v35 = vsel %vm117_vm0, %v18330_v22, -inf  ;;  %v5848_v7 = vadd.f32 %v19668_v63, %v19667_v52 }
 0xc4c   :  { %v18340_v19 = vadd.f32 %v13148_v42, %v5828_v10  ;;  %9502 = vmax.xlane.f32.xlu0 %v9501_v35  ;;  %v19671_v42 = vld [vmem:[#allocation103_spill] sm:$0xff] }
 0xc4d   :  { %v18342_v43 = vpop.f32.mrf.mxu1  ;;  %v19672_v35 = vld [vmem:[#allocation111_spill] sm:$0xff] }
 0xc4e   :  { %19661 = vst [vmem:[#allocation26_spill] sm:$0xff] %v18340_v19  ;;  %19662 = vst [vmem:[#allocation53_spill] sm:$0xff] %v18342_v43  ;;  %v5858_v19 = vadd.f32 %v19672_v35, %v19671_v42  ;;  %v18360_v43 = vpop.permute.xlu1 %10090 }
 0xc4f   :  { %v13151_v46 = vpop.f32.mrf.mxu1 }
 0xc50   :  { %v18348_v12 = vadd.f32 %v13151_v46, %v5838_v14  ;;  %v5853_v14 = vadd.f32 %v19674_v37, %v19673_v17  ;;  %v5878_v37 = vadd.f32 %v19683_v50, %v19682_v18  ;;  %v19685_v17 = vld [vmem:[#allocation113_spill] sm:$0xff]  ;;  %v18392_v50 = vpop.permute.xlu0 %10201 }
 0xc51   :  { %v18350_v30 = vpop.f32.mrf.mxu1 }
 0xc52   :  { %19665 = vst [vmem:[#allocation27_spill] sm:$0xff] %v18348_v12  ;;  %19666 = vst [vmem:[#allocation28_spill] sm:$0xff] %v18350_v30  ;;  %v19676_v30 = vld [vmem:[#allocation84_spill] sm:$0xff]  ;;  %v18372_v36 = vpop.permute.xlu1 %10203 }
 0xc53   :  { %v13154_v61 = vpop.f32.mrf.mxu1  ;;  %v5868_v52 = vadd.f32 %v19677_v2, %v19676_v30 }
 0xc54   :  { %v18354_v53 = vadd.f32 %v13154_v61, %v5848_v7  ;;  %v19679_v7 = vld [vmem:[#allocation125_spill] sm:$0xff] }
 0xc55   :  { %v18356_v10 = vpop.f32.mrf.mxu1 }
 0xc56   :  { %19669 = vst [vmem:[#allocation117_spill] sm:$0xff] %v18354_v53  ;;  %19670 = vst [vmem:[#allocation54_spill] sm:$0xff] %v18356_v10  ;;  %v19680_v53 = vld [vmem:[#allocation98_spill] sm:$0xff] }
 0xc57   :  { %v13157_v44 = vpop.f32.mrf.mxu1  ;;  %v5863_v10 = vadd.f32 %v19680_v53, %v19679_v7  ;;  %v18386_v7 = vpop.permute.xlu1 %10199 }
 0xc58   :  { %v18364_v46 = vadd.f32 %v13157_v44, %v5858_v19 }
 0xc59   :  { %v8339_v12 = vpop.f32.mrf.mxu1 }
 0xc5a   :  { %19675 = vst [vmem:[#allocation100_spill] sm:$0xff] %v18364_v46  ;;  %v18368_v63 = vadd.f32 %v8339_v12, %v5853_v14  ;;  %v19686_v46 = vld [vmem:[#allocation19_spill] sm:$0xff]  ;;  %v19688_v14 = vld [vmem:[#allocation109_spill] sm:$0xff] }
 0xc5b   :  { %v13160_v61 = vpop.f32.mrf.mxu1  ;;  %v5873_v2 = vadd.f32 %v19686_v46, %v19685_v17  ;;  %v19694_v46 = vld [vmem:[#allocation126_spill] sm:$0xff] }
 0xc5c   :  { %19678 = vst [vmem:[#allocation29_spill] sm:$0xff] %v18368_v63  ;;  %v18374_v42 = vadd.f32 %v13160_v61, %v5868_v52  ;;  %v19689_v63 = vld [vmem:[#allocation112_spill] sm:$0xff] }
 0xc5d   :  { %v8349_v35 = vpop.f32.mrf.mxu1  ;;  %v5888_v53 = vadd.f32 %v19689_v63, %v19688_v14 }
 0xc5e   :  { %19681 = vst [vmem:[#allocation121_spill] sm:$0xff] %v18374_v42  ;;  %v18378_v19 = vadd.f32 %v8349_v35, %v5863_v10  ;;  %v19691_v42 = vld [vmem:[#allocation116_spill] sm:$0xff] }
 0xc5f   :  { %v13163_v44 = vpop.f32.mrf.mxu1  ;;  %v5883_v18 = vadd.f32 %v19692_v47, %v19691_v42 }
 0xc60   :  { %19684 = vst [vmem:[#allocation57_spill] sm:$0xff] %v18378_v19  ;;  %v18382_v30 = vadd.f32 %v13163_v44, %v5878_v37  ;;  %v19695_v37 = vld [vmem:[#allocation20_spill] sm:$0xff] }
 0xc61   :  { %v8359_v12 = vpop.f32.mrf.mxu1  ;;  %v5898_v44 = vadd.f32 %v19695_v37, %v19694_v46 }
 0xc62   :  { %19687 = vst [vmem:[#allocation89_spill] sm:$0xff] %v18382_v30  ;;  %v18388_v52 = vadd.f32 %v8359_v12, %v5873_v2  ;;  %v19697_v2 = vld [vmem:[#allocation127_spill] sm:$0xff] }
 0xc63   :  { %v13166_v61 = vpop.f32.mrf.mxu1  ;;  %v19698_v12 = vld [vmem:[#allocation123_spill] sm:$0xff] }
 0xc64   :  { %19690 = vst [vmem:[#allocation33_spill] sm:$0xff] %v18388_v52  ;;  %v18394_v10 = vadd.f32 %v13166_v61, %v5888_v53  ;;  %v5893_v52 = vadd.f32 %v19698_v12, %v19697_v2 }
 0xc65   :  { %v8369_v35 = vpop.f32.mrf.mxu1 }
 0xc66   :  { %19693 = vst [vmem:[#allocation119_spill] sm:$0xff] %v18394_v10  ;;  %v18398_v17 = vadd.f32 %v8369_v35, %v5883_v18  ;;  %v9416_v30 = vpop.xlane.xlu1 %9415  ;;  %v19699_v10 = vld [vmem:[#allocation129_spill] sm:$0xff] }
 0xc67   :  { %v9508_v63 = vsub.f32 %v18157_v48, %v9416_v30  ;;  %v13169_v14 = vpop.f32.mrf.mxu1  ;;  %v5908_v20 = vadd.f32 %v19700_v57, %v19699_v10  ;;  %v19701_v48 = vld [vmem:[#allocation130_spill] sm:$0xff]  ;;  %v19702_v30 = vld [vmem:[#allocation88_spill] sm:$0xff] }
 0xc68   :  { %19696 = vst [vmem:[#allocation32_spill] sm:$0xff] %v18398_v17  ;;  %v18403_v19 = vadd.f32 %v13169_v14, %v5898_v44  ;;  %v9413_v47 = vpop.xlane.xlu0 %9412  ;;  %v5903_v37 = vadd.f32 %v19702_v30, %v19701_v48 }
 0xc69   :  { %v9541_v42 = vmul.f32 1.442695, %v9508_v63  ;;  %v9507_v53 = vsub.f32 %v18160_v6, %v9413_v47  ;;  %v8379_v61 = vpop.f32.mrf.mxu1 }
 0xc6a   :  { %v18408_v46 = vadd.f32 %v8379_v61, %v5893_v52 }
 0xc6b   :  { %13933 = vpow2.f32 %v9541_v42  ;;  %v9539_v18 = vmul.f32 1.442695, %v9507_v53  ;;  %v13172_v35 = vpop.f32.mrf.mxu1 }
 0xc6c   :  { %v18412_v17 = vadd.f32 %v13172_v35, %v5908_v20  ;;  %v9422_v44 = vpop.xlane.xlu0 %9421 }
 0xc6d   :  { %13935 = vpow2.f32 %v9539_v18  ;;  %v9510_v63 = vsub.f32 %v18173_v56, %v9422_v44  ;;  %v8389_v14 = vpop.f32.mrf.mxu1 }
 0xc6e   :  { %v18415_v6 = vadd.f32 %v8389_v14, %v5903_v37 }
 0xc6f   :  { %v9545_v2 = vmul.f32 1.442695, %v9510_v63 }
 0xc70   :  { %v9419_v12 = vpop.xlane.xlu0 %9418 }
 0xc71   :  { %13937 = vpow2.f32 %v9545_v2  ;;  %v9509_v57 = vsub.f32 %v18179_v24, %v9419_v12 }
 0xc73   :  { %v9543_v52 = vmul.f32 1.442695, %v9509_v57 }
 0xc75   :  { %13939 = vpow2.f32 %v9543_v52 }
 0xc76   :  { %v9428_v10 = vpop.xlane.xlu1 %9427 }
 0xc77   :  { %v9512_v47 = vsub.f32 %v18200_v45, %v9428_v10 }
 0xc78   :  { %v18419_v42 = vpop.eup %13933  ;;  %v9425_v20 = vpop.xlane.xlu0 %9424 }
 0xc79   :  { %v9549_v53 = vmul.f32 1.442695, %v9512_v47  ;;  %v9511_v61 = vsub.f32 %v18205_v49, %v9425_v20  ;;  %v9606_v56 = vsel %vm117_vm0, %v18419_v42, 0.0 }
 0xc7a   :  { %v18424_v18 = vpop.eup %13935  ;;  %9607 = vadd.xlane.f32.xlu1 %v9606_v56 }
 0xc7b   :  { %13941 = vpow2.f32 %v9549_v53  ;;  %v9547_v35 = vmul.f32 1.442695, %v9511_v61  ;;  %v9603_v24 = vsel %vm117_vm0, %v18424_v18, 0.0 }
 0xc7c   :  { %v9434_v48 = vpop.xlane.xlu1 %9433  ;;  %9604 = vadd.xlane.f32.xlu0 %v9603_v24 }
 0xc7d   :  { %13943 = vpow2.f32 %v9547_v35  ;;  %v9514_v45 = vsub.f32 %v18216_v4, %v9434_v48 }
 0xc7e   :  { %v18429_v30 = vpop.eup %13937 }
 0xc7f   :  { %v9553_v37 = vmul.f32 1.442695, %v9514_v45  ;;  %v9431_v49 = vpop.xlane.xlu0 %9430  ;;  %v9612_v44 = vsel %vm117_vm0, %v18429_v30, 0.0 }
 0xc80   :  { %v9513_v63 = vsub.f32 %v18221_v21, %v9431_v49  ;;  %9613 = vadd.xlane.f32.xlu1 %v9612_v44 }
 0xc81   :  { %13945 = vpow2.f32 %v9553_v37 }
 0xc82   :  { %v18434_v14 = vpop.eup %13939  ;;  %v9551_v2 = vmul.f32 1.442695, %v9513_v63 }
 0xc83   :  { %v9609_v12 = vsel %vm117_vm0, %v18434_v14, 0.0 }
 0xc84   :  { %13947 = vpow2.f32 %v9551_v2  ;;  %9610 = vadd.xlane.f32.xlu0 %v9609_v12  ;;  %v19703_v2 = vld [vmem:[#allocation131_spill] sm:$0xff]  ;;  %v19704_v12 = vld [vmem:[#allocation90_spill] sm:$0xff] }
 0xc86   :  { %v9440_v4 = vpop.xlane.xlu1 %9439 }
 0xc87   :  { %v9516_v57 = vsub.f32 %v18240_v62, %v9440_v4 }
 0xc88   :  { %v18439_v52 = vpop.eup %13941  ;;  %v9437_v10 = vpop.xlane.xlu0 %9436 }
 0xc89   :  { %v9557_v47 = vmul.f32 1.442695, %v9516_v57  ;;  %v9515_v20 = vsub.f32 %v18245_v8, %v9437_v10  ;;  %v9618_v21 = vsel %vm117_vm0, %v18439_v52, 0.0  ;;  %v19705_v57 = vld [vmem:[#allocation132_spill] sm:$0xff] }
 0xc8a   :  { %v18444_v53 = vpop.eup %13943  ;;  %9619 = vadd.xlane.f32.xlu1 %v9618_v21  ;;  %v19706_v10 = vld [vmem:[#allocation92_spill] sm:$0xff] }
 0xc8b   :  { %13949 = vpow2.f32 %v9557_v47  ;;  %v9555_v61 = vmul.f32 1.442695, %v9515_v20  ;;  %v9615_v56 = vsel %vm117_vm0, %v18444_v53, 0.0 }
 0xc8c   :  { %v9446_v35 = vpop.xlane.xlu1 %9445  ;;  %9616 = vadd.xlane.f32.xlu0 %v9615_v56  ;;  %v19708_v56 = vld [vmem:[#allocation93_spill] sm:$0xff] }
 0xc8d   :  { %13951 = vpow2.f32 %v9555_v61  ;;  %v9518_v62 = vsub.f32 %v18253_v54, %v9446_v35  ;;  %v5918_v54 = vadd.f32 %v19704_v12, %v19703_v2  ;;  %v19707_v61 = vld [vmem:[#allocation133_spill] sm:$0xff] }
 0xc8e   :  { %v18449_v24 = vpop.eup %13945  ;;  %v9443_v48 = vpop.xlane.xlu0 %9442  ;;  %v5928_v35 = vadd.f32 %v19708_v56, %v19707_v61 }
 0xc8f   :  { %v9561_v8 = vmul.f32 1.442695, %v9518_v62  ;;  %v9517_v45 = vsub.f32 %v18256_v40, %v9443_v48  ;;  %v9624_v37 = vsel %vm117_vm0, %v18449_v24, 0.0  ;;  %v5913_v40 = vadd.f32 %v19706_v10, %v19705_v57 }
 0xc90   :  { %9625 = vadd.xlane.f32.xlu1 %v9624_v37  ;;  %v19711_v37 = vld [vmem:[#allocation94_spill] sm:$0xff] }
 0xc91   :  { %v18454_v49 = vpop.eup %13947  ;;  %13953 = vpow2.f32 %v9561_v8  ;;  %v9559_v44 = vmul.f32 1.442695, %v9517_v45  ;;  %v19710_v45 = vld [vmem:[#allocation135_spill] sm:$0xff] }
 0xc92   :  { %v9621_v63 = vsel %vm117_vm0, %v18454_v49, 0.0 }
 0xc93   :  { %13955 = vpow2.f32 %v9559_v44  ;;  %9622 = vadd.xlane.f32.xlu0 %v9621_v63  ;;  %v5923_v44 = vadd.f32 %v19711_v37, %v19710_v45  ;;  %v19716_v37 = vld [vmem:[#allocation138_spill] sm:$0xff] }
 0xc94   :  { %v13175_v4 = vpop.f32.mrf.mxu1 }
 0xc95   :  { %v18462_v47 = vadd.f32 %v13175_v4, %v5918_v54 }
 0xc96   :  { %v8399_v20 = vpop.f32.mrf.mxu1  ;;  %v9452_v21 = vpop.xlane.xlu1 %9451 }
 0xc97   :  { %v18466_v62 = vadd.f32 %v8399_v20, %v5913_v40  ;;  %v9520_v48 = vsub.f32 %v18263_v33, %v9452_v21  ;;  %v19713_v40 = vld [vmem:[#allocation137_spill] sm:$0xff]  ;;  %v19714_v20 = vld [vmem:[#allocation95_spill] sm:$0xff] }
 0xc98   :  { %v18469_v8 = vpop.eup %13949  ;;  %v13178_v63 = vpop.f32.mrf.mxu1  ;;  %v5938_v33 = vadd.f32 %v19714_v20, %v19713_v40  ;;  %v19718_v20 = vld [vmem:[#allocation140_spill] sm:$0xff] }
 0xc99   :  { %19709 = vst [vmem:[#allocation59_spill] sm:$0xff] %v18466_v62  ;;  %v9449_v2 = vpop.xlane.xlu0 %9448  ;;  %v9565_v12 = vmul.f32 1.442695, %v9520_v48  ;;  %v18473_v57 = vadd.f32 %v13178_v63, %v5928_v35  ;;  %v9630_v4 = vsel %vm117_vm0, %v18469_v8, 0.0  ;;  %v19717_v63 = vld [vmem:[#allocation96_spill] sm:$0xff] }
 0xc9a   :  { %v9519_v54 = vsub.f32 %v18266_v58, %v9449_v2  ;;  %v18478_v10 = vpop.eup %13951  ;;  %v8409_v21 = vpop.f32.mrf.mxu1  ;;  %9631 = vadd.xlane.f32.xlu1 %v9630_v4  ;;  %v5933_v2 = vadd.f32 %v19717_v63, %v19716_v37 }
 0xc9b   :  { %19712 = vst [vmem:[#allocation58_spill] sm:$0xff] %v18473_v57  ;;  %13957 = vpow2.f32 %v9565_v12  ;;  %v18482_v56 = vadd.f32 %v8409_v21, %v5923_v44  ;;  %v9458_v45 = vpop.xlane.xlu1 %9457  ;;  %v9627_v35 = vsel %vm117_vm0, %v18478_v10, 0.0  ;;  %v19719_v21 = vld [vmem:[#allocation80_spill] sm:$0xff] }
 0xc9c   :  { %v9563_v61 = vmul.f32 1.442695, %v9519_v54  ;;  %v13181_v48 = vpop.f32.mrf.mxu1  ;;  %v9522_v58 = vsub.f32 %v18273_v13, %v9458_v45  ;;  %9628 = vadd.xlane.f32.xlu0 %v9627_v35  ;;  %v19720_v35 = vld [vmem:[#allocation142_spill] sm:$0xff] }
 0xc9d   :  { %19715 = vst [vmem:[#allocation35_spill] sm:$0xff] %v18482_v56  ;;  %v18489_v57 = vadd.f32 %v13181_v48, %v5938_v33  ;;  %v9455_v40 = vpop.xlane.xlu0 %9454  ;;  %v5948_v56 = vadd.f32 %v19719_v21, %v19718_v20  ;;  %v19721_v48 = vld [vmem:[#allocation79_spill] sm:$0xff] }
 0xc9e   :  { %13959 = vpow2.f32 %v9563_v61  ;;  %v18491_v4 = vpop.eup %13953  ;;  %v9569_v12 = vmul.f32 1.442695, %v9522_v58  ;;  %v8419_v44 = vpop.f32.mrf.mxu1  ;;  %v9521_v54 = vsub.f32 %v18276_v3, %v9455_v40  ;;  %v5943_v58 = vadd.f32 %v19721_v48, %v19720_v35 }
 0xc9f   :  { %v18496_v62 = vadd.f32 %v8419_v44, %v5933_v2  ;;  %v9636_v13 = vsel %vm117_vm0, %v18491_v4, 0.0 }
 0xca0   :  { %v18500_v45 = vpop.eup %13955  ;;  %13961 = vpow2.f32 %v9569_v12  ;;  %v9567_v33 = vmul.f32 1.442695, %v9521_v54  ;;  %v13184_v61 = vpop.f32.mrf.mxu1  ;;  %9637 = vadd.xlane.f32.xlu1 %v9636_v13 }
 0xca1   :  { %v18504_v37 = vadd.f32 %v13184_v61, %v5948_v56  ;;  %v9633_v3 = vsel %vm117_vm0, %v18500_v45, 0.0 }
 0xca2   :  { %13963 = vpow2.f32 %v9567_v33  ;;  %v8429_v63 = vpop.f32.mrf.mxu1  ;;  %9634 = vadd.xlane.f32.xlu0 %v9633_v3 }
 0xca3   :  { %19722 = vst [vmem:[#allocation115_spill] sm:$0xff] %v18504_v37  ;;  %v18508_v2 = vadd.f32 %v8429_v63, %v5943_v58 }
 0xca5   :  { %19723 = vst [vmem:[#allocation34_spill] sm:$0xff] %v18508_v2 }
 0xca8   :  { %v18510_v40 = vpop.eup %13957 }
 0xca9   :  { %v9642_v12 = vsel %vm117_vm0, %v18510_v40, 0.0 }
 0xcaa   :  { %9643 = vadd.xlane.f32.xlu0 %v9642_v12 }
 0xcab   :  { %v18514_v44 = vpop.eup %13959 }
 0xcac   :  { %v9639_v56 = vsel %vm117_vm0, %v18514_v44, 0.0 }
 0xcad   :  { %9640 = vadd.xlane.f32.xlu1 %v9639_v56  ;;  %v18518_v54 = vpop.eup %13961 }
 0xcae   :  { %v9648_v20 = vsel %vm117_vm0, %v18518_v54, 0.0 }
 0xcaf   :  { %v18522_v21 = vpop.eup %13963  ;;  %9649 = vadd.xlane.f32.xlu0 %v9648_v20 }
 0xcb0   :  { %v9645_v13 = vsel %vm117_vm0, %v18522_v21, 0.0 }
 0xcb1   :  { %9646 = vadd.xlane.f32.xlu1 %v9645_v13 }
 0xcb3   :  { %v9476_v33 = vpop.xlane.xlu1 %9475 }
 0xcb4   :  { %v9528_v61 = vsub.f32 %v18283_v1, %v9476_v33 }
 0xcb5   :  { %v9473_v35 = vpop.xlane.xlu0 %9472 }
 0xcb6   :  { %v9581_v48 = vmul.f32 1.442695, %v9528_v61  ;;  %v9527_v58 = vsub.f32 %v18286_v23, %v9473_v35 }
 0xcb8   :  { %13965 = vpow2.f32 %v9581_v48  ;;  %v9579_v3 = vmul.f32 1.442695, %v9527_v58 }
 0xcba   :  { %13967 = vpow2.f32 %v9579_v3 }
 0xcbb   :  { %v9482_v63 = vpop.xlane.xlu1 %9481 }
 0xcbc   :  { %v9530_v12 = vsub.f32 %v18293_v55, %v9482_v63 }
 0xcbd   :  { %v9479_v56 = vpop.xlane.xlu0 %9478 }
 0xcbe   :  { %v9585_v2 = vmul.f32 1.442695, %v9530_v12  ;;  %v9529_v20 = vsub.f32 %v18296_v25, %v9479_v56 }
 0xcc0   :  { %13969 = vpow2.f32 %v9585_v2  ;;  %v9583_v37 = vmul.f32 1.442695, %v9529_v20 }
 0xcc2   :  { %13971 = vpow2.f32 %v9583_v37 }
 0xcc5   :  { %v18530_v13 = vpop.eup %13965 }
 0xcc6   :  { %v9666_v1 = vsel %vm117_vm0, %v18530_v13, 0.0 }
 0xcc7   :  { %v18534_v33 = vpop.eup %13967  ;;  %9667 = vadd.xlane.f32.xlu0 %v9666_v1 }
 0xcc8   :  { %v9663_v23 = vsel %vm117_vm0, %v18534_v33, 0.0 }
 0xcc9   :  { %9664 = vadd.xlane.f32.xlu1 %v9663_v23 }
 0xccd   :  { %v18538_v55 = vpop.eup %13969 }
 0xcce   :  { %v9672_v25 = vsel %vm117_vm0, %v18538_v55, 0.0 }
 0xccf   :  { %v18542_v2 = vpop.eup %13971  ;;  %v9500_v37 = vpop.xlane.xlu1 %9499  ;;  %9673 = vadd.xlane.f32.xlu0 %v9672_v25 }
 0xcd0   :  { %v9536_v61 = vsub.f32 %v18308_v41, %v9500_v37  ;;  %v9669_v35 = vsel %vm117_vm0, %v18542_v2, 0.0 }
 0xcd1   :  { %9670 = vadd.xlane.f32.xlu1 %v9669_v35  ;;  %v9497_v48 = vpop.xlane.xlu0 %9496 }
 0xcd2   :  { %v9597_v58 = vmul.f32 1.442695, %v9536_v61  ;;  %v9535_v3 = vsub.f32 %v18314_v59, %v9497_v48 }
 0xcd3   :  { %v9506_v63 = vpop.xlane.xlu1 %9505 }
 0xcd4   :  { %13973 = vpow2.f32 %v9597_v58  ;;  %v9595_v12 = vmul.f32 1.442695, %v9535_v3  ;;  %v9538_v56 = vsub.f32 %v18323_v27, %v9506_v63 }
 0xcd5   :  { %v9503_v37 = vpop.xlane.xlu0 %9502 }
 0xcd6   :  { %13975 = vpow2.f32 %v9595_v12  ;;  %v9601_v20 = vmul.f32 1.442695, %v9538_v56  ;;  %v9537_v48 = vsub.f32 %v18330_v22, %v9503_v37 }
 0xcd8   :  { %13977 = vpow2.f32 %v9601_v20 }
 0xce1   :  { %v18549_v1 = vpop.eup %13973 }
 0xce2   :  { %v9690_v41 = vsel %vm117_vm0, %v18549_v1, 0.0 }
 0xce3   :  { %v18553_v23 = vpop.eup %13975  ;;  %9691 = vadd.xlane.f32.xlu0 %v9690_v41 }
 0xce4   :  { %v9687_v25 = vsel %vm117_vm0, %v18553_v23, 0.0 }
 0xce5   :  { %v18557_v59 = vpop.eup %13977  ;;  %9688 = vadd.xlane.f32.xlu1 %v9687_v25 }
 0xce6   :  { %v9696_v27 = vsel %vm117_vm0, %v18557_v59, 0.0 }
 0xce7   :  { %9697 = vadd.xlane.f32.xlu0 %v9696_v27 }
 0xcf6   :  { %10312 = vrot.lane.b32.xlu1 %v19618_v28, %s14186_s16  ;;  %v18572_v28 = vpop.f32.mrf.mxu1 }
 0xcfa   :  { %10310 = vrot.lane.b32.xlu1 %v19626_v29, %s14186_s16  ;;  %v9599_v29 = vmul.f32 1.442695, %v9537_v48 }
 0xcfd   :  { %10314 = vrot.lane.b32.xlu0 %v19613_v38, %s14186_s16  ;;  %v9041_v38 = vpop.f32.mrf.mxu1 }
 0xcfe   :  { %10308 = vrot.lane.b32.xlu1 %v19630_v34, %s14186_s16 }
 0xcff   :  { %v18574_v63 = vpop.f32.mrf.mxu1 }
 0xd01   :  { %10423 = vrot.lane.b32.xlu0 %v19625_v15, %s14186_s16  ;;  %v9051_v41 = vpop.f32.mrf.mxu1 }
 0xd03   :  { %v9608_v61 = vpop.xlane.xlu1 %9607  ;;  %v18580_v25 = vpop.f32.mrf.mxu1 }
 0xd04   :  { %13979 = vrcp.f32 %v9608_v61 }
 0xd05   :  { %v9605_v35 = vpop.xlane.xlu0 %9604  ;;  %v9275_v61 = vpop.f32.mrf.mxu1 }
 0xd06   :  { %13981 = vrcp.f32 %v9605_v35 }
 0xd09   :  { %v9614_v58 = vpop.xlane.xlu1 %9613 }
 0xd0a   :  { %13983 = vrcp.f32 %v9614_v58 }
 0xd0d   :  { %v9611_v3 = vpop.xlane.xlu0 %9610 }
 0xd0e   :  { %13985 = vrcp.f32 %v9611_v3  ;;  %v18609_v3 = vadd.f32 %v9275_v61, %v18154_v32 }
 0xd0f   :  { %13987 = vpow2.f32 %v9599_v29 }
 0xd11   :  { %v13980_v34 = vpop.eup %13979 }
 0xd12   :  { %v9732_v20 = vmul.f32 %v13980_v34, %v18419_v42  ;;  %v18586_v42 = vadd.f32 %v9041_v38, %v18154_v32  ;;  %v9483_v32 = vsel %vm117_vm0, %v18609_v3, -inf }
 0xd13   :  { %v13982_v12 = vpop.eup %13981  ;;  %v9620_v15 = vpop.xlane.xlu1 %9619 }
 0xd14   :  { %v9731_v56 = vmul.f32 %v13982_v12, %v18424_v18  ;;  %13989 = vrcp.f32 %v9620_v15 }
 0xd15   :  { %v9617_v22 = vpop.xlane.xlu0 %9616 }
 0xd16   :  { %13991 = vrcp.f32 %v9617_v22  ;;  %13305 = vmatprep.mubr.msk.f32.mxu1 %vm117_vm0, %v9731_v56 }
 0xd17   :  { %13306 = vmatmul.mubr.msk.f32.vlgmr.msra.gmra.mxu1 %vm117_vm0, %v9732_v20  ;;  %v13984_v37 = vpop.eup %13983 }
 0xd18   :  { %13312 = vmatpush3.msra.mxu1 %v18118_v16  ;;  %v9734_v16 = vmul.f32 %v13984_v37, %v18429_v30 }
 0xd19   :  { %13313 = vmatprep.subr.mxu1 %v18121_v60  ;;  %v9626_v27 = vpop.xlane.xlu1 %9625 }
 0xd1a   :  { %13314 = vmatpush3.msra.mxu1 %v18121_v60  ;;  %13993 = vrcp.f32 %v9626_v27  ;;  %v18598_v60 = vadd.f32 %v9051_v41, %v18170_v26 }
 0xd1b   :  { %v13986_v18 = vpop.eup %13985  ;;  %13315 = vmatprep.subr.mxu1 %v18124_v5 }
 0xd1c   :  { %13316 = vmatpush3.msra.mxu1 %v18124_v5  ;;  %v9623_v35 = vpop.xlane.xlu0 %9622  ;;  %v9733_v48 = vmul.f32 %v13986_v18, %v18434_v14  ;;  %v18593_v58 = vpop.eup %13987  ;;  %v9459_v5 = vsel %vm117_vm0, %v18586_v42, -inf  ;;  %v9465_v34 = vsel %vm117_vm0, %v18598_v60, -inf }
 0xd1d   :  { %13995 = vrcp.f32 %v9623_v35  ;;  %13317 = vmatprep.subr.mxu1 %v18127_v51  ;;  %v18604_v14 = vpop.f32.mrf.mxu1  ;;  %v9693_v30 = vsel %vm117_vm0, %v18593_v58, 0.0 }
 0xd1e   :  { %13318 = vmatpush3.msra.mxu1 %v18127_v51  ;;  %13308 = vmatprep.mubr.msk.f32.mxu1 %vm117_vm0, %v9733_v48 }
 0xd1f   :  { %13339 = vmatprep.subr.mxu1 %v18134_v39  ;;  %13309 = vmatmul.mubr.msk.f32.gmra.mxu1 %vm117_vm0, %v9734_v16  ;;  %v9285_v12 = vpop.f32.mrf.mxu1 }
 0xd20   :  { %9460 = vmax.xlane.f32.xlu0 %v9459_v5  ;;  %v18617_v22 = vadd.f32 %v9285_v12, %v18170_v26 }
 0xd21   :  { %v13990_v29 = vpop.eup %13989 }
 0xd22   :  { %9694 = vadd.xlane.f32.xlu1 %v9693_v30  ;;  %v9736_v56 = vmul.f32 %v13990_v29, %v18439_v52  ;;  %v9489_v37 = vsel %vm117_vm0, %v18617_v22, -inf }
 0xd23   :  { %v13992_v51 = vpop.eup %13991  ;;  %v9632_v38 = vpop.xlane.xlu1 %9631 }
 0xd24   :  { %9466 = vmax.xlane.f32.xlu0 %v9465_v34  ;;  %v9735_v15 = vmul.f32 %v13992_v51, %v18444_v53  ;;  %13997 = vrcp.f32 %v9632_v38 }
 0xd25   :  { %v9629_v20 = vpop.xlane.xlu0 %9628 }
 0xd26   :  { %13999 = vrcp.f32 %v9629_v20  ;;  %13319 = vmatprep.mubr.msk.f32.mxu1 %vm117_vm0, %v9735_v15 }
 0xd27   :  { %13320 = vmatmul.mubr.msk.f32.vlgmr.msra.gmra.mxu1 %vm117_vm0, %v9736_v56  ;;  %v13994_v41 = vpop.eup %13993 }
 0xd28   :  { %13340 = vmatpush3.msra.mxu1 %v18134_v39  ;;  %9484 = vmax.xlane.f32.xlu0 %v9483_v32  ;;  %v9738_v39 = vmul.f32 %v13994_v41, %v18449_v24 }
 0xd29   :  { %13341 = vmatprep.subr.mxu1 %v18346_v31  ;;  %v9638_v52 = vpop.xlane.xlu1 %9637 }
 0xd2a   :  { %v13996_v53 = vpop.eup %13995  ;;  %13342 = vmatpush3.msra.mxu1 %v18346_v31  ;;  %14001 = vrcp.f32 %v9638_v52 }
 0xd2b   :  { %13343 = vmatprep.subr.mxu1 %v18138_v11  ;;  %v9635_v26 = vpop.xlane.xlu0 %9634  ;;  %v9737_v27 = vmul.f32 %v13996_v53, %v18454_v49 }
 0xd2c   :  { %13344 = vmatpush3.msra.mxu1 %v18138_v11  ;;  %14003 = vrcp.f32 %v9635_v26  ;;  %9490 = vmax.xlane.f32.xlu0 %v9489_v37 }
 0xd2d   :  { %13322 = vmatprep.mubr.msk.f32.mxu1 %vm117_vm0, %v9737_v27  ;;  %13345 = vmatprep.subr.mxu1 %v18360_v43 }
 0xd2e   :  { %13323 = vmatmul.mubr.msk.f32.gmra.mxu1 %vm117_vm0, %v9738_v39 }
 0xd2f   :  { %13346 = vmatpush3.msra.mxu1 %v18360_v43 }
 0xd31   :  { %v13998_v31 = vpop.eup %13997 }
 0xd32   :  { %v9740_v61 = vmul.f32 %v13998_v31, %v18469_v8 }
 0xd33   :  { %v14000_v18 = vpop.eup %13999  ;;  %v9644_v49 = vpop.xlane.xlu0 %9643  ;;  %10421 = vrot.lane.b32.xlu1 %v19629_v9, %s14186_s16 }
 0xd34   :  { %v9739_v11 = vmul.f32 %v14000_v18, %v18478_v10  ;;  %14005 = vrcp.f32 %v9644_v49 }
 0xd36   :  { %v9641_v24 = vpop.xlane.xlu1 %9640  ;;  %13333 = vmatprep.mubr.msk.f32.mxu0 %vm117_vm0, %v9739_v11 }
 0xd37   :  { %14007 = vrcp.f32 %v9641_v24  ;;  %13334 = vmatmul.mubr.msk.f32.vlgmr.msra.gmra.mxu0 %vm117_vm0, %v9740_v61  ;;  %v14002_v35 = vpop.eup %14001 }
 0xd38   :  { %13354 = vmatpush3.msra.mxu0 %v18142_v0  ;;  %v9650_v43 = vpop.xlane.xlu0 %9649  ;;  %v9742_v10 = vmul.f32 %v14002_v35, %v18491_v4  ;;  %v19724_v0 = vld [vmem:[#allocation43_spill] sm:$0xff] }
 0xd39   :  { %v14004_v48 = vpop.eup %14003  ;;  %13355 = vmatprep.subr.mxu0 %v18372_v36  ;;  %14009 = vrcp.f32 %v9650_v43 }
 0xd3a   :  { %13356 = vmatpush3.msra.mxu0 %v18372_v36  ;;  %v9647_v9 = vpop.xlane.xlu1 %9646  ;;  %v9741_v8 = vmul.f32 %v14004_v48, %v18500_v45 }
 0xd3b   :  { %13357 = vmatprep.subr.mxu0 %v18392_v50  ;;  %14011 = vrcp.f32 %v9647_v9 }
 0xd3c   :  { %13358 = vmatpush3.msra.mxu0 %v18392_v50  ;;  %13336 = vmatprep.mubr.msk.f32.mxu0 %vm117_vm0, %v9741_v8 }
 0xd3d   :  { %13359 = vmatprep.subr.mxu0 %v18386_v7  ;;  %13337 = vmatmul.mubr.msk.f32.gmra.mxu0 %vm117_vm0, %v9742_v10 }
 0xd3e   :  { %13360 = vmatpush3.msra.mxu0 %v18386_v7  ;;  %v14061_v7 = vld [vmem:[#allocation8 + $0x68] sm:$0xff] }
 0xd3f   :  { %v18663_v51 = vadd.f32 %v14061_v7, %v18572_v28 }
 0xd41   :  { %v14006_v36 = vpop.eup %14005  ;;  %v9462_v34 = vsel %vm117_vm0, %v18663_v51, -inf }
 0xd42   :  { %10419 = vrot.lane.b32.xlu0 %v19724_v0, %s14186_s16  ;;  %v9744_v5 = vmul.f32 %v14006_v36, %v18510_v40  ;;  %v19725_v40 = vld [vmem:[#allocation48_spill] sm:$0xff] }
 0xd43   :  { %v18667_v38 = vadd.f32 %v18574_v63, %v19725_v40  ;;  %v18678_v28 = vadd.f32 %v18604_v14, %v19725_v40 }
 0xd44   :  { %v14008_v45 = vpop.eup %14007 }
 0xd45   :  { %v9743_v16 = vmul.f32 %v14008_v45, %v18514_v44  ;;  %v9492_v56 = vsel %vm117_vm0, %v18678_v28, -inf  ;;  %v19727_v45 = vld [vmem:[#allocation55_spill] sm:$0xff] }
 0xd46   :  { %v14010_v50 = vpop.eup %14009 }
 0xd47   :  { %13347 = vmatprep.mubr.msk.f32.mxu1 %vm117_vm0, %v9743_v16  ;;  %v9746_v29 = vmul.f32 %v14010_v50, %v18518_v54  ;;  %v18672_v54 = vadd.f32 %v14061_v7, %v18580_v25 }
 0xd48   :  { %13348 = vmatmul.mubr.msk.f32.vlgmr.msra.gmra.mxu1 %vm117_vm0, %v9744_v5  ;;  %v14012_v4 = vpop.eup %14011 }
 0xd49   :  { %v9745_v30 = vmul.f32 %v14012_v4, %v18522_v21  ;;  %v9468_v21 = vsel %vm117_vm0, %v18667_v38, -inf  ;;  %v9486_v12 = vsel %vm117_vm0, %v18672_v54, -inf }
 0xd4b   :  { %13350 = vmatprep.mubr.msk.f32.mxu1 %vm117_vm0, %v9745_v30 }
 0xd4c   :  { %13351 = vmatmul.mubr.msk.f32.gmra.mxu1 %vm117_vm0, %v9746_v29 }
 0xd50   :  { %v9668_v25 = vpop.xlane.xlu0 %9667 }
 0xd52   :  { %v9665_v44 = vpop.xlane.xlu1 %9664 }
 0xd53   :  { %14013 = vrcp.f32 %v9665_v44 }
 0xd54   :  { %14015 = vrcp.f32 %v9668_v25 }
 0xd57   :  { %9463 = vmax.xlane.f32.xlu1 %v9462_v34 }
 0xd58   :  { %v9674_v20 = vpop.xlane.xlu0 %9673 }
 0xd5a   :  { %v9671_v32 = vpop.xlane.xlu1 %9670 }
 0xd5b   :  { %9469 = vmax.xlane.f32.xlu1 %v9468_v21  ;;  %14017 = vrcp.f32 %v9671_v32  ;;  %v19729_v32 = vld [vmem:[#allocation52_spill] sm:$0xff] }
 0xd5c   :  { %14019 = vrcp.f32 %v9674_v20  ;;  %v19728_v20 = vld [vmem:[#allocation56_spill] sm:$0xff] }
 0xd5f   :  { %9487 = vmax.xlane.f32.xlu1 %v9486_v12 }
 0xd60   :  { %v14014_v63 = vpop.eup %14013 }
 0xd61   :  { %v9751_v15 = vmul.f32 %v14014_v63, %v18534_v33  ;;  %v19726_v33 = vld [vmem:[#allocation44_spill] sm:$0xff]  ;;  %v14016_v37 = vpop.eup %14015 }
 0xd62   :  { %v9752_v49 = vmul.f32 %v14016_v37, %v18530_v13 }
 0xd63   :  { %9493 = vmax.xlane.f32.xlu1 %v9492_v56  ;;  %13375 = vmatprep.mubr.msk.f32.mxu1 %vm117_vm0, %v9751_v15 }
 0xd68   :  { %v14018_v31 = vpop.eup %14017 }
 0xd69   :  { %v14020_v11 = vpop.eup %14019  ;;  %v9753_v61 = vmul.f32 %v14018_v31, %v18542_v2 }
 0xd6a   :  { %v9754_v35 = vmul.f32 %v14020_v11, %v18538_v55 }
 0xd6c   :  { %v18686_v14 = vpop.xlane.xlu0 %9691 }
 0xd6e   :  { %v9689_v41 = vpop.xlane.xlu1 %9688 }
 0xd6f   :  { %14021 = vrcp.f32 %v9689_v41 }
 0xd70   :  { %v18688_v52 = vpop.xlane.xlu0 %9697 }
 0xd72   :  { %v10313_v53 = vpop.permute.xlu1 %10312 }
 0xd74   :  { %10417 = vrot.lane.b32.xlu1 %v19726_v33, %s14186_s16  ;;  %v10315_v26 = vpop.permute.xlu0 %10314 }
 0xd75   :  { %13367 = vmatprep.subr.mxu1 %v10315_v26 }
 0xd76   :  { %v10311_v27 = vpop.permute.xlu1 %10310  ;;  %13368 = vmatpush3.msra.mxu1 %v10315_v26 }
 0xd77   :  { %13369 = vmatprep.subr.mxu1 %v10313_v53 }
 0xd78   :  { %13370 = vmatpush3.msra.mxu1 %v10313_v53  ;;  %v18692_v39 = vpop.permute.xlu0 %10423 }
 0xd79   :  { %13371 = vmatprep.subr.mxu1 %v10311_v27  ;;  %13381 = vmatprep.subr.mxu0 %v18692_v39 }
 0xd7a   :  { %v10309_v18 = vpop.permute.xlu1 %10308  ;;  %13372 = vmatpush3.msra.mxu1 %v10311_v27 }
 0xd7b   :  { %13373 = vmatprep.subr.mxu1 %v10309_v18 }
 0xd7c   :  { %13374 = vmatpush3.msra.mxu1 %v10309_v18  ;;  %v14022_v24 = vpop.eup %14021 }
 0xd7d   :  { %13376 = vmatmul.mubr.msk.f32.vlgmr.msra.gmra.mxu1 %vm117_vm0, %v9752_v49  ;;  %v9759_v43 = vmul.f32 %v14022_v24, %v18553_v23 }
 0xd7e   :  { %13378 = vmatprep.mubr.msk.f32.mxu1 %vm117_vm0, %v9753_v61 }
 0xd81   :  { %13379 = vmatmul.mubr.msk.f32.gmra.mxu1 %vm117_vm0, %v9754_v35 }
 0xd82   :  { %13403 = vmatprep.mubr.msk.f32.mxu1 %vm117_vm0, %v9759_v43 }
 0xda9   :  { %v9461_v48 = vpop.xlane.xlu0 %9460 }
 0xdaa   :  { %v9523_v13 = vsub.f32 %v18586_v42, %v9461_v48 }
 0xdab   :  { %v18712_v42 = vpop.xlane.xlu1 %9694 }
 0xdac   :  { %v9571_v9 = vmul.f32 1.442695, %v9523_v13 }
 0xdad   :  { %v9467_v8 = vpop.xlane.xlu0 %9466 }
 0xdae   :  { %14023 = vpow2.f32 %v9571_v9  ;;  %v9525_v2 = vsub.f32 %v18598_v60, %v9467_v8 }
 0xdaf   :  { %v18714_v5 = vpop.permute.xlu1 %10421 }
 0xdb0   :  { %v9575_v10 = vmul.f32 1.442695, %v9525_v2 }
 0xdb1   :  { %v9485_v16 = vpop.xlane.xlu0 %9484 }
 0xdb2   :  { %14025 = vpow2.f32 %v9575_v10  ;;  %v9531_v60 = vsub.f32 %v18609_v3, %v9485_v16 }
 0xdb4   :  { %v9587_v4 = vmul.f32 1.442695, %v9531_v60 }
 0xdb5   :  { %v9491_v50 = vpop.xlane.xlu0 %9490 }
 0xdb6   :  { %v9533_v30 = vsub.f32 %v18617_v22, %v9491_v50  ;;  %14027 = vpow2.f32 %v9587_v4 }
 0xdb8   :  { %v9591_v40 = vmul.f32 1.442695, %v9533_v30 }
 0xdb9   :  { %v10420_v48 = vpop.permute.xlu0 %10419 }
 0xdbb   :  { %v14024_v36 = vpop.eup %14023 }
 0xdbc   :  { %v9651_v0 = vsel %vm117_vm0, %v14024_v36, 0.0 }
 0xdbd   :  { %9652 = vadd.xlane.f32.xlu1 %v9651_v0 }
 0xdbf   :  { %v18706_v55 = vpop.eup %14025 }
 0xdc0   :  { %v9657_v23 = vsel %vm117_vm0, %v18706_v55, 0.0 }
 0xdc1   :  { %9658 = vadd.xlane.f32.xlu1 %v9657_v23 }
 0xdc3   :  { %v14028_v63 = vpop.eup %14027 }
 0xdc4   :  { %v9675_v22 = vsel %vm117_vm0, %v14028_v63, 0.0 }
 0xdd2   :  { %10530 = vrot.lane.b32.xlu1 %v19727_v45, %s14186_s16 }
 0xde0   :  { %v9464_v29 = vpop.xlane.xlu1 %9463 }
 0xde1   :  { %v9524_v7 = vsub.f32 %v18663_v51, %v9464_v29 }
 0xde3   :  { %v9573_v44 = vmul.f32 1.442695, %v9524_v7 }
 0xde4   :  { %v9470_v34 = vpop.xlane.xlu1 %9469 }
 0xde5   :  { %14029 = vpow2.f32 %v9573_v44  ;;  %v9526_v21 = vsub.f32 %v18667_v38, %v9470_v34 }
 0xde6   :  { %14031 = vpow2.f32 %v9591_v40 }
 0xde7   :  { %v9577_v12 = vmul.f32 1.442695, %v9526_v21  ;;  %v13307_v21 = vpop.f32.mrf.mxu1 }
 0xde8   :  { %v9488_v41 = vpop.xlane.xlu1 %9487 }
 0xde9   :  { %14033 = vpow2.f32 %v9577_v12  ;;  %v9532_v53 = vsub.f32 %v18672_v54, %v9488_v41 }
 0xdeb   :  { %v9589_v26 = vmul.f32 1.442695, %v9532_v53 }
 0xdec   :  { %v9494_v33 = vpop.xlane.xlu1 %9493 }
 0xded   :  { %v9534_v27 = vsub.f32 %v18678_v28, %v9494_v33  ;;  %14035 = vpow2.f32 %v9589_v26  ;;  %v19730_v28 = vld [vmem:[#allocation45_spill] sm:$0xff] }
 0xdef   :  { %v9593_v37 = vmul.f32 1.442695, %v9534_v27 }
 0xdf0   :  { %v10418_v54 = vpop.permute.xlu1 %10417 }
 0xdf1   :  { %14037 = vpow2.f32 %v9593_v37 }
 0xdf2   :  { %v14030_v15 = vpop.eup %14029 }
 0xdf3   :  { %v9654_v3 = vsel %vm117_vm0, %v14030_v15, 0.0  ;;  %v18721_v56 = vpop.eup %14031 }
 0xdf4   :  { %9655 = vadd.xlane.f32.xlu0 %v9654_v3  ;;  %v9681_v38 = vsel %vm117_vm0, %v18721_v56, 0.0 }
 0xdf6   :  { %v14034_v51 = vpop.eup %14033  ;;  %9676 = vadd.xlane.f32.xlu1 %v9675_v22 }
 0xdf7   :  { %v9660_v25 = vsel %vm117_vm0, %v14034_v51, 0.0 }
 0xdf8   :  { %9661 = vadd.xlane.f32.xlu0 %v9660_v25 }
 0xdfa   :  { %9682 = vadd.xlane.f32.xlu1 %v9681_v38  ;;  %v18733_v31 = vpop.eup %14035 }
 0xdfb   :  { %v9678_v18 = vsel %vm117_vm0, %v18733_v31, 0.0 }
 0xdfe   :  { %v18737_v49 = vpop.eup %14037 }
 0xdff   :  { %v9684_v11 = vsel %vm117_vm0, %v18737_v49, 0.0 }
 0xe0b   :  { %10526 = vrot.lane.b32.xlu1 %v19728_v20, %s14186_s16  ;;  %v13335_v20 = vpop.f32.mrf.mxu0 }
 0xe0d   :  { %v10071_v41 = vpop.f32.mrf.mxu0 }
 0xe0e   :  { %10532 = vrot.lane.b32.xlu0 %v19729_v32, %s14186_s16 }
 0xe0f   :  { %v13338_v53 = vpop.f32.mrf.mxu0 }
 0xe11   :  { %v10081_v26 = vpop.f32.mrf.mxu0 }
 0xe2d   :  { %9679 = vadd.xlane.f32.xlu0 %v9678_v18 }
 0xe31   :  { %9685 = vadd.xlane.f32.xlu0 %v9684_v11 }
 0xe46   :  { %v9653_v61 = vpop.xlane.xlu1 %9652 }
 0xe47   :  { %14039 = vrcp.f32 %v9653_v61  ;;  %10528 = vrot.lane.b32.xlu0 %v19730_v28, %s14186_s16 }
 0xe4a   :  { %v9659_v43 = vpop.xlane.xlu1 %9658 }
 0xe4b   :  { %14041 = vrcp.f32 %v9659_v43 }
 0xe4e   :  { %v10531_v13 = vpop.permute.xlu1 %10530 }
 0xe54   :  { %v14040_v24 = vpop.eup %14039 }
 0xe55   :  { %v9747_v35 = vmul.f32 %v14040_v24, %v14024_v36 }
 0xe57   :  { %13361 = vmatprep.mubr.msk.f32.mxu0 %vm117_vm0, %v9747_v35 }
 0xe58   :  { %v14042_v0 = vpop.eup %14041 }
 0xe59   :  { %v9749_v45 = vmul.f32 %v14042_v0, %v18706_v55  ;;  %v10635_v55 = vld [vmem:[#allocation7 + $0x18] sm:$0xff]  ;;  %v19732_v0 = vld [vmem:[#allocation15_spill] sm:$0xff] }
 0xe7d   :  { %v9656_v9 = vpop.xlane.xlu0 %9655 }
 0xe7e   :  { %14043 = vrcp.f32 %v9656_v9 }
 0xe7f   :  { %v9677_v8 = vpop.xlane.xlu1 %9676 }
 0xe80   :  { %14045 = vrcp.f32 %v9677_v8 }
 0xe81   :  { %v9662_v2 = vpop.xlane.xlu0 %9661 }
 0xe82   :  { %14047 = vrcp.f32 %v9662_v2 }
 0xe83   :  { %14049 = vrcp.f32 %v18686_v14 }
 0xe84   :  { %14051 = vrcp.f32 %v18712_v42 }
 0xe85   :  { %v10533_v10 = vpop.permute.xlu0 %10532  ;;  %14053 = vrcp.f32 %v18688_v52 }
 0xe86   :  { %13395 = vmatprep.subr.mxu1 %v10533_v10 }
 0xe87   :  { %13396 = vmatpush3.msra.mxu1 %v10533_v10  ;;  %v19731_v10 = vld [vmem:[#allocation46_spill] sm:$0xff] }
 0xe88   :  { %13397 = vmatprep.subr.mxu1 %v10531_v13 }
 0xe89   :  { %13398 = vmatpush3.msra.mxu1 %v10531_v13 }
 0xe8b   :  { %v14044_v23 = vpop.eup %14043 }
 0xe8c   :  { %v9748_v36 = vmul.f32 %v14044_v23, %v14030_v15  ;;  %v5793_v23 = vadd.f32 %v19732_v0, %v19731_v10  ;;  %v19750_v10 = vld [vmem:[#allocation27_spill] sm:$0xff] }
 0xe8d   :  { %v14046_v16 = vpop.eup %14045 }
 0xe8e   :  { %13362 = vmatmul.mubr.msk.f32.vlgmr.msra.gmra.mxu0 %vm117_vm0, %v9748_v36  ;;  %v9755_v4 = vmul.f32 %v14046_v16, %v14028_v63  ;;  %v9853_v63 = vpop.f32.mrf.mxu1  ;;  %v18799_v16 = vld [vmem:[%s18922_s4] ss:$0 sm:$0xff]  ;;  %s14187_s4 = smov [#allocation10]  }
 0xe8f   :  { %v14048_v60 = vpop.eup %14047  ;;  %13382 = vmatpush3.msra.mxu0 %v18692_v39  ;;  %13364 = vmatprep.mubr.msk.f32.mxu0 %vm117_vm0, %v9749_v45  ;;  %v9683_v39 = vpop.xlane.xlu1 %9682  ;;  %s11065_s19 = sshll.u32 %s14187_s4, 4  ;;  %s11066_s19 = int_to_ptr.vmem [resolvable:$true] %s11065_s19 }
 0xe90   :  { %13383 = vmatprep.subr.mxu0 %v18714_v5  ;;  %v9750_v50 = vmul.f32 %v14048_v60, %v14034_v51  ;;  %14055 = vrcp.f32 %v9683_v39  ;;  %v14050_v29 = vpop.eup %14049  ;;  %v19733_v60 = vld [vmem:[#allocation24_spill] sm:$0xff]  ;;  %s14142_s20 = scalar_lea.vmem %s11066_s19, 4096  ;;  %p14147_p7 = scmp.lt.s32.totalorder %s11066_s19, %s11066_s19 }
 0xe91   :  { %13384 = vmatpush3.msra.mxu0 %v18714_v5  ;;  %v14052_v44 = vpop.eup %14051  ;;  %v9760_v34 = vmul.f32 %v14050_v29, %v18549_v1  ;;  %v13310_v1 = vpop.f32.mrf.mxu1  ;;  %p14143_p6 = scmp.ne.s32.totalorder %s11066_s19, %s14142_s20  ;;  %p14148_p8 = scmp.lt.s32.totalorder %s14142_s20, %s14142_s20 }
 0xe92   :  { %13385 = vmatprep.subr.mxu0 %v10420_v48  ;;  %13365 = vmatmul.mubr.msk.f32.gmra.mxu0 %vm117_vm0, %v9750_v50  ;;  %v14054_v14 = vpop.eup %14053  ;;  %v9761_v42 = vmul.f32 %v14052_v44, %v18593_v58  ;;  %v8438_v50 = vadd.f32 %v19733_v60, %v5793_v23 }
 0xe93   :  { %13386 = vmatpush3.msra.mxu0 %v10420_v48  ;;  %13389 = vmatprep.mubr.msk.f32.mxu0 %vm117_vm0, %v9755_v4  ;;  %v10527_v40 = vpop.permute.xlu1 %10526  ;;  %v9762_v3 = vmul.f32 %v14054_v14, %v18557_v59  ;;  %v9863_v25 = vpop.f32.mrf.mxu1  ;;  %v19734_v4 = vld [vmem:[#allocation23_spill] sm:$0xff]  ;;  %p14149_p9 = por %p14148_p8, %p14147_p7 }
 0xe94   :  { %13387 = vmatprep.subr.mxu0 %v10418_v54 }
 0xe95   :  { %13388 = vmatpush3.msra.mxu0 %v10418_v54  ;;  %v13321_v38 = vpop.f32.mrf.mxu1  ;;  %p14150_p10 = pnand %p14149_p9, %p14143_p6 }
 0xe96   :  { %13409 = vmatprep.subr.mxu0 %v10635_v55 }
 0xe97   :  { %v9962_v59 = vpop.f32.mrf.mxu1 }
 0xe9d   :  { %v14056_v52 = vpop.eup %14055 }
 0xe9e   :  { %v9757_v22 = vmul.f32 %v14056_v52, %v18721_v56  ;;  %v13324_v56 = vpop.f32.mrf.mxu1  ;;  %v19738_v52 = vld [vmem:[#allocation49_spill] sm:$0xff] }
 0xea0   :  { %v9972_v32 = vpop.f32.mrf.mxu1 }
 0xea2   :  { %v13349_v33 = vpop.f32.mrf.mxu1 }
 0xea4   :  { %v10180_v27 = vpop.f32.mrf.mxu1 }
 0xea6   :  { %v13352_v37 = vpop.f32.mrf.mxu1 }
 0xeb6   :  { %v9680_v5 = vpop.xlane.xlu0 %9679 }
 0xeb7   :  { %14057 = vrcp.f32 %v9680_v5  ;;  %v19735_v5 = vld [vmem:[#allocation81_spill] sm:$0xff] }
 0xeba   :  { %v9686_v30 = vpop.xlane.xlu0 %9685 }
 0xebb   :  { %14059 = vrcp.f32 %v9686_v30  ;;  %v19736_v30 = vld [vmem:[#allocation22_spill] sm:$0xff] }
 0xebc   :  { %v5803_v29 = vadd.f32 %v19736_v30, %v19735_v5 }
 0xebe   :  { %v10529_v7 = vpop.permute.xlu0 %10528 }
 0xebf   :  { %13399 = vmatprep.subr.mxu1 %v10529_v7 }
 0xec0   :  { %13400 = vmatpush3.msra.mxu1 %v10529_v7 }
 0xec1   :  { %13401 = vmatprep.subr.mxu1 %v10527_v40 }
 0xec2   :  { %13402 = vmatpush3.msra.mxu1 %v10527_v40 }
 0xec3   :  { %13404 = vmatmul.mubr.msk.f32.vlgmr.msra.gmra.mxu1 %vm117_vm0, %v9760_v34 }
 0xec4   :  { %v14058_v12 = vpop.eup %14057  ;;  %13406 = vmatprep.mubr.msk.f32.mxu1 %vm117_vm0, %v9761_v42 }
 0xec5   :  { %v9756_v15 = vmul.f32 %v14058_v12, %v18733_v31  ;;  %v10190_v31 = vpop.f32.mrf.mxu1 }
 0xec7   :  { %13390 = vmatmul.mubr.msk.f32.vlgmr.msra.gmra.mxu0 %vm117_vm0, %v9756_v15  ;;  %13407 = vmatmul.mubr.msk.f32.gmra.mxu1 %vm117_vm0, %v9762_v3  ;;  %v13377_v18 = vpop.f32.mrf.mxu1  ;;  %v19739_v15 = vld [vmem:[#allocation97_spill] sm:$0xff] }
 0xec8   :  { %v14060_v51 = vpop.eup %14059  ;;  %13392 = vmatprep.mubr.msk.f32.mxu0 %vm117_vm0, %v9757_v22  ;;  %13410 = vmatpush3.msra.mxu0 %v10635_v55  ;;  %v19740_v3 = vld [vmem:[#allocation101_spill] sm:$0xff] }
 0xec9   :  { %v9758_v58 = vmul.f32 %v14060_v51, %v18737_v49  ;;  %v10398_v54 = vpop.f32.mrf.mxu1  ;;  %v5813_v22 = vadd.f32 %v19740_v3, %v19739_v15  ;;  %v19756_v15 = vld [vmem:[#allocation29_spill] sm:$0xff] }
 0xecb   :  { %13393 = vmatmul.mubr.msk.f32.gmra.mxu0 %vm117_vm0, %v9758_v58  ;;  %v13380_v24 = vpop.f32.mrf.mxu1 }
 0xecc   :  { %13411 = vmatprep.mubr.msk.f32.mxu0 %vm993_vm1, %v9853_v63 }
 0xecd   :  { %v10408_v35 = vpop.f32.mrf.mxu1 }
 0xecf   :  { %13412 = vmatmul.mubr.msk.f32.vlgmr.msra.gmra.mxu0 %vm993_vm1, %v13307_v21  ;;  %v19737_v21 = vld [vmem:[#allocation25_spill] sm:$0xff] }
 0xed0   :  { %13414 = vmatprep.mubr.msk.f32.mxu0 %vm993_vm1, %v9863_v25  ;;  %v8440_v14 = vadd.f32 %v19737_v21, %v5803_v29  ;;  %v19741_v25 = vld [vmem:[#allocation51_spill] sm:$0xff]  ;;  %v19754_v29 = vld [vmem:[#allocation117_spill] sm:$0xff] }
 0xed3   :  { %13415 = vmatmul.mubr.msk.f32.gmra.mxu0 %vm993_vm1, %v13310_v1 }
 0xed4   :  { %13417 = vmatprep.mubr.msk.f32.mxu0 %vm993_vm1, %v9962_v59 }
 0xed7   :  { %13418 = vmatmul.mubr.msk.f32.gmra.mxu0 %vm993_vm1, %v13321_v38  ;;  %v8442_v38 = vadd.f32 %v19741_v25, %v5813_v22 }
 0xed8   :  { %13420 = vmatprep.mubr.msk.f32.mxu0 %vm993_vm1, %v9972_v32 }
 0xedb   :  { %13421 = vmatmul.mubr.msk.f32.gmra.mxu0 %vm993_vm1, %v13324_v56  ;;  %v19742_v56 = vld [vmem:[#allocation50_spill] sm:$0xff] }
 0xedc   :  { %13423 = vmatprep.mubr.msk.f32.mxu0 %vm993_vm1, %v10071_v41  ;;  %v19743_v41 = vld [vmem:[#allocation102_spill] sm:$0xff] }
 0xedf   :  { %13424 = vmatmul.mubr.msk.f32.gmra.mxu0 %vm993_vm1, %v13335_v20 }
 0xee0   :  { %13426 = vmatprep.mubr.msk.f32.mxu0 %vm993_vm1, %v10081_v26 }
 0xee3   :  { %13427 = vmatmul.mubr.msk.f32.gmra.mxu0 %vm993_vm1, %v13338_v53  ;;  %v19744_v53 = vld [vmem:[#allocation118_spill] sm:$0xff] }
 0xee4   :  { %13429 = vmatprep.mubr.msk.f32.mxu0 %vm993_vm1, %v10180_v27 }
 0xee7   :  { %13430 = vmatmul.mubr.msk.f32.gmra.mxu0 %vm993_vm1, %v13349_v33  ;;  %v5823_v33 = vadd.f32 %v19744_v53, %v19743_v41  ;;  %v19759_v41 = vld [vmem:[#allocation89_spill] sm:$0xff] }
 0xee8   :  { %13432 = vmatprep.mubr.msk.f32.mxu0 %vm993_vm1, %v10190_v31  ;;  %v19745_v31 = vld [vmem:[#allocation53_spill] sm:$0xff] }
 0xeeb   :  { %13433 = vmatmul.mubr.msk.f32.gmra.mxu0 %vm993_vm1, %v13352_v37 }
 0xf4e   :  { %v13363_v49 = vpop.f32.mrf.mxu0 }
 0xf50   :  { %v10289_v11 = vpop.f32.mrf.mxu0 }
 0xf51   :  { %13435 = vmatprep.mubr.msk.f32.mxu0 %vm993_vm1, %v10289_v11  ;;  %v19746_v11 = vld [vmem:[#allocation26_spill] sm:$0xff] }
 0xf52   :  { %v13366_v61 = vpop.f32.mrf.mxu0  ;;  %13436 = vmatmul.mubr.msk.f32.gmra.mxu0 %vm993_vm1, %v13363_v49 }
 0xf54   :  { %v10299_v28 = vpop.f32.mrf.mxu0 }
 0xf55   :  { %13438 = vmatprep.mubr.msk.f32.mxu0 %vm993_vm1, %v10299_v28  ;;  %v19747_v28 = vld [vmem:[#allocation91_spill] sm:$0xff] }
 0xf56   :  { %13439 = vmatmul.mubr.msk.f32.gmra.mxu0 %vm993_vm1, %v13366_v61 }
 0xf57   :  { %13441 = vmatprep.mubr.msk.f32.mxu0 %vm993_vm1, %v10398_v54 }
 0xf5a   :  { %13442 = vmatmul.mubr.msk.f32.gmra.mxu0 %vm993_vm1, %v13377_v18  ;;  %v8444_v18 = vadd.f32 %v19745_v31, %v5823_v33 }
 0xf5b   :  { %13444 = vmatprep.mubr.msk.f32.mxu0 %vm993_vm1, %v10408_v35 }
 0xf5e   :  { %13445 = vmatmul.mubr.msk.f32.gmra.mxu0 %vm993_vm1, %v13380_v24  ;;  %v19748_v24 = vld [vmem:[#allocation120_spill] sm:$0xff] }
 0xf5f   :  { %v5833_v35 = vadd.f32 %v19748_v24, %v19747_v28  ;;  %v19762_v28 = vld [vmem:[#allocation32_spill] sm:$0xff] }
 0xf83   :  { %v13405_v43 = vpop.f32.mrf.mxu1 }
 0xf85   :  { %v10616_v9 = vpop.f32.mrf.mxu1 }
 0xf87   :  { %v13391_v48 = vpop.f32.mrf.mxu0  ;;  %v13408_v36 = vpop.f32.mrf.mxu1 }
 0xf89   :  { %v10507_v13 = vpop.f32.mrf.mxu0  ;;  %v10626_v40 = vpop.f32.mrf.mxu1 }
 0xf8a   :  { %13447 = vmatprep.mubr.msk.f32.mxu0 %vm993_vm1, %v10507_v13 }
 0xf8b   :  { %v13394_v8 = vpop.f32.mrf.mxu0  ;;  %13448 = vmatmul.mubr.msk.f32.gmra.mxu0 %vm993_vm1, %v13391_v48 }
 0xf8d   :  { %v10517_v2 = vpop.f32.mrf.mxu0 }
 0xf8e   :  { %13450 = vmatprep.mubr.msk.f32.mxu0 %vm993_vm1, %v10517_v2 }
 0xf8f   :  { %v13413_v45 = vpop.f32.mrf.mxu0  ;;  %13451 = vmatmul.mubr.msk.f32.gmra.mxu0 %vm993_vm1, %v13394_v8 }
 0xf90   :  { %v10958_v55 = vadd.f32 %v13413_v45, %v19734_v4  ;;  %13453 = vmatprep.mubr.msk.f32.mxu0 %vm993_vm1, %v10616_v9  ;;  %v19749_v9 = vld [vmem:[#allocation28_spill] sm:$0xff]  ;;  %v19752_v45 = vld [vmem:[#allocation122_spill] sm:$0xff] }
 0xf91   :  { %v10798_v39 = vpop.f32.mrf.mxu0  ;;  %v8446_v8 = vadd.f32 %v19749_v9, %v5833_v35 }
 0xf92   :  { %v10997_v7 = vadd.f32 %v18799_v16, %v10958_v55  ;;  %v10957_v44 = vadd.f32 %v10798_v39, %v8438_v50  ;;  %v19753_v39 = vld [vmem:[#allocation54_spill] sm:$0xff] }
 0xf93   :  { %v13416_v34 = vpop.f32.mrf.mxu0  ;;  %13454 = vmatmul.mubr.msk.f32.gmra.mxu0 %vm993_vm1, %v13405_v43 }
 0xf94   :  { %11029 = vst.msk [vmem:[#allocation10 + $0x8] sm:$0xff] %vm117_vm0, %v10997_v7  ;;  %v10996_v42 = vadd.f32 %v18799_v16, %v10957_v44  ;;  %v10960_v12 = vadd.f32 %v13416_v34, %v19738_v52  ;;  %13456 = vmatprep.mubr.msk.f32.mxu0 %vm993_vm1, %v10626_v40 }
 0xf95   :  { %v10808_v63 = vpop.f32.mrf.mxu0 }
 0xf96   :  { %11028 = vst.msk [vmem:[#allocation10] sm:$0xff] %vm117_vm0, %v10996_v42  ;;  %v10999_v1 = vadd.f32 %v18799_v16, %v10960_v12  ;;  %v10959_v51 = vadd.f32 %v10808_v63, %v8440_v14  ;;  %v19755_v42 = vld [vmem:[#allocation100_spill] sm:$0xff] }
 0xf97   :  { %v13419_v58 = vpop.f32.mrf.mxu0  ;;  %13457 = vmatmul.mubr.msk.f32.gmra.mxu0 %vm993_vm1, %v13408_v36  ;;  %v19751_v36 = vld [vmem:[#allocation106_spill] sm:$0xff] }
 0xf98   :  { %11031 = vst.msk [vmem:[#allocation10 + $0x18] sm:$0xff] %vm117_vm0, %v10999_v1  ;;  %v10998_v59 = vadd.f32 %v18799_v16, %v10959_v51  ;;  %v10962_v20 = vadd.f32 %v13419_v58, %v19742_v56  ;;  %v5843_v60 = vadd.f32 %v19752_v45, %v19751_v36  ;;  %v19757_v51 = vld [vmem:[#allocation121_spill] sm:$0xff] }
 0xf99   :  { %v10818_v32 = vpop.f32.mrf.mxu0 }
 0xf9a   :  { %11030 = vst.msk [vmem:[#allocation10 + $0x10] sm:$0xff] %vm117_vm0, %v10998_v59  ;;  %v11001_v26 = vadd.f32 %v18799_v16, %v10962_v20  ;;  %v10961_v27 = vadd.f32 %v10818_v32, %v8442_v38  ;;  %v8448_v5 = vadd.f32 %v19753_v39, %v5843_v60  ;;  %v19758_v59 = vld [vmem:[#allocation57_spill] sm:$0xff] }
 0xf9b   :  { %v13422_v37 = vpop.f32.mrf.mxu0 }
 0xf9c   :  { %11033 = vst.msk [vmem:[#allocation10 + $0x28] sm:$0xff] %vm117_vm0, %v11001_v26  ;;  %v11000_v49 = vadd.f32 %v18799_v16, %v10961_v27  ;;  %v10964_v54 = vadd.f32 %v13422_v37, %v19746_v11  ;;  %v19760_v27 = vld [vmem:[#allocation33_spill] sm:$0xff] }
 0xf9d   :  { %v10828_v61 = vpop.f32.mrf.mxu0 }
 0xf9e   :  { %11032 = vst.msk [vmem:[#allocation10 + $0x20] sm:$0xff] %vm117_vm0, %v11000_v49  ;;  %v11003_v43 = vadd.f32 %v18799_v16, %v10964_v54  ;;  %v10963_v48 = vadd.f32 %v10828_v61, %v8444_v18  ;;  %v19761_v49 = vld [vmem:[#allocation119_spill] sm:$0xff] }
 0xf9f   :  { %v13425_v13 = vpop.f32.mrf.mxu0 }
 0xfa0   :  { %11035 = vst.msk [vmem:[#allocation10 + $0x38] sm:$0xff] %vm117_vm0, %v11003_v43  ;;  %v11002_v2 = vadd.f32 %v18799_v16, %v10963_v48  ;;  %v10966_v0 = vadd.f32 %v13425_v13, %v19750_v10 }
 0xfa1   :  { %v10838_v23 = vpop.f32.mrf.mxu0 }
 0xfa2   :  { %11034 = vst.msk [vmem:[#allocation10 + $0x30] sm:$0xff] %vm117_vm0, %v11002_v2  ;;  %v11005_v50 = vadd.f32 %v18799_v16, %v10966_v0  ;;  %v10965_v4 = vadd.f32 %v10838_v23, %v8446_v8 }
 0xfa3   :  { %v13428_v55 = vpop.f32.mrf.mxu0 }
 0xfa4   :  { %11037 = vst.msk [vmem:[#allocation10 + $0x48] sm:$0xff] %vm117_vm0, %v11005_v50  ;;  %v11004_v30 = vadd.f32 %v18799_v16, %v10965_v4  ;;  %v10968_v7 = vadd.f32 %v13428_v55, %v19754_v29 }
 0xfa5   :  { %v10848_v44 = vpop.f32.mrf.mxu0 }
 0xfa6   :  { %11036 = vst.msk [vmem:[#allocation10 + $0x40] sm:$0xff] %vm117_vm0, %v11004_v30  ;;  %v11007_v40 = vadd.f32 %v18799_v16, %v10968_v7  ;;  %v10967_v34 = vadd.f32 %v10848_v44, %v8448_v5  ;;  %v19765_v44 = vld [vmem:[#allocation35_spill] sm:$0xff] }
 0xfa7   :  { %v13431_v21 = vpop.f32.mrf.mxu0 }
 0xfa8   :  { %11039 = vst.msk [vmem:[#allocation10 + $0x58] sm:$0xff] %vm117_vm0, %v11007_v40  ;;  %v11006_v14 = vadd.f32 %v18799_v16, %v10967_v34  ;;  %v10970_v52 = vadd.f32 %v13431_v21, %v19755_v42 }
 0xfa9   :  { %v10858_v12 = vpop.f32.mrf.mxu0 }
 0xfaa   :  { %11038 = vst.msk [vmem:[#allocation10 + $0x50] sm:$0xff] %vm117_vm0, %v11006_v14  ;;  %v11009_v63 = vadd.f32 %v18799_v16, %v10970_v52  ;;  %v10969_v3 = vadd.f32 %v10858_v12, %v19756_v15  ;;  %v19766_v15 = vld [vmem:[#allocation115_spill] sm:$0xff] }
 0xfab   :  { %v13434_v22 = vpop.f32.mrf.mxu0 }
 0xfac   :  { %11041 = vst.msk [vmem:[#allocation10 + $0x68] sm:$0xff] %vm117_vm0, %v11009_v63  ;;  %v11008_v1 = vadd.f32 %v18799_v16, %v10969_v3  ;;  %v10972_v58 = vadd.f32 %v13434_v22, %v19757_v51 }
 0xfad   :  { %v10868_v25 = vpop.f32.mrf.mxu0 }
 0xfae   :  { %11040 = vst.msk [vmem:[#allocation10 + $0x60] sm:$0xff] %vm117_vm0, %v11008_v1  ;;  %v11011_v38 = vadd.f32 %v18799_v16, %v10972_v58  ;;  %v10971_v56 = vadd.f32 %v10868_v25, %v19758_v59  ;;  %v19767_v1 = vld [vmem:[#allocation34_spill] sm:$0xff] }
 0xfb0   :  { %11043 = vst.msk [vmem:[#allocation10 + $0x78] sm:$0xff] %vm117_vm0, %v11011_v38  ;;  %v11010_v20 = vadd.f32 %v18799_v16, %v10971_v56 }
 0xfb2   :  { %11042 = vst.msk [vmem:[#allocation10 + $0x70] sm:$0xff] %vm117_vm0, %v11010_v20 }
0x1012   :  { %v13437_v32 = vpop.f32.mrf.mxu0 }
0x1013   :  { %v10974_v53 = vadd.f32 %v13437_v32, %v19759_v41 }
0x1014   :  { %v10878_v33 = vpop.f32.mrf.mxu0 }
0x1015   :  { %v11013_v26 = vadd.f32 %v18799_v16, %v10974_v53  ;;  %v10973_v37 = vadd.f32 %v10878_v33, %v19760_v27 }
0x1016   :  { %v13440_v31 = vpop.f32.mrf.mxu0 }
0x1017   :  { %11045 = vst.msk [vmem:[#allocation10 + $0x88] sm:$0xff] %vm117_vm0, %v11013_v26  ;;  %v11012_v18 = vadd.f32 %v18799_v16, %v10973_v37  ;;  %v10976_v11 = vadd.f32 %v13440_v31, %v19761_v49 }
0x1018   :  { %v10888_v54 = vpop.f32.mrf.mxu0 }
0x1019   :  { %11044 = vst.msk [vmem:[#allocation10 + $0x80] sm:$0xff] %vm117_vm0, %v11012_v18  ;;  %v11015_v61 = vadd.f32 %v18799_v16, %v10976_v11  ;;  %v10975_v24 = vadd.f32 %v10888_v54, %v19762_v28 }
0x101a   :  { %v13443_v35 = vpop.f32.mrf.mxu0 }
0x101b   :  { %11047 = vst.msk [vmem:[#allocation10 + $0x98] sm:$0xff] %vm117_vm0, %v11015_v61  ;;  %v11014_v43 = vadd.f32 %v18799_v16, %v10975_v24  ;;  %v10978_v48 = vadd.f32 %v13443_v35, %v18403_v19 }
0x101c   :  { %v10898_v13 = vpop.f32.mrf.mxu0 }
0x101d   :  { %11046 = vst.msk [vmem:[#allocation10 + $0x90] sm:$0xff] %vm117_vm0, %v11014_v43  ;;  %v11017_v9 = vadd.f32 %v18799_v16, %v10978_v48  ;;  %v10977_v8 = vadd.f32 %v10898_v13, %v18408_v46 }
0x101e   :  { %v13446_v2 = vpop.f32.mrf.mxu0 }
0x101f   :  { %11049 = vst.msk [vmem:[#allocation10 + $0xa8] sm:$0xff] %vm117_vm0, %v11017_v9  ;;  %v11016_v10 = vadd.f32 %v18799_v16, %v10977_v8  ;;  %v10980_v0 = vadd.f32 %v13446_v2, %v18412_v17  ;;  %v19763_v17 = vld [vmem:[#allocation59_spill] sm:$0xff] }
0x1020   :  { %v10908_v23 = vpop.f32.mrf.mxu0 }
0x1021   :  { %11048 = vst.msk [vmem:[#allocation10 + $0xa0] sm:$0xff] %vm117_vm0, %v11016_v10  ;;  %v11019_v36 = vadd.f32 %v18799_v16, %v10980_v0  ;;  %v10979_v19 = vadd.f32 %v10908_v23, %v18415_v6  ;;  %v19764_v6 = vld [vmem:[#allocation58_spill] sm:$0xff] }
0x1023   :  { %11051 = vst.msk [vmem:[#allocation10 + $0xb8] sm:$0xff] %vm117_vm0, %v11019_v36  ;;  %v11018_v45 = vadd.f32 %v18799_v16, %v10979_v19 }
0x1025   :  { %11050 = vst.msk [vmem:[#allocation10 + $0xb0] sm:$0xff] %vm117_vm0, %v11018_v45 }
0x104b   :  { %v13449_v46 = vpop.f32.mrf.mxu0 }
0x104c   :  { %v10982_v60 = vadd.f32 %v13449_v46, %v18462_v47 }
0x104d   :  { %v10918_v50 = vpop.f32.mrf.mxu0 }
0x104e   :  { %v11021_v4 = vadd.f32 %v18799_v16, %v10982_v60  ;;  %v10981_v55 = vadd.f32 %v10918_v50, %v19763_v17 }
0x104f   :  { %v13452_v39 = vpop.f32.mrf.mxu0 }
0x1050   :  { %11053 = vst.msk [vmem:[#allocation10 + $0xc8] sm:$0xff] %vm117_vm0, %v11021_v4  ;;  %v11020_v5 = vadd.f32 %v18799_v16, %v10981_v55  ;;  %v10984_v30 = vadd.f32 %v13452_v39, %v19764_v6 }
0x1051   :  { %v10928_v29 = vpop.f32.mrf.mxu0 }
0x1052   :  { %11052 = vst.msk [vmem:[#allocation10 + $0xc0] sm:$0xff] %vm117_vm0, %v11020_v5  ;;  %v11023_v7 = vadd.f32 %v18799_v16, %v10984_v30  ;;  %v10983_v40 = vadd.f32 %v10928_v29, %v19765_v44 }
0x1053   :  { %v13455_v47 = vpop.f32.mrf.mxu0 }
0x1054   :  { %11055 = vst.msk [vmem:[#allocation10 + $0xd8] sm:$0xff] %vm117_vm0, %v11023_v7  ;;  %v11022_v34 = vadd.f32 %v18799_v16, %v10983_v40  ;;  %v10986_v21 = vadd.f32 %v13455_v47, %v18489_v57 }
0x1055   :  { %v10938_v14 = vpop.f32.mrf.mxu0 }
0x1056   :  { %11054 = vst.msk [vmem:[#allocation10 + $0xd0] sm:$0xff] %vm117_vm0, %v11022_v34  ;;  %v11025_v42 = vadd.f32 %v18799_v16, %v10986_v21  ;;  %v10985_v52 = vadd.f32 %v10938_v14, %v18496_v62 }
0x1057   :  { %v13458_v12 = vpop.f32.mrf.mxu0 }
0x1058   :  { %11057 = vst.msk [vmem:[#allocation10 + $0xe8] sm:$0xff] %vm117_vm0, %v11025_v42  ;;  %v11024_v63 = vadd.f32 %v18799_v16, %v10985_v52  ;;  %v10988_v3 = vadd.f32 %v13458_v12, %v19766_v15 }
0x1059   :  { %v10948_v22 = vpop.f32.mrf.mxu0 }
0x105a   :  { %11056 = vst.msk [vmem:[#allocation10 + $0xe0] sm:$0xff] %vm117_vm0, %v11024_v63  ;;  %v11027_v57 = vadd.f32 %v18799_v16, %v10988_v3  ;;  %v10987_v51 = vadd.f32 %v10948_v22, %v19767_v1 }
0x105c   :  { %11059 = vst.msk [vmem:[#allocation10 + $0xf8] sm:$0xff] %vm117_vm0, %v11027_v57  ;;  %v11026_v62 = vadd.f32 %v18799_v16, %v10987_v51 }
0x105e   :  { %11058 = vst.msk [vmem:[#allocation10 + $0xf0] sm:$0xff] %vm117_vm0, %v11026_v62 }
0x105f   :  { %14153 = shalt.err (!%p14150_p10)
}
0x1060   :  { %11071 = dma.vmem_to_hbm [thread:$0]  %s11066_s19, 4096, %s18926_s8, [#allocation4], %s14172_s10, %s14172_s10, %s14173_s11  }
0x1061   :  { %14168 = dma.done.wait [#allocation4], 4096  }
0x1062   :  { %14169 = vsyncadd [#allocation4], 4294963200 }
0x1063   :  { %11075 = vsyncpa [#allocation3], 1 }
0x1064   :  { %11076 = vsyncpa [#allocation6], 1 }
0x1065   :  { %11077 = vsyncpa [#allocation9], 1 }
0x1066   :  { %11078 = vsyncpa [#allocation4], 1 }

</bundles_post_ra>
